<compile_context>
chip_gen: v7x
topology: tpu7x:2x2x1
jax: 0.10.0
libtpu: 0.0.40
codegen_flags: <defaults>
</compile_context>

<pallas_src>
import math
from functools import partial

import jax
import jax.numpy as jnp
from jax import lax
from jax.experimental import pallas as pl
from jax.experimental.pallas import tpu as pltpu


# ------------------------- helpers -------------------------

def _round_up(x, m):
    return ((x + m - 1) // m) * m


def _pick_tile(M):
    """Row tile: divides M, sublane-aligned, and >= 2 grid steps when possible
    (so the second TensorCore on v7x is not idle)."""
    for t in (256, 128, 64, 32, 16, 8):
        if M % t == 0 and M // t >= 2:
            return t
    for t in (256, 128, 64, 32, 16, 8):
        if M % t == 0:
            return t
    return M  # tiny fallback; a full-extent block is still legal


# ------------------------- kernel 1: LN + Linear (qkv projection) -------------------------

def _ln_linear_kernel(x_ref, g_ref, b_ref, w_ref, bias_ref, o_ref):
    x = x_ref[...].astype(jnp.float32)
    mu = jnp.mean(x, axis=-1, keepdims=True)
    var = jnp.mean((x - mu) ** 2, axis=-1, keepdims=True)
    xn = (x - mu) * lax.rsqrt(var + 1e-5) * g_ref[...] + b_ref[...]
    y = jnp.dot(xn, w_ref[...], preferred_element_type=jnp.float32) + bias_ref[...]
    o_ref[...] = y.astype(o_ref.dtype)


def fused_ln_linear(x, g, b, w, bias, tm):
    M, D = x.shape
    Cout = w.shape[1]
    return pl.pallas_call(
        _ln_linear_kernel,
        out_shape=jax.ShapeDtypeStruct((M, Cout), x.dtype),
        grid=(M // tm,),
        in_specs=[
            pl.BlockSpec((tm, D), lambda i: (i, 0)),
            pl.BlockSpec((1, D), lambda i: (0, 0)),
            pl.BlockSpec((1, D), lambda i: (0, 0)),
            pl.BlockSpec((D, Cout), lambda i: (0, 0)),
            pl.BlockSpec((1, Cout), lambda i: (0, 0)),
        ],
        out_specs=pl.BlockSpec((tm, Cout), lambda i: (i, 0)),
        compiler_params=pltpu.CompilerParams(dimension_semantics=("parallel",)),
    )(x, g.reshape(1, -1), b.reshape(1, -1), w, bias.reshape(1, -1))


# ------------------------- kernel 2: PE + local attention + proj MLP + residual -------------------------

def _attn_proj_res_kernel(q_ref, kv_ref, rel_ref,
                          pw1_ref, pb1_ref, pw2_ref, pb2_ref,
                          g_ref, b_ref,
                          wp1_ref, bp1_ref, wp2_ref, bp2_ref,
                          sc_ref, o_ref):
    TM, C = q_ref.shape
    K = kv_ref.shape[1]

    # --- PositionEncoder: Linear(4->C) -> ReLU -> Linear(C->C), fused here so the
    #     (M, K, C) pos-enc tensor never materializes in HBM.
    rel = rel_ref[...].astype(jnp.float32)                               # (TM*K, 4)
    h = jnp.dot(rel, pw1_ref[...], preferred_element_type=jnp.float32) + pb1_ref[...]
    h = jnp.maximum(h, 0.0)
    pe = jnp.dot(h, pw2_ref[...], preferred_element_type=jnp.float32) + pb2_ref[...]
    pe = pe.reshape(TM, K, C)                                            # (TM, K, C)

    # --- local attention: LN over channels, softmax over the K neighbours
    kv = kv_ref[...].astype(jnp.float32)                                 # (TM, K, 2C) = [k|v]
    k = kv[:, :, :C]
    v = kv[:, :, C:]
    q = q_ref[...].astype(jnp.float32)                                   # (TM, C)

    x = q[:, None, :] - k + pe
    mu = jnp.mean(x, axis=-1, keepdims=True)
    var = jnp.mean((x - mu) ** 2, axis=-1, keepdims=True)
    # gamma/beta arrive pre-divided by sqrt(attn_dim): single FMA per element.
    a = (x - mu) * lax.rsqrt(var + 1e-5) * g_ref[...] + b_ref[...]
    m = jnp.max(a, axis=1, keepdims=True)
    e = jnp.exp(a - m)
    s = jnp.sum(e, axis=1, keepdims=True)
    p = e * pl.reciprocal(s, approx=True)                                # divide -> EUP slot
    attn = jnp.sum(p * (v + pe), axis=1)                                 # (TM, C)

    # --- proj MLP (Linear -> GELU -> Linear) + residual, fused epilogue
    h1 = jnp.dot(attn, wp1_ref[...], preferred_element_type=jnp.float32) + bp1_ref[...]
    h1 = jax.nn.gelu(h1)  # TODO(synk): torch nn.GELU default is exact erf; tanh approx kept for lowering safety
    y = jnp.dot(h1, wp2_ref[...], preferred_element_type=jnp.float32) + bp2_ref[...]
    o_ref[...] = (y + sc_ref[...].astype(jnp.float32)).astype(o_ref.dtype)


def fused_attn_proj_res(q, kvg, rel, pw1, pb1, pw2, pb2, g, b,
                        wp1, bp1, wp2, bp2, shortcut, tm):
    M, C = q.shape
    K = kvg.shape[1]
    D = shortcut.shape[1]
    H = wp1.shape[1]
    Do = wp2.shape[1]
    row2 = lambda i: (i, 0)
    row3 = lambda i: (i, 0, 0)
    rep2 = lambda i: (0, 0)
    return pl.pallas_call(
        _attn_proj_res_kernel,
        out_shape=jax.ShapeDtypeStruct((M, Do), shortcut.dtype),
        grid=(M // tm,),
        in_specs=[
            pl.BlockSpec((tm, C), row2),          # q
            pl.BlockSpec((tm, K, 2 * C), row3),   # packed gathered [k|v]
            pl.BlockSpec((tm * K, 4), row2),      # relative positions (flattened rows)
            pl.BlockSpec((4, C), rep2),           # pos-enc fc1 w
            pl.BlockSpec((1, C), rep2),           # pos-enc fc1 b
            pl.BlockSpec((C, C), rep2),           # pos-enc fc2 w
            pl.BlockSpec((1, C), rep2),           # pos-enc fc2 b
            pl.BlockSpec((1, C), rep2),           # local_fc gamma / scale
            pl.BlockSpec((1, C), rep2),           # local_fc beta / scale
            pl.BlockSpec((C, H), rep2),           # proj fc1 w
            pl.BlockSpec((1, H), rep2),           # proj fc1 b
            pl.BlockSpec((H, Do), rep2),          # proj fc2 w
            pl.BlockSpec((1, Do), rep2),          # proj fc2 b
            pl.BlockSpec((tm, D), row2),          # residual shortcut
        ],
        out_specs=pl.BlockSpec((tm, Do), row2),
        compiler_params=pltpu.CompilerParams(dimension_semantics=("parallel",)),
    )(q, kvg, rel, pw1, pb1.reshape(1, -1), pw2, pb2.reshape(1, -1),
      g.reshape(1, -1), b.reshape(1, -1),
      wp1, bp1.reshape(1, -1), wp2, bp2.reshape(1, -1), shortcut)


# ------------------------- kernel 3: LN + MLP + residual -------------------------

def _ln_mlp_res_kernel(x_ref, g_ref, b_ref, w1_ref, b1_ref, w2_ref, b2_ref, o_ref):
    x = x_ref[...].astype(jnp.float32)
    mu = jnp.mean(x, axis=-1, keepdims=True)
    var = jnp.mean((x - mu) ** 2, axis=-1, keepdims=True)
    xn = (x - mu) * lax.rsqrt(var + 1e-5) * g_ref[...] + b_ref[...]
    h = jnp.dot(xn, w1_ref[...], preferred_element_type=jnp.float32) + b1_ref[...]
    h = jax.nn.gelu(h)  # TODO(synk): torch nn.GELU default is exact erf; tanh approx kept
    y = jnp.dot(h, w2_ref[...], preferred_element_type=jnp.float32) + b2_ref[...]
    o_ref[...] = (y + x).astype(o_ref.dtype)


def fused_ln_mlp_res(x, g, b, w1, b1, w2, b2, tm):
    M, D = x.shape
    H = w1.shape[1]
    return pl.pallas_call(
        _ln_mlp_res_kernel,
        out_shape=jax.ShapeDtypeStruct((M, D), x.dtype),
        grid=(M // tm,),
        in_specs=[
            pl.BlockSpec((tm, D), lambda i: (i, 0)),
            pl.BlockSpec((1, D), lambda i: (0, 0)),
            pl.BlockSpec((1, D), lambda i: (0, 0)),
            pl.BlockSpec((D, H), lambda i: (0, 0)),
            pl.BlockSpec((1, H), lambda i: (0, 0)),
            pl.BlockSpec((H, D), lambda i: (0, 0)),
            pl.BlockSpec((1, D), lambda i: (0, 0)),
        ],
        out_specs=pl.BlockSpec((tm, D), lambda i: (i, 0)),
        compiler_params=pltpu.CompilerParams(dimension_semantics=("parallel",)),
    )(x, g.reshape(1, -1), b.reshape(1, -1), w1, b1.reshape(1, -1), w2, b2.reshape(1, -1))


# ------------------------- JAX glue (kNN + gather) -------------------------
# TODO(synk): kNN and the data-dependent neighbour gather stay in XLA glue (not a
#             rectangular BlockSpec pattern); both are done once per layer / once per block.

def knn_idx(query, keys, K):
    # mirrors pytorch3d knn_points(...).idx: (B, Nq, K), ascending distance
    d = jnp.sum((query[:, :, None, :] - keys[:, None, :, :]) ** 2, axis=-1)
    _, idx = lax.top_k(-d, K)
    return idx


def knn_gather(x, idx):
    # x: (B, N, D), idx: (B, M, K) -> (B, M, K, D)
    return jax.vmap(lambda xb, ib: xb[ib])(x, idx)


# ------------------------- parameters -------------------------

def init_linear(key, cin, cout):
    kw, kb = jax.random.split(key)
    lim = 1.0 / math.sqrt(cin)
    return {
        "w": jax.random.uniform(kw, (cin, cout), jnp.float32, -lim, lim),
        "b": jax.random.uniform(kb, (cout,), jnp.float32, -lim, lim),
    }


def init_layernorm(c):
    return {"g": jnp.ones((c,), jnp.float32), "b": jnp.zeros((c,), jnp.float32)}


def init_pos_encoder(key, cin, cout):
    k1, k2 = jax.random.split(key)
    return {"fc1": init_linear(k1, cin, cout), "fc2": init_linear(k2, cout, cout)}


def init_mlp(key, cin, ch, cout):
    k1, k2 = jax.random.split(key)
    return {"fc1": init_linear(k1, cin, ch), "fc2": init_linear(k2, ch, cout)}


def init_event_attention(key, dim, attn_dim):
    ks = jax.random.split(key, 3)
    return {
        "local_qkv": init_linear(ks[0], dim, attn_dim * 3),
        "local_pe": init_pos_encoder(ks[1], 4, attn_dim),
        "local_fc": init_layernorm(attn_dim),
        "proj": init_mlp(ks[2], attn_dim, dim, dim),   # proj_dim == attn_dim here
    }


def init_block(key, dim, attn_dim, mlp_ratio):
    k1, k2 = jax.random.split(key)
    return {
        "norm1": init_layernorm(dim),
        "attn": init_event_attention(k1, dim, attn_dim),
        "norm2": init_layernorm(dim),
        "mlp": init_mlp(k2, dim, int(dim * mlp_ratio), dim),
    }


def init_basic_layer(key, depth, dim, attn_dim, mlp_ratio):
    ks = jax.random.split(key, depth)
    return [init_block(ks[i], dim, attn_dim, mlp_ratio) for i in range(depth)]


# ------------------------- EventTransformerBlock / BasicLayer -------------------------

def block_apply(p, feats_flat, idx, rel_flat, B, N, *, attn_dim, k_nearest, tm):
    M, D = feats_flat.shape
    C = attn_dim
    ap = p["attn"]

    # ---- K1: LN1 + qkv, output padded to a multiple of 128 lanes so the stores are
    #      unmasked and [k|v] is a contiguous slice for a single packed gather.
    wq, bq = ap["local_qkv"]["w"], ap["local_qkv"]["b"]
    cout_pad = _round_up(3 * C, 128)
    w_pad = jnp.pad(wq, ((0, 0), (0, cout_pad - 3 * C)))
    b_pad = jnp.pad(bq, (0, cout_pad - 3 * C))
    qkv = fused_ln_linear(feats_flat, p["norm1"]["g"], p["norm1"]["b"], w_pad, b_pad, tm)

    q = qkv[:, :C]                                            # (M, C)
    kv = qkv[:, C:3 * C].reshape(B, N, 2 * C)                 # packed [k|v]
    kvg = knn_gather(kv, idx).reshape(M, k_nearest, 2 * C)    # single gather per block

    # ---- K2: PositionEncoder + local attention + proj MLP + residual (fused)
    inv_scale = 1.0 / math.sqrt(attn_dim)                     # bake /sqrt(attn_dim) into LN affine
    g_s = ap["local_fc"]["g"] * inv_scale
    b_s = ap["local_fc"]["b"] * inv_scale
    x = fused_attn_proj_res(
        q, kvg, rel_flat,
        ap["local_pe"]["fc1"]["w"], ap["local_pe"]["fc1"]["b"],
        ap["local_pe"]["fc2"]["w"], ap["local_pe"]["fc2"]["b"],
        g_s, b_s,
        ap["proj"]["fc1"]["w"], ap["proj"]["fc1"]["b"],
        ap["proj"]["fc2"]["w"], ap["proj"]["fc2"]["b"],
        feats_flat, tm)
    # conv_kernel_size == 0 and global_step == 0 -> no concatenation branches

    # ---- K3: LN2 + MLP + residual (fused); drop_path == 0 -> Identity
    x = fused_ln_mlp_res(x, p["norm2"]["g"], p["norm2"]["b"],
                         p["mlp"]["fc1"]["w"], p["mlp"]["fc1"]["b"],
                         p["mlp"]["fc2"]["w"], p["mlp"]["fc2"]["b"], tm)
    return x


def basic_layer_apply(params, xyzp, feats, *, attn_dim, k_nearest):
    B, N, D = feats.shape
    M = B * N
    tm = _pick_tile(M)

    # kNN indices + relative positions depend only on xyzp -> hoisted out of the block loop.
    xyz = xyzp[:, :, :3]
    idx = knn_idx(xyz, xyz, k_nearest)                                 # (B, N, K)
    rel = xyzp[:, :, None, :] - knn_gather(xyzp, idx)                  # (B, N, K, 4)
    rel_flat = rel.reshape(M * k_nearest, 4)

    x = feats.reshape(M, D)
    for bp in params:
        x = block_apply(bp, x, idx, rel_flat, B, N,
                        attn_dim=attn_dim, k_nearest=k_nearest, tm=tm)
    # down_stride == 0 -> self.down is None
    return xyzp, x.reshape(B, N, D)


# ------------------------- main -------------------------

if __name__ == "__main__":
    B, N = 2, 64
    DIM, ATTN_DIM = 32, 16
    K_NEAREST = 8
    DEPTH = 2
    MLP_RATIO = 2.0

    pkey = jax.random.PRNGKey(42)
    params = init_basic_layer(pkey, DEPTH, DIM, ATTN_DIM, MLP_RATIO)

    key = jax.random.PRNGKey(0)
    k1, k2 = jax.random.split(key)
    xyzp = jax.random.uniform(k1, (B, N, 4), jnp.float32)     # x, y, t, polarity
    feats = jax.random.normal(k2, (B, N, DIM), jnp.float32)

    fwd = jax.jit(partial(basic_layer_apply, attn_dim=ATTN_DIM, k_nearest=K_NEAREST))
    xyzp_out, feats_out = fwd(params, xyzp, feats)
    jax.block_until_ready(feats_out)

    assert xyzp_out.shape == (B, N, 4)
    assert feats_out.shape == (B, N, DIM)
    assert bool(jnp.all(jnp.isfinite(feats_out)))
    print("KERNEL_OK")
</pallas_src>

<mosaic_0001>
module attributes {stable_mosaic.version = 11 : i64} {
  func.func @_ln_linear_kernel(%arg0: i32, %arg1: memref<64x32xf32, #tpu.memory_space<vmem>>, %arg2: memref<1x32xf32, #tpu.memory_space<vmem>>, %arg3: memref<1x32xf32, #tpu.memory_space<vmem>>, %arg4: memref<32x128xf32, #tpu.memory_space<vmem>>, %arg5: memref<1x128xf32, #tpu.memory_space<vmem>>, %arg6: memref<64x128xf32, #tpu.memory_space<vmem>>) attributes {dimension_semantics = [#tpu.dimension_semantics<parallel>], iteration_bounds = array<i64: 2>, scalar_prefetch = 0 : i64, scratch_operands = 0 : i64, tpu.core_type = #tpu.core_type<tc>, window_params = [{transform_indices = @transform_0, window_bounds = array<i64: 64, 32>}, {pipeline_mode = #tpu.pipeline_mode<synchronous>, transform_indices = @transform_1, window_bounds = array<i64: 1, 32>}, {pipeline_mode = #tpu.pipeline_mode<synchronous>, transform_indices = @transform_2, window_bounds = array<i64: 1, 32>}, {pipeline_mode = #tpu.pipeline_mode<synchronous>, transform_indices = @transform_3, window_bounds = array<i64: 32, 128>}, {pipeline_mode = #tpu.pipeline_mode<synchronous>, transform_indices = @transform_4, window_bounds = array<i64: 1, 128>}, {transform_indices = @transform_5, window_bounds = array<i64: 64, 128>}]} {
    %c0 = arith.constant 0 : index
    %c0_0 = arith.constant 0 : index
    %0 = vector.load %arg1[%c0, %c0_0] : memref<64x32xf32, #tpu.memory_space<vmem>>, vector<64x32xf32>
    %cst = arith.constant dense<0.000000e+00> : vector<64xf32>
    %1 = vector.multi_reduction <add>, %0, %cst [1] : vector<64x32xf32> to vector<64xf32>
    %2 = vector.shape_cast %1 : vector<64xf32> to vector<64x1xf32>
    %cst_1 = arith.constant 3.200000e+01 : f32
    %3 = vector.broadcast %cst_1 : f32 to vector<64x1xf32>
    %4 = arith.divf %2, %3 : vector<64x1xf32>
    %5 = vector.broadcast %4 : vector<64x1xf32> to vector<64x32xf32>
    %6 = arith.subf %0, %5 : vector<64x32xf32>
    %7 = arith.mulf %6, %6 : vector<64x32xf32>
    %cst_2 = arith.constant dense<0.000000e+00> : vector<64xf32>
    %8 = vector.multi_reduction <add>, %7, %cst_2 [1] : vector<64x32xf32> to vector<64xf32>
    %9 = vector.shape_cast %8 : vector<64xf32> to vector<64x1xf32>
    %cst_3 = arith.constant 3.200000e+01 : f32
    %10 = vector.broadcast %cst_3 : f32 to vector<64x1xf32>
    %11 = arith.divf %9, %10 : vector<64x1xf32>
    %12 = vector.broadcast %4 : vector<64x1xf32> to vector<64x32xf32>
    %13 = arith.subf %0, %12 : vector<64x32xf32>
    %cst_4 = arith.constant 9.99999974E-6 : f32
    %14 = vector.broadcast %cst_4 : f32 to vector<64x1xf32>
    %15 = arith.addf %11, %14 : vector<64x1xf32>
    %16 = math.rsqrt %15 : vector<64x1xf32>
    %17 = vector.broadcast %16 : vector<64x1xf32> to vector<64x32xf32>
    %18 = arith.mulf %13, %17 : vector<64x32xf32>
    %c0_5 = arith.constant 0 : index
    %c0_6 = arith.constant 0 : index
    %19 = vector.load %arg2[%c0_5, %c0_6] : memref<1x32xf32, #tpu.memory_space<vmem>>, vector<1x32xf32>
    %20 = vector.broadcast %19 : vector<1x32xf32> to vector<64x32xf32>
    %21 = arith.mulf %18, %20 : vector<64x32xf32>
    %c0_7 = arith.constant 0 : index
    %c0_8 = arith.constant 0 : index
    %22 = vector.load %arg3[%c0_7, %c0_8] : memref<1x32xf32, #tpu.memory_space<vmem>>, vector<1x32xf32>
    %23 = vector.broadcast %22 : vector<1x32xf32> to vector<64x32xf32>
    %24 = arith.addf %21, %23 : vector<64x32xf32>
    %c0_9 = arith.constant 0 : index
    %c0_10 = arith.constant 0 : index
    %25 = vector.load %arg4[%c0_9, %c0_10] : memref<32x128xf32, #tpu.memory_space<vmem>>, vector<32x128xf32>
    %cst_11 = arith.constant dense<0.000000e+00> : vector<64x128xf32>
    %26 = tpu.matmul %24, %25, %cst_11 {dimension_numbers = #tpu.dot_dimension_numbers<[1], [0], [0], [1], [0, 0, 1, 1], [], []>} : vector<64x32xf32>, vector<32x128xf32>, vector<64x128xf32> -> vector<64x128xf32>
    %c0_12 = arith.constant 0 : index
    %c0_13 = arith.constant 0 : index
    %27 = vector.load %arg5[%c0_12, %c0_13] : memref<1x128xf32, #tpu.memory_space<vmem>>, vector<1x128xf32>
    %28 = vector.broadcast %27 : vector<1x128xf32> to vector<64x128xf32>
    %29 = arith.addf %26, %28 : vector<64x128xf32>
    %c0_14 = arith.constant 0 : index
    %c0_15 = arith.constant 0 : index
    %30 = vector.load %arg6[%c0_14, %c0_15] : memref<64x128xf32, #tpu.memory_space<vmem>>, vector<64x128xf32>
    tpu.vector_store %arg6[%c0_14, %c0_15], %29 {strides = array<i32>} : memref<64x128xf32, #tpu.memory_space<vmem>>, vector<64x128xf32>,
    return
  }
  func.func @transform_0(%arg0: i32) -> (i32, i32) {
    %c0_i32 = arith.constant 0 : i32
    %c0_i32_0 = arith.constant 0 : i32
    return %arg0, %c0_i32 : i32, i32
  }
  func.func @transform_1(%arg0: i32) -> (i32, i32) {
    %c0_i32 = arith.constant 0 : i32
    %c0_i32_0 = arith.constant 0 : i32
    %c0_i32_1 = arith.constant 0 : i32
    return %c0_i32, %c0_i32_0 : i32, i32
  }
  func.func @transform_2(%arg0: i32) -> (i32, i32) {
    %c0_i32 = arith.constant 0 : i32
    %c0_i32_0 = arith.constant 0 : i32
    %c0_i32_1 = arith.constant 0 : i32
    return %c0_i32, %c0_i32_0 : i32, i32
  }
  func.func @transform_3(%arg0: i32) -> (i32, i32) {
    %c0_i32 = arith.constant 0 : i32
    %c0_i32_0 = arith.constant 0 : i32
    %c0_i32_1 = arith.constant 0 : i32
    return %c0_i32, %c0_i32_0 : i32, i32
  }
  func.func @transform_4(%arg0: i32) -> (i32, i32) {
    %c0_i32 = arith.constant 0 : i32
    %c0_i32_0 = arith.constant 0 : i32
    %c0_i32_1 = arith.constant 0 : i32
    return %c0_i32, %c0_i32_0 : i32, i32
  }
  func.func @transform_5(%arg0: i32) -> (i32, i32) {
    %c0_i32 = arith.constant 0 : i32
    %c0_i32_0 = arith.constant 0 : i32
    return %arg0, %c0_i32 : i32, i32
  }
}

module attributes {stable_mosaic.version = 11 : i64} {
  func.func @_attn_proj_res_kernel(%arg0: i32, %arg1: memref<64x16xf32, #tpu.memory_space<vmem>>, %arg2: memref<64x8x32xf32, #tpu.memory_space<vmem>>, %arg3: memref<512x4xf32, #tpu.memory_space<vmem>>, %arg4: memref<4x16xf32, #tpu.memory_space<vmem>>, %arg5: memref<1x16xf32, #tpu.memory_space<vmem>>, %arg6: memref<16x16xf32, #tpu.memory_space<vmem>>, %arg7: memref<1x16xf32, #tpu.memory_space<vmem>>, %arg8: memref<1x16xf32, #tpu.memory_space<vmem>>, %arg9: memref<1x16xf32, #tpu.memory_space<vmem>>, %arg10: memref<16x32xf32, #tpu.memory_space<vmem>>, %arg11: memref<1x32xf32, #tpu.memory_space<vmem>>, %arg12: memref<32x32xf32, #tpu.memory_space<vmem>>, %arg13: memref<1x32xf32, #tpu.memory_space<vmem>>, %arg14: memref<64x32xf32, #tpu.memory_space<vmem>>, %arg15: memref<64x32xf32, #tpu.memory_space<vmem>>) attributes {dimension_semantics = [#tpu.dimension_semantics<parallel>], iteration_bounds = array<i64: 2>, scalar_prefetch = 0 : i64, scratch_operands = 0 : i64, tpu.core_type = #tpu.core_type<tc>, window_params = [{transform_indices = @transform_0, window_bounds = array<i64: 64, 16>}, {transform_indices = @transform_1, window_bounds = array<i64: 64, 8, 32>}, {transform_indices = @transform_2, window_bounds = array<i64: 512, 4>}, {pipeline_mode = #tpu.pipeline_mode<synchronous>, transform_indices = @transform_3, window_bounds = array<i64: 4, 16>}, {pipeline_mode = #tpu.pipeline_mode<synchronous>, transform_indices = @transform_4, window_bounds = array<i64: 1, 16>}, {pipeline_mode = #tpu.pipeline_mode<synchronous>, transform_indices = @transform_5, window_bounds = array<i64: 16, 16>}, {pipeline_mode = #tpu.pipeline_mode<synchronous>, transform_indices = @transform_6, window_bounds = array<i64: 1, 16>}, {pipeline_mode = #tpu.pipeline_mode<synchronous>, transform_indices = @transform_7, window_bounds = array<i64: 1, 16>}, {pipeline_mode = #tpu.pipeline_mode<synchronous>, transform_indices = @transform_8, window_bounds = array<i64: 1, 16>}, {pipeline_mode = #tpu.pipeline_mode<synchronous>, transform_indices = @transform_9, window_bounds = array<i64: 16, 32>}, {pipeline_mode = #tpu.pipeline_mode<synchronous>, transform_indices = @transform_10, window_bounds = array<i64: 1, 32>}, {pipeline_mode = #tpu.pipeline_mode<synchronous>, transform_indices = @transform_11, window_bounds = array<i64: 32, 32>}, {pipeline_mode = #tpu.pipeline_mode<synchronous>, transform_indices = @transform_12, window_bounds = array<i64: 1, 32>}, {transform_indices = @transform_13, window_bounds = array<i64: 64, 32>}, {transform_indices = @transform_14, window_bounds = array<i64: 64, 32>}]} {
    %c0 = arith.constant 0 : index
    %c0_0 = arith.constant 0 : index
    %0 = vector.load %arg3[%c0, %c0_0] : memref<512x4xf32, #tpu.memory_space<vmem>>, vector<512x4xf32>
    %c0_1 = arith.constant 0 : index
    %c0_2 = arith.constant 0 : index
    %1 = vector.load %arg4[%c0_1, %c0_2] : memref<4x16xf32, #tpu.memory_space<vmem>>, vector<4x16xf32>
    %cst = arith.constant dense<0.000000e+00> : vector<512x16xf32>
    %2 = tpu.matmul %0, %1, %cst {dimension_numbers = #tpu.dot_dimension_numbers<[1], [0], [0], [1], [0, 0, 1, 1], [], []>} : vector<512x4xf32>, vector<4x16xf32>, vector<512x16xf32> -> vector<512x16xf32>
    %c0_3 = arith.constant 0 : index
    %c0_4 = arith.constant 0 : index
    %3 = vector.load %arg5[%c0_3, %c0_4] : memref<1x16xf32, #tpu.memory_space<vmem>>, vector<1x16xf32>
    %4 = vector.broadcast %3 : vector<1x16xf32> to vector<512x16xf32>
    %5 = arith.addf %2, %4 : vector<512x16xf32>
    %cst_5 = arith.constant 0.000000e+00 : f32
    %6 = vector.broadcast %cst_5 : f32 to vector<512x16xf32>
    %7 = arith.maximumf %5, %6 : vector<512x16xf32>
    %c0_6 = arith.constant 0 : index
    %c0_7 = arith.constant 0 : index
    %8 = vector.load %arg6[%c0_6, %c0_7] : memref<16x16xf32, #tpu.memory_space<vmem>>, vector<16x16xf32>
    %cst_8 = arith.constant dense<0.000000e+00> : vector<512x16xf32>
    %9 = tpu.matmul %7, %8, %cst_8 {dimension_numbers = #tpu.dot_dimension_numbers<[1], [0], [0], [1], [0, 0, 1, 1], [], []>} : vector<512x16xf32>, vector<16x16xf32>, vector<512x16xf32> -> vector<512x16xf32>
    %c0_9 = arith.constant 0 : index
    %c0_10 = arith.constant 0 : index
    %10 = vector.load %arg7[%c0_9, %c0_10] : memref<1x16xf32, #tpu.memory_space<vmem>>, vector<1x16xf32>
    %11 = vector.broadcast %10 : vector<1x16xf32> to vector<512x16xf32>
    %12 = arith.addf %9, %11 : vector<512x16xf32>
    %13 = vector.shape_cast %12 : vector<512x16xf32> to vector<64x8x16xf32>
    %c0_11 = arith.constant 0 : index
    %c0_12 = arith.constant 0 : index
    %c0_13 = arith.constant 0 : index
    %14 = vector.load %arg2[%c0_11, %c0_12, %c0_13] : memref<64x8x32xf32, #tpu.memory_space<vmem>>, vector<64x8x32xf32>
    %15 = vector.extract_strided_slice %14 {offsets = [0, 0, 0], sizes = [64, 8, 16], strides = [1, 1, 1]} : vector<64x8x32xf32> to vector<64x8x16xf32>
    %16 = vector.extract_strided_slice %14 {offsets = [0, 0, 16], sizes = [64, 8, 16], strides = [1, 1, 1]} : vector<64x8x32xf32> to vector<64x8x16xf32>
    %c0_14 = arith.constant 0 : index
    %c0_15 = arith.constant 0 : index
    %17 = vector.load %arg1[%c0_14, %c0_15] : memref<64x16xf32, #tpu.memory_space<vmem>>, vector<64x16xf32>
    %18 = vector.shape_cast %17 : vector<64x16xf32> to vector<64x1x16xf32>
    %19 = vector.broadcast %18 : vector<64x1x16xf32> to vector<64x8x16xf32>
    %20 = arith.subf %19, %15 : vector<64x8x16xf32>
    %21 = arith.addf %20, %13 : vector<64x8x16xf32>
    %cst_16 = arith.constant dense<0.000000e+00> : vector<64x8xf32>
    %22 = vector.multi_reduction <add>, %21, %cst_16 [2] : vector<64x8x16xf32> to vector<64x8xf32>
    %23 = vector.shape_cast %22 : vector<64x8xf32> to vector<64x8x1xf32>
    %cst_17 = arith.constant 1.600000e+01 : f32
    %24 = vector.broadcast %cst_17 : f32 to vector<64x8x1xf32>
    %25 = arith.divf %23, %24 : vector<64x8x1xf32>
    %26 = vector.broadcast %25 : vector<64x8x1xf32> to vector<64x8x16xf32>
    %27 = arith.subf %21, %26 : vector<64x8x16xf32>
    %28 = arith.mulf %27, %27 : vector<64x8x16xf32>
    %cst_18 = arith.constant dense<0.000000e+00> : vector<64x8xf32>
    %29 = vector.multi_reduction <add>, %28, %cst_18 [2] : vector<64x8x16xf32> to vector<64x8xf32>
    %30 = vector.shape_cast %29 : vector<64x8xf32> to vector<64x8x1xf32>
    %cst_19 = arith.constant 1.600000e+01 : f32
    %31 = vector.broadcast %cst_19 : f32 to vector<64x8x1xf32>
    %32 = arith.divf %30, %31 : vector<64x8x1xf32>
    %33 = vector.broadcast %25 : vector<64x8x1xf32> to vector<64x8x16xf32>
    %34 = arith.subf %21, %33 : vector<64x8x16xf32>
    %cst_20 = arith.constant 9.99999974E-6 : f32
    %35 = vector.broadcast %cst_20 : f32 to vector<64x8x1xf32>
    %36 = arith.addf %32, %35 : vector<64x8x1xf32>
    %37 = math.rsqrt %36 : vector<64x8x1xf32>
    %38 = vector.broadcast %37 : vector<64x8x1xf32> to vector<64x8x16xf32>
    %39 = arith.mulf %34, %38 : vector<64x8x16xf32>
    %c0_21 = arith.constant 0 : index
    %c0_22 = arith.constant 0 : index
    %40 = vector.load %arg8[%c0_21, %c0_22] : memref<1x16xf32, #tpu.memory_space<vmem>>, vector<1x16xf32>
    %41 = vector.shape_cast %40 : vector<1x16xf32> to vector<1x1x16xf32>
    %42 = vector.broadcast %41 : vector<1x1x16xf32> to vector<64x8x16xf32>
    %43 = arith.mulf %39, %42 : vector<64x8x16xf32>
    %c0_23 = arith.constant 0 : index
    %c0_24 = arith.constant 0 : index
    %44 = vector.load %arg9[%c0_23, %c0_24] : memref<1x16xf32, #tpu.memory_space<vmem>>, vector<1x16xf32>
    %45 = vector.shape_cast %44 : vector<1x16xf32> to vector<1x1x16xf32>
    %46 = vector.broadcast %45 : vector<1x1x16xf32> to vector<64x8x16xf32>
    %47 = arith.addf %43, %46 : vector<64x8x16xf32>
    %cst_25 = arith.constant dense<0xFF800000> : vector<64x16xf32>
    %48 = vector.multi_reduction <maximumf>, %47, %cst_25 [1] : vector<64x8x16xf32> to vector<64x16xf32>
    %49 = vector.shape_cast %48 : vector<64x16xf32> to vector<64x1x16xf32>
    %50 = vector.broadcast %49 : vector<64x1x16xf32> to vector<64x8x16xf32>
    %51 = arith.subf %47, %50 : vector<64x8x16xf32>
    %52 = math.exp %51 : vector<64x8x16xf32>
    %cst_26 = arith.constant dense<0.000000e+00> : vector<64x16xf32>
    %53 = vector.multi_reduction <add>, %52, %cst_26 [1] : vector<64x8x16xf32> to vector<64x16xf32>
    %54 = vector.shape_cast %53 : vector<64x16xf32> to vector<64x1x16xf32>
    %55 = tpu.reciprocal %54 {approx = true} : vector<64x1x16xf32> -> vector<64x1x16xf32>
    %56 = vector.broadcast %55 : vector<64x1x16xf32> to vector<64x8x16xf32>
    %57 = arith.mulf %52, %56 : vector<64x8x16xf32>
    %58 = arith.addf %16, %13 : vector<64x8x16xf32>
    %59 = arith.mulf %57, %58 : vector<64x8x16xf32>
    %cst_27 = arith.constant dense<0.000000e+00> : vector<64x16xf32>
    %60 = vector.multi_reduction <add>, %59, %cst_27 [1] : vector<64x8x16xf32> to vector<64x16xf32>
    %c0_28 = arith.constant 0 : index
    %c0_29 = arith.constant 0 : index
    %61 = vector.load %arg10[%c0_28, %c0_29] : memref<16x32xf32, #tpu.memory_space<vmem>>, vector<16x32xf32>
    %cst_30 = arith.constant dense<0.000000e+00> : vector<64x32xf32>
    %62 = tpu.matmul %60, %61, %cst_30 {dimension_numbers = #tpu.dot_dimension_numbers<[1], [0], [0], [1], [0, 0, 1, 1], [], []>} : vector<64x16xf32>, vector<16x32xf32>, vector<64x32xf32> -> vector<64x32xf32>
    %c0_31 = arith.constant 0 : index
    %c0_32 = arith.constant 0 : index
    %63 = vector.load %arg11[%c0_31, %c0_32] : memref<1x32xf32, #tpu.memory_space<vmem>>, vector<1x32xf32>
    %64 = vector.broadcast %63 : vector<1x32xf32> to vector<64x32xf32>
    %65 = arith.addf %62, %64 : vector<64x32xf32>
    %66 = arith.mulf %65, %65 : vector<64x32xf32>
    %67 = arith.mulf %65, %66 : vector<64x32xf32>
    %cst_33 = arith.constant 4.471500e-02 : f32
    %68 = vector.broadcast %cst_33 : f32 to vector<64x32xf32>
    %69 = arith.mulf %68, %67 : vector<64x32xf32>
    %70 = arith.addf %65, %69 : vector<64x32xf32>
    %cst_34 = arith.constant 0.797884583 : f32
    %71 = vector.broadcast %cst_34 : f32 to vector<64x32xf32>
    %72 = arith.mulf %71, %70 : vector<64x32xf32>
    %73 = math.tanh %72 : vector<64x32xf32>
    %cst_35 = arith.constant 1.000000e+00 : f32
    %74 = vector.broadcast %cst_35 : f32 to vector<64x32xf32>
    %75 = arith.addf %74, %73 : vector<64x32xf32>
    %cst_36 = arith.constant 5.000000e-01 : f32
    %76 = vector.broadcast %cst_36 : f32 to vector<64x32xf32>
    %77 = arith.mulf %76, %75 : vector<64x32xf32>
    %78 = arith.mulf %65, %77 : vector<64x32xf32>
    %c0_37 = arith.constant 0 : index
    %c0_38 = arith.constant 0 : index
    %79 = vector.load %arg12[%c0_37, %c0_38] : memref<32x32xf32, #tpu.memory_space<vmem>>, vector<32x32xf32>
    %cst_39 = arith.constant dense<0.000000e+00> : vector<64x32xf32>
    %80 = tpu.matmul %78, %79, %cst_39 {dimension_numbers = #tpu.dot_dimension_numbers<[1], [0], [0], [1], [0, 0, 1, 1], [], []>} : vector<64x32xf32>, vector<32x32xf32>, vector<64x32xf32> -> vector<64x32xf32>
    %c0_40 = arith.constant 0 : index
    %c0_41 = arith.constant 0 : index
    %81 = vector.load %arg13[%c0_40, %c0_41] : memref<1x32xf32, #tpu.memory_space<vmem>>, vector<1x32xf32>
    %82 = vector.broadcast %81 : vector<1x32xf32> to vector<64x32xf32>
    %83 = arith.addf %80, %82 : vector<64x32xf32>
    %c0_42 = arith.constant 0 : index
    %c0_43 = arith.constant 0 : index
    %84 = vector.load %arg14[%c0_42, %c0_43] : memref<64x32xf32, #tpu.memory_space<vmem>>, vector<64x32xf32>
    %85 = arith.addf %83, %84 : vector<64x32xf32>
    %c0_44 = arith.constant 0 : index
    %c0_45 = arith.constant 0 : index
    %86 = vector.load %arg15[%c0_44, %c0_45] : memref<64x32xf32, #tpu.memory_space<vmem>>, vector<64x32xf32>
    tpu.vector_store %arg15[%c0_44, %c0_45], %85 {strides = array<i32>} : memref<64x32xf32, #tpu.memory_space<vmem>>, vector<64x32xf32>,
    return
  }
  func.func @transform_0(%arg0: i32) -> (i32, i32) {
    %c0_i32 = arith.constant 0 : i32
    %c0_i32_0 = arith.constant 0 : i32
    return %arg0, %c0_i32 : i32, i32
  }
  func.func @transform_1(%arg0: i32) -> (i32, i32, i32) {
    %c0_i32 = arith.constant 0 : i32
    %c0_i32_0 = arith.constant 0 : i32
    %c0_i32_1 = arith.constant 0 : i32
    return %arg0, %c0_i32, %c0_i32_0 : i32, i32, i32
  }
  func.func @transform_2(%arg0: i32) -> (i32, i32) {
    %c0_i32 = arith.constant 0 : i32
    %c0_i32_0 = arith.constant 0 : i32
    return %arg0, %c0_i32 : i32, i32
  }
  func.func @transform_3(%arg0: i32) -> (i32, i32) {
    %c0_i32 = arith.constant 0 : i32
    %c0_i32_0 = arith.constant 0 : i32
    %c0_i32_1 = arith.constant 0 : i32
    return %c0_i32, %c0_i32_0 : i32, i32
  }
  func.func @transform_4(%arg0: i32) -> (i32, i32) {
    %c0_i32 = arith.constant 0 : i32
    %c0_i32_0 = arith.constant 0 : i32
    %c0_i32_1 = arith.constant 0 : i32
    return %c0_i32, %c0_i32_0 : i32, i32
  }
  func.func @transform_5(%arg0: i32) -> (i32, i32) {
    %c0_i32 = arith.constant 0 : i32
    %c0_i32_0 = arith.constant 0 : i32
    %c0_i32_1 = arith.constant 0 : i32
    return %c0_i32, %c0_i32_0 : i32, i32
  }
  func.func @transform_6(%arg0: i32) -> (i32, i32) {
    %c0_i32 = arith.constant 0 : i32
    %c0_i32_0 = arith.constant 0 : i32
    %c0_i32_1 = arith.constant 0 : i32
    return %c0_i32, %c0_i32_0 : i32, i32
  }
  func.func @transform_7(%arg0: i32) -> (i32, i32) {
    %c0_i32 = arith.constant 0 : i32
    %c0_i32_0 = arith.constant 0 : i32
    %c0_i32_1 = arith.constant 0 : i32
    return %c0_i32, %c0_i32_0 : i32, i32
  }
  func.func @transform_8(%arg0: i32) -> (i32, i32) {
    %c0_i32 = arith.constant 0 : i32
    %c0_i32_0 = arith.constant 0 : i32
    %c0_i32_1 = arith.constant 0 : i32
    return %c0_i32, %c0_i32_0 : i32, i32
  }
  func.func @transform_9(%arg0: i32) -> (i32, i32) {
    %c0_i32 = arith.constant 0 : i32
    %c0_i32_0 = arith.constant 0 : i32
    %c0_i32_1 = arith.constant 0 : i32
    return %c0_i32, %c0_i32_0 : i32, i32
  }
  func.func @transform_10(%arg0: i32) -> (i32, i32) {
    %c0_i32 = arith.constant 0 : i32
    %c0_i32_0 = arith.constant 0 : i32
    %c0_i32_1 = arith.constant 0 : i32
    return %c0_i32, %c0_i32_0 : i32, i32
  }
  func.func @transform_11(%arg0: i32) -> (i32, i32) {
    %c0_i32 = arith.constant 0 : i32
    %c0_i32_0 = arith.constant 0 : i32
    %c0_i32_1 = arith.constant 0 : i32
    return %c0_i32, %c0_i32_0 : i32, i32
  }
  func.func @transform_12(%arg0: i32) -> (i32, i32) {
    %c0_i32 = arith.constant 0 : i32
    %c0_i32_0 = arith.constant 0 : i32
    %c0_i32_1 = arith.constant 0 : i32
    return %c0_i32, %c0_i32_0 : i32, i32
  }
  func.func @transform_13(%arg0: i32) -> (i32, i32) {
    %c0_i32 = arith.constant 0 : i32
    %c0_i32_0 = arith.constant 0 : i32
    return %arg0, %c0_i32 : i32, i32
  }
  func.func @transform_14(%arg0: i32) -> (i32, i32) {
    %c0_i32 = arith.constant 0 : i32
    %c0_i32_0 = arith.constant 0 : i32
    return %arg0, %c0_i32 : i32, i32
  }
}

module attributes {stable_mosaic.version = 11 : i64} {
  func.func @_ln_mlp_res_kernel(%arg0: i32, %arg1: memref<64x32xf32, #tpu.memory_space<vmem>>, %arg2: memref<1x32xf32, #tpu.memory_space<vmem>>, %arg3: memref<1x32xf32, #tpu.memory_space<vmem>>, %arg4: memref<32x64xf32, #tpu.memory_space<vmem>>, %arg5: memref<1x64xf32, #tpu.memory_space<vmem>>, %arg6: memref<64x32xf32, #tpu.memory_space<vmem>>, %arg7: memref<1x32xf32, #tpu.memory_space<vmem>>, %arg8: memref<64x32xf32, #tpu.memory_space<vmem>>) attributes {dimension_semantics = [#tpu.dimension_semantics<parallel>], iteration_bounds = array<i64: 2>, scalar_prefetch = 0 : i64, scratch_operands = 0 : i64, tpu.core_type = #tpu.core_type<tc>, window_params = [{transform_indices = @transform_0, window_bounds = array<i64: 64, 32>}, {pipeline_mode = #tpu.pipeline_mode<synchronous>, transform_indices = @transform_1, window_bounds = array<i64: 1, 32>}, {pipeline_mode = #tpu.pipeline_mode<synchronous>, transform_indices = @transform_2, window_bounds = array<i64: 1, 32>}, {pipeline_mode = #tpu.pipeline_mode<synchronous>, transform_indices = @transform_3, window_bounds = array<i64: 32, 64>}, {pipeline_mode = #tpu.pipeline_mode<synchronous>, transform_indices = @transform_4, window_bounds = array<i64: 1, 64>}, {pipeline_mode = #tpu.pipeline_mode<synchronous>, transform_indices = @transform_5, window_bounds = array<i64: 64, 32>}, {pipeline_mode = #tpu.pipeline_mode<synchronous>, transform_indices = @transform_6, window_bounds = array<i64: 1, 32>}, {transform_indices = @transform_7, window_bounds = array<i64: 64, 32>}]} {
    %c0 = arith.constant 0 : index
    %c0_0 = arith.constant 0 : index
    %0 = vector.load %arg1[%c0, %c0_0] : memref<64x32xf32, #tpu.memory_space<vmem>>, vector<64x32xf32>
    %cst = arith.constant dense<0.000000e+00> : vector<64xf32>
    %1 = vector.multi_reduction <add>, %0, %cst [1] : vector<64x32xf32> to vector<64xf32>
    %2 = vector.shape_cast %1 : vector<64xf32> to vector<64x1xf32>
    %cst_1 = arith.constant 3.200000e+01 : f32
    %3 = vector.broadcast %cst_1 : f32 to vector<64x1xf32>
    %4 = arith.divf %2, %3 : vector<64x1xf32>
    %5 = vector.broadcast %4 : vector<64x1xf32> to vector<64x32xf32>
    %6 = arith.subf %0, %5 : vector<64x32xf32>
    %7 = arith.mulf %6, %6 : vector<64x32xf32>
    %cst_2 = arith.constant dense<0.000000e+00> : vector<64xf32>
    %8 = vector.multi_reduction <add>, %7, %cst_2 [1] : vector<64x32xf32> to vector<64xf32>
    %9 = vector.shape_cast %8 : vector<64xf32> to vector<64x1xf32>
    %cst_3 = arith.constant 3.200000e+01 : f32
    %10 = vector.broadcast %cst_3 : f32 to vector<64x1xf32>
    %11 = arith.divf %9, %10 : vector<64x1xf32>
    %12 = vector.broadcast %4 : vector<64x1xf32> to vector<64x32xf32>
    %13 = arith.subf %0, %12 : vector<64x32xf32>
    %cst_4 = arith.constant 9.99999974E-6 : f32
    %14 = vector.broadcast %cst_4 : f32 to vector<64x1xf32>
    %15 = arith.addf %11, %14 : vector<64x1xf32>
    %16 = math.rsqrt %15 : vector<64x1xf32>
    %17 = vector.broadcast %16 : vector<64x1xf32> to vector<64x32xf32>
    %18 = arith.mulf %13, %17 : vector<64x32xf32>
    %c0_5 = arith.constant 0 : index
    %c0_6 = arith.constant 0 : index
    %19 = vector.load %arg2[%c0_5, %c0_6] : memref<1x32xf32, #tpu.memory_space<vmem>>, vector<1x32xf32>
    %20 = vector.broadcast %19 : vector<1x32xf32> to vector<64x32xf32>
    %21 = arith.mulf %18, %20 : vector<64x32xf32>
    %c0_7 = arith.constant 0 : index
    %c0_8 = arith.constant 0 : index
    %22 = vector.load %arg3[%c0_7, %c0_8] : memref<1x32xf32, #tpu.memory_space<vmem>>, vector<1x32xf32>
    %23 = vector.broadcast %22 : vector<1x32xf32> to vector<64x32xf32>
    %24 = arith.addf %21, %23 : vector<64x32xf32>
    %c0_9 = arith.constant 0 : index
    %c0_10 = arith.constant 0 : index
    %25 = vector.load %arg4[%c0_9, %c0_10] : memref<32x64xf32, #tpu.memory_space<vmem>>, vector<32x64xf32>
    %cst_11 = arith.constant dense<0.000000e+00> : vector<64x64xf32>
    %26 = tpu.matmul %24, %25, %cst_11 {dimension_numbers = #tpu.dot_dimension_numbers<[1], [0], [0], [1], [0, 0, 1, 1], [], []>} : vector<64x32xf32>, vector<32x64xf32>, vector<64x64xf32> -> vector<64x64xf32>
    %c0_12 = arith.constant 0 : index
    %c0_13 = arith.constant 0 : index
    %27 = vector.load %arg5[%c0_12, %c0_13] : memref<1x64xf32, #tpu.memory_space<vmem>>, vector<1x64xf32>
    %28 = vector.broadcast %27 : vector<1x64xf32> to vector<64x64xf32>
    %29 = arith.addf %26, %28 : vector<64x64xf32>
    %30 = arith.mulf %29, %29 : vector<64x64xf32>
    %31 = arith.mulf %29, %30 : vector<64x64xf32>
    %cst_14 = arith.constant 4.471500e-02 : f32
    %32 = vector.broadcast %cst_14 : f32 to vector<64x64xf32>
    %33 = arith.mulf %32, %31 : vector<64x64xf32>
    %34 = arith.addf %29, %33 : vector<64x64xf32>
    %cst_15 = arith.constant 0.797884583 : f32
    %35 = vector.broadcast %cst_15 : f32 to vector<64x64xf32>
    %36 = arith.mulf %35, %34 : vector<64x64xf32>
    %37 = math.tanh %36 : vector<64x64xf32>
    %cst_16 = arith.constant 1.000000e+00 : f32
    %38 = vector.broadcast %cst_16 : f32 to vector<64x64xf32>
    %39 = arith.addf %38, %37 : vector<64x64xf32>
    %cst_17 = arith.constant 5.000000e-01 : f32
    %40 = vector.broadcast %cst_17 : f32 to vector<64x64xf32>
    %41 = arith.mulf %40, %39 : vector<64x64xf32>
    %42 = arith.mulf %29, %41 : vector<64x64xf32>
    %c0_18 = arith.constant 0 : index
    %c0_19 = arith.constant 0 : index
    %43 = vector.load %arg6[%c0_18, %c0_19] : memref<64x32xf32, #tpu.memory_space<vmem>>, vector<64x32xf32>
    %cst_20 = arith.constant dense<0.000000e+00> : vector<64x32xf32>
    %44 = tpu.matmul %42, %43, %cst_20 {dimension_numbers = #tpu.dot_dimension_numbers<[1], [0], [0], [1], [0, 0, 1, 1], [], []>} : vector<64x64xf32>, vector<64x32xf32>, vector<64x32xf32> -> vector<64x32xf32>
    %c0_21 = arith.constant 0 : index
    %c0_22 = arith.constant 0 : index
    %45 = vector.load %arg7[%c0_21, %c0_22] : memref<1x32xf32, #tpu.memory_space<vmem>>, vector<1x32xf32>
    %46 = vector.broadcast %45 : vector<1x32xf32> to vector<64x32xf32>
    %47 = arith.addf %44, %46 : vector<64x32xf32>
    %48 = arith.addf %47, %0 : vector<64x32xf32>
    %c0_23 = arith.constant 0 : index
    %c0_24 = arith.constant 0 : index
    %49 = vector.load %arg8[%c0_23, %c0_24] : memref<64x32xf32, #tpu.memory_space<vmem>>, vector<64x32xf32>
    tpu.vector_store %arg8[%c0_23, %c0_24], %48 {strides = array<i32>} : memref<64x32xf32, #tpu.memory_space<vmem>>, vector<64x32xf32>,
    return
  }
  func.func @transform_0(%arg0: i32) -> (i32, i32) {
    %c0_i32 = arith.constant 0 : i32
    %c0_i32_0 = arith.constant 0 : i32
    return %arg0, %c0_i32 : i32, i32
  }
  func.func @transform_1(%arg0: i32) -> (i32, i32) {
    %c0_i32 = arith.constant 0 : i32
    %c0_i32_0 = arith.constant 0 : i32
    %c0_i32_1 = arith.constant 0 : i32
    return %c0_i32, %c0_i32_0 : i32, i32
  }
  func.func @transform_2(%arg0: i32) -> (i32, i32) {
    %c0_i32 = arith.constant 0 : i32
    %c0_i32_0 = arith.constant 0 : i32
    %c0_i32_1 = arith.constant 0 : i32
    return %c0_i32, %c0_i32_0 : i32, i32
  }
  func.func @transform_3(%arg0: i32) -> (i32, i32) {
    %c0_i32 = arith.constant 0 : i32
    %c0_i32_0 = arith.constant 0 : i32
    %c0_i32_1 = arith.constant 0 : i32
    return %c0_i32, %c0_i32_0 : i32, i32
  }
  func.func @transform_4(%arg0: i32) -> (i32, i32) {
    %c0_i32 = arith.constant 0 : i32
    %c0_i32_0 = arith.constant 0 : i32
    %c0_i32_1 = arith.constant 0 : i32
    return %c0_i32, %c0_i32_0 : i32, i32
  }
  func.func @transform_5(%arg0: i32) -> (i32, i32) {
    %c0_i32 = arith.constant 0 : i32
    %c0_i32_0 = arith.constant 0 : i32
    %c0_i32_1 = arith.constant 0 : i32
    return %c0_i32, %c0_i32_0 : i32, i32
  }
  func.func @transform_6(%arg0: i32) -> (i32, i32) {
    %c0_i32 = arith.constant 0 : i32
    %c0_i32_0 = arith.constant 0 : i32
    %c0_i32_1 = arith.constant 0 : i32
    return %c0_i32, %c0_i32_0 : i32, i32
  }
  func.func @transform_7(%arg0: i32) -> (i32, i32) {
    %c0_i32 = arith.constant 0 : i32
    %c0_i32_0 = arith.constant 0 : i32
    return %arg0, %c0_i32 : i32, i32
  }
}

</mosaic_0001>

<bundles_post_ra>
// kernel: neg.1
= control target key start
LH: loop header
LB: loop body
LE: loop exit
PB: predicated region body
PF: predicated region fallthrough
CT: control target
= control target key end

     0   :  { %s264_s0 = inlined_call_operand.vmem [shape: f32[2,64,64], index: 0, kind: input, shape index: {}]   ;;  %s265_s1 = inlined_call_operand.vmem [shape: f32[2,64,64], index: 1, kind: output, shape index: {}]  }
   0x1   :  { %v2_v0 = vld [vmem:[%s264_s0] sm:$0xff]  ;;  %v130_v2 = vld [vmem:[%s264_s0 + $0x8] sm:$0xff]  ;;  %v134_v7 = vld [vmem:[%s264_s0 + $0x10] sm:$0xff] }
   0x2   :  { %v128_v1 = vld [vmem:[%s264_s0 + $0x40] sm:$0xff]  ;;  %v5_v3 = vxor.u32 2147483648, %v2_v0  ;;  %v20_v5 = vxor.u32 2147483648, %v130_v2  ;;  %v132_v6 = vld [vmem:[%s264_s0 + $0x48] sm:$0xff]  ;;  %v136_v8 = vld [vmem:[%s264_s0 + $0x50] sm:$0xff]  ;;  %v36_v10 = vxor.u32 2147483648, %v134_v7 }
   0x3   :  { %v12_v4 = vxor.u32 2147483648, %v128_v1  ;;  %v28_v9 = vxor.u32 2147483648, %v132_v6  ;;  %v44_v11 = vxor.u32 2147483648, %v136_v8  ;;  %v138_v12 = vld [vmem:[%s264_s0 + $0x18] sm:$0xff]  ;;  %v142_v14 = vld [vmem:[%s264_s0 + $0x20] sm:$0xff]  ;;  %v146_v19 = vld [vmem:[%s264_s0 + $0x28] sm:$0xff] }
   0x4   :  { %v140_v13 = vld [vmem:[%s264_s0 + $0x58] sm:$0xff]  ;;  %7 = vst [vmem:[%s265_s1] sm:$0xff] %v5_v3  ;;  %131 = vst [vmem:[%s265_s1 + $0x8] sm:$0xff] %v20_v5  ;;  %v52_v15 = vxor.u32 2147483648, %v138_v12  ;;  %v68_v17 = vxor.u32 2147483648, %v142_v14  ;;  %v144_v18 = vld [vmem:[%s264_s0 + $0x60] sm:$0xff]  ;;  %v84_v22 = vxor.u32 2147483648, %v146_v19 }
   0x5   :  { %129 = vst [vmem:[%s265_s1 + $0x40] sm:$0xff] %v12_v4  ;;  %v60_v16 = vxor.u32 2147483648, %v140_v13  ;;  %v148_v20 = vld [vmem:[%s264_s0 + $0x68] sm:$0xff]  ;;  %133 = vst [vmem:[%s265_s1 + $0x48] sm:$0xff] %v28_v9  ;;  %v76_v21 = vxor.u32 2147483648, %v144_v18  ;;  %v150_v24 = vld [vmem:[%s264_s0 + $0x30] sm:$0xff] }
   0x6   :  { %135 = vst [vmem:[%s265_s1 + $0x10] sm:$0xff] %v36_v10  ;;  %137 = vst [vmem:[%s265_s1 + $0x50] sm:$0xff] %v44_v11  ;;  %v92_v23 = vxor.u32 2147483648, %v148_v20  ;;  %v152_v25 = vld [vmem:[%s264_s0 + $0x70] sm:$0xff]  ;;  %v154_v26 = vld [vmem:[%s264_s0 + $0x38] sm:$0xff]  ;;  %v100_v27 = vxor.u32 2147483648, %v150_v24 }
   0x7   :  { %139 = vst [vmem:[%s265_s1 + $0x18] sm:$0xff] %v52_v15  ;;  %141 = vst [vmem:[%s265_s1 + $0x58] sm:$0xff] %v60_v16  ;;  %v108_v28 = vxor.u32 2147483648, %v152_v25  ;;  %v116_v29 = vxor.u32 2147483648, %v154_v26  ;;  %v156_v30 = vld [vmem:[%s264_s0 + $0x78] sm:$0xff] }
   0x8   :  { %143 = vst [vmem:[%s265_s1 + $0x20] sm:$0xff] %v68_v17  ;;  %145 = vst [vmem:[%s265_s1 + $0x60] sm:$0xff] %v76_v21  ;;  %v124_v31 = vxor.u32 2147483648, %v156_v30 }
   0x9   :  { %147 = vst [vmem:[%s265_s1 + $0x28] sm:$0xff] %v84_v22  ;;  %149 = vst [vmem:[%s265_s1 + $0x68] sm:$0xff] %v92_v23 }
   0xa   :  { %151 = vst [vmem:[%s265_s1 + $0x30] sm:$0xff] %v100_v27  ;;  %153 = vst [vmem:[%s265_s1 + $0x70] sm:$0xff] %v108_v28 }
   0xb   :  { %155 = vst [vmem:[%s265_s1 + $0x38] sm:$0xff] %v116_v29  ;;  %157 = vst [vmem:[%s265_s1 + $0x78] sm:$0xff] %v124_v31 }

// kernel: basic_layer_apply.6
= control target key start
LH: loop header
LB: loop body
LE: loop exit
PB: predicated region body
PF: predicated region fallthrough
CT: control target
= control target key end

     0   :  { %s704_s18 = smov 0   ;;  %s813_s0 = inlined_call_operand.vmem [shape: f32[128,32], index: 0, kind: input, shape index: {}]   ;;  %s814_s1 = inlined_call_operand.vmem [shape: f32[1,32], index: 1, kind: input, shape index: {}]   ;;  %s815_s2 = inlined_call_operand.vmem [shape: f32[1,32], index: 2, kind: input, shape index: {}]   ;;  %s816_s3 = inlined_call_operand.vmem [shape: f32[32,128], index: 3, kind: input, shape index: {}]   ;;  %s817_s4 = inlined_call_operand.vmem [shape: f32[1,128], index: 4, kind: input, shape index: {}]   ;;  %s818_s5 = inlined_call_operand.vmem [shape: f32[128,128], index: 5, kind: output, shape index: {}]  }
   0x1 LB: > { %s576_s19 = sadd.s32 4294967295, %s672_s18   ;;  %p580_p0 = scmp.ge.s32.totalorder %s672_s18, 1  ;;  %s672_s18 = sphi %s704_s18, %s15_s18  }
   0x2   : > { %p188_p1 = scmp.lt.s32.totalorder %s672_s18, 3 }
   0x4   : > { %p189_p2 = pnand %p580_p0, %p188_p1 }
   0x5   : > { %s581_s20 = sshll.u32 (!%p189_p2), %s576_s19, 3  ;;  %vm236_vm0 = vcmask (!%p189_p2), 261120   ;;  %v372_v56 = vld [vmem:[%s816_s3] sm:$0xff] (!%p189_p2)  ;;  %v373_v57 = vld [vmem:[%s816_s3 + $0x8] sm:$0xff] (!%p189_p2)  ;;  %v374_v59 = vld [vmem:[%s816_s3 + $0x10] sm:$0xff] (!%p189_p2) }
   0x6   : > { %192 = sbr.rel (%p189_p2) target bundleno = 562 (0x232), region = 40  ;;  %p217_p3 = scmp.lt.s32.totalorder (!%p189_p2), %s581_s20, 15  ;;  %v630_v58 = vpack.c.bf16 (!%p189_p2), %v373_v57, %v372_v56  ;;  %v375_v60 = vld [vmem:[%s816_s3 + $0x18] sm:$0xff] (!%p189_p2) }
   0x7   : > { %v634_v61 = vpack.c.bf16 (!%p189_p2), %v375_v60, %v374_v59 }
   0x8   : > { %631 = vmatprep.subr.bf16.mxu0 (!%p189_p2), %v630_v58  ;;  %638 = vmatprep.subr.bf16.mxu1 (!%p189_p2), %v630_v58 }
   0x9   : > { %633 = vmatpush3.bf16.msra.mxu0 (!%p189_p2), %v630_v58  ;;  %640 = vmatpush3.bf16.msra.mxu1 (!%p189_p2), %v630_v58 }
   0xa   : > { %635 = vmatprep.subr.bf16.mxu0 (!%p189_p2), %v634_v61  ;;  %639 = vmatprep.subr.bf16.mxu1 (!%p189_p2), %v634_v61 }
   0xd   : > { %s820_s20 = smov (!%p217_p3, %s581_s20), 15  ;;  %637 = vmatpush3.bf16.msra.mxu0 %v634_v61  ;;  %641 = vmatpush3.bf16.msra.mxu1 %v634_v61 }
   0xe   : > { %s582_s21 = sshll.u32 %s820_s20, 3 }
   0xf   : > { %s220_s24 = scalar_lea.vmem %s813_s0, %s582_s21  ;;  %s226_s16 = scalar_lea.vmem %s818_s5, %s582_s21 }
  0x10   : > { %v228_v0 = vld [vmem:[%s220_s24] sm:$0xff]  ;;  %v229_v1 = vld [vmem:[%s220_s24 + $0x8] sm:$0xff]  ;;  %v230_v8 = vld [vmem:[%s220_s24 + $0x10] sm:$0xff] }
  0x11   : > { %v232_v2 = vld [vmem:[%s220_s24 + $0x20] sm:$0xff]  ;;  %v237_v3 = vsel %vm236_vm0, %v228_v0, 0.0  ;;  %v240_v4 = vsel %vm236_vm0, %v229_v1, 0.0  ;;  %v233_v5 = vld [vmem:[%s220_s24 + $0x28] sm:$0xff]  ;;  %v234_v9 = vld [vmem:[%s220_s24 + $0x30] sm:$0xff]  ;;  %v243_v10 = vsel %vm236_vm0, %v230_v8, 0.0 }
  0x12   : > { %238 = vadd.xlane.f32.xlu0 %v237_v3  ;;  %241 = vadd.xlane.f32.xlu1 %v240_v4  ;;  %v249_v6 = vsel %vm236_vm0, %v232_v2, 0.0  ;;  %v252_v7 = vsel %vm236_vm0, %v233_v5, 0.0  ;;  %v255_v11 = vsel %vm236_vm0, %v234_v9, 0.0  ;;  %v231_v12 = vld [vmem:[%s220_s24 + $0x18] sm:$0xff] }
  0x13   : > { %v235_v13 = vld [vmem:[%s220_s24 + $0x38] sm:$0xff]  ;;  %v246_v14 = vsel %vm236_vm0, %v231_v12, 0.0 }
  0x14   : > { %v258_v15 = vsel %vm236_vm0, %v235_v13, 0.0 }
  0x16   : > { %250 = vadd.xlane.f32.xlu0 %v249_v6  ;;  %253 = vadd.xlane.f32.xlu1 %v252_v7 }
  0x1a   : > { %244 = vadd.xlane.f32.xlu0 %v243_v10  ;;  %256 = vadd.xlane.f32.xlu1 %v255_v11 }
  0x1e   : > { %247 = vadd.xlane.f32.xlu0 %v246_v14  ;;  %259 = vadd.xlane.f32.xlu1 %v258_v15 }
  0x9f   : > { %v239_v16 = vpop.xlane.xlu0 %238  ;;  %v242_v17 = vpop.xlane.xlu1 %241 }
  0xa0   : > { %v262_v18 = vmul.f32 0.03125, %v239_v16  ;;  %v263_v19 = vmul.f32 0.03125, %v242_v17 }
  0xa2   : > { %v728_v20 = vsub.f32 %v228_v0, %v262_v18  ;;  %v730_v21 = vsub.f32 %v229_v1, %v263_v19 }
  0xa3   : > { %v251_v22 = vpop.xlane.xlu0 %250  ;;  %v254_v23 = vpop.xlane.xlu1 %253 }
  0xa4   : > { %v266_v24 = vmul.f32 0.03125, %v251_v22  ;;  %v267_v25 = vmul.f32 0.03125, %v254_v23  ;;  %v278_v26 = vmul.f32 %v728_v20, %v728_v20  ;;  %v279_v27 = vmul.f32 %v730_v21, %v730_v21  ;;  %v585_v22 = vld [vmem:[%s814_s1] ss:$0 sm:$0xff] }
  0xa6   : > { %v736_v28 = vsub.f32 %v232_v2, %v266_v24  ;;  %v738_v29 = vsub.f32 %v233_v5, %v267_v25  ;;  %v286_v30 = vsel %vm236_vm0, %v278_v26, 0.0  ;;  %v289_v33 = vsel %vm236_vm0, %v279_v27, 0.0  ;;  %v586_v26 = vld [vmem:[%s815_s2] ss:$0 sm:$0xff] }
  0xa7   : > { %287 = vadd.xlane.f32.xlu0 %v286_v30  ;;  %v245_v31 = vpop.xlane.xlu0 %244  ;;  %v257_v32 = vpop.xlane.xlu1 %256 }
  0xa8   : > { %v264_v34 = vmul.f32 0.03125, %v245_v31  ;;  %v268_v35 = vmul.f32 0.03125, %v257_v32  ;;  %v282_v36 = vmul.f32 %v736_v28, %v736_v28  ;;  %v283_v37 = vmul.f32 %v738_v29, %v738_v29 }
  0xaa   : > { %v746_v38 = vsub.f32 %v230_v8, %v264_v34  ;;  %v748_v39 = vsub.f32 %v234_v9, %v268_v35  ;;  %v298_v40 = vsel %vm236_vm0, %v282_v36, 0.0  ;;  %v301_v43 = vsel %vm236_vm0, %v283_v37, 0.0 }
  0xab   : > { %290 = vadd.xlane.f32.xlu0 %v289_v33  ;;  %299 = vadd.xlane.f32.xlu1 %v298_v40  ;;  %v248_v41 = vpop.xlane.xlu0 %247  ;;  %v260_v42 = vpop.xlane.xlu1 %259 }
  0xac   : > { %v265_v44 = vmul.f32 0.03125, %v248_v41  ;;  %v269_v45 = vmul.f32 0.03125, %v260_v42  ;;  %v280_v46 = vmul.f32 %v746_v38, %v746_v38  ;;  %v284_v47 = vmul.f32 %v748_v39, %v748_v39 }
  0xae   : > { %v756_v48 = vsub.f32 %v231_v12, %v265_v44  ;;  %v758_v49 = vsub.f32 %v235_v13, %v269_v45  ;;  %v292_v50 = vsel %vm236_vm0, %v280_v46, 0.0  ;;  %v304_v51 = vsel %vm236_vm0, %v284_v47, 0.0 }
  0xaf   : > { %302 = vadd.xlane.f32.xlu1 %v301_v43  ;;  %293 = vadd.xlane.f32.xlu0 %v292_v50 }
  0xb0   : > { %v281_v52 = vmul.f32 %v756_v48, %v756_v48  ;;  %v285_v53 = vmul.f32 %v758_v49, %v758_v49 }
  0xb2   : > { %v295_v54 = vsel %vm236_vm0, %v281_v52, 0.0  ;;  %v307_v55 = vsel %vm236_vm0, %v285_v53, 0.0 }
  0xb3   : > { %305 = vadd.xlane.f32.xlu1 %v304_v51  ;;  %296 = vadd.xlane.f32.xlu0 %v295_v54 }
  0xb7   : > { %308 = vadd.xlane.f32.xlu1 %v307_v55 }
 0x134   : > { %v288_v62 = vpop.xlane.xlu0 %287 }
 0x135   : > { %v310_v63 = vmul.f32 0.03125, %v288_v62 }
 0x137   : > { %v318_v0 = vadd.f32 1e-05, %v310_v63 }
 0x138   : > { %v300_v1 = vpop.xlane.xlu1 %299  ;;  %v291_v2 = vpop.xlane.xlu0 %290 }
 0x139   : > { %650 = vrsqrt.f32 %v318_v0  ;;  %v314_v3 = vmul.f32 0.03125, %v300_v1  ;;  %v311_v4 = vmul.f32 0.03125, %v291_v2 }
 0x13b   : > { %v322_v5 = vadd.f32 1e-05, %v314_v3  ;;  %v319_v6 = vadd.f32 1e-05, %v311_v4 }
 0x13c   : > { %v303_v7 = vpop.xlane.xlu1 %302  ;;  %v294_v8 = vpop.xlane.xlu0 %293 }
 0x13d   : > { %652 = vrsqrt.f32 %v322_v5  ;;  %v315_v9 = vmul.f32 0.03125, %v303_v7  ;;  %v312_v10 = vmul.f32 0.03125, %v294_v8 }
 0x13e   : > { %654 = vrsqrt.f32 %v319_v6 }
 0x13f   : > { %v323_v11 = vadd.f32 1e-05, %v315_v9  ;;  %v320_v12 = vadd.f32 1e-05, %v312_v10 }
 0x140   : > { %v306_v13 = vpop.xlane.xlu1 %305  ;;  %v297_v14 = vpop.xlane.xlu0 %296 }
 0x141   : > { %656 = vrsqrt.f32 %v323_v11  ;;  %v316_v15 = vmul.f32 0.03125, %v306_v13  ;;  %v313_v16 = vmul.f32 0.03125, %v297_v14 }
 0x142   : > { %658 = vrsqrt.f32 %v320_v12 }
 0x143   : > { %v651_v17 = vpop.eup %650  ;;  %v324_v18 = vadd.f32 1e-05, %v316_v15  ;;  %v321_v19 = vadd.f32 1e-05, %v313_v16 }
 0x144   : > { %v309_v23 = vpop.xlane.xlu1 %308  ;;  %v334_v24 = vmul.f32 %v651_v17, %v728_v20 }
 0x145   : > { %660 = vrsqrt.f32 %v324_v18  ;;  %v317_v25 = vmul.f32 0.03125, %v309_v23 }
 0x146   : > { %662 = vrsqrt.f32 %v321_v19  ;;  %v349_v27 = vmul.f32 %v585_v22, %v334_v24 }
 0x147   : > { %v653_v30 = vpop.eup %652  ;;  %v325_v31 = vadd.f32 1e-05, %v317_v25 }
 0x148   : > { %v655_v32 = vpop.eup %654  ;;  %v364_v33 = vadd.f32 %v586_v26, %v349_v27  ;;  %v338_v34 = vmul.f32 %v653_v30, %v736_v28 }
 0x149   : > { %664 = vrsqrt.f32 %v325_v31  ;;  %v335_v35 = vmul.f32 %v655_v32, %v730_v21 }
 0x14a   : > { %618 = vmatprep.mubr.msk.f32.mxu0 %vm236_vm0, %v364_v33  ;;  %v353_v20 = vmul.f32 %v585_v22, %v338_v34 }
 0x14b   : > { %v657_v36 = vpop.eup %656  ;;  %v350_v37 = vmul.f32 %v585_v22, %v335_v35 }
 0x14c   : > { %v659_v40 = vpop.eup %658  ;;  %v368_v41 = vadd.f32 %v586_v26, %v353_v20  ;;  %v339_v42 = vmul.f32 %v657_v36, %v738_v29 }
 0x14d   : > { %v365_v43 = vadd.f32 %v586_v26, %v350_v37  ;;  %v336_v44 = vmul.f32 %v659_v40, %v746_v38 }
 0x14e   : > { %624 = vmatprep.mubr.msk.f32.mxu1 %vm236_vm0, %v368_v41  ;;  %v354_v45 = vmul.f32 %v585_v22, %v339_v42 }
 0x14f   : > { %v661_v46 = vpop.eup %660  ;;  %619 = vmatmul.mubr.msk.f32.vlgmr.msra.gmra.mrb[0].mxu0 %vm236_vm0, %v365_v43  ;;  %v351_v28 = vmul.f32 %v585_v22, %v336_v44 }
 0x150   : > { %v663_v21 = vpop.eup %662  ;;  %v369_v47 = vadd.f32 %v586_v26, %v354_v45  ;;  %v340_v50 = vmul.f32 %v661_v46, %v748_v39 }
 0x151   : > { %v366_v51 = vadd.f32 %v586_v26, %v351_v28  ;;  %v337_v52 = vmul.f32 %v663_v21, %v756_v48  ;;  %v587_v48 = vld [vmem:[%s817_s4] ss:$0 sm:$0xff] }
 0x152   : > { %625 = vmatmul.mubr.msk.f32.vlgmr.msra.gmra.mrb[0].mxu1 %vm236_vm0, %v369_v47  ;;  %v355_v29 = vmul.f32 %v585_v22, %v340_v50 }
 0x153   : > { %v665_v53 = vpop.eup %664  ;;  %621 = vmatprep.mubr.msk.f32.mxu0 %vm236_vm0, %v366_v51  ;;  %v352_v38 = vmul.f32 %v585_v22, %v337_v52 }
 0x154   : > { %v370_v54 = vadd.f32 %v586_v26, %v355_v29  ;;  %v341_v55 = vmul.f32 %v665_v53, %v758_v49 }
 0x155   : > { %v367_v56 = vadd.f32 %v586_v26, %v352_v38 }
 0x156   : > { %627 = vmatprep.mubr.msk.f32.mxu1 %vm236_vm0, %v370_v54  ;;  %v356_v57 = vmul.f32 %v585_v22, %v341_v55 }
 0x157   : > { %622 = vmatmul.mubr.msk.f32.gmra.mrb[2].mxu0 %vm236_vm0, %v367_v56 }
 0x158   : > { %v371_v39 = vadd.f32 %v586_v26, %v356_v57 }
 0x15a   : > { %628 = vmatmul.mubr.msk.f32.gmra.mrb[2].mxu1 %vm236_vm0, %v371_v39 }
 0x222   : > { %v620_v58 = vpop.f32.mrb[0].mxu0 }
 0x223   : > { %v479_v49 = vadd.f32 %v620_v58, %v587_v48  ;;  %v473_v59 = vpop.f32.mrb[1].mxu0 }
 0x224   : > { %v474_v60 = vadd.f32 %v587_v48, %v473_v59 }
 0x225   : > { %513 = vst [vmem:[%s226_s16 + $0x8] sm:$0xff] %v479_v49  ;;  %v626_v61 = vpop.f32.mrb[0].mxu1 }
 0x226   : > { %512 = vst [vmem:[%s226_s16] sm:$0xff] %v474_v60  ;;  %v499_v62 = vadd.f32 %v626_v61, %v587_v48  ;;  %v493_v63 = vpop.f32.mrb[1].mxu1 }
 0x227   : > { %v494_v0 = vadd.f32 %v587_v48, %v493_v63 }
 0x228   : > { %517 = vst [vmem:[%s226_s16 + $0x28] sm:$0xff] %v499_v62 }
 0x229   : > { %516 = vst [vmem:[%s226_s16 + $0x20] sm:$0xff] %v494_v0 }
 0x22a   : > { %v623_v1 = vpop.f32.mrb[2].mxu0 }
 0x22b   : > { %v489_v2 = vadd.f32 %v623_v1, %v587_v48  ;;  %v483_v3 = vpop.f32.mrb[3].mxu0 }
 0x22c   : > { %v484_v4 = vadd.f32 %v587_v48, %v483_v3 }
 0x22d   : > { %515 = vst [vmem:[%s226_s16 + $0x18] sm:$0xff] %v489_v2  ;;  %v629_v5 = vpop.f32.mrb[2].mxu1 }
 0x22e   : > { %514 = vst [vmem:[%s226_s16 + $0x10] sm:$0xff] %v484_v4  ;;  %v509_v6 = vadd.f32 %v629_v5, %v587_v48  ;;  %v503_v7 = vpop.f32.mrb[3].mxu1 }
 0x22f   : > { %v504_v8 = vadd.f32 %v587_v48, %v503_v7 }
 0x230   : > { %519 = vst [vmem:[%s226_s16 + $0x38] sm:$0xff] %v509_v6 }
 0x231   : > { %518 = vst [vmem:[%s226_s16 + $0x30] sm:$0xff] %v504_v8 }
 0x232 PF: > { %s15_s18 = sadd.s32 1, %s672_s18  }
 0x233   : > { %p12_p4 = scmp.ge.s32.totalorder %s15_s18, 4  }
 0x235   :  { %14 = sbr.rel (!%p12_p4) target bundleno = 1 (0x1), region = 70 }

// kernel: basic_layer_apply.8
= control target key start
LH: loop header
LB: loop body
LE: loop exit
PB: predicated region body
PF: predicated region fallthrough
CT: control target
= control target key end

     0   :  { %s1082_s24 = smov 0   ;;  %s1330_s0 = inlined_call_operand.vmem [shape: f32[128,32], index: 0, kind: input, shape index: {}]   ;;  %s1331_s1 = inlined_call_operand.vmem [shape: f32[1,32], index: 1, kind: input, shape index: {}]   ;;  %s1332_s2 = inlined_call_operand.vmem [shape: f32[1,32], index: 2, kind: input, shape index: {}]   ;;  %s1333_s3 = inlined_call_operand.vmem [shape: f32[32,64], index: 3, kind: input, shape index: {}]   ;;  %s1334_s4 = inlined_call_operand.vmem [shape: f32[1,64], index: 4, kind: input, shape index: {}]   ;;  %s1335_s5 = inlined_call_operand.vmem [shape: f32[64,32], index: 5, kind: input, shape index: {}]   ;;  %s1336_s6 = inlined_call_operand.vmem [shape: f32[1,32], index: 6, kind: input, shape index: {}]   ;;  %s1337_s7 = inlined_call_operand.vmem [shape: f32[128,32], index: 7, kind: output, shape index: {}]  }
   0x1 LB: > { %s855_s25 = sadd.s32 4294967295, %s1040_s24   ;;  %p859_p0 = scmp.ge.s32.totalorder %s1040_s24, 1  ;;  %s1040_s24 = sphi %s1082_s24, %s17_s24  }
   0x2   : > { %p238_p1 = scmp.lt.s32.totalorder %s1040_s24, 3 }
   0x4   : > { %p239_p2 = pnand %p859_p0, %p238_p1 }
   0x5   : > { %s860_s26 = sshll.u32 (!%p239_p2), %s855_s25, 3  ;;  %vm290_vm0 = vcmask (!%p239_p2), 261120   ;;  %v426_v56 = vld [vmem:[%s1333_s3] sm:$0xff] (!%p239_p2)  ;;  %v427_v57 = vld [vmem:[%s1333_s3 + $0x8] sm:$0xff] (!%p239_p2)  ;;  %v428_v59 = vld [vmem:[%s1333_s3 + $0x10] sm:$0xff] (!%p239_p2)  ;;  %vm653_vm1 = vcmask (!%p239_p2), 523264  }
   0x6   : > { %242 = sbr.rel (%p239_p2) target bundleno = 807 (0x327), region = 48  ;;  %p271_p3 = scmp.lt.s32.totalorder (!%p239_p2), %s860_s26, 15  ;;  %v962_v58 = vpack.c.bf16 (!%p239_p2), %v427_v57, %v426_v56  ;;  %v429_v60 = vld [vmem:[%s1333_s3 + $0x18] sm:$0xff] (!%p239_p2) }
   0x7   : > { %v966_v61 = vpack.c.bf16 (!%p239_p2), %v429_v60, %v428_v59 }
   0x8   : > { %963 = vmatprep.subr.bf16.mxu0 (!%p239_p2), %v962_v58 }
   0x9   : > { %965 = vmatpush3.bf16.msra.mxu0 (!%p239_p2), %v962_v58 }
   0xa   : > { %967 = vmatprep.subr.bf16.mxu0 (!%p239_p2), %v966_v61 }
   0xd   : > { %s1339_s26 = smov (!%p271_p3, %s860_s26), 15  ;;  %969 = vmatpush3.bf16.msra.mxu0 %v966_v61 }
   0xe   : > { %s861_s27 = sshll.u32 %s1339_s26, 3 }
   0xf   : > { %s274_s30 = scalar_lea.vmem %s1330_s0, %s861_s27  ;;  %s280_s22 = scalar_lea.vmem %s1337_s7, %s861_s27 }
  0x10   : > { %v1098_v0 = vld [vmem:[%s274_s30] sm:$0xff]  ;;  %v1100_v1 = vld [vmem:[%s274_s30 + $0x10] sm:$0xff]  ;;  %v1102_v2 = vld [vmem:[%s274_s30 + $0x8] sm:$0xff] }
  0x11   : > { %v291_v3 = vsel %vm290_vm0, %v1098_v0, 0.0  ;;  %v297_v4 = vsel %vm290_vm0, %v1100_v1, 0.0  ;;  %v1108_v5 = vld [vmem:[%s274_s30 + $0x18] sm:$0xff]  ;;  %v294_v6 = vsel %vm290_vm0, %v1102_v2, 0.0  ;;  %v1114_v8 = vld [vmem:[%s274_s30 + $0x20] sm:$0xff]  ;;  %v1116_v9 = vld [vmem:[%s274_s30 + $0x28] sm:$0xff] }
  0x12   : > { %292 = vadd.xlane.f32.xlu0 %v291_v3  ;;  %298 = vadd.xlane.f32.xlu1 %v297_v4  ;;  %v300_v7 = vsel %vm290_vm0, %v1108_v5, 0.0  ;;  %v303_v10 = vsel %vm290_vm0, %v1114_v8, 0.0  ;;  %v306_v11 = vsel %vm290_vm0, %v1116_v9, 0.0  ;;  %v1122_v12 = vld [vmem:[%s274_s30 + $0x30] sm:$0xff]  ;;  %v1124_v13 = vld [vmem:[%s274_s30 + $0x38] sm:$0xff] }
  0x13   : > { %v309_v14 = vsel %vm290_vm0, %v1122_v12, 0.0  ;;  %v312_v15 = vsel %vm290_vm0, %v1124_v13, 0.0 }
  0x16   : > { %295 = vadd.xlane.f32.xlu0 %v294_v6  ;;  %301 = vadd.xlane.f32.xlu1 %v300_v7 }
  0x1a   : > { %304 = vadd.xlane.f32.xlu0 %v303_v10  ;;  %307 = vadd.xlane.f32.xlu1 %v306_v11 }
  0x1e   : > { %310 = vadd.xlane.f32.xlu0 %v309_v14  ;;  %313 = vadd.xlane.f32.xlu1 %v312_v15 }
  0x9f   : > { %v293_v16 = vpop.xlane.xlu0 %292  ;;  %v299_v17 = vpop.xlane.xlu1 %298 }
  0xa0   : > { %v316_v18 = vmul.f32 0.03125, %v293_v16  ;;  %v318_v19 = vmul.f32 0.03125, %v299_v17 }
  0xa2   : > { %v1131_v20 = vsub.f32 %v1098_v0, %v316_v18  ;;  %v1134_v21 = vsub.f32 %v1100_v1, %v318_v19 }
  0xa3   : > { %v296_v22 = vpop.xlane.xlu0 %295  ;;  %v302_v23 = vpop.xlane.xlu1 %301 }
  0xa4   : > { %v317_v24 = vmul.f32 0.03125, %v296_v22  ;;  %v319_v25 = vmul.f32 0.03125, %v302_v23  ;;  %v332_v26 = vmul.f32 %v1131_v20, %v1131_v20  ;;  %v334_v27 = vmul.f32 %v1134_v21, %v1134_v21 }
  0xa6   : > { %v1141_v28 = vsub.f32 %v1102_v2, %v317_v24  ;;  %v1144_v29 = vsub.f32 %v1108_v5, %v319_v25  ;;  %v340_v30 = vsel %vm290_vm0, %v332_v26, 0.0  ;;  %v346_v33 = vsel %vm290_vm0, %v334_v27, 0.0 }
  0xa7   : > { %341 = vadd.xlane.f32.xlu0 %v340_v30  ;;  %v305_v31 = vpop.xlane.xlu0 %304  ;;  %v308_v32 = vpop.xlane.xlu1 %307 }
  0xa8   : > { %v320_v34 = vmul.f32 0.03125, %v305_v31  ;;  %v321_v35 = vmul.f32 0.03125, %v308_v32  ;;  %v333_v36 = vmul.f32 %v1141_v28, %v1141_v28  ;;  %v335_v37 = vmul.f32 %v1144_v29, %v1144_v29  ;;  %v864_v32 = vld [vmem:[%s1331_s1] ss:$0 sm:$0xff] }
  0xaa   : > { %v1153_v38 = vsub.f32 %v1114_v8, %v320_v34  ;;  %v1156_v39 = vsub.f32 %v1116_v9, %v321_v35  ;;  %v343_v40 = vsel %vm290_vm0, %v333_v36, 0.0  ;;  %v349_v43 = vsel %vm290_vm0, %v335_v37, 0.0  ;;  %v865_v36 = vld [vmem:[%s1332_s2] ss:$0 sm:$0xff] }
  0xab   : > { %347 = vadd.xlane.f32.xlu0 %v346_v33  ;;  %344 = vadd.xlane.f32.xlu1 %v343_v40  ;;  %v311_v41 = vpop.xlane.xlu0 %310  ;;  %v314_v42 = vpop.xlane.xlu1 %313 }
  0xac   : > { %v322_v44 = vmul.f32 0.03125, %v311_v41  ;;  %v323_v45 = vmul.f32 0.03125, %v314_v42  ;;  %v336_v46 = vmul.f32 %v1153_v38, %v1153_v38  ;;  %v337_v47 = vmul.f32 %v1156_v39, %v1156_v39 }
  0xae   : > { %v1165_v48 = vsub.f32 %v1122_v12, %v322_v44  ;;  %v1168_v49 = vsub.f32 %v1124_v13, %v323_v45  ;;  %v352_v50 = vsel %vm290_vm0, %v336_v46, 0.0  ;;  %v355_v51 = vsel %vm290_vm0, %v337_v47, 0.0 }
  0xaf   : > { %350 = vadd.xlane.f32.xlu1 %v349_v43  ;;  %353 = vadd.xlane.f32.xlu0 %v352_v50 }
  0xb0   : > { %v338_v52 = vmul.f32 %v1165_v48, %v1165_v48  ;;  %v339_v53 = vmul.f32 %v1168_v49, %v1168_v49 }
  0xb2   : > { %v358_v54 = vsel %vm290_vm0, %v338_v52, 0.0  ;;  %v361_v55 = vsel %vm290_vm0, %v339_v53, 0.0 }
  0xb3   : > { %356 = vadd.xlane.f32.xlu1 %v355_v51  ;;  %359 = vadd.xlane.f32.xlu0 %v358_v54 }
  0xb7   : > { %362 = vadd.xlane.f32.xlu1 %v361_v55 }
 0x134   : > { %v342_v62 = vpop.xlane.xlu0 %341 }
 0x135   : > { %v364_v63 = vmul.f32 0.03125, %v342_v62 }
 0x137   : > { %v372_v3 = vadd.f32 1e-05, %v364_v63 }
 0x138   : > { %v345_v4 = vpop.xlane.xlu1 %344  ;;  %v348_v6 = vpop.xlane.xlu0 %347 }
 0x139   : > { %1002 = vrsqrt.f32 %v372_v3  ;;  %v365_v7 = vmul.f32 0.03125, %v345_v4  ;;  %v366_v10 = vmul.f32 0.03125, %v348_v6  ;;  %v639_v6 = vld [vmem:[%s1335_s5 + $0x8] sm:$0xff] }
 0x13b   : > { %v373_v11 = vadd.f32 1e-05, %v365_v7  ;;  %v374_v14 = vadd.f32 1e-05, %v366_v10  ;;  %v641_v10 = vld [vmem:[%s1335_s5 + $0x18] sm:$0xff] }
 0x13c   : > { %v351_v15 = vpop.xlane.xlu1 %350  ;;  %v354_v16 = vpop.xlane.xlu0 %353 }
 0x13d   : > { %1004 = vrsqrt.f32 %v373_v11  ;;  %v367_v17 = vmul.f32 0.03125, %v351_v15  ;;  %v368_v18 = vmul.f32 0.03125, %v354_v16  ;;  %v643_v15 = vld [vmem:[%s1335_s5 + $0x28] sm:$0xff] }
 0x13e   : > { %1006 = vrsqrt.f32 %v374_v14  ;;  %v642_v14 = vld [vmem:[%s1335_s5 + $0x20] sm:$0xff] }
 0x13f   : > { %v375_v19 = vadd.f32 1e-05, %v367_v17  ;;  %v376_v22 = vadd.f32 1e-05, %v368_v18  ;;  %v978_v16 = vpack.c.bf16 %v643_v15, %v642_v14  ;;  %v644_v17 = vld [vmem:[%s1335_s5 + $0x30] sm:$0xff]  ;;  %v645_v18 = vld [vmem:[%s1335_s5 + $0x38] sm:$0xff] }
 0x140   : > { %v357_v23 = vpop.xlane.xlu1 %356  ;;  %v360_v24 = vpop.xlane.xlu0 %359 }
 0x141   : > { %1008 = vrsqrt.f32 %v375_v19  ;;  %v369_v25 = vmul.f32 0.03125, %v357_v23  ;;  %v370_v26 = vmul.f32 0.03125, %v360_v24  ;;  %v982_v19 = vpack.c.bf16 %v645_v18, %v644_v17 }
 0x142   : > { %1010 = vrsqrt.f32 %v376_v22  ;;  %v866_v22 = vld [vmem:[%s1334_s4] ss:$0 sm:$0xff] }
 0x143   : > { %v1003_v27 = vpop.eup %1002  ;;  %v377_v30 = vadd.f32 1e-05, %v369_v25  ;;  %v378_v31 = vadd.f32 1e-05, %v370_v26 }
 0x144   : > { %v363_v33 = vpop.xlane.xlu1 %362  ;;  %v388_v34 = vmul.f32 %v1003_v27, %v1131_v20 }
 0x145   : > { %1012 = vrsqrt.f32 %v377_v30  ;;  %v371_v35 = vmul.f32 0.03125, %v363_v33 }
 0x146   : > { %1014 = vrsqrt.f32 %v378_v31  ;;  %v403_v37 = vmul.f32 %v864_v32, %v388_v34 }
 0x147   : > { %v1005_v40 = vpop.eup %1004  ;;  %v379_v41 = vadd.f32 1e-05, %v371_v35 }
 0x148   : > { %v1007_v42 = vpop.eup %1006  ;;  %v418_v43 = vadd.f32 %v865_v36, %v403_v37  ;;  %v389_v44 = vmul.f32 %v1005_v40, %v1141_v28 }
 0x149   : > { %1016 = vrsqrt.f32 %v379_v41  ;;  %v390_v45 = vmul.f32 %v1007_v42, %v1134_v21 }
 0x14a   : > { %922 = vmatprep.mubr.msk.f32.mxu0 %vm290_vm0, %v418_v43  ;;  %v404_v20 = vmul.f32 %v864_v32, %v389_v44 }
 0x14b   : > { %v1009_v46 = vpop.eup %1008  ;;  %v405_v47 = vmul.f32 %v864_v32, %v390_v45 }
 0x14c   : > { %v1011_v50 = vpop.eup %1010  ;;  %v419_v51 = vadd.f32 %v865_v36, %v404_v20  ;;  %v391_v52 = vmul.f32 %v1009_v46, %v1144_v29 }
 0x14d   : > { %v420_v53 = vadd.f32 %v865_v36, %v405_v47  ;;  %v392_v54 = vmul.f32 %v1011_v50, %v1153_v38 }
 0x14e   : > { %923 = vmatmul.mubr.msk.f32.vlgmr.msra.gmra.mrb[0].mxu0 %vm290_vm0, %v419_v51  ;;  %v406_v55 = vmul.f32 %v864_v32, %v391_v52 }
 0x14f   : > { %v1013_v56 = vpop.eup %1012  ;;  %925 = vmatprep.mubr.msk.f32.mxu0 %vm290_vm0, %v420_v53  ;;  %v407_v28 = vmul.f32 %v864_v32, %v392_v54 }
 0x150   : > { %v1015_v21 = vpop.eup %1014  ;;  %v421_v57 = vadd.f32 %v865_v36, %v406_v55  ;;  %v393_v58 = vmul.f32 %v1013_v56, %v1156_v39 }
 0x151   : > { %v422_v59 = vadd.f32 %v865_v36, %v407_v28  ;;  %v394_v60 = vmul.f32 %v1015_v21, %v1165_v48  ;;  %v638_v48 = vld [vmem:[%s1335_s5] sm:$0xff] }
 0x152   : > { %926 = vmatmul.mubr.msk.f32.gmra.mrb[2].mxu0 %vm290_vm0, %v421_v57  ;;  %v408_v29 = vmul.f32 %v864_v32, %v393_v58  ;;  %v970_v7 = vpack.c.bf16 %v639_v6, %v638_v48 }
 0x153   : > { %v1017_v61 = vpop.eup %1016  ;;  %928 = vmatprep.mubr.msk.f32.mxu0 %vm290_vm0, %v422_v59  ;;  %v409_v38 = vmul.f32 %v864_v32, %v394_v60 }
 0x154   : > { %v423_v62 = vadd.f32 %v865_v36, %v408_v29  ;;  %v395_v63 = vmul.f32 %v1017_v61, %v1168_v49  ;;  %971 = vmatprep.subr.bf16.mxu0 %v970_v7  ;;  %986 = vmatprep.subr.bf16.mxu1 %v970_v7  ;;  %v640_v49 = vld [vmem:[%s1335_s5 + $0x10] sm:$0xff] }
 0x155   : > { %v424_v3 = vadd.f32 %v865_v36, %v409_v38  ;;  %973 = vmatpush3.bf16.msra.mxu0 %v970_v7  ;;  %990 = vmatpush3.bf16.msra.mxu1 %v970_v7  ;;  %v974_v11 = vpack.c.bf16 %v641_v10, %v640_v49 }
 0x156   : > { %929 = vmatmul.mubr.msk.f32.gmra.mrb[4].mxu0 %vm290_vm0, %v423_v62  ;;  %v410_v4 = vmul.f32 %v864_v32, %v395_v63 }
 0x157   : > { %931 = vmatprep.mubr.msk.f32.mxu0 %vm290_vm0, %v424_v3  ;;  %975 = vmatprep.subr.bf16.mxu0 %v974_v11 }
 0x158   : > { %v425_v39 = vadd.f32 %v865_v36, %v410_v4  ;;  %987 = vmatprep.subr.bf16.mxu1 %v974_v11 }
 0x159   : > { %977 = vmatpush3.bf16.msra.mxu0 %v974_v11  ;;  %991 = vmatpush3.bf16.msra.mxu1 %v974_v11 }
 0x15a   : > { %932 = vmatmul.mubr.msk.f32.gmra.mrb[6].mxu0 %vm290_vm0, %v425_v39  ;;  %979 = vmatprep.subr.bf16.mxu0 %v978_v16 }
 0x15b   : > { %988 = vmatprep.subr.bf16.mxu1 %v978_v16 }
 0x15d   : > { %981 = vmatpush3.bf16.msra.mxu0 %v978_v16  ;;  %992 = vmatpush3.bf16.msra.mxu1 %v978_v16 }
 0x15e   : > { %983 = vmatprep.subr.bf16.mxu0 %v982_v19  ;;  %989 = vmatprep.subr.bf16.mxu1 %v982_v19 }
 0x161   : > { %985 = vmatpush3.bf16.msra.mxu0 %v982_v19  ;;  %993 = vmatpush3.bf16.msra.mxu1 %v982_v19 }
 0x221   : > { %v924_v23 = vpop.f32.mrb[0].mxu0 }
 0x222   : > { %v1239_v24 = vadd.f32 %v924_v23, %v866_v22  ;;  %v527_v25 = vpop.f32.mrb[1].mxu0 }
 0x223   : > { %v1241_v26 = vadd.f32 %v866_v22, %v527_v25 }
 0x224   : > { %v567_v27 = vmul.f32 %v1239_v24, %v1239_v24 }
 0x225   : > { %v566_v30 = vmul.f32 %v1241_v26, %v1241_v26  ;;  %v927_v31 = vpop.f32.mrb[2].mxu0 }
 0x226   : > { %v575_v32 = vmul.f32 %v567_v27, %v1239_v24  ;;  %v1248_v33 = vadd.f32 %v927_v31, %v866_v22  ;;  %v537_v34 = vpop.f32.mrb[3].mxu0 }
 0x227   : > { %v574_v35 = vmul.f32 %v566_v30, %v1241_v26  ;;  %v1251_v36 = vadd.f32 %v866_v22, %v537_v34 }
 0x228   : > { %v583_v37 = vmul.f32 0.044715, %v575_v32  ;;  %v569_v40 = vmul.f32 %v1248_v33, %v1248_v33 }
 0x229   : > { %v582_v41 = vmul.f32 0.044715, %v574_v35  ;;  %v568_v42 = vmul.f32 %v1251_v36, %v1251_v36  ;;  %v930_v43 = vpop.f32.mrb[4].mxu0 }
 0x22a   : > { %v591_v44 = vadd.f32 %v583_v37, %v1239_v24  ;;  %v577_v45 = vmul.f32 %v569_v40, %v1248_v33  ;;  %v1259_v20 = vadd.f32 %v930_v43, %v866_v22  ;;  %v547_v46 = vpop.f32.mrb[5].mxu0 }
 0x22b   : > { %v590_v47 = vadd.f32 %v582_v41, %v1241_v26  ;;  %v576_v50 = vmul.f32 %v568_v42, %v1251_v36  ;;  %v1263_v51 = vadd.f32 %v866_v22, %v547_v46 }
 0x22c   : > { %v599_v52 = vmul.f32 0.7978846, %v591_v44  ;;  %v585_v53 = vmul.f32 0.044715, %v577_v45  ;;  %v571_v54 = vmul.f32 %v1259_v20, %v1259_v20 }
 0x22d   : > { %v598_v55 = vmul.f32 0.7978846, %v590_v47  ;;  %v584_v56 = vmul.f32 0.044715, %v576_v50  ;;  %v570_v28 = vmul.f32 %v1263_v51, %v1263_v51  ;;  %v933_v21 = vpop.f32.mrb[6].mxu0 }
 0x22e   : > { %1018 = vtanh.f32 %v599_v52  ;;  %v593_v57 = vadd.f32 %v585_v53, %v1248_v33  ;;  %v579_v58 = vmul.f32 %v571_v54, %v1259_v20  ;;  %v1271_v59 = vadd.f32 %v933_v21, %v866_v22  ;;  %v557_v60 = vpop.f32.mrb[7].mxu0 }
 0x22f   : > { %1020 = vtanh.f32 %v598_v55  ;;  %v578_v29 = vmul.f32 %v570_v28, %v1263_v51  ;;  %v1274_v61 = vadd.f32 %v866_v22, %v557_v60  ;;  %v592_v38 = vadd.f32 %v584_v56, %v1251_v36 }
 0x230   : > { %v601_v62 = vmul.f32 0.7978846, %v593_v57  ;;  %v587_v63 = vmul.f32 0.044715, %v579_v58  ;;  %v573_v3 = vmul.f32 %v1271_v59, %v1271_v59 }
 0x231   : > { %v586_v4 = vmul.f32 0.044715, %v578_v29  ;;  %v572_v39 = vmul.f32 %v1274_v61, %v1274_v61  ;;  %v600_v48 = vmul.f32 0.7978846, %v592_v38 }
 0x232   : > { %1022 = vtanh.f32 %v601_v62  ;;  %v595_v6 = vadd.f32 %v587_v63, %v1259_v20  ;;  %v581_v7 = vmul.f32 %v573_v3, %v1271_v59 }
 0x233   : > { %v594_v49 = vadd.f32 %v586_v4, %v1263_v51  ;;  %v580_v10 = vmul.f32 %v572_v39, %v1274_v61  ;;  %1024 = vtanh.f32 %v600_v48 }
 0x234   : > { %v603_v11 = vmul.f32 0.7978846, %v595_v6  ;;  %v589_v14 = vmul.f32 0.044715, %v581_v7 }
 0x235   : > { %v602_v15 = vmul.f32 0.7978846, %v594_v49  ;;  %v588_v16 = vmul.f32 0.044715, %v580_v10 }
 0x236   : > { %1026 = vtanh.f32 %v603_v11  ;;  %v597_v17 = vadd.f32 %v589_v14, %v1271_v59 }
 0x237   : > { %1028 = vtanh.f32 %v602_v15  ;;  %v596_v18 = vadd.f32 %v588_v16, %v1274_v61 }
 0x238   : > { %v1019_v19 = vpop.eup %1018  ;;  %v605_v22 = vmul.f32 0.7978846, %v597_v17 }
 0x239   : > { %v1021_v23 = vpop.eup %1020  ;;  %v615_v25 = vadd.f32 1.0, %v1019_v19  ;;  %v604_v27 = vmul.f32 0.7978846, %v596_v18 }
 0x23a   : > { %1030 = vtanh.f32 %v605_v22  ;;  %v614_v30 = vadd.f32 1.0, %v1021_v23 }
 0x23b   : > { %v623_v31 = vmul.f32 0.5, %v615_v25  ;;  %1032 = vtanh.f32 %v604_v27 }
 0x23c   : > { %v1023_v32 = vpop.eup %1022  ;;  %v622_v34 = vmul.f32 0.5, %v614_v30 }
 0x23d   : > { %v1025_v35 = vpop.eup %1024  ;;  %v617_v37 = vadd.f32 1.0, %v1023_v32  ;;  %v631_v42 = vmul.f32 %v623_v31, %v1239_v24 }
 0x23e   : > { %v630_v40 = vmul.f32 %v622_v34, %v1241_v26  ;;  %v616_v41 = vadd.f32 1.0, %v1025_v35 }
 0x23f   : > { %v625_v43 = vmul.f32 0.5, %v617_v37 }
 0x240   : > { %v1027_v44 = vpop.eup %1026  ;;  %950 = vmatprep.mubr.msk.f32.mxu0 %vm653_vm1, %v630_v40  ;;  %v624_v45 = vmul.f32 0.5, %v616_v41 }
 0x241   : > { %v1029_v46 = vpop.eup %1028  ;;  %951 = vmatmul.mubr.msk.f32.vlgmr.msra.gmra.mrb[8].mxu0 %vm653_vm1, %v631_v42  ;;  %v619_v47 = vadd.f32 1.0, %v1027_v44  ;;  %v633_v53 = vmul.f32 %v625_v43, %v1248_v33 }
 0x242   : > { %v632_v50 = vmul.f32 %v624_v45, %v1251_v36  ;;  %v618_v52 = vadd.f32 1.0, %v1029_v46 }
 0x243   : > { %v627_v54 = vmul.f32 0.5, %v619_v47 }
 0x244   : > { %v1031_v55 = vpop.eup %1030  ;;  %953 = vmatprep.mubr.msk.f32.mxu1 %vm653_vm1, %v632_v50  ;;  %v626_v26 = vmul.f32 0.5, %v618_v52 }
 0x245   : > { %v1033_v24 = vpop.eup %1032  ;;  %954 = vmatmul.mubr.msk.f32.vlgmr.msra.gmra.mrb[0].mxu1 %vm653_vm1, %v633_v53  ;;  %v621_v56 = vadd.f32 1.0, %v1031_v55  ;;  %v635_v57 = vmul.f32 %v627_v54, %v1259_v20 }
 0x246   : > { %v634_v28 = vmul.f32 %v626_v26, %v1263_v51  ;;  %v620_v21 = vadd.f32 1.0, %v1033_v24  ;;  %v875_v51 = vld [vmem:[%s1336_s6] ss:$0 sm:$0xff] }
 0x247   : > { %v629_v58 = vmul.f32 0.5, %v621_v56 }
 0x248   : > { %956 = vmatprep.mubr.msk.f32.mxu1 %vm653_vm1, %v634_v28  ;;  %v628_v36 = vmul.f32 0.5, %v620_v21 }
 0x249   : > { %957 = vmatmul.mubr.msk.f32.gmra.mrb[2].mxu1 %vm653_vm1, %v635_v57  ;;  %v637_v60 = vmul.f32 %v629_v58, %v1271_v59 }
 0x24a   : > { %v636_v33 = vmul.f32 %v628_v36, %v1274_v61 }
 0x24c   : > { %959 = vmatprep.mubr.msk.f32.mxu1 %vm653_vm1, %v636_v33 }
 0x24d   : > { %960 = vmatmul.mubr.msk.f32.gmra.mrb[4].mxu1 %vm653_vm1, %v637_v60 }
 0x314   : > { %v952_v29 = vpop.f32.mrb[8].mxu0 }
 0x315   : > { %v750_v20 = vadd.f32 %v952_v29, %v875_v51  ;;  %v744_v38 = vpop.f32.mrb[9].mxu0 }
 0x316   : > { %v745_v62 = vadd.f32 %v875_v51, %v744_v38 }
 0x317   : > { %v784_v61 = vadd.f32 %v750_v20, %v1102_v2 }
 0x318   : > { %v783_v59 = vadd.f32 %v745_v62, %v1098_v0  ;;  %v955_v63 = vpop.f32.mrb[0].mxu1 }
 0x319   : > { %792 = vst.msk [vmem:[%s280_s22 + $0x8] sm:$0xff] %vm290_vm0, %v784_v61  ;;  %v760_v3 = vadd.f32 %v955_v63, %v875_v51  ;;  %v754_v4 = vpop.f32.mrb[1].mxu1 }
 0x31a   : > { %791 = vst.msk [vmem:[%s280_s22] sm:$0xff] %vm290_vm0, %v783_v59  ;;  %v755_v39 = vadd.f32 %v875_v51, %v754_v4 }
 0x31b   : > { %v786_v48 = vadd.f32 %v760_v3, %v1108_v5 }
 0x31c   : > { %v785_v6 = vadd.f32 %v755_v39, %v1100_v1  ;;  %v958_v7 = vpop.f32.mrb[2].mxu1 }
 0x31d   : > { %794 = vst.msk [vmem:[%s280_s22 + $0x18] sm:$0xff] %vm290_vm0, %v786_v48  ;;  %v770_v49 = vadd.f32 %v958_v7, %v875_v51  ;;  %v764_v10 = vpop.f32.mrb[3].mxu1 }
 0x31e   : > { %793 = vst.msk [vmem:[%s280_s22 + $0x10] sm:$0xff] %vm290_vm0, %v785_v6  ;;  %v765_v0 = vadd.f32 %v875_v51, %v764_v10 }
 0x31f   : > { %v788_v2 = vadd.f32 %v770_v49, %v1116_v9 }
 0x320   : > { %v787_v11 = vadd.f32 %v765_v0, %v1114_v8  ;;  %v961_v14 = vpop.f32.mrb[4].mxu1 }
 0x321   : > { %796 = vst.msk [vmem:[%s280_s22 + $0x28] sm:$0xff] %vm290_vm0, %v788_v2  ;;  %v780_v15 = vadd.f32 %v961_v14, %v875_v51  ;;  %v774_v16 = vpop.f32.mrb[5].mxu1 }
 0x322   : > { %795 = vst.msk [vmem:[%s280_s22 + $0x20] sm:$0xff] %vm290_vm0, %v787_v11  ;;  %v775_v1 = vadd.f32 %v875_v51, %v774_v16 }
 0x323   : > { %v790_v5 = vadd.f32 %v780_v15, %v1124_v13 }
 0x324   : > { %v789_v17 = vadd.f32 %v775_v1, %v1122_v12 }
 0x325   : > { %798 = vst.msk [vmem:[%s280_s22 + $0x38] sm:$0xff] %vm290_vm0, %v790_v5 }
 0x326   : > { %797 = vst.msk [vmem:[%s280_s22 + $0x30] sm:$0xff] %vm290_vm0, %v789_v17 }
 0x327 PF: > { %s17_s24 = sadd.s32 1, %s1040_s24  }
 0x328   : > { %p14_p4 = scmp.ge.s32.totalorder %s17_s24, 4  }
 0x32a   :  { %16 = sbr.rel (!%p14_p4) target bundleno = 1 (0x1), region = 78 }

// kernel: basic_layer_apply.7
= control target key start
LH: loop header
LB: loop body
LE: loop exit
PB: predicated region body
PF: predicated region fallthrough
CT: control target
= control target key end

     0   :  { %s7776_s29 = smov 0   ;;  %s11530_s0 = inlined_call_operand.vmem [shape: f32[128,16], index: 0, kind: input, shape index: {}]   ;;  %s11531_s1 = inlined_call_operand.vmem [shape: f32[128,8,32], index: 1, kind: input, shape index: {}]   ;;  %s11532_s2 = inlined_call_operand.vmem [shape: f32[1024,4], index: 2, kind: input, shape index: {}]   ;;  %s11533_s3 = inlined_call_operand.vmem [shape: f32[4,16], index: 3, kind: input, shape index: {}]   ;;  %s11534_s4 = inlined_call_operand.vmem [shape: f32[1,16], index: 4, kind: input, shape index: {}]   ;;  %s11535_s5 = inlined_call_operand.vmem [shape: f32[16,16], index: 5, kind: input, shape index: {}]   ;;  %s11536_s6 = inlined_call_operand.vmem [shape: f32[1,16], index: 6, kind: input, shape index: {}]   ;;  %s11537_s7 = inlined_call_operand.vmem [shape: f32[1,16], index: 7, kind: input, shape index: {}]   ;;  %s11538_s8 = inlined_call_operand.vmem [shape: f32[1,16], index: 8, kind: input, shape index: {}]   ;;  %s11539_s9 = inlined_call_operand.vmem [shape: f32[16,32], index: 9, kind: input, shape index: {}]   ;;  %s11540_s10 = inlined_call_operand.vmem [shape: f32[1,32], index: 10, kind: input, shape index: {}]   ;;  %s11541_s11 = inlined_call_operand.vmem [shape: f32[32,32], index: 11, kind: input, shape index: {}]   ;;  %s11542_s12 = inlined_call_operand.vmem [shape: f32[1,32], index: 12, kind: input, shape index: {}]   ;;  %s11543_s13 = inlined_call_operand.vmem [shape: f32[128,32], index: 13, kind: input, shape index: {}]   ;;  %s11544_s14 = inlined_call_operand.vmem [shape: f32[128,32], index: 14, kind: output, shape index: {}]  }
   0x1 LB: > { %s6627_s30 = sadd.s32 4294967295, %s7696_s29   ;;  %p6631_p0 = scmp.ge.s32.totalorder %s7696_s29, 1  ;;  %s7696_s29 = sphi %s7776_s29, %s24_s29  }
   0x2   : > { %p446_p1 = scmp.lt.s32.totalorder %s7696_s29, 3 }
   0x4   : > { %p447_p2 = pnand %p6631_p0, %p446_p1 }
   0x6   : > { %450 = sbr.rel (%p447_p2) target bundleno = 3299 (0xce3), region = 76 }
   0xd   : > { %v601_v0 = vld [vmem:[%s11533_s3] sm:$0xf]  ;;  %vm802_vm0 = vcmask 1043456   ;;  %s6634_s17 = sshll.u32 %s6627_s30, 6  ;;  %vm609_vm1 = vcmask 31744   ;;  %v1256_v14 = vld [vmem:[%s11535_s5 + $0x8] sm:$0xff] }
   0xe   : > { %6948 = vmatprep.subr.msk.mxu0 %vm802_vm0, %v601_v0  ;;  %p514_p3 = scmp.lt.s32.totalorder %s6634_s17, 127  ;;  %v1255_v13 = vld [vmem:[%s11535_s5] sm:$0xff]  ;;  %vm1264_vm2 = vcmask 130048   ;;  %s6632_s28 = sshll.u32 %s6627_s30, 3  ;;  %vm6114_vm3 = vcmask 1041409   ;;  %vm6116_vm4 = vcmask 1042434  }
   0xf   : > { %6949 = vmatpush3.msk.msra.mxu0 %vm802_vm0, %v601_v0  ;;  %v7182_v15 = vpack.c.bf16 %v1256_v14, %v1255_v13  ;;  %v7852_v26 = vld [vmem:[%s11534_s4] ss:$0 sm:$0xff]  ;;  %p508_p4 = scmp.lt.s32.totalorder %s6632_s28, 15  ;;  %s7699_s19 = smov 16   ;;  %vm6118_vm5 = vcmask 1043459   ;;  %vm6120_vm6 = vcmask 1044484  }
  0x10   : > { %s12082_s17 = smov (!%p514_p3, %s6634_s17), 127  ;;  %vm6122_vm7 = vcmask 1045509   ;;  %vm6124_vm8 = vcmask 1046534   ;;  %vm6126_vm9 = vcmask 1047559   ;;  %vm6381_vm10 = vcmask 261120  }
  0x11   : > { %s6635_s18 = sshll.u32 %s12082_s17, 3  ;;  %7183 = vmatprep.subr.bf16.mxu1 %v7182_v15  ;;  %s12084_s28 = smov (!%p508_p4, %s6632_s28), 15 }
  0x12   : > { %s7797_s21 = scalar_lea.vmem %s11532_s2, %s6635_s18  ;;  %7185 = vmatpush3.bf16.msra.mxu1 %v7182_v15  ;;  %s7914_s30 = sshll.u32 %s12084_s28, 3 }
  0x13   : > { %v537_v1 = vld [vmem:[%s7797_s21] sm:$0xff]  ;;  %v538_v2 = vld [vmem:[%s7797_s21 + $0x8] sm:$0xff]  ;;  %v539_v3 = vld [vmem:[%s7797_s21 + $0x10] sm:$0xff]  ;;  %s7923_s23 = scalar_lea.vmem %s11530_s0, %s7914_s30  ;;  %s7952_s26 = scalar_lea.vmem %s11531_s1, %s6635_s18 }
  0x14   : > { %6950 = vmatprep.mubr.msk.f32.mxu0 %vm609_vm1, %v537_v1  ;;  %v540_v4 = vld [vmem:[%s7797_s21 + $0x18] sm:$0xff]  ;;  %v541_v5 = vld [vmem:[%s7797_s21 + $0x20] sm:$0xff]  ;;  %v542_v6 = vld [vmem:[%s7797_s21 + $0x28] sm:$0xff]  ;;  %s11476_s24 = scalar_lea.vmem %s11543_s13, %s7914_s30  ;;  %s11490_s28 = scalar_lea.vmem %s11544_s14, %s7914_s30 }
  0x15   : > { %6951 = vmatmul.mubr.msk.f32.vlgmr.msra.gmra.mrb[0].mxu0 %vm609_vm1, %v538_v2  ;;  %v543_v7 = vld [vmem:[%s7797_s21 + $0x30] sm:$0xff]  ;;  %v544_v8 = vld [vmem:[%s7797_s21 + $0x38] sm:$0xff]  ;;  %v545_v9 = vld [vmem:[%s7797_s21 + $0x40] sm:$0xff] }
  0x16   : > { %6953 = vmatprep.mubr.msk.f32.mxu0 %vm609_vm1, %v539_v3  ;;  %v546_v10 = vld [vmem:[%s7797_s21 + $0x48] sm:$0xff]  ;;  %v547_v11 = vld [vmem:[%s7797_s21 + $0x50] sm:$0xff]  ;;  %v548_v12 = vld [vmem:[%s7797_s21 + $0x58] sm:$0xff] }
  0x17   : > { %v549_v16 = vld [vmem:[%s7797_s21 + $0x60] sm:$0xff]  ;;  %v550_v17 = vld [vmem:[%s7797_s21 + $0x68] sm:$0xff]  ;;  %v551_v18 = vld [vmem:[%s7797_s21 + $0x70] sm:$0xff] }
  0x18   : > { %v552_v19 = vld [vmem:[%s7797_s21 + $0x78] sm:$0xff]  ;;  %v553_v20 = vld [vmem:[%s7797_s21 + $0x80] sm:$0xff]  ;;  %v554_v21 = vld [vmem:[%s7797_s21 + $0x88] sm:$0xff] }
  0x19   : > { %6954 = vmatmul.mubr.msk.f32.gmra.mrb[2].mxu0 %vm609_vm1, %v540_v4  ;;  %v555_v22 = vld [vmem:[%s7797_s21 + $0x90] sm:$0xff]  ;;  %v556_v23 = vld [vmem:[%s7797_s21 + $0x98] sm:$0xff]  ;;  %v557_v24 = vld [vmem:[%s7797_s21 + $0xa0] sm:$0xff] }
  0x1a   : > { %6956 = vmatprep.mubr.msk.f32.mxu0 %vm609_vm1, %v541_v5  ;;  %v558_v25 = vld [vmem:[%s7797_s21 + $0xa8] sm:$0xff]  ;;  %v561_v14 = vld [vmem:[%s7797_s21 + $0xc0] sm:$0xff] }
  0x1b   : > { %v562_v15 = vld [vmem:[%s7797_s21 + $0xc8] sm:$0xff] }
  0x1d   : > { %6957 = vmatmul.mubr.msk.f32.gmra.mrb[4].mxu0 %vm609_vm1, %v542_v6 }
  0x1e   : > { %6959 = vmatprep.mubr.msk.f32.mxu0 %vm609_vm1, %v543_v7 }
  0x21   : > { %6960 = vmatmul.mubr.msk.f32.gmra.mrb[6].mxu0 %vm609_vm1, %v544_v8  ;;  %v559_v8 = vld [vmem:[%s7797_s21 + $0xb0] sm:$0xff] }
  0x22   : > { %6962 = vmatprep.mubr.msk.f32.mxu0 %vm609_vm1, %v545_v9  ;;  %v560_v9 = vld [vmem:[%s7797_s21 + $0xb8] sm:$0xff] }
  0x25   : > { %6963 = vmatmul.mubr.msk.f32.gmra.mrb[8].mxu0 %vm609_vm1, %v546_v10 }
  0x26   : > { %6965 = vmatprep.mubr.msk.f32.mxu0 %vm609_vm1, %v547_v11 }
  0x29   : > { %6966 = vmatmul.mubr.msk.f32.gmra.mrb[10].mxu0 %vm609_vm1, %v548_v12 }
  0x2a   : > { %6968 = vmatprep.mubr.msk.f32.mxu0 %vm609_vm1, %v549_v16 }
  0x2d   : > { %6969 = vmatmul.mubr.msk.f32.gmra.mrb[12].mxu0 %vm609_vm1, %v550_v17 }
  0x2e   : > { %6971 = vmatprep.mubr.msk.f32.mxu0 %vm609_vm1, %v551_v18 }
  0x31   : > { %6972 = vmatmul.mubr.msk.f32.gmra.mrb[14].mxu0 %vm609_vm1, %v552_v19 }
  0x32   : > { %6974 = vmatprep.mubr.msk.f32.mxu0 %vm609_vm1, %v553_v20 }
  0x35   : > { %6975 = vmatmul.mubr.msk.f32.gmra.mrb[16].mxu0 %vm609_vm1, %v554_v21 }
  0x36   : > { %6977 = vmatprep.mubr.msk.f32.mxu0 %vm609_vm1, %v555_v22 }
  0x39   : > { %6978 = vmatmul.mubr.msk.f32.gmra.mrb[18].mxu0 %vm609_vm1, %v556_v23 }
  0x3a   : > { %6980 = vmatprep.mubr.msk.f32.mxu0 %vm609_vm1, %v557_v24 }
  0x3d   : > { %6981 = vmatmul.mubr.msk.f32.gmra.mrb[20].mxu0 %vm609_vm1, %v558_v25 }
  0x3e   : > { %6983 = vmatprep.mubr.msk.f32.mxu0 %vm609_vm1, %v559_v8 }
  0x41   : > { %6984 = vmatmul.mubr.msk.f32.gmra.mrb[22].mxu0 %vm609_vm1, %v560_v9 }
  0x42   : > { %6986 = vmatprep.mubr.msk.f32.mxu0 %vm609_vm1, %v561_v14 }
  0x45   : > { %6987 = vmatmul.mubr.msk.f32.gmra.mrb[24].mxu0 %vm609_vm1, %v562_v15 }
  0xe8   : > { %v6952_v27 = vpop.f32.mrb[0].mxu0 }
  0xe9   : > { %v878_v28 = vadd.f32 %v6952_v27, %v7852_v26  ;;  %v872_v29 = vpop.f32.mrb[1].mxu0 }
  0xea   : > { %v873_v30 = vadd.f32 %v7852_v26, %v872_v29  ;;  %v564_v29 = vld [vmem:[%s7797_s21 + $0xd8] sm:$0xff] }
  0xeb   : > { %v1192_v33 = vmax.f32 %v878_v28, 0.0  ;;  %v563_v28 = vld [vmem:[%s7797_s21 + $0xd0] sm:$0xff] }
  0xec   : > { %v1191_v31 = vmax.f32 %v873_v30, 0.0  ;;  %v6955_v32 = vpop.f32.mrb[2].mxu0  ;;  %6989 = vmatprep.mubr.msk.f32.mxu0 %vm609_vm1, %v563_v28  ;;  %v7911_v30 = vld [vmem:[%s11536_s6] ss:$0 sm:$0xff] }
  0xed   : > { %v888_v34 = vadd.f32 %v6955_v32, %v7852_v26  ;;  %v882_v35 = vpop.f32.mrb[3].mxu0  ;;  %6990 = vmatmul.mubr.msk.f32.gmra.mrb[26].mxu0 %vm609_vm1, %v564_v29 }
  0xee   : > { %v883_v36 = vadd.f32 %v7852_v26, %v882_v35  ;;  %7050 = vmatprep.mubr.msk.f32.mxu1 %vm1264_vm2, %v1191_v31  ;;  %v7698_v31 = vmov 1966171168  }
  0xef   : > { %7051 = vmatmul.mubr.msk.f32.vlgmr.msra.gmra.mrb[0].mxu1 %vm1264_vm2, %v1192_v33  ;;  %v1194_v39 = vmax.f32 %v888_v34, 0.0  ;;  %v1924_v32 = vunpack.c.l.s4 %v7698_v31  ;;  %v1926_v33 = vlaneseq }
  0xf0   : > { %v1193_v37 = vmax.f32 %v883_v36, 0.0  ;;  %v6958_v38 = vpop.f32.mrb[4].mxu0 }
  0xf1   : > { %v898_v40 = vadd.f32 %v6958_v38, %v7852_v26  ;;  %v892_v41 = vpop.f32.mrb[5].mxu0  ;;  %v1925_v38 = vunpack.c.0.s8 %v1924_v32 }
  0xf2   : > { %7053 = vmatprep.mubr.msk.f32.mxu1 %vm1264_vm2, %v1193_v37  ;;  %v893_v42 = vadd.f32 %v7852_v26, %v892_v41 }
  0xf3   : > { %7054 = vmatmul.mubr.msk.f32.gmra.mrb[2].mxu1 %vm1264_vm2, %v1194_v39  ;;  %v1196_v43 = vmax.f32 %v898_v40, 0.0  ;;  %v1927_v39 = vshrl.u32 %v1926_v33, 7 }
  0xf4   : > { %v1195_v44 = vmax.f32 %v893_v42, 0.0  ;;  %v6961_v45 = vpop.f32.mrb[6].mxu0 }
  0xf5   : > { %v908_v46 = vadd.f32 %v6961_v45, %v7852_v26  ;;  %v902_v47 = vpop.f32.mrb[7].mxu0 }
  0xf6   : > { %v903_v48 = vadd.f32 %v7852_v26, %v902_v47  ;;  %7056 = vmatprep.mubr.msk.f32.mxu1 %vm1264_vm2, %v1195_v44  ;;  %v7930_v44 = vld [vmem:[%s7923_s23] sm:$0xff] }
  0xf7   : > { %v1198_v49 = vmax.f32 %v908_v46, 0.0  ;;  %7057 = vmatmul.mubr.msk.f32.gmra.mrb[4].mxu1 %vm1264_vm2, %v1196_v43  ;;  %v7926_v43 = vsub.s32 %v1925_v38, %v1927_v39  ;;  %v1922_v29 = vcombine.high %v7930_v44, %v7930_v44  ;;  %v1849_v38 = vld [vmem:[%s7952_s26 + $0x38] sm:$0xff] }
  0xf8   : > { %v1197_v50 = vmax.f32 %v903_v48, 0.0  ;;  %v6964_v51 = vpop.f32.mrb[8].mxu0 }
  0xf9   : > { %v918_v52 = vadd.f32 %v6964_v51, %v7852_v26  ;;  %v912_v53 = vpop.f32.mrb[9].mxu0  ;;  %v1929_v48 = vrot.slane %v7930_v44, %v7926_v43  ;;  %v1936_v31 = vrot.slane %v1922_v29, %v7926_v43 }
  0xfa   : > { %7059 = vmatprep.mubr.msk.f32.mxu1 %vm1264_vm2, %v1197_v50  ;;  %v913_v54 = vadd.f32 %v7852_v26, %v912_v53 }
  0xfb   : > { %7060 = vmatmul.mubr.msk.f32.gmra.mrb[6].mxu1 %vm1264_vm2, %v1198_v49  ;;  %v1200_v55 = vmax.f32 %v918_v52, 0.0  ;;  %v1937_v51 = vcombine.high %v1929_v48, %v1929_v48  ;;  %v1938_v33 = vcombine.high %v1936_v31, %v1936_v31  ;;  %v1952_v44 = vrot.slane %v1936_v31, %v7926_v43 }
  0xfc   : > { %v1199_v56 = vmax.f32 %v913_v54, 0.0  ;;  %v6967_v57 = vpop.f32.mrb[10].mxu0 }
  0xfd   : > { %v928_v58 = vadd.f32 %v6967_v57, %v7852_v26  ;;  %v922_v59 = vpop.f32.mrb[11].mxu0  ;;  %v1959_v54 = vrot.slane %v1937_v51, %v7926_v43 }
  0xfe   : > { %7062 = vmatprep.mubr.msk.f32.mxu1 %vm1264_vm2, %v1199_v56  ;;  %v923_v60 = vadd.f32 %v7852_v26, %v922_v59  ;;  %v1843_v59 = vld [vmem:[%s7952_s26 + $0x8] sm:$0xff] }
  0xff   : > { %7063 = vmatmul.mubr.msk.f32.gmra.mrb[8].mxu1 %vm1264_vm2, %v1200_v55  ;;  %v1202_v61 = vmax.f32 %v928_v58, 0.0  ;;  %v7945_v55 = vsub.s32 0, %v1927_v39  ;;  %v1945_v58 = vrot.slane %v1929_v48, %v7926_v43 }
 0x100   : > { %v1201_v62 = vmax.f32 %v923_v60, 0.0  ;;  %v6970_v63 = vpop.f32.mrb[12].mxu0 }
 0x101   : > { %v938_v0 = vadd.f32 %v6970_v63, %v7852_v26  ;;  %v932_v1 = vpop.f32.mrb[13].mxu0  ;;  %v2321_v57 = vrot.slane %v1959_v54, %v7945_v55 }
 0x102   : > { %7065 = vmatprep.mubr.msk.f32.mxu1 %vm1264_vm2, %v1201_v62  ;;  %v933_v2 = vadd.f32 %v7852_v26, %v932_v1  ;;  %v1842_v62 = vld [vmem:[%s7952_s26] sm:$0xff]  ;;  %v1969_v1 = vcombine.high %v1959_v54, %v1959_v54 }
 0x103   : > { %7066 = vmatmul.mubr.msk.f32.gmra.mrb[10].mxu1 %vm1264_vm2, %v1202_v61  ;;  %v1204_v3 = vmax.f32 %v938_v0, 0.0  ;;  %v2635_v60 = vsub.f32 %v2321_v57, %v1843_v59  ;;  %v2317_v61 = vrot.slane %v1945_v58, %v7945_v55 }
 0x104   : > { %v1203_v4 = vmax.f32 %v933_v2, 0.0  ;;  %v6973_v5 = vpop.f32.mrb[14].mxu0 }
 0x105   : > { %v948_v6 = vadd.f32 %v6973_v5, %v7852_v26  ;;  %v942_v7 = vpop.f32.mrb[15].mxu0  ;;  %v2634_v0 = vsub.f32 %v2317_v61, %v1842_v62  ;;  %v1967_v5 = vcombine.high %v1945_v58, %v1945_v58  ;;  %v2333_v58 = vrot.slane %v1952_v44, %v7945_v55 }
 0x106   : > { %v943_v10 = vadd.f32 %v7852_v26, %v942_v7  ;;  %7068 = vmatprep.mubr.msk.f32.mxu1 %vm1264_vm2, %v1203_v4  ;;  %v2329_v4 = vrot.slane %v1969_v1, %v7945_v55  ;;  %v570_v1 = vld [vmem:[%s7797_s21 + $0x108] sm:$0xff] }
 0x107   : > { %v1206_v11 = vmax.f32 %v948_v6, 0.0  ;;  %7069 = vmatmul.mubr.msk.f32.gmra.mrb[12].mxu1 %vm1264_vm2, %v1204_v3  ;;  %v1845_v6 = vld [vmem:[%s7952_s26 + $0x18] sm:$0xff]  ;;  %v2325_v9 = vrot.slane %v1967_v5, %v7945_v55 }
 0x108   : > { %v1205_v12 = vmax.f32 %v943_v10, 0.0  ;;  %v6976_v13 = vpop.f32.mrb[16].mxu0  ;;  %v2637_v8 = vsub.f32 %v2329_v4, %v1845_v6  ;;  %v1844_v10 = vld [vmem:[%s7952_s26 + $0x10] sm:$0xff] }
 0x109   : > { %v958_v16 = vadd.f32 %v6976_v13, %v7852_v26  ;;  %v952_v17 = vpop.f32.mrb[17].mxu0 }
 0x10a   : > { %7071 = vmatprep.mubr.msk.f32.mxu1 %vm1264_vm2, %v1205_v12  ;;  %v953_v18 = vadd.f32 %v7852_v26, %v952_v17  ;;  %v2636_v17 = vsub.f32 %v2325_v9, %v1844_v10  ;;  %v8045_v10 = vld [vmem:[%s7923_s23 + $0x8] sm:$0xff] }
 0x10b   : > { %7072 = vmatmul.mubr.msk.f32.gmra.mrb[14].mxu1 %vm1264_vm2, %v1206_v11  ;;  %v1208_v19 = vmax.f32 %v958_v16, 0.0 }
 0x10c   : > { %v1207_v20 = vmax.f32 %v953_v18, 0.0  ;;  %v6979_v21 = vpop.f32.mrb[18].mxu0 }
 0x10d   : > { %v968_v22 = vadd.f32 %v6979_v21, %v7852_v26  ;;  %v962_v23 = vpop.f32.mrb[19].mxu0  ;;  %v566_v21 = vld [vmem:[%s7797_s21 + $0xe8] sm:$0xff] }
 0x10e   : > { %7074 = vmatprep.mubr.msk.f32.mxu1 %vm1264_vm2, %v1207_v20  ;;  %v963_v24 = vadd.f32 %v7852_v26, %v962_v23  ;;  %v565_v20 = vld [vmem:[%s7797_s21 + $0xe0] sm:$0xff] }
 0x10f   : > { %7075 = vmatmul.mubr.msk.f32.gmra.mrb[16].mxu1 %vm1264_vm2, %v1208_v19  ;;  %v1210_v25 = vmax.f32 %v968_v22, 0.0  ;;  %6992 = vmatprep.mubr.msk.f32.mxu0 %vm609_vm1, %v565_v20 }
 0x110   : > { %v1209_v27 = vmax.f32 %v963_v24, 0.0  ;;  %v6982_v12 = vpop.f32.mrb[20].mxu0  ;;  %6993 = vmatmul.mubr.msk.f32.gmra.mrb[28].mxu0 %vm609_vm1, %v566_v21  ;;  %v567_v24 = vld [vmem:[%s7797_s21 + $0xf0] sm:$0xff] }
 0x111   : > { %v978_v13 = vadd.f32 %v6982_v12, %v7852_v26  ;;  %v972_v14 = vpop.f32.mrb[21].mxu0  ;;  %6995 = vmatprep.mubr.msk.f32.mxu0 %vm609_vm1, %v567_v24  ;;  %v1978_v12 = vrot.slane %v8045_v10, %v7926_v43  ;;  %v571_v21 = vld [vmem:[%s7797_s21 + $0x110] sm:$0xff] }
 0x112   : > { %7077 = vmatprep.mubr.msk.f32.mxu1 %vm1264_vm2, %v1209_v27  ;;  %v973_v15 = vadd.f32 %v7852_v26, %v972_v14 }
 0x113   : > { %7078 = vmatmul.mubr.msk.f32.gmra.mrb[18].mxu1 %vm1264_vm2, %v1210_v25  ;;  %v1212_v18 = vmax.f32 %v978_v13, 0.0  ;;  %v568_v25 = vld [vmem:[%s7797_s21 + $0xf8] sm:$0xff]  ;;  %v1986_v13 = vcombine.high %v1978_v12, %v1978_v12 }
 0x114   : > { %v1211_v19 = vmax.f32 %v973_v15, 0.0  ;;  %6996 = vmatmul.mubr.msk.f32.gmra.mrb[30].mxu0 %vm609_vm1, %v568_v25 }
 0x115   : > { %v2008_v14 = vrot.slane %v1986_v13, %v7926_v43 }
 0x116   : > { %7080 = vmatprep.mubr.msk.f32.mxu1 %vm1264_vm2, %v1211_v19 }
 0x117   : > { %7081 = vmatmul.mubr.msk.f32.gmra.mrb[20].mxu1 %vm1264_vm2, %v1212_v18 }
 0x1c2   : > { %v7052_v34 = vpop.f32.mrb[0].mxu1 }
 0x1c3   : > { %v1529_v35 = vadd.f32 %v7052_v34, %v7911_v30  ;;  %v1523_v36 = vpop.f32.mrb[1].mxu1 }
 0x1c4   : > { %v1524_v37 = vadd.f32 %v7911_v30, %v1523_v36 }
 0x1c5   : > { %5019 = vrot.lane.b32.xlu1 %v1529_v35, %s7699_s19  ;;  %v7961_v63 = vadd.f32 %v2635_v60, %v1529_v35  ;;  %v1966_v35 = vrot.slane %v1938_v33, %v7926_v43  ;;  %v1846_v60 = vld [vmem:[%s7952_s26 + $0x20] sm:$0xff] }
 0x1c6   : > { %v7055_v40 = vpop.f32.mrb[2].mxu1  ;;  %5017 = vrot.lane.b32.xlu0 %v1524_v37, %s7699_s19  ;;  %v7965_v3 = vadd.f32 %v2634_v0, %v1524_v37  ;;  %v569_v0 = vld [vmem:[%s7797_s21 + $0x100] sm:$0xff]  ;;  %v2638_v5 = vsub.f32 %v2333_v58, %v1846_v60  ;;  %v574_v60 = vld [vmem:[%s7797_s21 + $0x128] sm:$0xff] }
 0x1c7   : > { %v1539_v41 = vadd.f32 %v7055_v40, %v7911_v30  ;;  %v1533_v42 = vpop.f32.mrb[3].mxu1  ;;  %v2765_v2 = vsel %vm1264_vm2, %v7961_v63, 0.0  ;;  %v1970_v36 = vcombine.high %v1966_v35, %v1966_v35  ;;  %6998 = vmatprep.mubr.msk.f32.mxu0 %vm609_vm1, %v569_v0 }
 0x1c8   : > { %v1534_v46 = vadd.f32 %v7911_v30, %v1533_v42  ;;  %v2762_v7 = vsel %vm1264_vm2, %v7965_v3, 0.0  ;;  %v2337_v42 = vrot.slane %v1966_v35, %v7945_v55  ;;  %6999 = vmatmul.mubr.msk.f32.gmra.mrb[32].mxu0 %vm609_vm1, %v570_v1  ;;  %v1848_v35 = vld [vmem:[%s7952_s26 + $0x30] sm:$0xff] }
 0x1c9   : > { %5023 = vrot.lane.b32.xlu1 %v1539_v41, %s7699_s19  ;;  %v7977_v16 = vadd.f32 %v2637_v8, %v1539_v41  ;;  %v2345_v37 = vrot.slane %v1970_v36, %v7945_v55  ;;  %7001 = vmatprep.mubr.msk.f32.mxu0 %vm609_vm1, %v571_v21 }
 0x1ca   : > { %v7058_v45 = vpop.f32.mrb[4].mxu1  ;;  %v7986_v23 = vadd.f32 %v2636_v17, %v1534_v46  ;;  %v1851_v17 = vld [vmem:[%s7952_s26 + $0x48] sm:$0xff] }
 0x1cb   : > { %v7933_v47 = vpop.f32.mrb[5].mxu1  ;;  %v2771_v22 = vsel %vm1264_vm2, %v7977_v16, 0.0  ;;  %v1549_v32 = vadd.f32 %v7058_v45, %v7911_v30  ;;  %v2641_v39 = vsub.f32 %v2345_v37, %v1849_v38  ;;  %v1847_v45 = vld [vmem:[%s7952_s26 + $0x28] sm:$0xff] }
 0x1cc   : > { %v2768_v27 = vsel %vm1264_vm2, %v7986_v23, 0.0  ;;  %v1544_v34 = vadd.f32 %v7911_v30, %v7933_v47  ;;  %v6985_v47 = vpop.f32.mrb[22].mxu0  ;;  %v2639_v57 = vsub.f32 %v2337_v42, %v1847_v45 }
 0x1cd   : > { %5021 = vrot.lane.b32.xlu1 %v1534_v46, %s7699_s19  ;;  %v982_v51 = vpop.f32.mrb[23].mxu0 }
 0x1ce   : > { %v7061_v49 = vpop.f32.mrb[6].mxu1  ;;  %v983_v54 = vadd.f32 %v7852_v26, %v982_v51  ;;  %v8032_v4 = vadd.f32 %v2639_v57, %v1549_v32  ;;  %v1852_v57 = vld [vmem:[%s7952_s26 + $0x50] sm:$0xff] }
 0x1cf   : > { %v7938_v50 = vpop.f32.mrb[7].mxu1  ;;  %v1559_v28 = vadd.f32 %v7061_v49, %v7911_v30  ;;  %v988_v49 = vadd.f32 %v6985_v47, %v7852_v26 }
 0x1d0   : > { %v1213_v61 = vmax.f32 %v983_v54, 0.0  ;;  %v2777_v6 = vsel %vm1264_vm2, %v8032_v4, 0.0  ;;  %v1554_v15 = vadd.f32 %v7911_v30, %v7938_v50  ;;  %v6988_v50 = vpop.f32.mrb[24].mxu0 }
 0x1d1   : > { %v8008_v40 = vadd.f32 %v2641_v39, %v1559_v28  ;;  %v1214_v59 = vmax.f32 %v988_v49, 0.0  ;;  %v998_v24 = vadd.f32 %v6988_v50, %v7852_v26  ;;  %v992_v25 = vpop.f32.mrb[25].mxu0  ;;  %v1853_v49 = vld [vmem:[%s7952_s26 + $0x58] sm:$0xff] }
 0x1d2   : > { %v7940_v52 = vpop.f32.mrb[8].mxu1  ;;  %7083 = vmatprep.mubr.msk.f32.mxu1 %vm1264_vm2, %v1213_v61 }
 0x1d3   : > { %v7942_v53 = vpop.f32.mrb[9].mxu1  ;;  %v2783_v41 = vsel %vm1264_vm2, %v8008_v40, 0.0  ;;  %7084 = vmatmul.mubr.msk.f32.gmra.mrb[22].mxu1 %vm1264_vm2, %v1214_v59  ;;  %v1569_v8 = vadd.f32 %v7940_v52, %v7911_v30  ;;  %v2353_v52 = vrot.slane %v2008_v14, %v7945_v55  ;;  %v1216_v29 = vmax.f32 %v998_v24, 0.0  ;;  %v573_v59 = vld [vmem:[%s7797_s21 + $0x120] sm:$0xff] }
 0x1d4   : > { %v1564_v42 = vadd.f32 %v7911_v30, %v7942_v53  ;;  %v1971_v24 = vcombine.high %v8045_v10, %v8045_v10 }
 0x1d5   : > { %v2643_v18 = vsub.f32 %v2353_v52, %v1851_v17 }
 0x1d6   : > { %v7954_v56 = vpop.f32.mrb[10].mxu1 }
 0x1d7   : > { %v7973_v11 = vpop.f32.mrb[11].mxu1  ;;  %v8055_v19 = vadd.f32 %v2643_v18, %v1569_v8  ;;  %v1579_v38 = vadd.f32 %v7954_v56, %v7911_v30  ;;  %v1994_v56 = vrot.slane %v1978_v12, %v7926_v43 }
 0x1d9   : > { %v2789_v20 = vsel %vm1264_vm2, %v8055_v19, 0.0  ;;  %v2016_v47 = vcombine.high %v1994_v56, %v1994_v56 }
 0x1da   : > { %v8015_v46 = vpop.f32.mrb[12].mxu1 }
 0x1db   : > { %v8017_v48 = vpop.f32.mrb[13].mxu1  ;;  %v2357_v54 = vrot.slane %v2016_v47, %v7945_v55  ;;  %v1589_v21 = vadd.f32 %v8015_v46, %v7911_v30 }
 0x1dd   : > { %v2644_v58 = vsub.f32 %v2357_v54, %v1852_v57 }
 0x1de   : > { %v8023_v62 = vpop.f32.mrb[14].mxu1 }
 0x1e5   : > { %2766 = vadd.xlane.f32.xlu0 %v2765_v2  ;;  %v8027_v2 = vpop.f32.mrb[15].mxu1 }
 0x1e6   : > { %v1594_v50 = vadd.f32 %v7911_v30, %v8027_v2 }
 0x1e9   : > { %2763 = vadd.xlane.f32.xlu0 %v2762_v7  ;;  %v8037_v7 = vadd.f32 %v2638_v5, %v1544_v34  ;;  %v2349_v5 = vrot.slane %v1994_v56, %v7945_v55 }
 0x1eb   : > { %v2774_v9 = vsel %vm1264_vm2, %v8037_v7, 0.0 }
 0x1f1   : > { %2772 = vadd.xlane.f32.xlu1 %v2771_v22  ;;  %v572_v22 = vld [vmem:[%s7797_s21 + $0x118] sm:$0xff] }
 0x1f2   : > { %7002 = vmatmul.mubr.msk.f32.gmra.mrb[34].mxu0 %vm609_vm1, %v572_v22  ;;  %v1584_v22 = vadd.f32 %v7911_v30, %v8017_v48 }
 0x1f3   : > { %7004 = vmatprep.mubr.msk.f32.mxu0 %vm609_vm1, %v573_v59  ;;  %v1856_v59 = vld [vmem:[%s7952_s26 + $0x70] sm:$0xff] }
 0x1f5   : > { %2769 = vadd.xlane.f32.xlu1 %v2768_v27  ;;  %v1968_v27 = vcombine.high %v1952_v44, %v1952_v44  ;;  %v2018_v44 = vcombine.high %v2008_v14, %v2008_v14 }
 0x1f6   : > { %7005 = vmatmul.mubr.msk.f32.gmra.mrb[36].mxu0 %vm609_vm1, %v574_v60 }
 0x1f7   : > { %v2341_v33 = vrot.slane %v1968_v27, %v7945_v55  ;;  %v2361_v45 = vrot.slane %v2018_v44, %v7945_v55 }
 0x1f9   : > { %v2640_v36 = vsub.f32 %v2341_v33, %v1848_v35  ;;  %v2645_v51 = vsub.f32 %v2361_v45, %v1853_v49  ;;  %v1855_v33 = vld [vmem:[%s7952_s26 + $0x68] sm:$0xff] }
 0x1fb   : > { %v8073_v37 = vadd.f32 %v2640_v36, %v1554_v15  ;;  %v1854_v36 = vld [vmem:[%s7952_s26 + $0x60] sm:$0xff] }
 0x1fd   : > { %v2780_v39 = vsel %vm1264_vm2, %v8073_v37, 0.0 }
 0x1ff   : > { %5031 = vrot.lane.b32.xlu0 %v1559_v28, %s7699_s19  ;;  %v993_v28 = vadd.f32 %v7852_v26, %v992_v25  ;;  %v1985_v25 = vrot.slane %v1971_v24, %v7926_v43 }
 0x201   : > { %v1215_v31 = vmax.f32 %v993_v28, 0.0  ;;  %v1987_v27 = vcombine.high %v1985_v25, %v1985_v25  ;;  %v2001_v28 = vrot.slane %v1985_v25, %v7926_v43 }
 0x203   : > { %7086 = vmatprep.mubr.msk.f32.mxu1 %vm1264_vm2, %v1215_v31  ;;  %v8130_v46 = vrot.slane %v1987_v27, %v7926_v43  ;;  %v575_v31 = vld [vmem:[%s7797_s21 + $0x130] sm:$0xff]  ;;  %v2365_v35 = vrot.slane %v2001_v28, %v7945_v55 }
 0x204   : > { %7087 = vmatmul.mubr.msk.f32.gmra.mrb[24].mxu1 %vm1264_vm2, %v1216_v29  ;;  %v1908_v29 = vld [vmem:[%s7923_s23 + $0x10] sm:$0xff]  ;;  %7007 = vmatprep.mubr.msk.f32.mxu0 %vm609_vm1, %v575_v31 }
 0x205   : > { %v2369_v48 = vrot.slane %v8130_v46, %v7945_v55  ;;  %v2020_v2 = vcombine.high %v1908_v29, %v1908_v29  ;;  %v2646_v56 = vsub.f32 %v2365_v35, %v1854_v36  ;;  %v576_v35 = vld [vmem:[%s7797_s21 + $0x138] sm:$0xff] }
 0x206   : > { %5027 = vrot.lane.b32.xlu1 %v1549_v32, %s7699_s19  ;;  %v8065_v32 = vpop.f32.mrb[16].mxu1  ;;  %7008 = vmatmul.mubr.msk.f32.gmra.mrb[38].mxu0 %vm609_vm1, %v576_v35 }
 0x207   : > { %v2647_v10 = vsub.f32 %v2369_v48, %v1855_v33 }
 0x209   : > { %v8142_v44 = vadd.f32 %v2647_v10, %v1589_v21 }
 0x20a   : > { %5025 = vrot.lane.b32.xlu1 %v1544_v34, %s7699_s19  ;;  %v8068_v34 = vpop.f32.mrb[17].mxu1 }
 0x20b   : > { %v8103_v1 = vpop.f32.mrb[18].mxu1 }
 0x21e   : > { %2784 = vadd.xlane.f32.xlu0 %v2783_v41  ;;  %v1574_v41 = vadd.f32 %v7911_v30, %v7973_v11  ;;  %v8091_v11 = vadd.f32 %v2645_v51, %v1579_v38 }
 0x220   : > { %v2795_v53 = vsel %vm1264_vm2, %v8091_v11, 0.0  ;;  %v8099_v61 = vadd.f32 %v2644_v58, %v1574_v41 }
 0x222   : > { %v2792_v0 = vsel %vm1264_vm2, %v8099_v61, 0.0 }
 0x22e   : > { %2778 = vadd.xlane.f32.xlu1 %v2777_v6  ;;  %v6991_v6 = vpop.f32.mrb[26].mxu0 }
 0x22f   : > { %v1008_v12 = vadd.f32 %v6991_v6, %v7852_v26  ;;  %v1002_v13 = vpop.f32.mrb[27].mxu0 }
 0x230   : > { %v1003_v14 = vadd.f32 %v7852_v26, %v1002_v13  ;;  %v2801_v13 = vsel %vm1264_vm2, %v8142_v44, 0.0 }
 0x232   : > { %2775 = vadd.xlane.f32.xlu1 %v2774_v9  ;;  %v1850_v9 = vld [vmem:[%s7952_s26 + $0x40] sm:$0xff]  ;;  %v1217_v17 = vmax.f32 %v1003_v14, 0.0  ;;  %v8166_v14 = vadd.f32 %v2646_v56, %v1584_v22 }
 0x233   : > { %v2642_v52 = vsub.f32 %v2349_v5, %v1850_v9 }
 0x234   : > { %5035 = vrot.lane.b32.xlu0 %v1569_v8, %s7699_s19  ;;  %v8106_v8 = vpop.f32.mrb[19].mxu1  ;;  %7089 = vmatprep.mubr.msk.f32.mxu1 %vm1264_vm2, %v1217_v17  ;;  %v1862_v17 = vld [vmem:[%s7952_s26 + $0xa0] sm:$0xff] }
 0x235   : > { %v8113_v18 = vadd.f32 %v2642_v52, %v1564_v42  ;;  %v7082_v54 = vpop.f32.mrb[20].mxu1  ;;  %v1863_v52 = vld [vmem:[%s7952_s26 + $0xa8] sm:$0xff] }
 0x243   : > { %5029 = vrot.lane.b32.xlu1 %v1554_v15, %s7699_s19  ;;  %v1218_v15 = vmax.f32 %v1008_v12, 0.0 }
 0x245   : > { %7090 = vmatmul.mubr.msk.f32.gmra.mrb[26].mxu1 %vm1264_vm2, %v1218_v15 }
 0x253   : > { %2790 = vadd.xlane.f32.xlu0 %v2789_v20  ;;  %v2786_v20 = vsel %vm1264_vm2, %v8113_v18, 0.0 }
 0x267   : > { %2781 = vadd.xlane.f32.xlu1 %v2780_v39  ;;  %v2034_v39 = vrot.slane %v2020_v2, %v7926_v43  ;;  %v2798_v2 = vsel %vm1264_vm2, %v8166_v14, 0.0 }
 0x269   : > { %5039 = vrot.lane.b32.xlu0 %v1579_v38, %s7699_s19  ;;  %v2017_v38 = vcombine.high %v2001_v28, %v2001_v28  ;;  %v8151_v58 = vrot.slane %v2034_v39, %v7926_v43 }
 0x26b   : > { %v2373_v49 = vrot.slane %v2017_v38, %v7945_v55  ;;  %v2397_v12 = vrot.slane %v8151_v58, %v7945_v55  ;;  %v1599_v38 = vadd.f32 %v8023_v62, %v7911_v30  ;;  %v1858_v62 = vld [vmem:[%s7952_s26 + $0x80] sm:$0xff] }
 0x26d   : > { %5037 = vrot.lane.b32.xlu0 %v1574_v41, %s7699_s19  ;;  %v6994_v41 = vpop.f32.mrb[28].mxu0  ;;  %v2654_v27 = vsub.f32 %v2397_v12, %v1862_v17 }
 0x26e   : > { %v1018_v45 = vadd.f32 %v6994_v41, %v7852_v26  ;;  %v1012_v47 = vpop.f32.mrb[29].mxu0  ;;  %v2027_v41 = vrot.slane %v1908_v29, %v7926_v43 }
 0x26f   : > { %v1013_v51 = vadd.f32 %v7852_v26, %v1012_v47  ;;  %v6997_v15 = vpop.f32.mrb[30].mxu0  ;;  %v577_v47 = vld [vmem:[%s7797_s21 + $0x140] sm:$0xff] }
 0x270   : > { %v1220_v60 = vmax.f32 %v1018_v45, 0.0  ;;  %v1022_v24 = vpop.f32.mrb[31].mxu0  ;;  %v2043_v56 = vrot.slane %v2027_v41, %v7926_v43  ;;  %v1857_v45 = vld [vmem:[%s7952_s26 + $0x78] sm:$0xff]  ;;  %7010 = vmatprep.mubr.msk.f32.mxu0 %vm609_vm1, %v577_v47  ;;  %v1859_v47 = vld [vmem:[%s7952_s26 + $0x88] sm:$0xff] }
 0x271   : > { %v1219_v5 = vmax.f32 %v1013_v51, 0.0  ;;  %v1023_v48 = vadd.f32 %v7852_v26, %v1022_v24 }
 0x272   : > { %v2381_v51 = vrot.slane %v2043_v56, %v7945_v55 }
 0x273   : > { %7092 = vmatprep.mubr.msk.f32.mxu1 %vm1264_vm2, %v1219_v5  ;;  %v1221_v33 = vmax.f32 %v1023_v48, 0.0 }
 0x274   : > { %7093 = vmatmul.mubr.msk.f32.gmra.mrb[28].mxu1 %vm1264_vm2, %v1220_v60 }
 0x275   : > { %7095 = vmatprep.mubr.msk.f32.mxu1 %vm1264_vm2, %v1221_v33 }
 0x278   : > { %5033 = vrot.lane.b32.xlu1 %v1564_v42, %s7699_s19  ;;  %v2036_v42 = vcombine.high %v2034_v39, %v2034_v39  ;;  %v2019_v39 = vcombine.high %v8130_v46, %v8130_v46 }
 0x27a   : > { %v8148_v57 = vrot.slane %v2036_v42, %v7926_v43  ;;  %v2377_v42 = vrot.slane %v2019_v39, %v7945_v55 }
 0x27c   : > { %v2401_v9 = vrot.slane %v8148_v57, %v7945_v55 }
 0x27e   : > { %v2655_v25 = vsub.f32 %v2401_v9, %v1863_v52 }
 0x28c   : > { %2796 = vadd.xlane.f32.xlu0 %v2795_v53  ;;  %v8155_v53 = vadd.f32 %v7082_v54, %v7911_v30 }
 0x290   : > { %2793 = vadd.xlane.f32.xlu0 %v2792_v0  ;;  %v1623_v0 = vpop.f32.mrb[21].mxu1 }
 0x291   : > { %v8158_v6 = vadd.f32 %v7911_v30, %v1623_v0  ;;  %v2650_v0 = vsub.f32 %v2381_v51, %v1858_v62  ;;  %v580_v51 = vld [vmem:[%s7797_s21 + $0x158] sm:$0xff] }
 0x293   : > { %v8178_v28 = vadd.f32 %v2654_v27, %v8158_v6 }
 0x295   : > { %11652 = vst [vmem:[#allocation3_spill] sm:$0xff] %v8178_v28 }
 0x29b   : > { %v7000_v54 = vpop.f32.mrb[32].mxu0 }
 0x29c   : > { %2787 = vadd.xlane.f32.xlu1 %v2786_v20  ;;  %v2648_v20 = vsub.f32 %v2373_v49, %v1856_v59  ;;  %v578_v49 = vld [vmem:[%s7797_s21 + $0x148] sm:$0xff]  ;;  %v1038_v46 = vadd.f32 %v7000_v54, %v7852_v26  ;;  %v1032_v59 = vpop.f32.mrb[33].mxu0 }
 0x29d   : > { %7011 = vmatmul.mubr.msk.f32.gmra.mrb[40].mxu0 %vm609_vm1, %v578_v49  ;;  %v1033_v5 = vadd.f32 %v7852_v26, %v1032_v59 }
 0x29e   : > { %v8182_v10 = vadd.f32 %v2648_v20, %v1594_v50  ;;  %v1224_v9 = vmax.f32 %v1038_v46, 0.0 }
 0x29f   : > { %v1223_v12 = vmax.f32 %v1033_v5, 0.0 }
 0x2a0   : > { %v2804_v36 = vsel %vm1264_vm2, %v8182_v10, 0.0 }
 0x2a6   : > { %5043 = vrot.lane.b32.xlu0 %v1589_v21, %s7699_s19  ;;  %v1028_v21 = vadd.f32 %v6997_v15, %v7852_v26  ;;  %v7085_v29 = vpop.f32.mrb[22].mxu1  ;;  %v2066_v15 = vcombine.high %v8151_v58, %v8151_v58  ;;  %v1864_v58 = vld [vmem:[%s7952_s26 + $0xb0] sm:$0xff] }
 0x2a7   : > { %v1633_v20 = vpop.f32.mrb[23].mxu1  ;;  %v8230_v27 = vadd.f32 %v7085_v29, %v7911_v30 }
 0x2a8   : > { %v1222_v31 = vmax.f32 %v1028_v21, 0.0  ;;  %v2405_v24 = vrot.slane %v2066_v15, %v7945_v55 }
 0x2aa   : > { %5041 = vrot.lane.b32.xlu0 %v1584_v22, %s7699_s19  ;;  %v8175_v22 = vadd.f32 %v2655_v25, %v8155_v53  ;;  %7096 = vmatmul.mubr.msk.f32.gmra.mrb[30].mxu1 %vm1264_vm2, %v1222_v31  ;;  %v1865_v25 = vld [vmem:[%s7952_s26 + $0xb8] sm:$0xff]  ;;  %v2656_v31 = vsub.f32 %v2405_v24, %v1864_v58  ;;  %v581_v58 = vld [vmem:[%s7797_s21 + $0x160] sm:$0xff] }
 0x2ab   : > { %7098 = vmatprep.mubr.msk.f32.mxu1 %vm1264_vm2, %v1223_v12  ;;  %v1861_v24 = vld [vmem:[%s7952_s26 + $0x98] sm:$0xff] }
 0x2ac   : > { %11651 = vst [vmem:[#allocation2_spill] sm:$0xff] %v8175_v22 }
 0x2ad   : > { %5045 = vrot.lane.b32.xlu1 %v1594_v50, %s7699_s19  ;;  %v1604_v50 = vadd.f32 %v7911_v30, %v8068_v34  ;;  %v2649_v34 = vsub.f32 %v2377_v42, %v1857_v45  ;;  %v2065_v45 = vcombine.high %v2043_v56, %v2043_v56 }
 0x2ae   : > { %7099 = vmatmul.mubr.msk.f32.gmra.mrb[32].mxu1 %vm1264_vm2, %v1224_v9 }
 0x2af   : > { %v8209_v60 = vadd.f32 %v2649_v34, %v1599_v38  ;;  %v8218_v17 = vadd.f32 %v2650_v0, %v1604_v50  ;;  %v579_v34 = vld [vmem:[%s7797_s21 + $0x150] sm:$0xff] }
 0x2b0   : > { %7013 = vmatprep.mubr.msk.f32.mxu0 %vm609_vm1, %v579_v34 }
 0x2b1   : > { %v2807_v52 = vsel %vm1264_vm2, %v8209_v60, 0.0  ;;  %11653 = vst [vmem:[#allocation4_spill] sm:$0xff] %v8218_v17  ;;  %v2810_v33 = vsel %vm1264_vm2, %v8218_v17, 0.0  ;;  %7014 = vmatmul.mubr.msk.f32.gmra.mrb[42].mxu0 %vm609_vm1, %v580_v51  ;;  %v583_v51 = vld [vmem:[%s7797_s21 + $0x170] sm:$0xff] }
 0x2b2   : > { %7016 = vmatprep.mubr.msk.f32.mxu0 %vm609_vm1, %v581_v58 }
 0x2c5   : > { %v7003_v49 = vpop.f32.mrb[34].mxu0 }
 0x2c6   : > { %v1042_v54 = vpop.f32.mrb[35].mxu0 }
 0x2c7   : > { %v1043_v59 = vadd.f32 %v7852_v26, %v1042_v54  ;;  %v1868_v54 = vld [vmem:[%s7952_s26 + $0xd0] sm:$0xff] }
 0x2c9   : > { %2802 = vadd.xlane.f32.xlu0 %v2801_v13  ;;  %v2068_v13 = vcombine.high %v8148_v57, %v8148_v57  ;;  %v8225_v57 = vadd.f32 %v7911_v30, %v1633_v20  ;;  %v1225_v0 = vmax.f32 %v1043_v59, 0.0 }
 0x2cb   : > { %v2409_v21 = vrot.slane %v2068_v13, %v7945_v55  ;;  %v8238_v35 = vadd.f32 %v2656_v31, %v8225_v57  ;;  %7101 = vmatprep.mubr.msk.f32.mxu1 %vm1264_vm2, %v1225_v0  ;;  %v2822_v0 = vsel %vm1264_vm2, %v8178_v28, 0.0 }
 0x2cd   : > { %2799 = vadd.xlane.f32.xlu0 %v2798_v2  ;;  %v2657_v48 = vsub.f32 %v2409_v21, %v1865_v25  ;;  %11655 = vst [vmem:[#allocation6_spill] sm:$0xff] %v8238_v35  ;;  %v7006_v25 = vpop.f32.mrb[36].mxu0 }
 0x2cf   : > { %v8235_v2 = vadd.f32 %v2657_v48, %v8230_v27  ;;  %v582_v48 = vld [vmem:[%s7797_s21 + $0x168] sm:$0xff] }
 0x2d0   : > { %7017 = vmatmul.mubr.msk.f32.gmra.mrb[44].mxu0 %vm609_vm1, %v582_v48  ;;  %v1871_v48 = vld [vmem:[%s7952_s26 + $0xe8] sm:$0xff] }
 0x2d1   : > { %2805 = vadd.xlane.f32.xlu1 %v2804_v36  ;;  %11654 = vst [vmem:[#allocation5_spill] sm:$0xff] %v8235_v2  ;;  %v1614_v36 = vadd.f32 %v7911_v30, %v8106_v8  ;;  %v2389_v8 = vrot.slane %v2065_v45, %v7945_v55  ;;  %7019 = vmatprep.mubr.msk.f32.mxu0 %vm609_vm1, %v583_v51  ;;  %v586_v51 = vld [vmem:[%s7797_s21 + $0x188] sm:$0xff] }
 0x2d7   : > { %v8253_v46 = vpop.f32.mrb[24].mxu1 }
 0x2d8   : > { %v8258_v29 = vpop.f32.mrb[25].mxu1 }
 0x2e2   : > { %5049 = vrot.lane.b32.xlu1 %v1604_v50, %s7699_s19  ;;  %v1609_v50 = vadd.f32 %v8065_v32, %v7911_v30  ;;  %v1048_v32 = vadd.f32 %v7003_v49, %v7852_v26 }
 0x2e3   : > { %5047 = vrot.lane.b32.xlu0 %v1599_v38, %s7699_s19  ;;  %v2035_v38 = vcombine.high %v2027_v41, %v2027_v41  ;;  %v1860_v41 = vld [vmem:[%s7952_s26 + $0x90] sm:$0xff] }
 0x2e4   : > { %v1226_v56 = vmax.f32 %v1048_v32, 0.0  ;;  %v2652_v9 = vsub.f32 %v2389_v8, %v1860_v41 }
 0x2e5   : > { %v2057_v39 = vrot.slane %v2035_v38, %v7926_v43 }
 0x2e6   : > { %7102 = vmatmul.mubr.msk.f32.gmra.mrb[34].mxu1 %vm1264_vm2, %v1226_v56  ;;  %v8267_v13 = vadd.f32 %v2652_v9, %v1614_v36  ;;  %v2825_v56 = vsel %vm1264_vm2, %v8175_v22, 0.0 }
 0x2e7   : > { %v2385_v42 = vrot.slane %v2057_v39, %v7945_v55  ;;  %v2067_v20 = vcombine.high %v2057_v39, %v2057_v39 }
 0x2e8   : > { %11656 = vst [vmem:[#allocation7_spill] sm:$0xff] %v8267_v13  ;;  %v2816_v15 = vsel %vm1264_vm2, %v8267_v13, 0.0 }
 0x2e9   : > { %v2651_v62 = vsub.f32 %v2385_v42, %v1859_v47  ;;  %v2393_v21 = vrot.slane %v2067_v20, %v7945_v55 }
 0x2eb   : > { %v8261_v5 = vadd.f32 %v2651_v62, %v1609_v50  ;;  %v2653_v31 = vsub.f32 %v2393_v21, %v1861_v24  ;;  %v584_v62 = vld [vmem:[%s7797_s21 + $0x178] sm:$0xff] }
 0x2ec   : > { %7020 = vmatmul.mubr.msk.f32.gmra.mrb[46].mxu0 %vm609_vm1, %v584_v62 }
 0x2ed   : > { %v2813_v12 = vsel %vm1264_vm2, %v8261_v5, 0.0 }
 0x302   : > { %2808 = vadd.xlane.f32.xlu0 %v2807_v52  ;;  %v1619_v52 = vadd.f32 %v8103_v1, %v7911_v30  ;;  %v1052_v1 = vpop.f32.mrb[37].mxu0 }
 0x304   : > { %v8290_v39 = vadd.f32 %v2653_v31, %v1619_v52  ;;  %v1870_v31 = vld [vmem:[%s7952_s26 + $0xe0] sm:$0xff] }
 0x306   : > { %2811 = vadd.xlane.f32.xlu1 %v2810_v33  ;;  %v1909_v33 = vld [vmem:[%s7923_s23 + $0x18] sm:$0xff]  ;;  %v2819_v49 = vsel %vm1264_vm2, %v8290_v39, 0.0 }
 0x307   : > { %v2069_v9 = vcombine.high %v1909_v33, %v1909_v33 }
 0x317   : > { %5053 = vrot.lane.b32.xlu1 %v1614_v36, %s7699_s19  ;;  %v1058_v36 = vadd.f32 %v7006_v25, %v7852_v26 }
 0x318   : > { %5051 = vrot.lane.b32.xlu0 %v1609_v50, %s7699_s19  ;;  %v8288_v50 = vrot.slane %v1909_v33, %v7926_v43  ;;  %v8297_v45 = vpop.f32.mrb[26].mxu1 }
 0x319   : > { %v1653_v34 = vpop.f32.mrb[27].mxu1 }
 0x31a   : > { %v8294_v42 = vrot.slane %v8288_v50, %v7926_v43  ;;  %v8308_v32 = vadd.f32 %v7911_v30, %v1653_v34  ;;  %v585_v34 = vld [vmem:[%s7797_s21 + $0x180] sm:$0xff] }
 0x31b   : > { %7022 = vmatprep.mubr.msk.f32.mxu0 %vm609_vm1, %v585_v34  ;;  %v2084_v34 = vcombine.high %v8288_v50, %v8288_v50 }
 0x31c   : > { %v2114_v47 = vcombine.high %v8294_v42, %v8294_v42  ;;  %7023 = vmatmul.mubr.msk.f32.gmra.mrb[48].mxu0 %vm609_vm1, %v586_v51 }
 0x31e   : > { %v2421_v8 = vrot.slane %v2114_v47, %v7945_v55 }
 0x320   : > { %v2660_v41 = vsub.f32 %v2421_v8, %v1868_v54 }
 0x322   : > { %v8314_v59 = vadd.f32 %v2660_v41, %v8308_v32  ;;  %v8352_v41 = vld [vmem:[%s11534_s4] ss:$0 sm:$0xff] }
 0x324   : > { %11657 = vst [vmem:[#allocation8_spill] sm:$0xff] %v8314_v59 }
 0x337   : > { %2814 = vadd.xlane.f32.xlu0 %v2813_v12  ;;  %v2083_v12 = vrot.slane %v2069_v9, %v7926_v43  ;;  %v1873_v9 = vld [vmem:[%s7952_s26 + $0xf8] sm:$0xff] }
 0x339   : > { %v2099_v20 = vrot.slane %v2083_v12, %v7926_v43 }
 0x33b   : > { %2817 = vadd.xlane.f32.xlu1 %v2816_v15  ;;  %v2085_v15 = vcombine.high %v2083_v12, %v2083_v12  ;;  %v2429_v58 = vrot.slane %v2099_v20, %v7945_v55 }
 0x347   : > { %v7094_v21 = vpop.f32.mrb[28].mxu1 }
 0x348   : > { %v8328_v24 = vadd.f32 %v7094_v21, %v7911_v30  ;;  %v1663_v25 = vpop.f32.mrb[29].mxu1 }
 0x34c   : > { %5059 = vrot.lane.b32.xlu1 %v8155_v53, %s7699_s19  ;;  %v1053_v53 = vadd.f32 %v7852_v26, %v1052_v1  ;;  %v2115_v1 = vcombine.high %v2099_v20, %v2099_v20 }
 0x34d   : > { %5055 = vrot.lane.b32.xlu0 %v1619_v52, %s7699_s19  ;;  %v2113_v52 = vrot.slane %v2085_v15, %v7926_v43 }
 0x34e   : > { %v1227_v38 = vmax.f32 %v1053_v53, 0.0  ;;  %v2437_v54 = vrot.slane %v2115_v1, %v7945_v55  ;;  %v1649_v1 = vadd.f32 %v8253_v46, %v7911_v30 }
 0x34f   : > { %v2117_v53 = vcombine.high %v2113_v52, %v2113_v52 }
 0x350   : > { %5057 = vrot.lane.b32.xlu1 %v8158_v6, %s7699_s19  ;;  %v1228_v6 = vmax.f32 %v1058_v36, 0.0  ;;  %7104 = vmatprep.mubr.msk.f32.mxu1 %vm1264_vm2, %v1227_v38  ;;  %v2662_v36 = vsub.f32 %v2429_v58, %v1870_v31  ;;  %v7009_v38 = vpop.f32.mrb[38].mxu0 }
 0x351   : > { %v1068_v47 = vadd.f32 %v7009_v38, %v7852_v26  ;;  %v1872_v26 = vld [vmem:[%s7952_s26 + $0xf0] sm:$0xff]  ;;  %v2441_v12 = vrot.slane %v2117_v53, %v7945_v55  ;;  %v2413_v53 = vrot.slane %v8294_v42, %v7945_v55 }
 0x352   : > { %7105 = vmatmul.mubr.msk.f32.gmra.mrb[36].mxu1 %vm1264_vm2, %v1228_v6  ;;  %v2831_v6 = vsel %vm1264_vm2, %v8235_v2, 0.0  ;;  %v587_v38 = vld [vmem:[%s7797_s21 + $0x190] sm:$0xff] }
 0x353   : > { %v1230_v15 = vmax.f32 %v1068_v47, 0.0  ;;  %v2665_v58 = vsub.f32 %v2441_v12, %v1873_v9  ;;  %v588_v47 = vld [vmem:[%s7797_s21 + $0x198] sm:$0xff]  ;;  %7025 = vmatprep.mubr.msk.f32.mxu0 %vm609_vm1, %v587_v38  ;;  %v589_v38 = vld [vmem:[%s7797_s21 + $0x1a0] sm:$0xff] }
 0x354   : > { %7026 = vmatmul.mubr.msk.f32.gmra.mrb[50].mxu0 %vm609_vm1, %v588_v47  ;;  %v590_v47 = vld [vmem:[%s7797_s21 + $0x1a8] sm:$0xff] }
 0x355   : > { %7028 = vmatprep.mubr.msk.f32.mxu0 %vm609_vm1, %v589_v38 }
 0x358   : > { %7029 = vmatmul.mubr.msk.f32.gmra.mrb[52].mxu0 %vm609_vm1, %v590_v47 }
 0x36c   : > { %2820 = vadd.xlane.f32.xlu0 %v2819_v49  ;;  %v1062_v49 = vpop.f32.mrb[39].mxu0 }
 0x370   : > { %v7012_v51 = vpop.f32.mrb[40].mxu0 }
 0x374   : > { %2826 = vadd.xlane.f32.xlu1 %v2825_v56  ;;  %v1063_v56 = vadd.f32 %v8352_v41, %v1062_v49 }
 0x376   : > { %v1229_v21 = vmax.f32 %v1063_v56, 0.0 }
 0x378   : > { %2823 = vadd.xlane.f32.xlu1 %v2822_v0  ;;  %7107 = vmatprep.mubr.msk.f32.mxu1 %vm1264_vm2, %v1229_v21 }
 0x379   : > { %7108 = vmatmul.mubr.msk.f32.gmra.mrb[38].mxu1 %vm1264_vm2, %v1230_v15  ;;  %v1867_v15 = vld [vmem:[%s7952_s26 + $0xc8] sm:$0xff] }
 0x37d   : > { %v7097_v0 = vpop.f32.mrb[30].mxu1 }
 0x37e   : > { %v1673_v20 = vpop.f32.mrb[31].mxu1 }
 0x381   : > { %v8401_v12 = vpop.f32.mrb[32].mxu1 }
 0x382   : > { %5063 = vrot.lane.b32.xlu0 %v8230_v27, %s7699_s19  ;;  %v2433_v27 = vrot.slane %v2113_v52, %v7945_v55  ;;  %v8360_v52 = vadd.f32 %v7097_v0, %v7911_v30  ;;  %v2106_v0 = vrot.slane %v2084_v34, %v7926_v43 }
 0x384   : > { %v2663_v33 = vsub.f32 %v2433_v27, %v1871_v48  ;;  %v2664_v27 = vsub.f32 %v2437_v54, %v1872_v26  ;;  %v8371_v31 = vadd.f32 %v2665_v58, %v8360_v52  ;;  %v1072_v54 = vpop.f32.mrb[41].mxu0  ;;  %v2417_v9 = vrot.slane %v2106_v0, %v7945_v55 }
 0x385   : > { %v1073_v46 = vadd.f32 %v8352_v41, %v1072_v54 }
 0x386   : > { %v8343_v62 = vadd.f32 %v2663_v33, %v8328_v24  ;;  %11661 = vst [vmem:[#allocation12_spill] sm:$0xff] %v8371_v31  ;;  %v2828_v33 = vsel %vm1264_vm2, %v8238_v35, 0.0  ;;  %v2659_v21 = vsub.f32 %v2417_v9, %v1867_v15  ;;  %v592_v9 = vld [vmem:[%s7797_s21 + $0x1b8] sm:$0xff]  ;;  %v593_v15 = vld [vmem:[%s7797_s21 + $0x1c0] sm:$0xff] }
 0x387   : > { %v1231_v26 = vmax.f32 %v1073_v46, 0.0 }
 0x388   : > { %11658 = vst [vmem:[#allocation9_spill] sm:$0xff] %v8343_v62 }
 0x389   : > { %5061 = vrot.lane.b32.xlu1 %v8225_v57, %s7699_s19  ;;  %v8333_v57 = vadd.f32 %v7911_v30, %v1663_v25  ;;  %v8364_v25 = vadd.f32 %v7911_v30, %v1673_v20  ;;  %7110 = vmatprep.mubr.msk.f32.mxu1 %vm1264_vm2, %v1231_v26  ;;  %v8404_v20 = vpop.f32.mrb[33].mxu1  ;;  %v1910_v26 = vld [vmem:[%s7923_s23 + $0x20] sm:$0xff] }
 0x38b   : > { %v8346_v8 = vadd.f32 %v2662_v36, %v8333_v57  ;;  %v8368_v48 = vadd.f32 %v2664_v27, %v8364_v25  ;;  %v1644_v36 = vadd.f32 %v7911_v30, %v8258_v29  ;;  %v1078_v29 = vadd.f32 %v8352_v41, %v7012_v51 }
 0x38c   : > { %v8406_v27 = vadd.f32 %v2659_v21, %v1649_v1  ;;  %v2118_v21 = vcombine.high %v1910_v26, %v1910_v26 }
 0x38d   : > { %11659 = vst [vmem:[#allocation10_spill] sm:$0xff] %v8346_v8  ;;  %11660 = vst [vmem:[#allocation11_spill] sm:$0xff] %v8368_v48  ;;  %v1232_v56 = vmax.f32 %v1078_v29, 0.0 }
 0x38e   : > { %11663 = vst [vmem:[#allocation14_spill] sm:$0xff] %v8406_v27  ;;  %v2837_v58 = vsel %vm1264_vm2, %v8406_v27, 0.0 }
 0x38f   : > { %7111 = vmatmul.mubr.msk.f32.gmra.mrb[40].mxu1 %vm1264_vm2, %v1232_v56 }
 0x3a1   : > { %2832 = vadd.xlane.f32.xlu0 %v2831_v6  ;;  %v1866_v6 = vld [vmem:[%s7952_s26 + $0xc0] sm:$0xff] }
 0x3a2   : > { %v2658_v49 = vsub.f32 %v2413_v53, %v1866_v6  ;;  %v1869_v6 = vld [vmem:[%s7952_s26 + $0xd8] sm:$0xff] }
 0x3a4   : > { %v8393_v42 = vadd.f32 %v2658_v49, %v1644_v36  ;;  %v7015_v49 = vpop.f32.mrb[42].mxu0 }
 0x3a5   : > { %v1088_v34 = vadd.f32 %v8352_v41, %v7015_v49  ;;  %v1082_v51 = vpop.f32.mrb[43].mxu0 }
 0x3a6   : > { %11662 = vst [vmem:[#allocation13_spill] sm:$0xff] %v8393_v42  ;;  %v2834_v50 = vsel %vm1264_vm2, %v8393_v42, 0.0 }
 0x3ad   : > { %2829 = vadd.xlane.f32.xlu1 %v2828_v33  ;;  %v1659_v33 = vadd.f32 %v8297_v45, %v7911_v30  ;;  %v1083_v30 = vadd.f32 %v8352_v41, %v1082_v51  ;;  %v1234_v45 = vmax.f32 %v1088_v34, 0.0  ;;  %v8460_v51 = vld [vmem:[%s11536_s6] ss:$0 sm:$0xff] }
 0x3af   : > { %v1233_v29 = vmax.f32 %v1083_v30, 0.0 }
 0x3b1   : > { %7113 = vmatprep.mubr.msk.f32.mxu1 %vm1264_vm2, %v1233_v29 }
 0x3b2   : > { %7114 = vmatmul.mubr.msk.f32.gmra.mrb[42].mxu1 %vm1264_vm2, %v1234_v45 }
 0x3b7   : > { %5065 = vrot.lane.b32.xlu0 %v1644_v36, %s7699_s19  ;;  %v2116_v36 = vcombine.high %v2106_v0, %v2106_v0  ;;  %v2840_v0 = vsel %vm1264_vm2, %v8314_v59, 0.0 }
 0x3b9   : > { %v2425_v53 = vrot.slane %v2116_v36, %v7945_v55  ;;  %v8425_v54 = vpop.f32.mrb[34].mxu1 }
 0x3ba   : > { %v8427_v46 = vpop.f32.mrb[35].mxu1 }
 0x3be   : > { %5067 = vrot.lane.b32.xlu1 %v1649_v1, %s7699_s19  ;;  %v2661_v1 = vsub.f32 %v2425_v53, %v1869_v6  ;;  %v2132_v6 = vrot.slane %v2118_v21, %v7926_v43  ;;  %v1878_v21 = vld [vmem:[%s7952_s26 + $0x120] sm:$0xff] }
 0x3c0   : > { %v2148_v34 = vrot.slane %v2132_v6, %v7926_v43 }
 0x3d6   : > { %2835 = vadd.xlane.f32.xlu0 %v2834_v50  ;;  %v591_v50 = vld [vmem:[%s7797_s21 + $0x1b0] sm:$0xff] }
 0x3d7   : > { %7031 = vmatprep.mubr.msk.f32.mxu0 %vm609_vm1, %v591_v50 }
 0x3d8   : > { %7032 = vmatmul.mubr.msk.f32.gmra.mrb[54].mxu0 %vm609_vm1, %v592_v9 }
 0x3d9   : > { %7034 = vmatprep.mubr.msk.f32.mxu0 %vm609_vm1, %v593_v15  ;;  %v1879_v15 = vld [vmem:[%s7952_s26 + $0x128] sm:$0xff] }
 0x3e2   : > { %2838 = vadd.xlane.f32.xlu1 %v2837_v58  ;;  %v7018_v58 = vpop.f32.mrb[44].mxu0 }
 0x3e3   : > { %v1092_v36 = vpop.f32.mrb[45].mxu0 }
 0x3e4   : > { %v7021_v45 = vpop.f32.mrb[46].mxu0 }
 0x3e5   : > { %v1108_v50 = vadd.f32 %v8352_v41, %v7021_v45  ;;  %v1102_v9 = vpop.f32.mrb[47].mxu0  ;;  %v2125_v45 = vrot.slane %v1910_v26, %v7926_v43 }
 0x3ec   : > { %5071 = vrot.lane.b32.xlu0 %v1659_v33, %s7699_s19 }
 0x3f3   : > { %5069 = vrot.lane.b32.xlu1 %v8308_v32, %s7699_s19  ;;  %v8423_v32 = vadd.f32 %v2661_v1, %v1659_v33  ;;  %v1098_v33 = vadd.f32 %v8352_v41, %v7018_v58  ;;  %v2134_v1 = vcombine.high %v2132_v6, %v2132_v6  ;;  %v2849_v58 = vsel %vm1264_vm2, %v8343_v62, 0.0  ;;  %v1896_v62 = vld [vmem:[%s7952_s26 + $0x1b0] sm:$0xff] }
 0x3f5   : > { %11664 = vst [vmem:[#allocation15_spill] sm:$0xff] %v8423_v32  ;;  %v2843_v56 = vsel %vm1264_vm2, %v8423_v32, 0.0  ;;  %v1236_v53 = vmax.f32 %v1098_v33, 0.0  ;;  %v2162_v49 = vrot.slane %v2134_v1, %v7926_v43  ;;  %v1103_v33 = vadd.f32 %v8352_v41, %v1102_v9 }
 0x3f6   : > { %v1684_v1 = vadd.f32 %v8460_v51, %v8404_v20 }
 0x40b   : > { %2844 = vadd.xlane.f32.xlu0 %v2843_v56  ;;  %v2465_v56 = vrot.slane %v2162_v49, %v7945_v55 }
 0x417   : > { %2841 = vadd.xlane.f32.xlu1 %v2840_v0  ;;  %v2461_v0 = vrot.slane %v2148_v34, %v7945_v55 }
 0x421   : > { %5075 = vrot.lane.b32.xlu0 %v8328_v24, %s7699_s19  ;;  %v1093_v24 = vadd.f32 %v8352_v41, %v1092_v36  ;;  %v2671_v36 = vsub.f32 %v2465_v56, %v1879_v15  ;;  %v2141_v56 = vrot.slane %v2125_v45, %v7926_v43  ;;  %v1874_v15 = vld [vmem:[%s7952_s26 + $0x100] sm:$0xff] }
 0x423   : > { %v2445_v9 = vrot.slane %v2141_v56, %v7945_v55 }
 0x425   : > { %5073 = vrot.lane.b32.xlu0 %v8333_v57, %s7699_s19  ;;  %v594_v57 = vld [vmem:[%s7797_s21 + $0x1c8] sm:$0xff]  ;;  %v7106_v38 = vpop.f32.mrb[36].mxu1 }
 0x426   : > { %7035 = vmatmul.mubr.msk.f32.gmra.mrb[56].mxu0 %vm609_vm1, %v594_v57  ;;  %v1703_v47 = vpop.f32.mrb[37].mxu1  ;;  %v8463_v30 = vadd.f32 %v8460_v51, %v7106_v38  ;;  %v1238_v57 = vmax.f32 %v1108_v50, 0.0  ;;  %v2846_v38 = vsel %vm1264_vm2, %v8346_v8, 0.0  ;;  %v596_v50 = vld [vmem:[%s7797_s21 + $0x1d8] sm:$0xff] }
 0x427   : > { %v8466_v29 = vadd.f32 %v8460_v51, %v1703_v47  ;;  %v2852_v47 = vsel %vm1264_vm2, %v8368_v48, 0.0 }
 0x428   : > { %5077 = vrot.lane.b32.xlu1 %v8364_v25, %s7699_s19  ;;  %v1235_v25 = vmax.f32 %v1093_v24, 0.0  ;;  %v2670_v24 = vsub.f32 %v2461_v0, %v1878_v21  ;;  %v595_v0 = vld [vmem:[%s7797_s21 + $0x1d0] sm:$0xff]  ;;  %v7024_v21 = vpop.f32.mrb[48].mxu0 }
 0x429   : > { %7037 = vmatprep.mubr.msk.f32.mxu0 %vm609_vm1, %v595_v0  ;;  %v1118_v20 = vadd.f32 %v8352_v41, %v7024_v21 }
 0x42a   : > { %7116 = vmatprep.mubr.msk.f32.mxu1 %vm1264_vm2, %v1235_v25  ;;  %v8477_v25 = vadd.f32 %v2671_v36, %v8463_v30  ;;  %v8480_v6 = vadd.f32 %v2670_v24, %v8466_v29  ;;  %7038 = vmatmul.mubr.msk.f32.gmra.mrb[58].mxu0 %vm609_vm1, %v596_v50 }
 0x42b   : > { %7117 = vmatmul.mubr.msk.f32.gmra.mrb[44].mxu1 %vm1264_vm2, %v1236_v53  ;;  %v1237_v53 = vmax.f32 %v1103_v33, 0.0  ;;  %v2666_v33 = vsub.f32 %v2445_v9, %v1874_v15  ;;  %v1240_v26 = vmax.f32 %v1118_v20, 0.0 }
 0x42c   : > { %11665 = vst [vmem:[#allocation16_spill] sm:$0xff] %v8477_v25  ;;  %11666 = vst [vmem:[#allocation17_spill] sm:$0xff] %v8480_v6 }
 0x42d   : > { %7119 = vmatprep.mubr.msk.f32.mxu1 %vm1264_vm2, %v1237_v53  ;;  %v2164_v53 = vcombine.high %v2148_v34, %v2148_v34  ;;  %v1880_v34 = vld [vmem:[%s7952_s26 + $0x130] sm:$0xff] }
 0x42f   : > { %7120 = vmatmul.mubr.msk.f32.gmra.mrb[46].mxu1 %vm1264_vm2, %v1238_v57  ;;  %v2166_v57 = vcombine.high %v2162_v49, %v2162_v49  ;;  %v2469_v9 = vrot.slane %v2164_v53, %v7945_v55  ;;  %v1881_v49 = vld [vmem:[%s7952_s26 + $0x138] sm:$0xff] }
 0x431   : > { %v2473_v50 = vrot.slane %v2166_v57, %v7945_v55  ;;  %v2672_v20 = vsub.f32 %v2469_v9, %v1880_v34 }
 0x444   : > { %2850 = vadd.xlane.f32.xlu0 %v2849_v58  ;;  %v1112_v58 = vpop.f32.mrb[49].mxu0 }
 0x448   : > { %2847 = vadd.xlane.f32.xlu0 %v2846_v38  ;;  %v2855_v38 = vsel %vm1264_vm2, %v8371_v31, 0.0 }
 0x44c   : > { %2853 = vadd.xlane.f32.xlu1 %v2852_v47  ;;  %v7109_v24 = vpop.f32.mrb[38].mxu1  ;;  %v8505_v47 = vadd.f32 %v2666_v33, %v1684_v1 }
 0x44d   : > { %v1713_v0 = vpop.f32.mrb[39].mxu1  ;;  %v8517_v21 = vadd.f32 %v8460_v51, %v7109_v24  ;;  %v2133_v24 = vcombine.high %v2125_v45, %v2125_v45 }
 0x44e   : > { %11667 = vst [vmem:[#allocation18_spill] sm:$0xff] %v8505_v47  ;;  %v8512_v15 = vadd.f32 %v8460_v51, %v1713_v0  ;;  %v1875_v0 = vld [vmem:[%s7952_s26 + $0x108] sm:$0xff] }
 0x44f   : > { %v2155_v57 = vrot.slane %v2133_v24, %v7926_v43 }
 0x451   : > { %v2449_v53 = vrot.slane %v2155_v57, %v7945_v55 }
 0x453   : > { %v2667_v9 = vsub.f32 %v2449_v53, %v1875_v0  ;;  %v597_v0 = vld [vmem:[%s7797_s21 + $0x1e0] sm:$0xff] }
 0x454   : > { %7040 = vmatprep.mubr.msk.f32.mxu0 %vm609_vm1, %v597_v0 }
 0x45d   : > { %5081 = vrot.lane.b32.xlu1 %v1684_v1, %s7699_s19  ;;  %v2673_v1 = vsub.f32 %v2473_v50, %v1881_v49  ;;  %v7027_v50 = vpop.f32.mrb[50].mxu0 }
 0x45e   : > { %5079 = vrot.lane.b32.xlu0 %v8360_v52, %s7699_s19  ;;  %v1113_v52 = vadd.f32 %v8352_v41, %v1112_v58  ;;  %v2858_v58 = vsel %vm1264_vm2, %v8505_v47, 0.0 }
 0x45f   : > { %v8522_v33 = vadd.f32 %v2673_v1, %v8517_v21  ;;  %v1876_v1 = vld [vmem:[%s7952_s26 + $0x110] sm:$0xff] }
 0x460   : > { %v1239_v36 = vmax.f32 %v1113_v52, 0.0  ;;  %v8525_v52 = vadd.f32 %v2672_v20, %v8512_v15 }
 0x461   : > { %11668 = vst [vmem:[#allocation19_spill] sm:$0xff] %v8522_v33 }
 0x462   : > { %7122 = vmatprep.mubr.msk.f32.mxu1 %vm1264_vm2, %v1239_v36  ;;  %11669 = vst [vmem:[#allocation20_spill] sm:$0xff] %v8525_v52  ;;  %v1689_v36 = vadd.f32 %v8460_v51, %v8401_v12  ;;  %v1122_v12 = vpop.f32.mrb[51].mxu0  ;;  %v8538_v34 = vpop.f32.mrb[40].mxu1 }
 0x463   : > { %7123 = vmatmul.mubr.msk.f32.gmra.mrb[48].mxu1 %vm1264_vm2, %v1240_v26  ;;  %v1694_v26 = vadd.f32 %v8460_v51, %v8427_v46  ;;  %v1128_v46 = vadd.f32 %v8352_v41, %v7027_v50  ;;  %v1123_v45 = vadd.f32 %v8352_v41, %v1122_v12  ;;  %v8542_v20 = vpop.f32.mrb[41].mxu1  ;;  %v598_v50 = vld [vmem:[%s7797_s21 + $0x1e8] sm:$0xff] }
 0x464   : > { %7041 = vmatmul.mubr.msk.f32.gmra.mrb[60].mxu0 %vm609_vm1, %v598_v50 }
 0x465   : > { %v1241_v24 = vmax.f32 %v1123_v45, 0.0 }
 0x467   : > { %7125 = vmatprep.mubr.msk.f32.mxu1 %vm1264_vm2, %v1241_v24 }
 0x47d   : > { %2856 = vadd.xlane.f32.xlu0 %v2855_v38  ;;  %v2163_v38 = vcombine.high %v2141_v56, %v2141_v56  ;;  %v8544_v56 = vadd.f32 %v2667_v9, %v1689_v36  ;;  %v1699_v9 = vadd.f32 %v8460_v51, %v8425_v54 }
 0x47f   : > { %v2453_v49 = vrot.slane %v2163_v38, %v7945_v55  ;;  %11670 = vst [vmem:[#allocation21_spill] sm:$0xff] %v8544_v56  ;;  %v2861_v53 = vsel %vm1264_vm2, %v8544_v56, 0.0 }
 0x481   : > { %2859 = vadd.xlane.f32.xlu1 %v2858_v58  ;;  %v1242_v58 = vmax.f32 %v1128_v46, 0.0  ;;  %v2668_v47 = vsub.f32 %v2453_v49, %v1876_v1  ;;  %v1877_v49 = vld [vmem:[%s7952_s26 + $0x118] sm:$0xff]  ;;  %v7030_v46 = vpop.f32.mrb[52].mxu0  ;;  %v1911_v1 = vld [vmem:[%s7923_s23 + $0x28] sm:$0xff] }
 0x482   : > { %v1138_v45 = vadd.f32 %v8352_v41, %v7030_v46 }
 0x483   : > { %7126 = vmatmul.mubr.msk.f32.gmra.mrb[50].mxu1 %vm1264_vm2, %v1242_v58  ;;  %v8550_v38 = vadd.f32 %v2668_v47, %v1694_v26  ;;  %v2165_v47 = vcombine.high %v2155_v57, %v2155_v57  ;;  %v1132_v58 = vpop.f32.mrb[53].mxu0 }
 0x484   : > { %v1244_v24 = vmax.f32 %v1138_v45, 0.0  ;;  %v2873_v45 = vsel %vm1264_vm2, %v8477_v25, 0.0 }
 0x485   : > { %11671 = vst [vmem:[#allocation22_spill] sm:$0xff] %v8550_v38  ;;  %v8569_v54 = vpop.f32.mrb[42].mxu1 }
 0x492   : > { %5085 = vrot.lane.b32.xlu1 %v1694_v26, %s7699_s19  ;;  %v2457_v26 = vrot.slane %v2165_v47, %v7945_v55  ;;  %v1733_v47 = vpop.f32.mrb[43].mxu1 }
 0x493   : > { %5083 = vrot.lane.b32.xlu0 %v1689_v36, %s7699_s19  ;;  %v2864_v36 = vsel %vm1264_vm2, %v8550_v38, 0.0 }
 0x494   : > { %v2669_v12 = vsub.f32 %v2457_v26, %v1877_v49  ;;  %v8589_v26 = vadd.f32 %v8460_v51, %v1733_v47  ;;  %v1884_v49 = vld [vmem:[%s7952_s26 + $0x150] sm:$0xff] }
 0x496   : > { %v8575_v57 = vadd.f32 %v2669_v12, %v1699_v9 }
 0x498   : > { %11672 = vst [vmem:[#allocation23_spill] sm:$0xff] %v8575_v57 }
 0x4b2   : > { %2862 = vadd.xlane.f32.xlu0 %v2861_v53  ;;  %v8573_v53 = vrot.slane %v1911_v1, %v7926_v43 }
 0x4b4   : > { %v8579_v0 = vrot.slane %v8573_v53, %v7926_v43 }
 0x4b6   : > { %2865 = vadd.xlane.f32.xlu1 %v2864_v36  ;;  %v2212_v50 = vcombine.high %v8579_v0, %v8579_v0  ;;  %v2867_v36 = vsel %vm1264_vm2, %v8575_v57, 0.0 }
 0x4c7   : > { %5091 = vrot.lane.b32.xlu1 %v8463_v30, %s7699_s19  ;;  %v1133_v30 = vadd.f32 %v8352_v41, %v1132_v58  ;;  %v2870_v58 = vsel %vm1264_vm2, %v8480_v6, 0.0 }
 0x4c8   : > { %5087 = vrot.lane.b32.xlu0 %v1699_v9, %s7699_s19  ;;  %v2485_v9 = vrot.slane %v2212_v50, %v7945_v55  ;;  %v7033_v50 = vpop.f32.mrb[54].mxu0 }
 0x4c9   : > { %v1148_v47 = vadd.f32 %v8352_v41, %v7033_v50 }
 0x4ca   : > { %v2676_v46 = vsub.f32 %v2485_v9, %v1884_v49  ;;  %v1142_v9 = vpop.f32.mrb[55].mxu0 }
 0x4cb   : > { %5089 = vrot.lane.b32.xlu1 %v8466_v29, %s7699_s19  ;;  %v1243_v29 = vmax.f32 %v1133_v30, 0.0  ;;  %v599_v30 = vld [vmem:[%s7797_s21 + $0x1f0] sm:$0xff] }
 0x4cc   : > { %v8593_v12 = vadd.f32 %v2676_v46, %v8589_v26  ;;  %7043 = vmatprep.mubr.msk.f32.mxu0 %vm609_vm1, %v599_v30  ;;  %v1143_v46 = vadd.f32 %v8352_v41, %v1142_v9 }
 0x4cd   : > { %7128 = vmatprep.mubr.msk.f32.mxu1 %vm1264_vm2, %v1243_v29  ;;  %v2167_v29 = vcombine.high %v1911_v1, %v1911_v1 }
 0x4ce   : > { %7129 = vmatmul.mubr.msk.f32.gmra.mrb[52].mxu1 %vm1264_vm2, %v1244_v24  ;;  %11673 = vst [vmem:[#allocation24_spill] sm:$0xff] %v8593_v12  ;;  %v600_v24 = vld [vmem:[%s7797_s21 + $0x1f8] sm:$0xff]  ;;  %s7700_s21 = smov 112  }
 0x4cf   : > { %7044 = vmatmul.mubr.msk.f32.gmra.mrb[62].mxu0 %vm609_vm1, %v600_v24  ;;  %v1246_v24 = vmax.f32 %v1148_v47, 0.0 }
 0x4e7   : > { %2868 = vadd.xlane.f32.xlu0 %v2867_v36  ;;  %v2181_v36 = vrot.slane %v2167_v29, %v7926_v43 }
 0x4e9   : > { %v2183_v30 = vcombine.high %v2181_v36, %v2181_v36  ;;  %v2197_v50 = vrot.slane %v2181_v36, %v7926_v43 }
 0x4eb   : > { %v2211_v29 = vrot.slane %v2183_v30, %v7926_v43  ;;  %v1886_v30 = vld [vmem:[%s7952_s26 + $0x160] sm:$0xff] }
 0x4ed   : > { %v2497_v47 = vrot.slane %v2211_v29, %v7945_v55  ;;  %v2215_v48 = vcombine.high %v2211_v29, %v2211_v29  ;;  %v1888_v29 = vld [vmem:[%s7952_s26 + $0x170] sm:$0xff] }
 0x4ef   : > { %2874 = vadd.xlane.f32.xlu1 %v2873_v45 }
 0x4f3   : > { %2871 = vadd.xlane.f32.xlu1 %v2870_v58 }
 0x4f9   : > { %v7036_v58 = vpop.f32.mrb[56].mxu0 }
 0x4fa   : > { %v1152_v6 = vpop.f32.mrb[57].mxu0 }
 0x4fb   : > { %v1153_v1 = vadd.f32 %v8352_v41, %v1152_v6  ;;  %v1887_v6 = vld [vmem:[%s7952_s26 + $0x168] sm:$0xff] }
 0x4fc   : > { %v2679_v36 = vsub.f32 %v2497_v47, %v1887_v6  ;;  %v1889_v47 = vld [vmem:[%s7952_s26 + $0x178] sm:$0xff] }
 0x4fd   : > { %5095 = vrot.lane.b32.xlu0 %v8517_v21, %s7699_s19  ;;  %v1158_v21 = vadd.f32 %v8352_v41, %v7036_v58  ;;  %v1247_v38 = vmax.f32 %v1153_v1, 0.0  ;;  %v2493_v58 = vrot.slane %v2197_v50, %v7945_v55 }
 0x4fe   : > { %v7118_v49 = vpop.f32.mrb[44].mxu1 }
 0x4ff   : > { %v1743_v45 = vpop.f32.mrb[45].mxu1  ;;  %v8615_v25 = vadd.f32 %v8460_v51, %v7118_v49  ;;  %v2678_v49 = vsub.f32 %v2493_v58, %v1886_v30  ;;  %v2505_v58 = vrot.slane %v2215_v48, %v7945_v55  ;;  %v2477_v48 = vrot.slane %v8579_v0, %v7945_v55 }
 0x500   : > { %v8618_v9 = vadd.f32 %v8460_v51, %v1743_v45  ;;  %v2213_v45 = vcombine.high %v2197_v50, %v2197_v50 }
 0x501   : > { %v2681_v30 = vsub.f32 %v2505_v58, %v1889_v47 }
 0x502   : > { %v7121_v1 = vpop.f32.mrb[46].mxu1  ;;  %v2501_v56 = vrot.slane %v2213_v45, %v7945_v55  ;;  %v2876_v45 = vsel %vm1264_vm2, %v8525_v52, 0.0 }
 0x503   : > { %v1753_v57 = vpop.f32.mrb[47].mxu1 }
 0x504   : > { %5093 = vrot.lane.b32.xlu1 %v8512_v15, %s7699_s19  ;;  %v1245_v15 = vmax.f32 %v1143_v46, 0.0  ;;  %v1248_v46 = vmax.f32 %v1158_v21, 0.0  ;;  %v8630_v21 = vadd.f32 %v2679_v36, %v8615_v25  ;;  %v1754_v50 = vadd.f32 %v8460_v51, %v1753_v57 }
 0x505   : > { %v2680_v6 = vsub.f32 %v2501_v56, %v1888_v29  ;;  %v1724_v57 = vadd.f32 %v8460_v51, %v8542_v20  ;;  %v1882_v56 = vld [vmem:[%s7952_s26 + $0x140] sm:$0xff]  ;;  %v7039_v29 = vpop.f32.mrb[58].mxu0 }
 0x506   : > { %7131 = vmatprep.mubr.msk.f32.mxu1 %vm1264_vm2, %v1245_v15  ;;  %v2879_v15 = vsel %vm1264_vm2, %v8522_v33, 0.0  ;;  %11674 = vst [vmem:[#allocation25_spill] sm:$0xff] %v8630_v21  ;;  %v1168_v47 = vadd.f32 %v8352_v41, %v7039_v29  ;;  %v1162_v20 = vpop.f32.mrb[59].mxu0 }
 0x507   : > { %7132 = vmatmul.mubr.msk.f32.gmra.mrb[54].mxu1 %vm1264_vm2, %v1246_v24  ;;  %v8633_v24 = vadd.f32 %v2678_v49, %v8618_v9  ;;  %v8644_v36 = vadd.f32 %v2680_v6, %v1754_v50  ;;  %v1163_v58 = vadd.f32 %v8352_v41, %v1162_v20 }
 0x508   : > { %7134 = vmatprep.mubr.msk.f32.mxu1 %vm1264_vm2, %v1247_v38  ;;  %v8637_v38 = vadd.f32 %v8460_v51, %v7121_v1  ;;  %v2182_v1 = vcombine.high %v8573_v53, %v8573_v53  ;;  %v1250_v6 = vmax.f32 %v1168_v47, 0.0  ;;  %v1739_v47 = vadd.f32 %v8460_v51, %v8569_v54 }
 0x509   : > { %11675 = vst [vmem:[#allocation26_spill] sm:$0xff] %v8633_v24  ;;  %11676 = vst [vmem:[#allocation27_spill] sm:$0xff] %v8644_v36 }
 0x50a   : > { %v8647_v49 = vadd.f32 %v2681_v30, %v8637_v38 }
 0x50b   : > { %7135 = vmatmul.mubr.msk.f32.gmra.mrb[56].mxu1 %vm1264_vm2, %v1248_v46  ;;  %v1729_v46 = vadd.f32 %v8460_v51, %v8538_v34  ;;  %v2204_v34 = vrot.slane %v2182_v1, %v7926_v43 }
 0x50c   : > { %11677 = vst [vmem:[#allocation28_spill] sm:$0xff] %v8647_v49 }
 0x50d   : > { %v2481_v0 = vrot.slane %v2204_v34, %v7945_v55  ;;  %v2214_v20 = vcombine.high %v2204_v34, %v2204_v34 }
 0x51c   : > { %2880 = vadd.xlane.f32.xlu0 %v2879_v15  ;;  %v2674_v15 = vsub.f32 %v2477_v48, %v1882_v56  ;;  %v1883_v56 = vld [vmem:[%s7952_s26 + $0x148] sm:$0xff] }
 0x51e   : > { %v8664_v30 = vadd.f32 %v2674_v15, %v1724_v57 }
 0x520   : > { %11678 = vst [vmem:[#allocation29_spill] sm:$0xff] %v8664_v30  ;;  %v2882_v53 = vsel %vm1264_vm2, %v8664_v30, 0.0  ;;  %v1895_v30 = vld [vmem:[%s7952_s26 + $0x1a8] sm:$0xff] }
 0x528   : > { %2877 = vadd.xlane.f32.xlu1 %v2876_v45  ;;  %v1249_v45 = vmax.f32 %v1163_v58, 0.0  ;;  %v2489_v58 = vrot.slane %v2214_v20, %v7945_v55 }
 0x52a   : > { %7137 = vmatprep.mubr.msk.f32.mxu1 %vm1264_vm2, %v1249_v45 }
 0x52b   : > { %7138 = vmatmul.mubr.msk.f32.gmra.mrb[58].mxu1 %vm1264_vm2, %v1250_v6  ;;  %v1885_v6 = vld [vmem:[%s7952_s26 + $0x158] sm:$0xff] }
 0x52c   : > { %v2677_v45 = vsub.f32 %v2489_v58, %v1885_v6  ;;  %v2894_v6 = vsel %vm1264_vm2, %v8633_v24, 0.0 }
 0x532   : > { %5097 = vrot.lane.b32.xlu0 %v1724_v57, %s7699_s19  ;;  %v2675_v57 = vsub.f32 %v2481_v0, %v1883_v56 }
 0x534   : > { %v8675_v15 = vadd.f32 %v2675_v57, %v1729_v46 }
 0x536   : > { %v8672_v48 = vpop.f32.mrb[48].mxu1  ;;  %11679 = vst [vmem:[#allocation30_spill] sm:$0xff] %v8675_v15  ;;  %v2885_v1 = vsel %vm1264_vm2, %v8675_v15, 0.0 }
 0x537   : > { %v1763_v29 = vpop.f32.mrb[49].mxu1  ;;  %v7042_v54 = vpop.f32.mrb[60].mxu0 }
 0x538   : > { %v1178_v57 = vadd.f32 %v8352_v41, %v7042_v54 }
 0x539   : > { %5099 = vrot.lane.b32.xlu1 %v1729_v46, %s7699_s19 }
 0x53a   : > { %v1252_v34 = vmax.f32 %v1178_v57, 0.0 }
 0x551   : > { %2883 = vadd.xlane.f32.xlu0 %v2882_v53  ;;  %v8686_v53 = vadd.f32 %v2677_v45, %v1739_v47 }
 0x553   : > { %11680 = vst [vmem:[#allocation31_spill] sm:$0xff] %v8686_v53  ;;  %v2891_v56 = vsel %vm1264_vm2, %v8686_v53, 0.0 }
 0x556   : > { %v8688_v46 = vpop.f32.mrb[50].mxu1 }
 0x557   : > { %v1773_v0 = vpop.f32.mrb[51].mxu1 }
 0x55d   : > { %2886 = vadd.xlane.f32.xlu1 %v2885_v1  ;;  %v1172_v1 = vpop.f32.mrb[61].mxu0 }
 0x567   : > { %5103 = vrot.lane.b32.xlu0 %v1739_v47, %s7699_s19  ;;  %v2888_v47 = vsel %vm1264_vm2, %v8593_v12, 0.0  ;;  %v1892_v12 = vld [vmem:[%s7952_s26 + $0x190] sm:$0xff] }
 0x56e   : > { %5101 = vrot.lane.b32.xlu1 %v8589_v26, %s7699_s19  ;;  %v1173_v26 = vadd.f32 %v8352_v41, %v1172_v1  ;;  %v1764_v1 = vadd.f32 %v8460_v51, %v1763_v29 }
 0x570   : > { %v1251_v15 = vmax.f32 %v1173_v26, 0.0  ;;  %v1912_v26 = vld [vmem:[%s7923_s23 + $0x30] sm:$0xff] }
 0x572   : > { %7140 = vmatprep.mubr.msk.f32.mxu1 %vm1264_vm2, %v1251_v15  ;;  %v2897_v15 = vsel %vm1264_vm2, %v8630_v21, 0.0 }
 0x573   : > { %7141 = vmatmul.mubr.msk.f32.gmra.mrb[60].mxu1 %vm1264_vm2, %v1252_v34  ;;  %v2223_v34 = vrot.slane %v1912_v26, %v7926_v43 }
 0x586   : > { %2892 = vadd.xlane.f32.xlu0 %v2891_v56 }
 0x592   : > { %2889 = vadd.xlane.f32.xlu1 %v2888_v47  ;;  %v2239_v47 = vrot.slane %v2223_v34, %v7926_v43 }
 0x59c   : > { %5107 = vrot.lane.b32.xlu0 %v8615_v25, %s7699_s19  ;;  %v2900_v25 = vsel %vm1264_vm2, %v8644_v36, 0.0  ;;  %v8741_v36 = vpop.permute.xlu1 %5019 }
 0x5a0   : > { %5105 = vrot.lane.b32.xlu0 %v8618_v9, %s7699_s19 }
 0x5a1   : > { %v7130_v20 = vpop.f32.mrb[52].mxu1 }
 0x5a2   : > { %v8703_v58 = vpop.f32.mrb[53].mxu1  ;;  %v7045_v45 = vpop.f32.mrb[62].mxu0 }
 0x5a3   : > { %5109 = vrot.lane.b32.xlu1 %v1754_v50, %s7699_s19  ;;  %v1188_v9 = vadd.f32 %v8352_v41, %v7045_v45  ;;  %v1182_v50 = vpop.f32.mrb[63].mxu0 }
 0x5a4   : > { %v1183_v56 = vadd.f32 %v8352_v41, %v1182_v50  ;;  %v2509_v41 = vrot.slane %v2239_v47, %v7945_v55 }
 0x5a5   : > { %v1254_v54 = vmax.f32 %v1188_v9, 0.0 }
 0x5a6   : > { %v1253_v57 = vmax.f32 %v1183_v56, 0.0 }
 0x5a8   : > { %7143 = vmatprep.mubr.msk.f32.mxu1 %vm1264_vm2, %v1253_v57  ;;  %v1769_v57 = vadd.f32 %v8460_v51, %v8672_v48 }
 0x5a9   : > { %7144 = vmatmul.mubr.msk.f32.gmra.mrb[62].mxu1 %vm1264_vm2, %v1254_v54  ;;  %v1774_v54 = vadd.f32 %v8460_v51, %v1773_v0 }
 0x5bf   : > { %2898 = vadd.xlane.f32.xlu0 %v2897_v15 }
 0x5c3   : > { %2895 = vadd.xlane.f32.xlu0 %v2894_v6 }
 0x5c7   : > { %2901 = vadd.xlane.f32.xlu1 %v2900_v25  ;;  %v1890_v25 = vld [vmem:[%s7952_s26 + $0x180] sm:$0xff] }
 0x5c8   : > { %v2682_v9 = vsub.f32 %v2509_v41, %v1890_v25  ;;  %v8744_v41 = vpop.permute.xlu0 %5017 }
 0x5ca   : > { %v8734_v50 = vadd.f32 %v2682_v9, %v1764_v1 }
 0x5cc   : > { %11681 = vst [vmem:[#allocation32_spill] sm:$0xff] %v8734_v50  ;;  %v2906_v56 = vsel %vm1264_vm2, %v8734_v50, 0.0  ;;  %v8760_v21 = vpop.xlane.xlu0 %2766 }
 0x5d8   : > { %5113 = vrot.lane.b32.xlu1 %v1764_v1, %s7699_s19  ;;  %v2231_v1 = vcombine.high %v2223_v34, %v2223_v34 }
 0x5d9   : > { %5111 = vrot.lane.b32.xlu0 %v8637_v38, %s7699_s19  ;;  %v2903_v38 = vsel %vm1264_vm2, %v8647_v49, 0.0 }
 0x5da   : > { %v8722_v15 = vpop.f32.mrb[54].mxu1  ;;  %v2253_v25 = vrot.slane %v2231_v1, %v7926_v43  ;;  %v8764_v1 = vpop.permute.xlu1 %5023 }
 0x5db   : > { %v8725_v6 = vpop.f32.mrb[55].mxu1 }
 0x5dc   : > { %v2513_v9 = vrot.slane %v2253_v25, %v7945_v55 }
 0x5de   : > { %v8728_v45 = vpop.f32.mrb[56].mxu1 }
 0x5df   : > { %v8730_v29 = vpop.f32.mrb[57].mxu1 }
 0x5f8   : > { %2904 = vadd.xlane.f32.xlu0 %v2903_v38  ;;  %v2261_v38 = vcombine.high %v2239_v47, %v2239_v47 }
 0x5fa   : > { %v2517_v0 = vrot.slane %v2261_v38, %v7945_v55  ;;  %v2263_v38 = vcombine.high %v2253_v25, %v2253_v25 }
 0x5fc   : > { %2907 = vadd.xlane.f32.xlu1 %v2906_v56  ;;  %v1891_v56 = vld [vmem:[%s7952_s26 + $0x188] sm:$0xff]  ;;  %v2684_v49 = vsub.f32 %v2517_v0, %v1892_v12  ;;  %v1779_v12 = vadd.f32 %v8460_v51, %v8688_v46 }
 0x5fd   : > { %v2683_v50 = vsub.f32 %v2513_v9, %v1891_v56  ;;  %v1789_v9 = vadd.f32 %v8460_v51, %v7130_v20  ;;  %v2216_v20 = vcombine.high %v1912_v26, %v1912_v26  ;;  %v2521_v56 = vrot.slane %v2263_v38, %v7945_v55 }
 0x5fe   : > { %v8752_v48 = vpop.f32.mrb[58].mxu1  ;;  %v8756_v24 = vadd.f32 %v2684_v49, %v1774_v54  ;;  %v8769_v49 = vpop.permute.xlu1 %5021 }
 0x5ff   : > { %v8754_v52 = vadd.f32 %v2683_v50, %v1769_v57  ;;  %v8772_v50 = vpop.xlane.xlu0 %2763  ;;  %v2230_v46 = vrot.slane %v2216_v20, %v7926_v43  ;;  %v8789_v33 = vpop.f32.mrb[59].mxu1 }
 0x600   : > { %11683 = vst [vmem:[#allocation34_spill] sm:$0xff] %v8756_v24  ;;  %v2912_v47 = vsel %vm1264_vm2, %v8756_v24, 0.0 }
 0x601   : > { %11682 = vst [vmem:[#allocation33_spill] sm:$0xff] %v8754_v52  ;;  %v2909_v34 = vsel %vm1264_vm2, %v8754_v52, 0.0  ;;  %v2232_v0 = vcombine.high %v2230_v46, %v2230_v46  ;;  %v2246_v53 = vrot.slane %v2230_v46, %v7926_v43 }
 0x603   : > { %v2260_v24 = vrot.slane %v2232_v0, %v7926_v43  ;;  %v2525_v25 = vrot.slane %v2246_v53, %v7945_v55  ;;  %v1894_v0 = vld [vmem:[%s7952_s26 + $0x1a0] sm:$0xff] }
 0x605   : > { %v2264_v28 = vcombine.high %v2260_v24, %v2260_v24 }
 0x60d   : > { %5117 = vrot.lane.b32.xlu1 %v1774_v54, %s7699_s19  ;;  %v1784_v54 = vadd.f32 %v8460_v51, %v8703_v58  ;;  %v2529_v58 = vrot.slane %v2260_v24, %v7945_v55  ;;  %v1905_v24 = vld [vmem:[%s7952_s26 + $0x1f8] sm:$0xff] }
 0x60e   : > { %5115 = vrot.lane.b32.xlu0 %v1769_v57, %s7699_s19  ;;  %v8777_v57 = vpop.xlane.xlu1 %2772 }
 0x60f   : > { %v2687_v26 = vsub.f32 %v2529_v58, %v1895_v30 }
 0x62d   : > { %2910 = vadd.xlane.f32.xlu0 %v2909_v34  ;;  %v1893_v34 = vld [vmem:[%s7952_s26 + $0x198] sm:$0xff] }
 0x631   : > { %2913 = vadd.xlane.f32.xlu1 %v2912_v47  ;;  %v2685_v47 = vsub.f32 %v2521_v56, %v1893_v34  ;;  %v8796_v56 = vpop.permute.xlu0 %5031  ;;  %v2686_v34 = vsub.f32 %v2525_v25, %v1894_v0  ;;  %v1913_v25 = vld [vmem:[%s7923_s23 + $0x38] sm:$0xff] }
 0x632   : > { %v2272_v0 = vrot.slane %v1913_v25, %v7926_v43 }
 0x633   : > { %v8784_v52 = vadd.f32 %v2685_v47, %v1779_v12  ;;  %v8803_v47 = vpop.xlane.xlu1 %2769  ;;  %v8805_v30 = vadd.f32 %v2686_v34, %v1784_v54 }
 0x635   : > { %11684 = vst [vmem:[#allocation35_spill] sm:$0xff] %v8784_v52  ;;  %v2915_v20 = vsel %vm1264_vm2, %v8784_v52, 0.0  ;;  %11686 = vst [vmem:[#allocation37_spill] sm:$0xff] %v8805_v30  ;;  %v2918_v52 = vsel %vm1264_vm2, %v8805_v30, 0.0 }
 0x637   : > { %v8811_v59 = vpop.permute.xlu1 %5027 }
 0x642   : > { %5123 = vrot.lane.b32.xlu1 %v1789_v9, %s7699_s19 }
 0x643   : > { %5119 = vrot.lane.b32.xlu0 %v1779_v12, %s7699_s19  ;;  %v8799_v12 = vadd.f32 %v2687_v26, %v1789_v9  ;;  %v1804_v9 = vadd.f32 %v8460_v51, %v8730_v29  ;;  %v8815_v26 = vpop.xlane.xlu0 %2784  ;;  %v8831_v29 = vrot.slane %v2272_v0, %v7926_v43 }
 0x645   : > { %11685 = vst [vmem:[#allocation36_spill] sm:$0xff] %v8799_v12  ;;  %v2921_v58 = vsel %vm1264_vm2, %v8799_v12, 0.0  ;;  %v2265_v12 = vcombine.high %v1913_v25, %v1913_v25  ;;  %v1897_v25 = vld [vmem:[%s7952_s26 + $0x1b8] sm:$0xff] }
 0x646   : > { %5121 = vrot.lane.b32.xlu1 %v1784_v54, %s7699_s19  ;;  %v8794_v38 = vpop.f32.mrb[60].mxu1  ;;  %v1799_v54 = vadd.f32 %v8460_v51, %v8722_v15  ;;  %v2541_v15 = vrot.slane %v8831_v29, %v7945_v55 }
 0x647   : > { %v8801_v46 = vpop.f32.mrb[61].mxu1  ;;  %v8845_v8 = vpop.permute.xlu0 %5035 }
 0x662   : > { %2916 = vadd.xlane.f32.xlu0 %v2915_v20  ;;  %v8821_v20 = vpop.permute.xlu1 %5025 }
 0x666   : > { %v8827_v34 = vpop.xlane.xlu1 %2778 }
 0x66a   : > { %2922 = vadd.xlane.f32.xlu1 %v2921_v58  ;;  %v1898_v58 = vld [vmem:[%s7952_s26 + $0x1c0] sm:$0xff]  ;;  %v8865_v32 = vpop.xlane.xlu1 %2775 }
 0x66b   : > { %v2690_v30 = vsub.f32 %v2541_v15, %v1898_v58 }
 0x66d   : > { %v8836_v27 = vadd.f32 %v2690_v30, %v1804_v9  ;;  %v2537_v30 = vrot.slane %v2264_v28, %v7945_v55 }
 0x66e   : > { %2919 = vadd.xlane.f32.xlu1 %v2918_v52  ;;  %v1794_v52 = vadd.f32 %v8460_v51, %v8725_v6  ;;  %v8839_v6 = vrot.slane %v2265_v12, %v7926_v43 }
 0x66f   : > { %11687 = vst [vmem:[#allocation38_spill] sm:$0xff] %v8836_v27  ;;  %v2930_v31 = vsel %vm1264_vm2, %v8836_v27, 0.0  ;;  %v2689_v58 = vsub.f32 %v2537_v30, %v1897_v25 }
 0x670   : > { %v2281_v35 = vcombine.high %v8839_v6, %v8839_v6 }
 0x671   : > { %v8858_v13 = vadd.f32 %v2689_v58, %v1799_v54  ;;  %v1809_v58 = vadd.f32 %v8460_v51, %v8728_v45 }
 0x672   : > { %v8848_v15 = vrot.slane %v2281_v35, %v7926_v43 }
 0x673   : > { %11688 = vst [vmem:[#allocation39_spill] sm:$0xff] %v8858_v13 }
 0x674   : > { %v2313_v12 = vcombine.high %v8848_v15, %v8848_v15 }
 0x676   : > { %v2569_v22 = vrot.slane %v2313_v12, %v7945_v55 }
 0x678   : > { %5129 = vrot.lane.b32.xlu0 %v1804_v9, %s7699_s19  ;;  %v2262_v9 = vcombine.high %v2246_v53, %v2246_v53  ;;  %v2697_v35 = vsub.f32 %v2569_v22, %v1905_v24  ;;  %v1819_v22 = vadd.f32 %v8460_v51, %v8752_v48  ;;  %v2280_v48 = vcombine.high %v2272_v0, %v2272_v0 }
 0x67a   : > { %v2533_v27 = vrot.slane %v2262_v9, %v7945_v55  ;;  %v2927_v9 = vsel %vm1264_vm2, %v8858_v13, 0.0  ;;  %v2302_v24 = vrot.slane %v2280_v48, %v7926_v43  ;;  %v1899_v48 = vld [vmem:[%s7952_s26 + $0x1c8] sm:$0xff] }
 0x67c   : > { %v7145_v17 = vpop.f32.mrb[62].mxu1  ;;  %v2545_v45 = vrot.slane %v2302_v24, %v7945_v55 }
 0x67d   : > { %v8861_v28 = vadd.f32 %v8460_v51, %v7145_v17  ;;  %v8863_v53 = vpop.f32.mrb[63].mxu1 }
 0x67f   : > { %5127 = vrot.lane.b32.xlu1 %v1799_v54, %s7699_s19  ;;  %v8872_v12 = vadd.f32 %v2697_v35, %v8861_v28  ;;  %v7619_v54 = vld [vmem:[%s7952_s26] sm:$0xff]  ;;  %v2312_v35 = vcombine.high %v2302_v24, %v2302_v24  ;;  %v1824_v24 = vadd.f32 %v8460_v51, %v8801_v46  ;;  %v7621_v46 = vld [vmem:[%s7952_s26 + $0x8] sm:$0xff] }
 0x681   : > { %11690 = vst [vmem:[#allocation41_spill] sm:$0xff] %v8872_v12 }
 0x683   : > { %5125 = vrot.lane.b32.xlu1 %v1794_v52, %s7699_s19 }
 0x697   : > { %2931 = vadd.xlane.f32.xlu0 %v2930_v31  ;;  %v2688_v31 = vsub.f32 %v2533_v27, %v1896_v62  ;;  %v8878_v62 = vpop.permute.xlu1 %5029  ;;  %v8880_v27 = vpop.xlane.xlu0 %2790 }
 0x699   : > { %v8867_v30 = vadd.f32 %v2688_v31, %v1794_v52  ;;  %v5209_v52 = vadd.f32 %v7619_v54, %v8744_v41  ;;  %v1901_v41 = vld [vmem:[%s7952_s26 + $0x1d8] sm:$0xff] }
 0x69b   : > { %11689 = vst [vmem:[#allocation40_spill] sm:$0xff] %v8867_v30  ;;  %v2924_v17 = vsel %vm1264_vm2, %v8867_v30, 0.0  ;;  %v8885_v25 = vpop.permute.xlu0 %5039  ;;  %v8891_v31 = vpop.xlane.xlu1 %2781  ;;  %v2691_v30 = vsub.f32 %v2545_v45, %v1899_v48  ;;  %v5210_v48 = vadd.f32 %v7621_v46, %v8741_v36  ;;  %v2310_v36 = vcombine.high %v8831_v29, %v8831_v29 }
 0x69d   : > { %v8904_v13 = vadd.f32 %v2691_v30, %v1809_v58 }
 0x69f   : > { %v8900_v0 = vpop.permute.xlu0 %5037  ;;  %11692 = vst [vmem:[#allocation43_spill] sm:$0xff] %v8904_v13 }
 0x6a7   : > { %2928 = vadd.xlane.f32.xlu1 %v2927_v9  ;;  %v2553_v9 = vrot.slane %v2312_v35, %v7945_v55  ;;  %v2933_v35 = vsel %vm1264_vm2, %v8904_v13, 0.0 }
 0x6ab   : > { %2925 = vadd.xlane.f32.xlu1 %v2924_v17  ;;  %v2693_v17 = vsub.f32 %v2553_v9, %v1901_v41  ;;  %v8908_v9 = vpop.permute.xlu1 %5033  ;;  %v1829_v41 = vadd.f32 %v8460_v51, %v8794_v38  ;;  %v1814_v38 = vadd.f32 %v8460_v51, %v8789_v33 }
 0x6ad   : > { %5135 = vrot.lane.b32.xlu0 %v1819_v22, %s7699_s19  ;;  %v8896_v54 = vadd.f32 %v2693_v17, %v1819_v22  ;;  %v8910_v22 = vpop.xlane.xlu0 %2796 }
 0x6af   : > { %11691 = vst [vmem:[#allocation42_spill] sm:$0xff] %v8896_v54  ;;  %v8925_v45 = vpop.xlane.xlu1 %2787 }
 0x6b1   : > { %5337 = vrot.lane.b32.xlu0 %v5209_v52, %s7700_s21  ;;  %v2939_v52 = vsel %vm1264_vm2, %v8896_v54, 0.0  ;;  %v8917_v30 = vpop.xlane.xlu0 %2793  ;;  %v1902_v54 = vld [vmem:[%s7952_s26 + $0x1e0] sm:$0xff] }
 0x6bc   : > { %5131 = vrot.lane.b32.xlu1 %v1809_v58, %s7699_s19  ;;  %v7620_v58 = vld [vmem:[%s7952_s26 + $0x10] sm:$0xff] }
 0x6bd   : > { %v5211_v17 = vadd.f32 %v7620_v58, %v8769_v49  ;;  %v2561_v49 = vrot.slane %v8848_v15, %v7945_v55  ;;  %v2295_v58 = vrot.slane %v8839_v6, %v7926_v43  ;;  %v2549_v15 = vrot.slane %v2310_v36, %v7945_v55  ;;  %v1900_v6 = vld [vmem:[%s7952_s26 + $0x1d0] sm:$0xff] }
 0x6bf   : > { %v2557_v33 = vrot.slane %v2295_v58, %v7945_v55 }
 0x6c1   : > { %v2694_v2 = vsub.f32 %v2557_v33, %v1902_v54  ;;  %v7622_v33 = vld [vmem:[%s7952_s26 + $0x18] sm:$0xff] }
 0x6c2   : > { %v5212_v36 = vadd.f32 %v7622_v33, %v8764_v1  ;;  %v2311_v1 = vcombine.high %v2295_v58, %v2295_v58  ;;  %v1904_v33 = vld [vmem:[%s7952_s26 + $0x1f0] sm:$0xff] }
 0x6c3   : > { %v8946_v46 = vadd.f32 %v2694_v2, %v1824_v24 }
 0x6c5   : > { %11694 = vst [vmem:[#allocation45_spill] sm:$0xff] %v8946_v46 }
 0x6d0   : > { %2940 = vadd.xlane.f32.xlu0 %v2939_v52  ;;  %v8922_v52 = vpop.permute.xlu0 %5043 }
 0x6d4   : > { %v8951_v43 = vpop.permute.xlu0 %5041 }
 0x6d8   : > { %v8956_v54 = vpop.xlane.xlu0 %2802 }
 0x6e0   : > { %2934 = vadd.xlane.f32.xlu1 %v2933_v35  ;;  %v8932_v35 = vpop.permute.xlu1 %5045 }
 0x6e6   : > { %5139 = vrot.lane.b32.xlu0 %v1829_v41, %s7699_s19 }
 0x6ea   : > { %5137 = vrot.lane.b32.xlu0 %v1824_v24, %s7699_s19  ;;  %v8962_v24 = vpop.xlane.xlu1 %2805 }
 0x6ee   : > { %5341 = vrot.lane.b32.xlu0 %v5211_v17, %s7700_s21  ;;  %v1903_v17 = vld [vmem:[%s7952_s26 + $0x1e8] sm:$0xff] }
 0x6ef   : > { %v2695_v13 = vsub.f32 %v2561_v49, %v1903_v17  ;;  %v1834_v49 = vadd.f32 %v8460_v51, %v8863_v53  ;;  %v8966_v17 = vpop.xlane.xlu0 %2799 }
 0x6f1   : > { %5133 = vrot.lane.b32.xlu1 %v1814_v38, %s7699_s19  ;;  %v8942_v42 = vadd.f32 %v2695_v13, %v1829_v41  ;;  %v2942_v13 = vsel %vm1264_vm2, %v8946_v46, 0.0  ;;  %v2692_v41 = vsub.f32 %v2549_v15, %v1900_v6  ;;  %v7623_v15 = vld [vmem:[%s7952_s26 + $0x28] sm:$0xff]  ;;  %v7624_v6 = vld [vmem:[%s7952_s26 + $0x20] sm:$0xff] }
 0x6f2   : > { %v5214_v51 = vadd.f32 %v7623_v15, %v8811_v59 }
 0x6f3   : > { %11693 = vst [vmem:[#allocation44_spill] sm:$0xff] %v8942_v42  ;;  %v8958_v2 = vadd.f32 %v2692_v41, %v1814_v38  ;;  %v8971_v38 = vpop.permute.xlu1 %5049 }
 0x6f5   : > { %5339 = vrot.lane.b32.xlu1 %v5210_v48, %s7700_s21  ;;  %v2945_v48 = vsel %vm1264_vm2, %v8942_v42, 0.0  ;;  %11695 = vst [vmem:[#allocation46_spill] sm:$0xff] %v8958_v2  ;;  %v2936_v29 = vsel %vm1264_vm2, %v8958_v2, 0.0 }
 0x70d   : > { %2946 = vadd.xlane.f32.xlu0 %v2945_v48  ;;  %v8974_v48 = vpop.xlane.xlu1 %2811 }
 0x711   : > { %2943 = vadd.xlane.f32.xlu0 %v2942_v13  ;;  %v8980_v53 = vpop.permute.xlu1 %5053  ;;  %v5213_v13 = vadd.f32 %v7624_v6, %v8821_v20 }
 0x715   : > { %v8985_v41 = vpop.xlane.xlu1 %2817 }
 0x719   : > { %2937 = vadd.xlane.f32.xlu1 %v2936_v29  ;;  %v2565_v29 = vrot.slane %v2311_v1, %v7945_v55  ;;  %v9002_v55 = vpop.permute.xlu1 %5059  ;;  %v2951_v1 = vsel %vm1264_vm2, %v8872_v12, 0.0  ;;  %v7627_v12 = vld [vmem:[%s7952_s26 + $0x58] sm:$0xff] }
 0x71d   : > { %v9013_v2 = vpop.permute.xlu1 %5057 }
 0x727   : > { %5141 = vrot.lane.b32.xlu0 %v1834_v49, %s7699_s19 }
 0x72a   : > { %5343 = vrot.lane.b32.xlu1 %v5212_v36, %s7700_s21  ;;  %v2696_v36 = vsub.f32 %v2565_v29, %v1904_v33 }
 0x72c   : > { %v8992_v15 = vadd.f32 %v2696_v36, %v1834_v49  ;;  %v7625_v49 = vld [vmem:[%s7952_s26 + $0x38] sm:$0xff]  ;;  %v7626_v36 = vld [vmem:[%s7952_s26 + $0x48] sm:$0xff] }
 0x72d   : > { %v5216_v29 = vadd.f32 %v7625_v49, %v8796_v56  ;;  %v5220_v56 = vadd.f32 %v7627_v12, %v8885_v25  ;;  %v7630_v25 = vld [vmem:[%s7952_s26 + $0x68] sm:$0xff] }
 0x72e   : > { %5143 = vrot.lane.b32.xlu1 %v8861_v28, %s7699_s19  ;;  %v5048_v28 = vpop.permute.xlu0 %5047  ;;  %11696 = vst [vmem:[#allocation47_spill] sm:$0xff] %v8992_v15  ;;  %v5222_v42 = vadd.f32 %v7630_v25, %v8922_v52  ;;  %v7633_v52 = vld [vmem:[%s7952_s26 + $0x70] sm:$0xff] }
 0x732   : > { %5347 = vrot.lane.b32.xlu1 %v5214_v51, %s7700_s21  ;;  %v8990_v59 = vpop.xlane.xlu0 %2808  ;;  %v2948_v51 = vsel %vm1264_vm2, %v8992_v15, 0.0 }
 0x736   : > { %5345 = vrot.lane.b32.xlu1 %v5213_v13, %s7700_s21  ;;  %v5052_v20 = vpop.permute.xlu0 %5051 }
 0x73a   : > { %v8996_v58 = vpop.xlane.xlu0 %2814 }
 0x73e   : > { %v8998_v6 = vpop.permute.xlu0 %5055 }
 0x742   : > { %v9000_v13 = vpop.xlane.xlu0 %2820 }
 0x746   : > { %2949 = vadd.xlane.f32.xlu0 %v2948_v51  ;;  %v9008_v33 = vpop.permute.xlu0 %5063  ;;  %v5218_v51 = vadd.f32 %v7626_v36, %v8845_v8 }
 0x747   : > { %11697 = vst [vmem:[#allocation48_spill] sm:$0xff] %v9008_v33 }
 0x74a   : > { %v9015_v15 = vpop.xlane.xlu0 %2832 }
 0x74e   : > { %v9023_v49 = vpop.permute.xlu0 %5065 }
 0x752   : > { %v9032_v12 = vpop.xlane.xlu0 %2835 }
 0x75a   : > { %2952 = vadd.xlane.f32.xlu1 %v2951_v1  ;;  %v9020_v1 = vpop.xlane.xlu1 %2826 }
 0x75b   : > { %11698 = vst [vmem:[#allocation49_spill] sm:$0xff] %v9020_v1 }
 0x75c   : > { %5351 = vrot.lane.b32.xlu0 %v5216_v29, %s7700_s21  ;;  %v7628_v29 = vld [vmem:[%s7952_s26 + $0x50] sm:$0xff] }
 0x75d   : > { %v5219_v8 = vadd.f32 %v7628_v29, %v8900_v0  ;;  %v7632_v29 = vld [vmem:[%s7952_s26 + $0x60] sm:$0xff] }
 0x75e   : > { %v9027_v36 = vpop.xlane.xlu1 %2823 }
 0x75f   : > { %11699 = vst [vmem:[#allocation50_spill] sm:$0xff] %v9027_v36 }
 0x760   : > { %5355 = vrot.lane.b32.xlu0 %v5218_v51, %s7700_s21  ;;  %v7629_v51 = vld [vmem:[%s7952_s26 + $0x30] sm:$0xff] }
 0x761   : > { %v5215_v46 = vadd.f32 %v7629_v51, %v8878_v62  ;;  %v9044_v62 = vpop.permute.xlu0 %5071 }
 0x762   : > { %v9042_v33 = vpop.permute.xlu1 %5061 }
 0x764   : > { %5359 = vrot.lane.b32.xlu0 %v5220_v56, %s7700_s21  ;;  %v7631_v56 = vld [vmem:[%s7952_s26 + $0x40] sm:$0xff] }
 0x765   : > { %v5217_v0 = vadd.f32 %v7631_v56, %v8908_v9  ;;  %v9053_v9 = vpop.xlane.xlu0 %2844 }
 0x766   : > { %v9051_v25 = vpop.xlane.xlu1 %2829 }
 0x767   : > { %11700 = vst [vmem:[#allocation51_spill] sm:$0xff] %v9051_v25 }
 0x768   : > { %5357 = vrot.lane.b32.xlu0 %v5219_v8, %s7700_s21  ;;  %v5221_v8 = vadd.f32 %v7632_v29, %v8951_v43  ;;  %v7635_v43 = vld [vmem:[%s7952_s26 + $0x80] sm:$0xff]  ;;  %v7636_v29 = vld [vmem:[%s7952_s26 + $0x88] sm:$0xff] }
 0x769   : > { %v5225_v56 = vadd.f32 %v7635_v43, %v8971_v38 }
 0x76b   : > { %5349 = vrot.lane.b32.xlu1 %v5215_v46, %s7700_s21  ;;  %v5223_v46 = vadd.f32 %v7633_v52, %v8932_v35  ;;  %v9064_v35 = vpop.permute.xlu0 %5075 }
 0x76c   : > { %5363 = vrot.lane.b32.xlu0 %v5222_v42, %s7700_s21  ;;  %v7634_v42 = vld [vmem:[%s7952_s26 + $0x78] sm:$0xff] }
 0x76d   : > { %v5224_v51 = vadd.f32 %v7634_v42, %v5048_v28 }
 0x76f   : > { %5353 = vrot.lane.b32.xlu1 %v5217_v0, %s7700_s21  ;;  %v5226_v0 = vadd.f32 %v7636_v29, %v5052_v20  ;;  %v9068_v52 = vpop.permute.xlu0 %5073  ;;  %v2955_v20 = vmul.f32 0.0625, %v8772_v50 }
 0x770   : > { %5361 = vrot.lane.b32.xlu0 %v5221_v8, %s7700_s21  ;;  %v9061_v8 = vpop.permute.xlu1 %5067 }
 0x771   : > { %v9083_v29 = vsub.f32 %v7965_v3, %v2955_v20 }
 0x773   : > { %5365 = vrot.lane.b32.xlu1 %v5223_v46, %s7700_s21  ;;  %v9072_v42 = vpop.xlane.xlu0 %2850 }
 0x774   : > { %5367 = vrot.lane.b32.xlu0 %v5224_v51, %s7700_s21  ;;  %v9066_v28 = vpop.xlane.xlu1 %2838 }
 0x775   : > { %11701 = vst [vmem:[#allocation52_spill] sm:$0xff] %v9066_v28 }
 0x777   : > { %5369 = vrot.lane.b32.xlu1 %v5225_v56, %s7700_s21  ;;  %v9076_v38 = vpop.xlane.xlu0 %2847  ;;  %v2956_v56 = vmul.f32 0.0625, %v8760_v21 }
 0x778   : > { %5371 = vrot.lane.b32.xlu0 %v5226_v0, %s7700_s21  ;;  %v9070_v46 = vpop.permute.xlu1 %5069  ;;  %11703 = vst [vmem:[#allocation54_spill] sm:$0xff] %v9076_v38  ;;  %v7637_v38 = vld [vmem:[%s7952_s26 + $0x90] sm:$0xff] }
 0x779   : > { %v9090_v25 = vsub.f32 %v7961_v63, %v2956_v56 }
 0x77b   : > { %v9085_v0 = vpop.permute.xlu0 %5079  ;;  %v3084_v3 = vmul.f32 %v9090_v25, %v9090_v25 }
 0x77c   : > { %v9074_v51 = vpop.xlane.xlu1 %2841  ;;  %11705 = vst [vmem:[#allocation56_spill] sm:$0xff] %v9085_v0 }
 0x77d   : > { %11702 = vst [vmem:[#allocation53_spill] sm:$0xff] %v9074_v51  ;;  %v3083_v51 = vmul.f32 %v9083_v29, %v9083_v29  ;;  %v3150_v63 = vsel %vm1264_vm2, %v3084_v3, 0.0 }
 0x77f   : > { %v9094_v36 = vpop.xlane.xlu0 %2856  ;;  %v3147_v21 = vsel %vm1264_vm2, %v3083_v51, 0.0 }
 0x780   : > { %v9079_v43 = vpop.permute.xlu1 %5077  ;;  %11707 = vst [vmem:[#allocation58_spill] sm:$0xff] %v9094_v36 }
 0x781   : > { %11704 = vst [vmem:[#allocation55_spill] sm:$0xff] %v9079_v43 }
 0x783   : > { %v9101_v20 = vpop.permute.xlu0 %5083 }
 0x784   : > { %v9087_v28 = vpop.xlane.xlu1 %2853 }
 0x785   : > { %11706 = vst [vmem:[#allocation57_spill] sm:$0xff] %v9087_v28 }
 0x787   : > { %v9106_v56 = vpop.xlane.xlu0 %2862 }
 0x788   : > { %v9096_v50 = vpop.permute.xlu1 %5081 }
 0x789   : > { %11708 = vst [vmem:[#allocation59_spill] sm:$0xff] %v9096_v50  ;;  %v7638_v50 = vld [vmem:[%s7952_s26 + $0x98] sm:$0xff] }
 0x78b   : > { %v9110_v28 = vpop.permute.xlu0 %5087 }
 0x78c   : > { %v9103_v0 = vpop.xlane.xlu1 %2859  ;;  %11711 = vst [vmem:[#allocation62_spill] sm:$0xff] %v9110_v28 }
 0x78d   : > { %11709 = vst [vmem:[#allocation60_spill] sm:$0xff] %v9103_v0  ;;  %v5228_v0 = vadd.f32 %v7638_v50, %v8998_v6  ;;  %v2957_v6 = vmul.f32 0.0625, %v8803_v47 }
 0x78f   : > { %v9114_v51 = vpop.xlane.xlu0 %2868 }
 0x790   : > { %v9108_v43 = vpop.permute.xlu1 %5085 }
 0x791   : > { %11710 = vst [vmem:[#allocation61_spill] sm:$0xff] %v9108_v43 }
 0x793   : > { %v9123_v3 = vpop.permute.xlu0 %5095 }
 0x794   : > { %v9112_v36 = vpop.xlane.xlu1 %2865  ;;  %11714 = vst [vmem:[#allocation65_spill] sm:$0xff] %v9123_v3  ;;  %v9145_v3 = vsub.f32 %v7986_v23, %v2957_v6 }
 0x795   : > { %11712 = vst [vmem:[#allocation63_spill] sm:$0xff] %v9112_v36 }
 0x797   : > { %3148 = vadd.xlane.f32.xlu0 %v3147_v21  ;;  %v5227_v21 = vadd.f32 %v7637_v38, %v8980_v53  ;;  %v9128_v28 = vpop.xlane.xlu0 %2880 }
 0x798   : > { %v9118_v1 = vpop.permute.xlu1 %5091 }
 0x799   : > { %11713 = vst [vmem:[#allocation64_spill] sm:$0xff] %v9118_v1 }
 0x79b   : > { %3151 = vadd.xlane.f32.xlu1 %v3150_v63  ;;  %v9132_v36 = vpop.permute.xlu0 %5097 }
 0x79c   : > { %v9126_v63 = vpop.permute.xlu1 %5089  ;;  %11717 = vst [vmem:[#allocation68_spill] sm:$0xff] %v9132_v36 }
 0x79d   : > { %11715 = vst [vmem:[#allocation66_spill] sm:$0xff] %v9126_v63  ;;  %v2962_v63 = vmul.f32 0.0625, %v8815_v26 }
 0x79f   : > { %v9136_v38 = vpop.xlane.xlu0 %2883  ;;  %v9156_v47 = vsub.f32 %v8008_v40, %v2962_v63 }
 0x7a0   : > { %v9130_v43 = vpop.xlane.xlu1 %2874 }
 0x7a1   : > { %11716 = vst [vmem:[#allocation67_spill] sm:$0xff] %v9130_v43 }
 0x7a4   : > { %v9134_v53 = vpop.xlane.xlu1 %2871 }
 0x7a5   : > { %11718 = vst [vmem:[#allocation69_spill] sm:$0xff] %v9134_v53 }
 0x7a8   : > { %v9139_v50 = vpop.permute.xlu1 %5093 }
 0x7a9   : > { %11719 = vst [vmem:[#allocation70_spill] sm:$0xff] %v9139_v50 }
 0x7ac   : > { %5373 = vrot.lane.b32.xlu1 %v5227_v21, %s7700_s21  ;;  %v9141_v21 = vpop.permute.xlu0 %5103  ;;  %v9148_v1 = vpop.xlane.xlu1 %2877 }
 0x7ad   : > { %5375 = vrot.lane.b32.xlu0 %v5228_v0, %s7700_s21  ;;  %11720 = vst [vmem:[#allocation71_spill] sm:$0xff] %v9141_v21  ;;  %v2958_v0 = vmul.f32 0.0625, %v8777_v57  ;;  %11721 = vst [vmem:[#allocation72_spill] sm:$0xff] %v9148_v1  ;;  %v3085_v21 = vmul.f32 %v9145_v3, %v9145_v3 }
 0x7af   : > { %v9153_v53 = vsub.f32 %v7977_v16, %v2958_v0  ;;  %v3153_v23 = vsel %vm1264_vm2, %v3085_v21, 0.0  ;;  %v3090_v16 = vmul.f32 %v9156_v47, %v9156_v47 }
 0x7b0   : > { %v9150_v36 = vpop.xlane.xlu0 %2892  ;;  %v9160_v50 = vpop.permute.xlu1 %5099 }
 0x7b1   : > { %11722 = vst [vmem:[#allocation73_spill] sm:$0xff] %v9160_v50  ;;  %v3086_v26 = vmul.f32 %v9153_v53, %v9153_v53  ;;  %v3168_v63 = vsel %vm1264_vm2, %v3090_v16, 0.0 }
 0x7b3   : > { %v3156_v40 = vsel %vm1264_vm2, %v3086_v26, 0.0 }
 0x7b4   : > { %v9162_v57 = vpop.permute.xlu0 %5107  ;;  %v9169_v6 = vpop.xlane.xlu1 %2886 }
 0x7b5   : > { %11723 = vst [vmem:[#allocation74_spill] sm:$0xff] %v9162_v57  ;;  %11724 = vst [vmem:[#allocation75_spill] sm:$0xff] %v9169_v6  ;;  %v7639_v6 = vld [vmem:[%s7952_s26 + $0xa8] sm:$0xff] }
 0x7b6   : > { %v5230_v26 = vadd.f32 %v7639_v6, %v9002_v55 }
 0x7b8   : > { %v9173_v0 = vpop.permute.xlu0 %5105  ;;  %v9175_v21 = vpop.permute.xlu1 %5101 }
 0x7b9   : > { %11725 = vst [vmem:[#allocation76_spill] sm:$0xff] %v9173_v0  ;;  %11726 = vst [vmem:[#allocation77_spill] sm:$0xff] %v9175_v21  ;;  %v7641_v0 = vld [vmem:[%s7952_s26 + $0xc0] sm:$0xff] }
 0x7ba   : > { %v5233_v21 = vadd.f32 %v7641_v0, %v9023_v49  ;;  %v2964_v49 = vmul.f32 0.0625, %v8880_v27 }
 0x7bc   : > { %v9177_v57 = vpop.xlane.xlu0 %2898  ;;  %v9179_v50 = vpop.xlane.xlu1 %2889 }
 0x7bd   : > { %11727 = vst [vmem:[#allocation78_spill] sm:$0xff] %v9179_v50 }
 0x7c0   : > { %v9181_v1 = vpop.xlane.xlu0 %2895 }
 0x7c4   : > { %v9187_v43 = vpop.permute.xlu0 %5111 }
 0x7c5   : > { %11729 = vst [vmem:[#allocation80_spill] sm:$0xff] %v9187_v43 }
 0x7c8   : > { %v9196_v50 = vpop.xlane.xlu0 %2904 }
 0x7cc   : > { %3154 = vadd.xlane.f32.xlu0 %v3153_v23  ;;  %v9183_v23 = vpop.permute.xlu1 %5109  ;;  %v9202_v55 = vpop.permute.xlu0 %5115 }
 0x7cd   : > { %11728 = vst [vmem:[#allocation79_spill] sm:$0xff] %v9183_v23  ;;  %11732 = vst [vmem:[#allocation83_spill] sm:$0xff] %v9202_v55 }
 0x7d0   : > { %3157 = vadd.xlane.f32.xlu1 %v3156_v40  ;;  %3169 = vadd.xlane.f32.xlu0 %v3168_v63  ;;  %v9190_v16 = vpop.xlane.xlu1 %2901  ;;  %v7640_v40 = vld [vmem:[%s7952_s26 + $0xa0] sm:$0xff] }
 0x7d1   : > { %11730 = vst [vmem:[#allocation81_spill] sm:$0xff] %v9190_v16  ;;  %v5229_v63 = vadd.f32 %v7640_v40, %v9013_v2 }
 0x7d4   : > { %v9200_v23 = vpop.permute.xlu1 %5113 }
 0x7d5   : > { %11731 = vst [vmem:[#allocation82_spill] sm:$0xff] %v9200_v23 }
 0x7d8   : > { %v9204_v6 = vpop.xlane.xlu1 %2907 }
 0x7d9   : > { %11733 = vst [vmem:[#allocation84_spill] sm:$0xff] %v9204_v6 }
 0x7dc   : > { %v9208_v43 = vpop.permute.xlu1 %5117 }
 0x7dd   : > { %11734 = vst [vmem:[#allocation85_spill] sm:$0xff] %v9208_v43 }
 0x7e0   : > { %v9212_v40 = vpop.xlane.xlu1 %2913 }
 0x7e1   : > { %5379 = vrot.lane.b32.xlu1 %v5230_v26, %s7700_s21  ;;  %v9206_v26 = vpop.xlane.xlu0 %2910  ;;  %11736 = vst [vmem:[#allocation87_spill] sm:$0xff] %v9212_v40 }
 0x7e4   : > { %v9221_v55 = vpop.permute.xlu1 %5123 }
 0x7e5   : > { %5377 = vrot.lane.b32.xlu1 %v5229_v63, %s7700_s21  ;;  %v9210_v2 = vpop.permute.xlu0 %5119  ;;  %v9219_v63 = vsub.f32 %v8055_v19, %v2964_v49  ;;  %11737 = vst [vmem:[#allocation88_spill] sm:$0xff] %v9221_v55 }
 0x7e6   : > { %5385 = vrot.lane.b32.xlu0 %v5233_v21, %s7700_s21  ;;  %11735 = vst [vmem:[#allocation86_spill] sm:$0xff] %v9210_v2  ;;  %v2960_v21 = vmul.f32 0.0625, %v8827_v34  ;;  %v2959_v2 = vmul.f32 0.0625, %v8865_v32 }
 0x7e7   : > { %v3092_v43 = vmul.f32 %v9219_v63, %v9219_v63 }
 0x7e8   : > { %v9226_v6 = vsub.f32 %v8032_v4, %v2960_v21  ;;  %v9231_v27 = vpop.permute.xlu1 %5121  ;;  %v9236_v34 = vsub.f32 %v8037_v7, %v2959_v2 }
 0x7e9   : > { %v9215_v0 = vpop.xlane.xlu0 %2916  ;;  %11739 = vst [vmem:[#allocation90_spill] sm:$0xff] %v9231_v27  ;;  %v3174_v19 = vsel %vm1264_vm2, %v3092_v43, 0.0 }
 0x7ea   : > { %v3088_v49 = vmul.f32 %v9226_v6, %v9226_v6  ;;  %v3087_v21 = vmul.f32 %v9236_v34, %v9236_v34 }
 0x7ec   : > { %v9241_v4 = vpop.xlane.xlu1 %2922  ;;  %v3162_v32 = vsel %vm1264_vm2, %v3088_v49, 0.0  ;;  %v3159_v2 = vsel %vm1264_vm2, %v3087_v21, 0.0  ;;  %v7642_v49 = vld [vmem:[%s7952_s26 + $0xd8] sm:$0xff] }
 0x7ed   : > { %v9223_v23 = vpop.permute.xlu0 %5129  ;;  %11740 = vst [vmem:[#allocation91_spill] sm:$0xff] %v9241_v4  ;;  %v5236_v4 = vadd.f32 %v7642_v49, %v9044_v62 }
 0x7ee   : > { %11738 = vst [vmem:[#allocation89_spill] sm:$0xff] %v9223_v23 }
 0x7f0   : > { %v9248_v7 = vpop.xlane.xlu1 %2919 }
 0x7f1   : > { %v9233_v40 = vpop.xlane.xlu0 %2931  ;;  %11742 = vst [vmem:[#allocation93_spill] sm:$0xff] %v9248_v7 }
 0x7f4   : > { %v9253_v27 = vpop.permute.xlu1 %5127 }
 0x7f5   : > { %v9246_v23 = vpop.permute.xlu0 %5135  ;;  %11743 = vst [vmem:[#allocation94_spill] sm:$0xff] %v9253_v27 }
 0x7f6   : > { %11741 = vst [vmem:[#allocation92_spill] sm:$0xff] %v9246_v23 }
 0x7f8   : > { %v9257_v55 = vpop.permute.xlu1 %5125 }
 0x7f9   : > { %v9251_v43 = vpop.permute.xlu0 %5337  ;;  %11744 = vst [vmem:[#allocation95_spill] sm:$0xff] %v9257_v55 }
 0x7fc   : > { %v9266_v21 = vpop.xlane.xlu1 %2928 }
 0x7fd   : > { %11746 = vst [vmem:[#allocation97_spill] sm:$0xff] %v9266_v21 }
 0x800   : > { %v9271_v27 = vpop.xlane.xlu1 %2925 }
 0x801   : > { %11748 = vst [vmem:[#allocation99_spill] sm:$0xff] %v9271_v27 }
 0x804   : > { %v9275_v55 = vpop.permute.xlu1 %5131 }
 0x805   : > { %3175 = vadd.xlane.f32.xlu0 %v3174_v19  ;;  %v9255_v19 = vpop.xlane.xlu0 %2940  ;;  %11749 = vst [vmem:[#allocation100_spill] sm:$0xff] %v9275_v55 }
 0x808   : > { %v9279_v49 = vpop.xlane.xlu1 %2934 }
 0x809   : > { %3163 = vadd.xlane.f32.xlu1 %v3162_v32  ;;  %v9261_v16 = vpop.permute.xlu0 %5139  ;;  %v7643_v32 = vld [vmem:[%s7952_s26 + $0xb0] sm:$0xff]  ;;  %11750 = vst [vmem:[#allocation101_spill] sm:$0xff] %v9279_v49 }
 0x80a   : > { %11745 = vst [vmem:[#allocation96_spill] sm:$0xff] %v9261_v16  ;;  %v5231_v23 = vadd.f32 %v7643_v32, %v9042_v33 }
 0x80c   : > { %v9288_v32 = vpop.permute.xlu1 %5133 }
 0x80d   : > { %3160 = vadd.xlane.f32.xlu1 %v3159_v2  ;;  %v9269_v2 = vpop.permute.xlu0 %5137  ;;  %11752 = vst [vmem:[#allocation103_spill] sm:$0xff] %v9288_v32 }
 0x80e   : > { %11747 = vst [vmem:[#allocation98_spill] sm:$0xff] %v9269_v2  ;;  %v2961_v2 = vmul.f32 0.0625, %v8891_v31 }
 0x810   : > { %v9301_v21 = vsub.f32 %v8073_v37, %v2961_v2 }
 0x811   : > { %v9273_v7 = vpop.permute.xlu0 %5341 }
 0x815   : > { %v9277_v62 = vpop.xlane.xlu0 %2946 }
 0x819   : > { %v9282_v16 = vpop.xlane.xlu0 %2943 }
 0x81a   : > { %11751 = vst [vmem:[#allocation102_spill] sm:$0xff] %v9282_v16 }
 0x81b   : > { %5391 = vrot.lane.b32.xlu0 %v5236_v4, %s7700_s21  ;;  %v2966_v4 = vmul.f32 0.0625, %v8910_v22  ;;  %v9298_v22 = vpop.permute.xlu1 %5339 }
 0x81d   : > { %v9285_v33 = vsub.f32 %v8091_v11, %v2966_v4  ;;  %v9294_v55 = vpop.permute.xlu0 %5141 }
 0x81e   : > { %5381 = vrot.lane.b32.xlu1 %v5231_v23, %s7700_s21  ;;  %v2965_v23 = vmul.f32 0.0625, %v8917_v30  ;;  %11753 = vst [vmem:[#allocation104_spill] sm:$0xff] %v9294_v55 }
 0x81f   : > { %v3094_v49 = vmul.f32 %v9285_v33, %v9285_v33 }
 0x820   : > { %v9292_v27 = vsub.f32 %v8099_v61, %v2965_v23  ;;  %v9308_v61 = vpop.xlane.xlu1 %2937  ;;  %v3089_v23 = vmul.f32 %v9301_v21, %v9301_v21 }
 0x821   : > { %v9303_v11 = vpop.xlane.xlu0 %2949  ;;  %v3180_v30 = vsel %vm1264_vm2, %v3094_v49, 0.0  ;;  %11755 = vst [vmem:[#allocation106_spill] sm:$0xff] %v9308_v61 }
 0x822   : > { %11754 = vst [vmem:[#allocation105_spill] sm:$0xff] %v9303_v11  ;;  %v3093_v31 = vmul.f32 %v9292_v27, %v9292_v27  ;;  %v3165_v2 = vsel %vm1264_vm2, %v3089_v23, 0.0 }
 0x824   : > { %v3177_v4 = vsel %vm1264_vm2, %v3093_v31, 0.0  ;;  %v9316_v55 = vpop.permute.xlu1 %5343  ;;  %v7644_v31 = vld [vmem:[%s7952_s26 + $0xc8] sm:$0xff] }
 0x825   : > { %v9313_v37 = vpop.permute.xlu0 %5351  ;;  %v5234_v11 = vadd.f32 %v7644_v31, %v9061_v8 }
 0x826   : > { %11756 = vst [vmem:[#allocation107_spill] sm:$0xff] %v9313_v37  ;;  %v7645_v37 = vld [vmem:[%s7952_s26 + $0xe8] sm:$0xff] }
 0x827   : > { %v5238_v16 = vadd.f32 %v7645_v37, %v9064_v35 }
 0x829   : > { %v9318_v49 = vpop.permute.xlu0 %5355 }
 0x82a   : > { %11757 = vst [vmem:[#allocation108_spill] sm:$0xff] %v9318_v49 }
 0x82d   : > { %v9322_v32 = vpop.permute.xlu0 %5359 }
 0x82e   : > { %11759 = vst [vmem:[#allocation110_spill] sm:$0xff] %v9322_v32 }
 0x83a   : > { %3181 = vadd.xlane.f32.xlu0 %v3180_v30  ;;  %v9320_v30 = vpop.permute.xlu1 %5143 }
 0x83b   : > { %11758 = vst [vmem:[#allocation109_spill] sm:$0xff] %v9320_v30 }
 0x83e   : > { %3178 = vadd.xlane.f32.xlu0 %v3177_v4  ;;  %v9324_v61 = vpop.permute.xlu1 %5347  ;;  %v9328_v4 = vpop.permute.xlu0 %5357 }
 0x83f   : > { %11760 = vst [vmem:[#allocation111_spill] sm:$0xff] %v9328_v4 }
 0x842   : > { %3166 = vadd.xlane.f32.xlu1 %v3165_v2  ;;  %v9333_v23 = vpop.permute.xlu1 %5345  ;;  %v7646_v2 = vld [vmem:[%s7952_s26 + $0xe0] sm:$0xff]  ;;  %v9338_v32 = vpop.permute.xlu0 %5363 }
 0x843   : > { %v5237_v30 = vadd.f32 %v7646_v2, %v9068_v52  ;;  %11761 = vst [vmem:[#allocation112_spill] sm:$0xff] %v9338_v32  ;;  %v2968_v52 = vmul.f32 0.0625, %v8956_v54 }
 0x846   : > { %v9340_v49 = vpop.xlane.xlu1 %2952  ;;  %v9343_v8 = vpop.permute.xlu0 %5361 }
 0x847   : > { %11762 = vst [vmem:[#allocation113_spill] sm:$0xff] %v9340_v49  ;;  %11763 = vst [vmem:[#allocation114_spill] sm:$0xff] %v9343_v8  ;;  %v2967_v8 = vmul.f32 0.0625, %v8966_v17 }
 0x84a   : > { %v9345_v31 = vpop.permute.xlu1 %5349  ;;  %v9347_v35 = vpop.permute.xlu0 %5367 }
 0x84b   : > { %11764 = vst [vmem:[#allocation115_spill] sm:$0xff] %v9345_v31  ;;  %11765 = vst [vmem:[#allocation116_spill] sm:$0xff] %v9347_v35 }
 0x84e   : > { %v9351_v37 = vpop.permute.xlu0 %5371 }
 0x84f   : > { %11767 = vst [vmem:[#allocation118_spill] sm:$0xff] %v9351_v37 }
 0x852   : > { %v3149_v32 = vpop.xlane.xlu0 %3148 }
 0x853   : > { %5387 = vrot.lane.b32.xlu1 %v5234_v11, %s7700_s21  ;;  %v9349_v11 = vpop.permute.xlu1 %5353 }
 0x854   : > { %5395 = vrot.lane.b32.xlu0 %v5238_v16, %s7700_s21  ;;  %11766 = vst [vmem:[#allocation117_spill] sm:$0xff] %v9349_v11  ;;  %v2963_v16 = vmul.f32 0.0625, %v8925_v45  ;;  %v9367_v11 = vsub.f32 %v8166_v14, %v2967_v8  ;;  %v2970_v45 = vmul.f32 0.0625, %v8990_v59 }
 0x856   : > { %v9358_v49 = vsub.f32 %v8113_v18, %v2963_v16  ;;  %11772 = vst [vmem:[#allocation123_spill] sm:$0xff] %v9367_v11  ;;  %v9374_v18 = vpop.permute.xlu0 %5375  ;;  %v3095_v14 = vmul.f32 %v9367_v11, %v9367_v11 }
 0x857   : > { %v9355_v2 = vpop.permute.xlu1 %5365  ;;  %11773 = vst [vmem:[#allocation124_spill] sm:$0xff] %v9374_v18 }
 0x858   : > { %5393 = vrot.lane.b32.xlu0 %v5237_v30, %s7700_s21  ;;  %11768 = vst [vmem:[#allocation119_spill] sm:$0xff] %v9355_v2  ;;  %11769 = vst [vmem:[#allocation120_spill] sm:$0xff] %v9358_v49  ;;  %v9361_v30 = vsub.f32 %v8142_v44, %v2968_v52  ;;  %v3091_v54 = vmul.f32 %v9358_v49, %v9358_v49  ;;  %v9377_v44 = vsub.f32 %v8209_v60, %v2970_v45 }
 0x859   : > { %v3183_v18 = vsel %vm1264_vm2, %v3095_v14, 0.0 }
 0x85a   : > { %11770 = vst [vmem:[#allocation121_spill] sm:$0xff] %v9361_v30  ;;  %v3096_v37 = vmul.f32 %v9361_v30, %v9361_v30  ;;  %11774 = vst [vmem:[#allocation125_spill] sm:$0xff] %v9377_v44  ;;  %v3171_v17 = vsel %vm1264_vm2, %v3091_v54, 0.0  ;;  %v3155_v59 = vpop.xlane.xlu0 %3154  ;;  %v3098_v60 = vmul.f32 %v9377_v44, %v9377_v44 }
 0x85b   : > { %v9364_v35 = vpop.permute.xlu1 %5369  ;;  %v3341_v4 = vmul.f32 0.0625, %v3155_v59 }
 0x85c   : > { %11771 = vst [vmem:[#allocation122_spill] sm:$0xff] %v9364_v35  ;;  %v3186_v52 = vsel %vm1264_vm2, %v3096_v37, 0.0  ;;  %v3339_v35 = vmul.f32 0.0625, %v3149_v32  ;;  %v3192_v11 = vsel %vm1264_vm2, %v3098_v60, 0.0 }
 0x85d   : > { %v3405_v54 = vadd.f32 1e-05, %v3341_v4 }
 0x85e   : > { %v3403_v37 = vadd.f32 1e-05, %v3339_v35 }
 0x85f   : > { %v3152_v16 = vpop.xlane.xlu1 %3151 }
 0x860   : > { %v3340_v8 = vmul.f32 0.0625, %v3152_v16  ;;  %v3170_v16 = vpop.xlane.xlu0 %3169 }
 0x861   : > { %v3346_v59 = vmul.f32 0.0625, %v3170_v16 }
 0x862   : > { %v3404_v45 = vadd.f32 1e-05, %v3340_v8 }
 0x863   : > { %v9383_v2 = vpop.permute.xlu1 %5373  ;;  %v3410_v4 = vadd.f32 1e-05, %v3346_v59 }
 0x864   : > { %11775 = vst [vmem:[#allocation126_spill] sm:$0xff] %v9383_v2  ;;  %7217 = vrsqrt.f32 %v3404_v45 }
 0x865   : > { %7219 = vrsqrt.f32 %v3403_v37 }
 0x866   : > { %7221 = vrsqrt.f32 %v3405_v54 }
 0x867   : > { %v3158_v31 = vpop.xlane.xlu1 %3157 }
 0x868   : > { %v3342_v32 = vmul.f32 0.0625, %v3158_v31 }
 0x86b   : > { %v9392_v60 = vpop.permute.xlu1 %5379 }
 0x86c   : > { %11776 = vst [vmem:[#allocation127_spill] sm:$0xff] %v9392_v60 }
 0x86e   : > { %v7218_v35 = vpop.eup %7217 }
 0x877   : > { %3172 = vadd.xlane.f32.xlu1 %v3171_v17  ;;  %3187 = vadd.xlane.f32.xlu0 %v3186_v52  ;;  %v3406_v17 = vadd.f32 1e-05, %v3342_v32  ;;  %v7647_v52 = vld [vmem:[%s7952_s26 + $0xd0] sm:$0xff]  ;;  %v9404_v32 = vpop.permute.xlu1 %5377 }
 0x878   : > { %v5235_v14 = vadd.f32 %v7647_v52, %v9070_v46  ;;  %v9399_v46 = vld [vmem:[%s11537_s7] ss:$0 sm:$0xff]  ;;  %11777 = vst [vmem:[#allocation128_spill] sm:$0xff] %v9404_v32 }
 0x879   : > { %7223 = vrsqrt.f32 %v3406_v17  ;;  %v7648_v17 = vld [vmem:[%s7952_s26 + $0x108] sm:$0xff] }
 0x87a   : > { %7225 = vrsqrt.f32 %v3410_v4 }
 0x87b   : > { %3184 = vadd.xlane.f32.xlu0 %v3183_v18  ;;  %v7220_v18 = vpop.eup %7219 }
 0x87c   : > { %v7222_v8 = vpop.eup %7221  ;;  %v3531_v31 = vmul.f32 %v7220_v18, %v9083_v29  ;;  %v9411_v29 = vld [vmem:[%s11538_s8] ss:$0 sm:$0xff] }
 0x87d   : > { %v3533_v45 = vmul.f32 %v7222_v8, %v9145_v3 }
 0x87e   : > { %v3602_v54 = vmul.f32 %v9399_v46, %v3531_v31 }
 0x87f   : > { %3193 = vadd.xlane.f32.xlu0 %v3192_v11  ;;  %v3532_v11 = vmul.f32 %v7218_v35, %v9090_v25  ;;  %v5242_v25 = vadd.f32 %v7648_v17, %v9101_v20  ;;  %v3604_v52 = vmul.f32 %v9399_v46, %v3533_v45 }
 0x880   : > { %v9419_v3 = vadd.f32 %v9411_v29, %v3602_v54 }
 0x881   : > { %v3603_v37 = vmul.f32 %v9399_v46, %v3532_v11  ;;  %v9423_v20 = vadd.f32 %v9411_v29, %v3604_v52 }
 0x882   : > { %v3737_v31 = vsel %vm1264_vm2, %v9419_v3, -inf }
 0x883   : > { %v7224_v16 = vpop.eup %7223  ;;  %v3751_v54 = vsel %vm1264_vm2, %v9423_v20, -inf }
 0x884   : > { %v3534_v59 = vmul.f32 %v7224_v16, %v9153_v53  ;;  %v7226_v18 = vpop.eup %7225 }
 0x885   : > { %v3538_v53 = vmul.f32 %v7226_v18, %v9156_v47 }
 0x886   : > { %v3605_v45 = vmul.f32 %v9399_v46, %v3534_v59 }
 0x887   : > { %v3609_v32 = vmul.f32 %v9399_v46, %v3538_v53 }
 0x888   : > { %5389 = vrot.lane.b32.xlu1 %v5235_v14, %s7700_s21  ;;  %v9415_v14 = vadd.f32 %v9411_v29, %v3603_v37  ;;  %v9434_v60 = vadd.f32 %v9411_v29, %v3605_v45 }
 0x88a   : > { %v3744_v8 = vsel %vm1264_vm2, %v9415_v14, -inf  ;;  %v3758_v47 = vsel %vm1264_vm2, %v9434_v60, -inf }
 0x88b   : > { %v3745_v17 = vrot.slane %v3744_v8, 4  ;;  %v3759_v30 = vrot.slane %v3758_v47, 4 }
 0x88d   : > { %v3746_v59 = vmax.f32 %v3744_v8, %v3745_v17  ;;  %v2972_v8 = vmul.f32 0.0625, %v8996_v58 }
 0x88f   : > { %v9458_v58 = vsub.f32 %v8261_v5, %v2972_v8 }
 0x891   : > { %11779 = vst [vmem:[#allocation130_spill] sm:$0xff] %v9458_v58 }
 0x895   : > { %5403 = vrot.lane.b32.xlu0 %v5242_v25, %s7700_s21  ;;  %v3738_v25 = vrot.slane %v3737_v31, 4 }
 0x896   : > { %v3164_v35 = vpop.xlane.xlu1 %3163 }
 0x897   : > { %v3344_v4 = vmul.f32 0.0625, %v3164_v35  ;;  %v3752_v35 = vrot.slane %v3751_v54, 4  ;;  %v3739_v2 = vmax.f32 %v3737_v31, %v3738_v25 }
 0x899   : > { %v3408_v11 = vadd.f32 1e-05, %v3344_v4  ;;  %v2969_v4 = vmul.f32 0.0625, %v8962_v24  ;;  %v3753_v44 = vmax.f32 %v3751_v54, %v3752_v35 }
 0x89a   : > { %v3161_v37 = vpop.xlane.xlu1 %3160 }
 0x89b   : > { %7227 = vrsqrt.f32 %v3408_v11  ;;  %v3343_v16 = vmul.f32 0.0625, %v3161_v37  ;;  %v9441_v18 = vsub.f32 %v8182_v10, %v2969_v4  ;;  %v9444_v11 = vadd.f32 %v9411_v29, %v3609_v32 }
 0x89c   : > { %v3747_v37 = vrot.slane %v3746_v59, 2  ;;  %v3754_v24 = vrot.slane %v3753_v44, 2 }
 0x89d   : > { %v3407_v52 = vadd.f32 1e-05, %v3343_v16  ;;  %11778 = vst [vmem:[#allocation129_spill] sm:$0xff] %v9441_v18  ;;  %v3740_v16 = vrot.slane %v3739_v2, 2  ;;  %v3786_v31 = vsel %vm1264_vm2, %v9444_v11, -inf  ;;  %v3097_v54 = vmul.f32 %v9441_v18, %v9441_v18 }
 0x89e   : > { %v3748_v10 = vmax.f32 %v3746_v59, %v3747_v37  ;;  %v3755_v35 = vmax.f32 %v3753_v44, %v3754_v24  ;;  %v3787_v4 = vrot.slane %v3786_v31, 4  ;;  %v2978_v59 = vmul.f32 0.0625, %v9015_v15  ;;  %v11781_v24 = vld [vmem:[#allocation5_spill] sm:$0xff] }
 0x89f   : > { %7229 = vrsqrt.f32 %v3407_v52  ;;  %v3741_v25 = vmax.f32 %v3739_v2, %v3740_v16  ;;  %v3760_v52 = vmax.f32 %v3758_v47, %v3759_v30  ;;  %v3189_v18 = vsel %vm1264_vm2, %v3097_v54, 0.0 }
 0x8a0   : > { %v3749_v37 = vrot.slane %v3748_v10, 1  ;;  %v3756_v47 = vrot.slane %v3755_v35, 1  ;;  %v3788_v16 = vmax.f32 %v3786_v31, %v3787_v4  ;;  %v3100_v15 = vmul.f32 %v9458_v58, %v9458_v58 }
 0x8a1   : > { %v3742_v30 = vrot.slane %v3741_v25, 1  ;;  %v3761_v44 = vrot.slane %v3760_v52, 2  ;;  %v2979_v4 = vmul.f32 0.0625, %v9032_v12 }
 0x8a3   : > { %v3743_v31 = vmax.f32 %v3741_v25, %v3742_v30  ;;  %v3762_v54 = vmax.f32 %v3760_v52, %v3761_v44  ;;  %v11784_v30 = vld [vmem:[#allocation13_spill] sm:$0xff] }
 0x8a4   : > { %v9490_v44 = vsub.f32 %v11784_v30, %v2979_v4 }
 0x8a5   : > { %v7228_v45 = vpop.eup %7227  ;;  %v4185_v52 = vsub.f32 %v9419_v3, %v3743_v31 }
 0x8a6   : > { %v3536_v53 = vmul.f32 %v7228_v45, %v9226_v6  ;;  %v2974_v45 = vmul.f32 0.0625, %v9000_v13  ;;  %11785 = vst [vmem:[#allocation13_spill] sm:$0xff] %v9490_v44 }
 0x8a8   : > { %v3607_v17 = vmul.f32 %v9399_v46, %v3536_v53  ;;  %v9470_v13 = vsub.f32 %v8290_v39, %v2974_v45  ;;  %v9475_v53 = vsub.f32 %v11781_v24, %v2978_v59  ;;  %v3198_v45 = vsel %vm1264_vm2, %v3100_v15, 0.0 }
 0x8a9   : > { %v7230_v32 = vpop.eup %7229 }
 0x8aa   : > { %v9454_v49 = vadd.f32 %v9411_v29, %v3607_v17  ;;  %v3535_v6 = vmul.f32 %v7230_v32, %v9236_v34  ;;  %11780 = vst [vmem:[#allocation131_spill] sm:$0xff] %v9470_v13  ;;  %11782 = vst [vmem:[#allocation5_spill] sm:$0xff] %v9475_v53  ;;  %v3102_v58 = vmul.f32 %v9470_v13, %v9470_v13 }
 0x8ab   : > { %v3106_v25 = vmul.f32 %v9475_v53, %v9475_v53 }
 0x8ac   : > { %v3606_v2 = vmul.f32 %v9399_v46, %v3535_v6  ;;  %3190 = vadd.xlane.f32.xlu1 %v3189_v18  ;;  %v3772_v34 = vsel %vm1264_vm2, %v9454_v49, -inf  ;;  %v3750_v18 = vmax.f32 %v3748_v10, %v3749_v37  ;;  %v3757_v6 = vmax.f32 %v3755_v35, %v3756_v47  ;;  %v9484_v10 = vpop.permute.xlu0 %5385 }
 0x8ad   : > { %v3773_v17 = vrot.slane %v3772_v34, 4  ;;  %11783 = vst [vmem:[#allocation132_spill] sm:$0xff] %v9484_v10  ;;  %v3763_v37 = vrot.slane %v3762_v54, 1  ;;  %v2982_v47 = vmul.f32 0.0625, %v9053_v9  ;;  %v11786_v9 = vld [vmem:[#allocation15_spill] sm:$0xff] }
 0x8ae   : > { %v9467_v5 = vadd.f32 %v9411_v29, %v3606_v2  ;;  %v3789_v2 = vrot.slane %v3788_v16, 2  ;;  %v4186_v59 = vsub.f32 %v9415_v14, %v3750_v18  ;;  %v4187_v15 = vsub.f32 %v9423_v20, %v3757_v6  ;;  %v7649_v6 = vld [vmem:[%s7952_s26 + $0x100] sm:$0xff] }
 0x8af   : > { %v3774_v12 = vmax.f32 %v3772_v34, %v3773_v17  ;;  %v3204_v18 = vsel %vm1264_vm2, %v3102_v58, 0.0  ;;  %v4249_v34 = vmul.f32 1.442695, %v4185_v52  ;;  %v3764_v17 = vmax.f32 %v3762_v54, %v3763_v37  ;;  %v11789_v52 = vld [vmem:[#allocation4_spill] sm:$0xff]  ;;  %v11791_v37 = vld [vmem:[#allocation7_spill] sm:$0xff] }
 0x8b0   : > { %v3765_v8 = vsel %vm1264_vm2, %v9467_v5, -inf  ;;  %v3790_v24 = vmax.f32 %v3788_v16, %v3789_v2  ;;  %v4251_v3 = vmul.f32 1.442695, %v4186_v59  ;;  %v3176_v31 = vpop.xlane.xlu0 %3175  ;;  %v9499_v30 = vsub.f32 %v11786_v9, %v2982_v47 }
 0x8b1   : > { %v3766_v32 = vrot.slane %v3765_v8, 4  ;;  %v3775_v4 = vrot.slane %v3774_v12, 2  ;;  %v4253_v20 = vmul.f32 1.442695, %v4187_v15  ;;  %v3107_v58 = vmul.f32 %v9490_v44, %v9490_v44 }
 0x8b2   : > { %11787 = vst [vmem:[#allocation15_spill] sm:$0xff] %v9499_v30  ;;  %v3791_v16 = vrot.slane %v3790_v24, 1  ;;  %7231 = vpow2.f32 %v4251_v3  ;;  %v4188_v15 = vsub.f32 %v9434_v60, %v3764_v17  ;;  %v11798_v60 = vld [vmem:[#allocation51_spill] sm:$0xff] }
 0x8b3   : > { %v3767_v39 = vmax.f32 %v3765_v8, %v3766_v32  ;;  %v2971_v8 = vmul.f32 0.0625, %v8974_v48  ;;  %v2973_v32 = vmul.f32 0.0625, %v8985_v41  ;;  %v2984_v48 = vmul.f32 0.0625, %v9072_v42  ;;  %v11788_v41 = vld [vmem:[#allocation59_spill] sm:$0xff]  ;;  %v11794_v42 = vld [vmem:[#allocation54_spill] sm:$0xff] }
 0x8b4   : > { %3199 = vadd.xlane.f32.xlu0 %v3198_v45  ;;  %v3216_v45 = vsel %vm1264_vm2, %v3106_v25, 0.0  ;;  %v5241_v2 = vadd.f32 %v7649_v6, %v11788_v41  ;;  %7233 = vpow2.f32 %v4249_v34  ;;  %v2983_v9 = vmul.f32 0.0625, %v11794_v42  ;;  %v11795_v6 = vld [vmem:[#allocation9_spill] sm:$0xff]  ;;  %v11797_v34 = vld [vmem:[#allocation50_spill] sm:$0xff] }
 0x8b5   : > { %v3768_v35 = vrot.slane %v3767_v39, 2  ;;  %v9507_v54 = vsub.f32 %v11789_v52, %v2971_v8  ;;  %v9510_v25 = vsub.f32 %v11791_v37, %v2973_v32  ;;  %7235 = vpow2.f32 %v4253_v20  ;;  %v9536_v37 = vpop.permute.xlu0 %5391 }
 0x8b6   : > { %v3219_v8 = vsel %vm1264_vm2, %v3107_v58, 0.0  ;;  %v9518_v41 = vsub.f32 %v11795_v6, %v2984_v48  ;;  %v2975_v52 = vmul.f32 0.0625, %v11797_v34  ;;  %11804 = vst [vmem:[#allocation9_spill] sm:$0xff] %v9536_v37  ;;  %v11809_v34 = vld [vmem:[#allocation52_spill] sm:$0xff] }
 0x8b7   : > { %v3769_v14 = vmax.f32 %v3767_v39, %v3768_v35  ;;  %v3348_v39 = vmul.f32 0.0625, %v3176_v31  ;;  %11790 = vst [vmem:[#allocation59_spill] sm:$0xff] %v9507_v54  ;;  %11792 = vst [vmem:[#allocation4_spill] sm:$0xff] %v9510_v25  ;;  %v11793_v35 = vld [vmem:[#allocation49_spill] sm:$0xff]  ;;  %v3792_v31 = vmax.f32 %v3790_v24, %v3791_v16  ;;  %v3099_v17 = vmul.f32 %v9507_v54, %v9507_v54  ;;  %v11799_v16 = vld [vmem:[#allocation2_spill] sm:$0xff] }
 0x8b8   : > { %3205 = vadd.xlane.f32.xlu0 %v3204_v18  ;;  %v2976_v47 = vmul.f32 0.0625, %v11793_v35  ;;  %v3776_v18 = vmax.f32 %v3774_v12, %v3775_v4  ;;  %11796 = vst [vmem:[#allocation7_spill] sm:$0xff] %v9518_v41  ;;  %v2977_v12 = vmul.f32 0.0625, %v11798_v60  ;;  %v4255_v4 = vmul.f32 1.442695, %v4188_v15 }
 0x8b9   : > { %v3770_v59 = vrot.slane %v3769_v14, 1  ;;  %v3412_v32 = vadd.f32 1e-05, %v3348_v39  ;;  %v3101_v20 = vmul.f32 %v9510_v25, %v9510_v25  ;;  %v3112_v42 = vmul.f32 %v9518_v41, %v9518_v41 }
 0x8ba   : > { %v3777_v24 = vrot.slane %v3776_v18, 1  ;;  %v9529_v58 = vsub.f32 %v11799_v16, %v2976_v47  ;;  %v11805_v47 = vld [vmem:[#allocation3_spill] sm:$0xff]  ;;  %v2980_v60 = vmul.f32 0.0625, %v11809_v34  ;;  %v11811_v16 = vld [vmem:[#allocation48_spill] sm:$0xff] }
 0x8bb   : > { %v3771_v3 = vmax.f32 %v3769_v14, %v3770_v59  ;;  %v11801_v14 = vld [vmem:[#allocation10_spill] sm:$0xff]  ;;  %v4192_v59 = vsub.f32 %v9444_v11, %v3792_v31  ;;  %7237 = vrsqrt.f32 %v3412_v32  ;;  %v9550_v11 = vsel %vm1264_vm2, %v3099_v17, 0.0  ;;  %v11810_v31 = vld [vmem:[#allocation53_spill] sm:$0xff] }
 0x8bc   : > { %3217 = vadd.xlane.f32.xlu0 %v3216_v45  ;;  %v3110_v45 = vmul.f32 %v9499_v30, %v9499_v30  ;;  %11800 = vst [vmem:[#allocation49_spill] sm:$0xff] %v9529_v58  ;;  %v9532_v48 = vsub.f32 %v11801_v14, %v2983_v9  ;;  %v11807_v9 = vld [vmem:[#allocation6_spill] sm:$0xff]  ;;  %v2981_v32 = vmul.f32 0.0625, %v11810_v31  ;;  %7239 = vpow2.f32 %v4255_v4 }
 0x8bd   : > { %5401 = vrot.lane.b32.xlu1 %v5241_v2, %s7700_s21  ;;  %v11803_v2 = vld [vmem:[#allocation58_spill] sm:$0xff]  ;;  %v4189_v35 = vsub.f32 %v9467_v5, %v3771_v3  ;;  %v9546_v6 = vsub.f32 %v11807_v9, %v2977_v12  ;;  %v3778_v5 = vmax.f32 %v3776_v18, %v3777_v24  ;;  %v9554_v3 = vsel %vm1264_vm2, %v3101_v20, 0.0  ;;  %v11813_v12 = vld [vmem:[#allocation12_spill] sm:$0xff] }
 0x8be   : > { %11802 = vst [vmem:[#allocation54_spill] sm:$0xff] %v9532_v48  ;;  %v2986_v39 = vmul.f32 0.0625, %v11803_v2  ;;  %v3228_v15 = vsel %vm1264_vm2, %v3110_v45, 0.0  ;;  %v9556_v45 = vpop.eup %7231  ;;  %v3111_v17 = vmul.f32 %v9532_v48, %v9532_v48  ;;  %v2988_v18 = vmul.f32 0.0625, %v9106_v56  ;;  %v11815_v31 = vld [vmem:[#allocation14_spill] sm:$0xff] }
 0x8bf   : > { %11808 = vst [vmem:[#allocation51_spill] sm:$0xff] %v9546_v6  ;;  %v4257_v4 = vmul.f32 1.442695, %v4189_v35  ;;  %v3234_v20 = vsel %vm1264_vm2, %v3112_v42, 0.0  ;;  %v3104_v9 = vmul.f32 %v9529_v58, %v9529_v58  ;;  %v3105_v56 = vmul.f32 %v9546_v6, %v9546_v6  ;;  %v11817_v35 = vld [vmem:[#allocation8_spill] sm:$0xff] }
 0x8c0   : > { %3220 = vadd.xlane.f32.xlu0 %v3219_v8  ;;  %v9543_v8 = vsub.f32 %v11805_v47, %v2975_v52  ;;  %v7650_v52 = vld [vmem:[%s7952_s26 + $0xb8] sm:$0xff]  ;;  %v9563_v2 = vsub.f32 %v11813_v12, %v2986_v39  ;;  %v9567_v47 = vpop.eup %7233  ;;  %v9576_v39 = vsub.f32 %v11815_v31, %v2980_v60  ;;  %v2990_v42 = vmul.f32 0.0625, %v9114_v51 }
 0x8c1   : > { %v9560_v14 = vadd.f32 %v7650_v52, %v11811_v16  ;;  %v9573_v34 = vpop.eup %7235  ;;  %v9583_v16 = vsub.f32 %v11817_v35, %v2981_v32  ;;  %v4384_v12 = vsel %vm1264_vm2, %v9556_v45, 0.0  ;;  %v4190_v37 = vsub.f32 %v9454_v49, %v3778_v5  ;;  %v11819_v31 = vld [vmem:[#allocation21_spill] sm:$0xff]  ;;  %v9599_v35 = vpop.permute.xlu1 %5381 }
 0x8c2   : > { %11806 = vst [vmem:[#allocation50_spill] sm:$0xff] %v9543_v8  ;;  %11814 = vst [vmem:[#allocation10_spill] sm:$0xff] %v9563_v2  ;;  %v3103_v52 = vmul.f32 %v9543_v8, %v9543_v8  ;;  %v9593_v10 = vsub.f32 %v11819_v31, %v2988_v18  ;;  %v4377_v32 = vsel %vm1264_vm2, %v9567_v47, 0.0  ;;  %v4391_v51 = vsel %vm1264_vm2, %v9573_v34, 0.0  ;;  %v11822_v18 = vld [vmem:[#allocation23_spill] sm:$0xff] }
 0x8c3   : > { %11812 = vst [vmem:[#allocation2_spill] sm:$0xff] %v9560_v14  ;;  %11816 = vst [vmem:[#allocation58_spill] sm:$0xff] %v9576_v39  ;;  %v4385_v5 = vrot.slane %v4384_v12, 4  ;;  %v9605_v31 = vsub.f32 %v11822_v18, %v2990_v42  ;;  %v4259_v6 = vmul.f32 1.442695, %v4190_v37  ;;  %v4392_v58 = vrot.slane %v4391_v51, 4 }
 0x8c4   : > { %3229 = vadd.xlane.f32.xlu0 %v3228_v15  ;;  %v4263_v15 = vmul.f32 1.442695, %v4192_v59  ;;  %11818 = vst [vmem:[#allocation3_spill] sm:$0xff] %v9583_v16  ;;  %11820 = vst [vmem:[#allocation6_spill] sm:$0xff] %v9593_v10  ;;  %v9608_v8 = vsel %vm1264_vm2, %v3103_v52, 0.0  ;;  %v3116_v37 = vmul.f32 %v9593_v10, %v9593_v10  ;;  %v3109_v52 = vmul.f32 %v9583_v16, %v9583_v16 }
 0x8c5   : > { %11821 = vst [vmem:[#allocation52_spill] sm:$0xff] %v9599_v35  ;;  %11823 = vst [vmem:[#allocation53_spill] sm:$0xff] %v9605_v31  ;;  %v4378_v35 = vrot.slane %v4377_v32, 4  ;;  %v4393_v10 = vadd.f32 %v4392_v58, %v4391_v51 }
 0x8c6   : > { %7241 = vpow2.f32 %v4263_v15 }
 0x8c7   : > { %v3182_v24 = vpop.xlane.xlu0 %3181  ;;  %7243 = vpow2.f32 %v4257_v4  ;;  %v9611_v4 = vsel %vm1264_vm2, %v3105_v56, 0.0  ;;  %v4386_v56 = vadd.f32 %v4385_v5, %v4384_v12  ;;  %v11825_v5 = vld [vmem:[#allocation19_spill] sm:$0xff] }
 0x8c8   : > { %v3350_v59 = vmul.f32 0.0625, %v3182_v24  ;;  %3235 = vadd.xlane.f32.xlu0 %v3234_v20  ;;  %v3231_v24 = vsel %vm1264_vm2, %v3111_v17, 0.0  ;;  %v3114_v20 = vmul.f32 %v9563_v2, %v9563_v2  ;;  %v9602_v17 = vsel %vm1264_vm2, %v3104_v9, 0.0 }
 0x8c9   : > { %v2994_v9 = vmul.f32 0.0625, %v9128_v28  ;;  %v2995_v28 = vmul.f32 0.0625, %v9136_v38  ;;  %v4379_v2 = vadd.f32 %v4378_v35, %v4377_v32  ;;  %v11827_v32 = vld [vmem:[#allocation55_spill] sm:$0xff]  ;;  %v4387_v51 = vrot.slane %v4386_v56, 2 }
 0x8ca   : > { %v3414_v60 = vadd.f32 1e-05, %v3350_v59  ;;  %v7238_v59 = vpop.eup %7237  ;;  %v3240_v42 = vsel %vm1264_vm2, %v3114_v20, 0.0  ;;  %v3118_v20 = vmul.f32 %v9605_v31, %v9605_v31  ;;  %v11836_v31 = vld [vmem:[#allocation31_spill] sm:$0xff] }
 0x8cb   : > { %v3179_v49 = vpop.xlane.xlu0 %3178  ;;  %v3540_v18 = vmul.f32 %v7238_v59, %v9219_v63  ;;  %v9631_v63 = vsub.f32 %v11825_v5, %v2994_v9  ;;  %v7651_v59 = vld [vmem:[%s7952_s26 + $0xf0] sm:$0xff] }
 0x8cc   : > { %7245 = vrsqrt.f32 %v3414_v60  ;;  %v3349_v15 = vmul.f32 0.0625, %v3179_v49  ;;  %3232 = vadd.xlane.f32.xlu0 %v3231_v24  ;;  %v3108_v60 = vmul.f32 %v9576_v39, %v9576_v39  ;;  %v9615_v24 = vpop.eup %7239  ;;  %v11824_v39 = vld [vmem:[#allocation57_spill] sm:$0xff]  ;;  %v9642_v58 = vadd.f32 %v7651_v59, %v11827_v32  ;;  %v11834_v32 = vld [vmem:[#allocation56_spill] sm:$0xff] }
 0x8cd   : > { %v2985_v54 = vmul.f32 0.0625, %v11824_v39  ;;  %v4398_v16 = vsel %vm1264_vm2, %v9615_v24, 0.0  ;;  %11826 = vst [vmem:[#allocation48_spill] sm:$0xff] %v9631_v63  ;;  %v3246_v39 = vsel %vm1264_vm2, %v3116_v37, 0.0  ;;  %v3611_v35 = vmul.f32 %v9399_v46, %v3540_v18  ;;  %v7652_v59 = vld [vmem:[%s7952_s26 + $0xf8] sm:$0xff] }
 0x8ce   : > { %v3413_v25 = vadd.f32 1e-05, %v3349_v15  ;;  %v9636_v38 = vsel %vm1264_vm2, %v3108_v60, 0.0  ;;  %11828 = vst [vmem:[#allocation12_spill] sm:$0xff] %v9642_v58  ;;  %v4399_v60 = vrot.slane %v4398_v16, 4  ;;  %v9658_v58 = vadd.f32 %v7652_v59, %v11834_v32 }
 0x8cf   : > { %v3167_v49 = vpop.xlane.xlu1 %3166  ;;  %v4380_v18 = vrot.slane %v4379_v2, 2  ;;  %v9671_v59 = vadd.f32 %v9411_v29, %v3611_v35 }
 0x8d0   : > { %7247 = vrsqrt.f32 %v3413_v25  ;;  %v3345_v15 = vmul.f32 0.0625, %v3167_v49  ;;  %3241 = vadd.xlane.f32.xlu0 %v3240_v42  ;;  %v2998_v25 = vmul.f32 0.0625, %v9150_v36  ;;  %v11829_v36 = vld [vmem:[#allocation11_spill] sm:$0xff]  ;;  %v11831_v42 = vld [vmem:[#allocation29_spill] sm:$0xff]  ;;  %11835 = vst [vmem:[#allocation23_spill] sm:$0xff] %v9658_v58 }
 0x8d1   : > { %7249 = vpow2.f32 %v4259_v6  ;;  %v9638_v6 = vpop.eup %7241  ;;  %v9648_v49 = vsub.f32 %v11829_v36, %v2985_v54  ;;  %v9651_v37 = vsub.f32 %v11831_v42, %v2995_v28  ;;  %v3000_v36 = vmul.f32 0.0625, %v9177_v57  ;;  %v11838_v57 = vld [vmem:[#allocation60_spill] sm:$0xff] }
 0x8d2   : > { %v3409_v12 = vadd.f32 1e-05, %v3345_v15  ;;  %v9645_v9 = vpop.eup %7243  ;;  %v9654_v15 = vsel %vm1264_vm2, %v3109_v52, 0.0  ;;  %v9662_v48 = vsub.f32 %v11836_v31, %v2998_v25  ;;  %v4426_v54 = vsel %vm1264_vm2, %v9638_v6, 0.0 }
 0x8d3   : > { %11830 = vst [vmem:[#allocation14_spill] sm:$0xff] %v9648_v49  ;;  %11832 = vst [vmem:[#allocation8_spill] sm:$0xff] %v9651_v37  ;;  %v3122_v52 = vmul.f32 %v9631_v63, %v9631_v63  ;;  %v4388_v42 = vadd.f32 %v4387_v51, %v4386_v56  ;;  %v4400_v31 = vadd.f32 %v4399_v60, %v4398_v16  ;;  %v2987_v56 = vmul.f32 0.0625, %v11838_v57 }
 0x8d4   : > { %7251 = vrsqrt.f32 %v3409_v12  ;;  %3247 = vadd.xlane.f32.xlu0 %v3246_v39  ;;  %11833 = vst [vmem:[#allocation21_spill] sm:$0xff] %v9654_v15  ;;  %v4394_v12 = vrot.slane %v4393_v10, 2  ;;  %v3252_v39 = vsel %vm1264_vm2, %v3118_v20, 0.0  ;;  %11837 = vst [vmem:[#allocation57_spill] sm:$0xff] %v9662_v48  ;;  %v4405_v20 = vsel %vm1264_vm2, %v9645_v9, 0.0 }
 0x8d5   : > { %v3123_v32 = vmul.f32 %v9651_v37, %v9651_v37  ;;  %v4381_v51 = vadd.f32 %v4380_v18, %v4379_v2  ;;  %v4427_v63 = vrot.slane %v4426_v54, 4  ;;  %v4406_v30 = vrot.slane %v4405_v20, 4 }
 0x8d6   : > { %v7246_v5 = vpop.eup %7245  ;;  %v4395_v35 = vadd.f32 %v4394_v12, %v4393_v10  ;;  %v3264_v60 = vsel %vm1264_vm2, %v3122_v52, 0.0  ;;  %v4389_v44 = vrot.slane %v4388_v42, 1  ;;  %v3800_v10 = vsel %vm1264_vm2, %v9671_v59, -inf }
 0x8d7   : > { %v3542_v28 = vmul.f32 %v7246_v5, %v9285_v33  ;;  %v9680_v33 = vmul.f32 %v9648_v49, %v9648_v49  ;;  %v2999_v49 = vmul.f32 0.0625, %v9181_v1  ;;  %v4401_v2 = vrot.slane %v4400_v31, 2 }
 0x8d8   : > { %3253 = vadd.xlane.f32.xlu0 %v3252_v39  ;;  %v3126_v39 = vmul.f32 %v9662_v48, %v9662_v48  ;;  %v3267_v12 = vsel %vm1264_vm2, %v3123_v32, 0.0  ;;  %v4396_v57 = vrot.slane %v4395_v35, 1  ;;  %v4428_v1 = vadd.f32 %v4427_v63, %v4426_v54 }
 0x8d9   : > { %v3613_v25 = vmul.f32 %v9399_v46, %v3542_v28  ;;  %v11839_v28 = vld [vmem:[#allocation25_spill] sm:$0xff]  ;;  %v4407_v48 = vadd.f32 %v4406_v30, %v4405_v20  ;;  %v4402_v15 = vadd.f32 %v4401_v2, %v4400_v31  ;;  %v3004_v2 = vmul.f32 0.0625, %v9206_v26 }
 0x8da   : > { %v7248_v5 = vpop.eup %7247  ;;  %v9690_v37 = vsub.f32 %v11839_v28, %v3000_v36  ;;  %v3801_v28 = vrot.slane %v3800_v10, 4  ;;  %v3276_v32 = vsel %vm1264_vm2, %v3126_v39, 0.0  ;;  %v4397_v54 = vadd.f32 %v4396_v57, %v4395_v35 }
 0x8db   : > { %v9683_v41 = vpop.eup %7249  ;;  %v3541_v16 = vmul.f32 %v7248_v5, %v9292_v27  ;;  %v9696_v18 = vadd.f32 %v9411_v29, %v3613_v25  ;;  %v4382_v5 = vrot.slane %v4381_v51, 1  ;;  %v11840_v25 = vld [vmem:[#allocation26_spill] sm:$0xff]  ;;  %v4408_v20 = vrot.slane %v4407_v48, 2 }
 0x8dc   : > { %3265 = vadd.xlane.f32.xlu0 %v3264_v60  ;;  %v4412_v36 = vsel %vm1264_vm2, %v9683_v41, 0.0  ;;  %v9707_v13 = vsub.f32 %v11840_v25, %v2999_v49  ;;  %v3128_v58 = vmul.f32 %v9690_v37, %v9690_v37 }
 0x8dd   : > { %v3612_v27 = vmul.f32 %v9399_v46, %v3541_v16  ;;  %v4390_v16 = vadd.f32 %v4389_v44, %v4388_v42  ;;  %v4413_v14 = vrot.slane %v4412_v36, 4  ;;  %v3814_v30 = vsel %vm1264_vm2, %v9696_v18, -inf }
 0x8de   : > { %v7252_v52 = vpop.eup %7251  ;;  %v4383_v49 = vadd.f32 %v4382_v5, %v4381_v51  ;;  %v4429_v44 = vrot.slane %v4428_v1, 2  ;;  %v3802_v42 = vmax.f32 %v3800_v10, %v3801_v28  ;;  %v4409_v57 = vadd.f32 %v4408_v20, %v4407_v48 }
 0x8df   : > { %v9703_v53 = vadd.f32 %v9411_v29, %v3612_v27  ;;  %v3537_v60 = vmul.f32 %v7252_v52, %v9301_v21  ;;  %v3002_v21 = vmul.f32 0.0625, %v9196_v50  ;;  %v3815_v27 = vrot.slane %v3814_v30, 4  ;;  %v11841_v52 = vld [vmem:[#allocation28_spill] sm:$0xff] }
 0x8e0   : > { %3268 = vadd.xlane.f32.xlu0 %v3267_v12  ;;  %v3127_v50 = vmul.f32 %v9707_v13, %v9707_v13  ;;  %7253 = vrcp.f32 %v4390_v16  ;;  %v4414_v51 = vadd.f32 %v4413_v14, %v4412_v36  ;;  %v3803_v26 = vrot.slane %v3802_v42, 2  ;;  %v11845_v36 = vld [vmem:[#allocation33_spill] sm:$0xff] }
 0x8e1   : > { %v3608_v63 = vmul.f32 %v9399_v46, %v3537_v60  ;;  %3196 = vadd.xlane.f32.xlu1 %v9550_v11  ;;  %v3807_v39 = vsel %vm1264_vm2, %v9703_v53, -inf  ;;  %v3282_v46 = vsel %vm1264_vm2, %v3128_v58, 0.0  ;;  %v4403_v11 = vrot.slane %v4402_v15, 1  ;;  %v11842_v58 = vld [vmem:[#allocation18_spill] sm:$0xff]  ;;  %v11844_v60 = vld [vmem:[#allocation63_spill] sm:$0xff] }
 0x8e2   : > { %7255 = vrcp.f32 %v4397_v54  ;;  %v3808_v10 = vrot.slane %v3807_v39, 4  ;;  %v9729_v5 = vsub.f32 %v11841_v52, %v3002_v21  ;;  %v9732_v28 = vsub.f32 %v11842_v58, %v2987_v56 }
 0x8e3   : > { %v9720_v31 = vadd.f32 %v9411_v29, %v3608_v63  ;;  %v4430_v29 = vadd.f32 %v4429_v44, %v4428_v1  ;;  %7257 = vrcp.f32 %v4383_v49  ;;  %v2989_v25 = vmul.f32 0.0625, %v11844_v60  ;;  %v11849_v60 = vld [vmem:[#allocation35_spill] sm:$0xff] }
 0x8e4   : > { %3277 = vadd.xlane.f32.xlu0 %v3276_v32  ;;  %11843 = vst [vmem:[#allocation19_spill] sm:$0xff] %v9732_v28  ;;  %v3816_v16 = vmax.f32 %v3814_v30, %v3815_v27  ;;  %v9736_v32 = vsub.f32 %v11845_v36, %v3004_v2  ;;  %v4404_v63 = vadd.f32 %v4403_v11, %v4402_v15  ;;  %v4415_v54 = vrot.slane %v4414_v51, 2  ;;  %v11846_v27 = vld [vmem:[#allocation22_spill] sm:$0xff] }
 0x8e5   : > { %v3779_v35 = vsel %vm1264_vm2, %v9720_v31, -inf  ;;  %v9740_v1 = vsel %vm1264_vm2, %v9680_v33, 0.0  ;;  %v3809_v21 = vmax.f32 %v3807_v39, %v3808_v10  ;;  %v3279_v48 = vsel %vm1264_vm2, %v3127_v50, 0.0 }
 0x8e6   : > { %v3780_v12 = vrot.slane %v3779_v35, 4  ;;  %v4431_v56 = vrot.slane %v4430_v29, 1  ;;  %v3006_v44 = vmul.f32 0.0625, %v9215_v0  ;;  %v3804_v30 = vmax.f32 %v3802_v42, %v3803_v26  ;;  %v7653_v42 = vld [vmem:[%s7952_s26 + $0x110] sm:$0xff] }
 0x8e7   : > { %v4410_v20 = vrot.slane %v4409_v57, 1  ;;  %v3130_v2 = vmul.f32 %v9729_v5, %v9729_v5  ;;  %v9747_v15 = vsub.f32 %v11846_v27, %v2989_v25  ;;  %v3115_v33 = vmul.f32 %v9732_v28, %v9732_v28 }
 0x8e8   : > { %v3781_v14 = vmax.f32 %v3779_v35, %v3780_v12  ;;  %3283 = vadd.xlane.f32.xlu0 %v3282_v46  ;;  %v3817_v46 = vrot.slane %v3816_v16, 2  ;;  %v3011_v39 = vmul.f32 0.0625, %v9233_v40  ;;  %v4416_v50 = vadd.f32 %v4415_v54, %v4414_v51  ;;  %v11848_v35 = vld [vmem:[#allocation61_spill] sm:$0xff] }
 0x8e9   : > { %11847 = vst [vmem:[#allocation55_spill] sm:$0xff] %v9747_v15  ;;  %v3132_v0 = vmul.f32 %v9736_v32, %v9736_v32  ;;  %7259 = vrcp.f32 %v4404_v63  ;;  %v5243_v10 = vadd.f32 %v7653_v42, %v11848_v35  ;;  %v3810_v12 = vrot.slane %v3809_v21, 2 }
 0x8ea   : > { %v3782_v49 = vrot.slane %v3781_v14, 2  ;;  %v4432_v26 = vadd.f32 %v4431_v56, %v4430_v29  ;;  %v7254_v58 = vpop.eup %7253  ;;  %v9757_v25 = vsub.f32 %v11849_v60, %v3006_v44  ;;  %v3288_v36 = vsel %vm1264_vm2, %v3130_v2, 0.0  ;;  %v11850_v29 = vld [vmem:[#allocation38_spill] sm:$0xff] }
 0x8eb   : > { %v3818_v51 = vmax.f32 %v3816_v16, %v3817_v46  ;;  %v9761_v63 = vsel %vm1264_vm2, %v3115_v33, 0.0  ;;  %v9766_v56 = vsub.f32 %v11850_v29, %v3011_v39  ;;  %v3014_v44 = vmul.f32 0.0625, %v9255_v19  ;;  %v11851_v19 = vld [vmem:[#allocation67_spill] sm:$0xff]  ;;  %v11856_v29 = vld [vmem:[#allocation16_spill] sm:$0xff] }
 0x8ec   : > { %v3783_v11 = vmax.f32 %v3781_v14, %v3782_v49  ;;  %3280 = vadd.xlane.f32.xlu0 %v3279_v48  ;;  %v3805_v14 = vrot.slane %v3804_v30, 1  ;;  %v4411_v49 = vadd.f32 %v4410_v20, %v4409_v57  ;;  %v7256_v40 = vpop.eup %7255  ;;  %v3117_v48 = vmul.f32 %v9747_v15, %v9747_v15 }
 0x8ed   : > { %v7258_v27 = vpop.eup %7257  ;;  %v3294_v42 = vsel %vm1264_vm2, %v3132_v0, 0.0  ;;  %v4417_v57 = vrot.slane %v4416_v50, 1  ;;  %v3811_v20 = vmax.f32 %v3809_v21, %v3810_v12  ;;  %7261 = vrcp.f32 %v4432_v26  ;;  %v7654_v21 = vld [vmem:[%s7952_s26 + $0x118] sm:$0xff] }
 0x8ee   : > { %v3784_v52 = vrot.slane %v3783_v11, 1  ;;  %v4890_v2 = vmul.f32 %v7254_v58, %v9556_v45  ;;  %v3806_v46 = vmax.f32 %v3804_v30, %v3805_v14  ;;  %7263 = vrcp.f32 %v4411_v49  ;;  %v11853_v45 = vld [vmem:[#allocation42_spill] sm:$0xff] }
 0x8ef   : > { %v4891_v33 = vmul.f32 %v7256_v40, %v9573_v34  ;;  %v2992_v39 = vmul.f32 0.0625, %v11851_v19  ;;  %v3819_v0 = vrot.slane %v3818_v51, 1  ;;  %v9783_v30 = vsub.f32 %v11853_v45, %v3014_v44  ;;  %v11863_v19 = vld [vmem:[#allocation105_spill] sm:$0xff] }
 0x8f0   : > { %v3785_v54 = vmax.f32 %v3783_v11, %v3784_v52  ;;  %3289 = vadd.xlane.f32.xlu0 %v3288_v36  ;;  %v3134_v11 = vmul.f32 %v9757_v25, %v9757_v25  ;;  %v3139_v52 = vmul.f32 %v9766_v56, %v9766_v56  ;;  %v4418_v26 = vadd.f32 %v4417_v57, %v4416_v50  ;;  %v7655_v36 = vld [vmem:[%s7952_s26 + $0x128] sm:$0xff] }
 0x8f1   : > { %11854 = vst [vmem:[#allocation11_spill] sm:$0xff] %v9783_v30  ;;  %v3016_v34 = vmul.f32 0.0625, %v9277_v62  ;;  %v3812_v58 = vrot.slane %v3811_v20, 1  ;;  %v5530_v60 = vmul.f32 %v9298_v22, %v4890_v2  ;;  %v4194_v40 = vsub.f32 %v9671_v59, %v3806_v46 }
 0x8f2   : > { %v4191_v16 = vsub.f32 %v9720_v31, %v3785_v54  ;;  %5405 = vrot.lane.b32.xlu1 %v5243_v10, %s7700_s21  ;;  %v4889_v31 = vmul.f32 %v7258_v27, %v9567_v47  ;;  %v11852_v10 = vld [vmem:[#allocation62_spill] sm:$0xff]  ;;  %v11855_v47 = vld [vmem:[#allocation64_spill] sm:$0xff]  ;;  %v3300_v54 = vsel %vm1264_vm2, %v3134_v11, 0.0  ;;  %v5531_v27 = vmul.f32 %v9273_v7, %v4891_v33 }
 0x8f3   : > { %v9780_v12 = vadd.f32 %v7654_v21, %v11852_v10  ;;  %v7260_v14 = vpop.eup %7259  ;;  %v9791_v49 = vadd.f32 %v7655_v36, %v11855_v47  ;;  %v9797_v44 = vsub.f32 %v11856_v29, %v2992_v39  ;;  %v3820_v50 = vmax.f32 %v3818_v51, %v3819_v0  ;;  %v11859_v7 = vld [vmem:[#allocation44_spill] sm:$0xff]  ;;  %v9810_v51 = vpop.permute.xlu0 %5395  ;;  %v11862_v11 = vld [vmem:[#allocation102_spill] sm:$0xff] }
 0x8f4   : > { %v4261_v35 = vmul.f32 1.442695, %v4191_v16  ;;  %3295 = vadd.xlane.f32.xlu0 %v3294_v42  ;;  %v5529_v62 = vmul.f32 %v9251_v43, %v4889_v31  ;;  %v9801_v22 = vsel %vm1264_vm2, %v3117_v48, 0.0  ;;  %v11858_v42 = vld [vmem:[#allocation69_spill] sm:$0xff]  ;;  %v3315_v16 = vsel %vm1264_vm2, %v3139_v52, 0.0  ;;  %11861 = vst [vmem:[#allocation31_spill] sm:$0xff] %v9810_v51 }
 0x8f5   : > { %11857 = vst [vmem:[#allocation29_spill] sm:$0xff] %v9797_v44  ;;  %v2991_v57 = vmul.f32 0.0625, %v11858_v42  ;;  %v3142_v59 = vmul.f32 %v9783_v30, %v9783_v30  ;;  %v9808_v2 = vsub.f32 %v11859_v7, %v3016_v34  ;;  %v3813_v46 = vmax.f32 %v3811_v20, %v3812_v58  ;;  %v7656_v21 = vld [vmem:[%s7952_s26 + $0x120] sm:$0xff]  ;;  %v7657_v34 = vld [vmem:[%s7952_s26 + $0x138] sm:$0xff]  ;;  %v11870_v42 = vld [vmem:[#allocation47_spill] sm:$0xff] }
 0x8f6   : > { %7265 = vpow2.f32 %v4261_v35  ;;  %v4892_v43 = vmul.f32 %v7260_v14, %v9615_v24  ;;  %v5600_v48 = vsel %vm1264_vm2, %v5530_v60, 0.0  ;;  %v3015_v33 = vmul.f32 0.0625, %v11862_v11  ;;  %v11864_v10 = vld [vmem:[#allocation66_spill] sm:$0xff]  ;;  %v11865_v58 = vld [vmem:[#allocation65_spill] sm:$0xff]  ;;  %v9845_v11 = vpop.permute.xlu1 %5387 }
 0x8f7   : > { %7267 = vrcp.f32 %v4418_v26  ;;  %11860 = vst [vmem:[#allocation56_spill] sm:$0xff] %v9808_v2  ;;  %v3017_v39 = vmul.f32 0.0625, %v11863_v19  ;;  %v4267_v0 = vmul.f32 1.442695, %v4194_v40  ;;  %v5607_v35 = vsel %vm1264_vm2, %v5531_v27, 0.0  ;;  %v7262_v31 = vpop.eup %7261  ;;  %v11866_v14 = vld [vmem:[#allocation17_spill] sm:$0xff] }
 0x8f8   : > { %3301 = vadd.xlane.f32.xlu0 %v3300_v54  ;;  %v9819_v45 = vadd.f32 %v7656_v21, %v11864_v10  ;;  %v4196_v20 = vsub.f32 %v9696_v18, %v3820_v50  ;;  %v5593_v52 = vsel %vm1264_vm2, %v5529_v62, 0.0  ;;  %v3120_v24 = vmul.f32 %v9797_v44, %v9797_v44  ;;  %v7264_v26 = vpop.eup %7263  ;;  %v11868_v50 = vld [vmem:[#allocation45_spill] sm:$0xff]  ;;  %11872 = vst [vmem:[#allocation28_spill] sm:$0xff] %v9845_v11  ;;  %v11874_v19 = vld [vmem:[#allocation70_spill] sm:$0xff] }
 0x8f9   : > { %v9827_v60 = vadd.f32 %v7657_v34, %v11865_v58  ;;  %v9830_v36 = vsub.f32 %v11866_v14, %v2991_v57  ;;  %v3324_v47 = vsel %vm1264_vm2, %v3142_v59, 0.0  ;;  %v5601_v40 = vrot.slane %v5600_v48, 4 }
 0x8fa   : > { %v4195_v54 = vsub.f32 %v9703_v53, %v3813_v46  ;;  %v3144_v18 = vmul.f32 %v9808_v2, %v9808_v2  ;;  %v5532_v27 = vmul.f32 %v9316_v55, %v4892_v43  ;;  %v5608_v29 = vrot.slane %v5607_v35, 4  ;;  %v9847_v53 = vpop.permute.xlu0 %5393 }
 0x8fb   : > { %11867 = vst [vmem:[#allocation60_spill] sm:$0xff] %v9830_v36  ;;  %v9838_v62 = vsub.f32 %v11868_v50, %v3015_v33  ;;  %7269 = vpow2.f32 %v4267_v0  ;;  %v5594_v57 = vrot.slane %v5593_v52, 4  ;;  %v4271_v59 = vmul.f32 1.442695, %v4196_v20  ;;  %11873 = vst [vmem:[#allocation18_spill] sm:$0xff] %v9847_v53  ;;  %v7658_v33 = vld [vmem:[%s7952_s26 + $0x130] sm:$0xff] }
 0x8fc   : > { %3316 = vadd.xlane.f32.xlu0 %v3315_v16  ;;  %v9841_v16 = vsub.f32 %v11870_v42, %v3017_v39  ;;  %v4893_v46 = vmul.f32 %v7264_v26, %v9645_v9  ;;  %v4896_v55 = vmul.f32 %v7262_v31, %v9638_v6  ;;  %v9852_v43 = vsel %vm1264_vm2, %v3120_v24, 0.0  ;;  %v11875_v0 = vld [vmem:[#allocation72_spill] sm:$0xff] }
 0x8fd   : > { %11869 = vst [vmem:[#allocation25_spill] sm:$0xff] %v9838_v62  ;;  %v9856_v39 = vadd.f32 %v7658_v33, %v11874_v19  ;;  %v2993_v21 = vmul.f32 0.0625, %v11875_v0  ;;  %v5602_v20 = vadd.f32 %v5601_v40, %v5600_v48  ;;  %v4269_v34 = vmul.f32 1.442695, %v4195_v54  ;;  %v11877_v53 = vld [vmem:[#allocation20_spill] sm:$0xff] }
 0x8fe   : > { %11871 = vst [vmem:[#allocation26_spill] sm:$0xff] %v9841_v16  ;;  %v5609_v14 = vadd.f32 %v5608_v29, %v5607_v35  ;;  %v5614_v9 = vsel %vm1264_vm2, %v5532_v27, 0.0  ;;  %v3330_v6 = vsel %vm1264_vm2, %v3144_v18, 0.0  ;;  %v3143_v31 = vmul.f32 %v9838_v62, %v9838_v62  ;;  %v11876_v35 = vld [vmem:[#allocation107_spill] sm:$0xff] }
 0x8ff   : > { %v3145_v24 = vmul.f32 %v9841_v16, %v9841_v16  ;;  %7271 = vpow2.f32 %v4271_v59  ;;  %v5533_v40 = vmul.f32 %v9333_v23, %v4893_v46  ;;  %v5536_v54 = vmul.f32 %v11876_v35, %v4896_v55  ;;  %v11889_v16 = vld [vmem:[#allocation115_spill] sm:$0xff] }
 0x900   : > { %v9843_v7 = vpop.eup %7265  ;;  %3325 = vadd.xlane.f32.xlu0 %v3324_v47  ;;  %v5595_v47 = vadd.f32 %v5594_v57, %v5593_v52  ;;  %v5603_v33 = vrot.slane %v5602_v20, 2  ;;  %v5615_v18 = vrot.slane %v5614_v9, 4  ;;  %7273 = vpow2.f32 %v4269_v34 }
 0x901   : > { %v4419_v10 = vsel %vm1264_vm2, %v9843_v7, 0.0  ;;  %v7268_v26 = vpop.eup %7267  ;;  %v5610_v51 = vrot.slane %v5609_v14, 2  ;;  %v9871_v52 = vsub.f32 %v11877_v53, %v2993_v21 }
 0x902   : > { %v4420_v58 = vrot.slane %v4419_v10, 4  ;;  %v4894_v0 = vmul.f32 %v7268_v26, %v9683_v41  ;;  %v5596_v55 = vrot.slane %v5595_v47, 2  ;;  %v3333_v26 = vsel %vm1264_vm2, %v3145_v24, 0.0 }
 0x903   : > { %11878 = vst [vmem:[#allocation63_spill] sm:$0xff] %v9871_v52  ;;  %v5616_v53 = vadd.f32 %v5615_v18, %v5614_v9 }
 0x904   : > { %v4421_v50 = vadd.f32 %v4420_v58, %v4419_v10  ;;  %v3173_v42 = vpop.xlane.xlu1 %3172  ;;  %3331 = vadd.xlane.f32.xlu0 %v3330_v6  ;;  %v3188_v48 = vpop.xlane.xlu0 %3187  ;;  %v3327_v10 = vsel %vm1264_vm2, %v3143_v31, 0.0  ;;  %v5621_v58 = vsel %vm1264_vm2, %v5533_v40, 0.0  ;;  %v5642_v6 = vsel %vm1264_vm2, %v5536_v54, 0.0 }
 0x905   : > { %v3347_v27 = vmul.f32 0.0625, %v3173_v42  ;;  %v3352_v29 = vmul.f32 0.0625, %v3188_v48  ;;  %v9876_v34 = vpop.eup %7269  ;;  %v5534_v42 = vmul.f32 %v9324_v61, %v4894_v0  ;;  %v5604_v48 = vadd.f32 %v5603_v33, %v5602_v20 }
 0x906   : > { %v4422_v19 = vrot.slane %v4421_v50, 2  ;;  %v5611_v31 = vadd.f32 %v5610_v51, %v5609_v14  ;;  %v4440_v54 = vsel %vm1264_vm2, %v9876_v34, 0.0  ;;  %v5597_v24 = vadd.f32 %v5596_v55, %v5595_v47  ;;  %v7659_v47 = vld [vmem:[%s7952_s26 + $0x140] sm:$0xff]  ;;  %v11880_v55 = vld [vmem:[#allocation68_spill] sm:$0xff] }
 0x907   : > { %v3411_v57 = vadd.f32 1e-05, %v3347_v27  ;;  %v3416_v59 = vadd.f32 1e-05, %v3352_v29  ;;  %v5643_v27 = vrot.slane %v5642_v6, 4  ;;  %v11879_v29 = vld [vmem:[#allocation75_spill] sm:$0xff]  ;;  %v9885_v61 = vmul.f32 %v9830_v36, %v9830_v36 }
 0x908   : > { %3328 = vadd.xlane.f32.xlu0 %v3327_v10  ;;  %v3185_v23 = vpop.xlane.xlu0 %3184  ;;  %v4423_v46 = vadd.f32 %v4422_v19, %v4421_v50  ;;  %v5622_v50 = vrot.slane %v5621_v58, 4  ;;  %v2996_v40 = vmul.f32 0.0625, %v11879_v29  ;;  %v5617_v18 = vrot.slane %v5616_v53, 2 }
 0x909   : > { %7275 = vrsqrt.f32 %v3411_v57  ;;  %v3351_v41 = vmul.f32 0.0625, %v3185_v23  ;;  %v9887_v51 = vpop.eup %7271  ;;  %v5605_v20 = vrot.slane %v5604_v48, 1  ;;  %v5612_v14 = vrot.slane %v5611_v31, 1 }
 0x90a   : > { %v4424_v21 = vrot.slane %v4423_v46, 1  ;;  %7277 = vrsqrt.f32 %v3416_v59  ;;  %v5628_v33 = vsel %vm1264_vm2, %v5534_v42, 0.0  ;;  %v4441_v0 = vrot.slane %v4440_v54, 4 }
 0x90b   : > { %v3415_v35 = vadd.f32 1e-05, %v3351_v41  ;;  %v5623_v10 = vadd.f32 %v5622_v50, %v5621_v58  ;;  %v5644_v23 = vadd.f32 %v5643_v27, %v5642_v6  ;;  %v9894_v41 = vadd.f32 %v7659_v47, %v11880_v55  ;;  %v11883_v50 = vld [vmem:[#allocation78_spill] sm:$0xff] }
 0x90c   : > { %3334 = vadd.xlane.f32.xlu0 %v3333_v26  ;;  %v3194_v19 = vpop.xlane.xlu0 %3193  ;;  %v4425_v57 = vadd.f32 %v4424_v21, %v4423_v46  ;;  %v9890_v46 = vpop.eup %7273  ;;  %v11881_v26 = vld [vmem:[#allocation30_spill] sm:$0xff]  ;;  %v9901_v29 = vmul.f32 %v9871_v52, %v9871_v52  ;;  %v4454_v42 = vsel %vm1264_vm2, %v9887_v51, 0.0  ;;  %v5618_v58 = vadd.f32 %v5617_v18, %v5616_v53  ;;  %v11884_v52 = vld [vmem:[#allocation120_spill] sm:$0xff]  ;;  %v11885_v18 = vld [vmem:[#allocation81_spill] sm:$0xff] }
 0x90d   : > { %7279 = vrsqrt.f32 %v3415_v35  ;;  %v3354_v9 = vmul.f32 0.0625, %v3194_v19  ;;  %v9897_v21 = vsub.f32 %v11881_v26, %v2996_v40  ;;  %v5598_v35 = vrot.slane %v5597_v24, 1 }
 0x90e   : > { %7281 = vrcp.f32 %v4425_v57  ;;  %v5629_v6 = vrot.slane %v5628_v33, 4  ;;  %v9906_v27 = vmul.f32 0.0625, %v11883_v50  ;;  %v5606_v19 = vadd.f32 %v5605_v20, %v5604_v48  ;;  %v11886_v50 = vld [vmem:[#allocation84_spill] sm:$0xff] }
 0x90f   : > { %v3418_v59 = vadd.f32 1e-05, %v3354_v9  ;;  %11882 = vst [vmem:[#allocation33_spill] sm:$0xff] %v9897_v21  ;;  %v5613_v57 = vadd.f32 %v5612_v14, %v5611_v31  ;;  %v4442_v40 = vadd.f32 %v4441_v0, %v4440_v54  ;;  %v4447_v47 = vsel %vm1264_vm2, %v9890_v46, 0.0  ;;  %v9920_v14 = vld [vmem:[%s11537_s7] ss:$0 sm:$0xff] }
 0x910   : > { %v5624_v55 = vrot.slane %v5623_v10, 2  ;;  %v5645_v26 = vrot.slane %v5644_v23, 2  ;;  %v4455_v11 = vrot.slane %v4454_v42, 4  ;;  %v5599_v44 = vadd.f32 %v5598_v35, %v5597_v24 }
 0x911   : > { %7283 = vrsqrt.f32 %v3418_v59  ;;  %v9912_v59 = vmul.f32 0.0625, %v11885_v18  ;;  %v9915_v48 = vmul.f32 0.0625, %v11886_v50  ;;  %v5619_v31 = vrot.slane %v5618_v58, 1 }
 0x912   : > { %v5630_v20 = vadd.f32 %v5629_v6, %v5628_v33  ;;  %v4448_v54 = vrot.slane %v4447_v47, 4  ;;  %v6115_v35 = vsel %vm6114_vm3, %v5606_v19, %v5599_v44  ;;  %v4443_v18 = vrot.slane %v4442_v40, 2  ;;  %v11888_v44 = vld [vmem:[#allocation123_spill] sm:$0xff] }
 0x913   : > { %v7276_v9 = vpop.eup %7275  ;;  %v5625_v50 = vadd.f32 %v5624_v55, %v5623_v10  ;;  %v9926_v15 = vadd.f32 %v5645_v26, %v5644_v23  ;;  %v6117_v33 = vsel %vm6116_vm4, %v5613_v57, %v6115_v35  ;;  %v4456_v28 = vadd.f32 %v4455_v11, %v4454_v42  ;;  %v6041_v10 = vld [vmem:[%s11539_s9] sm:$0xff]  ;;  %v6042_v11 = vld [vmem:[%s11539_s9 + $0x8] sm:$0xff] }
 0x914   : > { %v3539_v36 = vmul.f32 %v7276_v9, %v11884_v52  ;;  %v7278_v53 = vpop.eup %7277  ;;  %v11887_v52 = vld [vmem:[#allocation121_spill] sm:$0xff]  ;;  %v5620_v42 = vadd.f32 %v5619_v31, %v5618_v58  ;;  %v5631_v57 = vrot.slane %v5630_v20, 2  ;;  %v7186_v55 = vpack.c.bf16 %v6042_v11, %v6041_v10 }
 0x915   : > { %v3544_v24 = vmul.f32 %v7278_v53, %v11887_v52  ;;  %v4449_v26 = vadd.f32 %v4448_v54, %v4447_v47  ;;  %v5626_v58 = vrot.slane %v5625_v50, 1  ;;  %v4457_v31 = vrot.slane %v4456_v28, 2 }
 0x916   : > { %v3610_v0 = vmul.f32 %v9920_v14, %v3539_v36  ;;  %3202 = vadd.xlane.f32.xlu1 %v9554_v3  ;;  %v9932_v36 = vld [vmem:[%s11538_s8] ss:$0 sm:$0xff]  ;;  %7187 = vmatprep.subr.bf16.mxu0 %v7186_v55  ;;  %v6119_v30 = vsel %vm6118_vm5, %v5620_v42, %v6117_v33 }
 0x917   : > { %v7280_v9 = vpop.eup %7279  ;;  %v3615_v3 = vmul.f32 %v9920_v14, %v3544_v24  ;;  %7189 = vmatpush3.bf16.msra.mxu0 %v7186_v55  ;;  %v4458_v55 = vadd.f32 %v4457_v31, %v4456_v28 }
 0x918   : > { %v7282_v6 = vpop.eup %7281  ;;  %v9935_v53 = vadd.f32 %v9932_v36, %v3610_v0  ;;  %v3543_v19 = vmul.f32 %v7280_v9, %v11888_v44  ;;  %v4444_v9 = vadd.f32 %v4443_v18, %v4442_v40  ;;  %v4450_v18 = vrot.slane %v4449_v26, 2 }
 0x919   : > { %v4895_v23 = vmul.f32 %v7282_v6, %v9843_v7  ;;  %v9949_v52 = vadd.f32 %v9932_v36, %v3615_v3  ;;  %v11890_v6 = vld [vmem:[#allocation125_spill] sm:$0xff] }
 0x91a   : > { %v3793_v0 = vsel %vm1264_vm2, %v9935_v53, -inf  ;;  %v3614_v24 = vmul.f32 %v9920_v14, %v3543_v19  ;;  %3211 = vadd.xlane.f32.xlu1 %v9602_v17  ;;  %v5632_v17 = vadd.f32 %v5631_v57, %v5630_v20  ;;  %v5627_v57 = vadd.f32 %v5626_v58, %v5625_v50 }
 0x91b   : > { %v7284_v35 = vpop.eup %7283  ;;  %v3794_v44 = vrot.slane %v3793_v0, 4  ;;  %v5535_v7 = vmul.f32 %v11889_v16, %v4895_v23  ;;  %v3828_v47 = vsel %vm1264_vm2, %v9949_v52, -inf }
 0x91c   : > { %v9957_v54 = vadd.f32 %v9932_v36, %v3614_v24  ;;  %v3546_v3 = vmul.f32 %v7284_v35, %v11890_v6  ;;  %v3829_v10 = vrot.slane %v3828_v47, 4  ;;  %v4445_v24 = vrot.slane %v4444_v9, 1 }
 0x91d   : > { %v3795_v19 = vmax.f32 %v3793_v0, %v3794_v44  ;;  %v5635_v40 = vsel %vm1264_vm2, %v5535_v7, 0.0  ;;  %v5633_v28 = vrot.slane %v5632_v17, 1  ;;  %v6121_v33 = vsel %vm6120_vm6, %v5627_v57, %v6119_v30 }
 0x91e   : > { %v3821_v16 = vsel %vm1264_vm2, %v9957_v54, -inf  ;;  %v3617_v11 = vmul.f32 %v9920_v14, %v3546_v3  ;;  %3208 = vadd.xlane.f32.xlu1 %v9608_v8  ;;  %v5636_v23 = vrot.slane %v5635_v40, 4  ;;  %v3830_v2 = vmax.f32 %v3828_v47, %v3829_v10 }
 0x91f   : > { %v3796_v62 = vrot.slane %v3795_v19, 2  ;;  %v3822_v35 = vrot.slane %v3821_v16, 4  ;;  %v4451_v3 = vadd.f32 %v4450_v18, %v4449_v26  ;;  %v4459_v10 = vrot.slane %v4458_v55, 1 }
 0x920   : > { %v9966_v20 = vadd.f32 %v9932_v36, %v3617_v11  ;;  %v5637_v0 = vadd.f32 %v5636_v23, %v5635_v40  ;;  %v3831_v7 = vrot.slane %v3830_v2, 2 }
 0x921   : > { %v3797_v44 = vmax.f32 %v3795_v19, %v3796_v62  ;;  %v3823_v6 = vmax.f32 %v3821_v16, %v3822_v35  ;;  %v4446_v19 = vadd.f32 %v4445_v24, %v4444_v9  ;;  %v4452_v11 = vrot.slane %v4451_v3, 1 }
 0x922   : > { %v3842_v8 = vsel %vm1264_vm2, %v9966_v20, -inf  ;;  %3214 = vadd.xlane.f32.xlu1 %v9611_v4  ;;  %5417 = vrot.lane.b32.xlu0 %v9894_v41, %s7700_s21  ;;  %v5638_v31 = vrot.slane %v5637_v0, 2  ;;  %v3832_v50 = vmax.f32 %v3830_v2, %v3831_v7  ;;  %v11891_v4 = vld [vmem:[#allocation2_spill] sm:$0xff]  ;;  %v5634_v41 = vadd.f32 %v5633_v28, %v5632_v17 }
 0x923   : > { %v3798_v47 = vrot.slane %v3797_v44, 1  ;;  %v3824_v58 = vrot.slane %v3823_v6, 2  ;;  %v3843_v62 = vrot.slane %v3842_v8, 4  ;;  %v5647_v2 = vrot.slane %v9926_v15, 1 }
 0x924   : > { %v5639_v40 = vadd.f32 %v5638_v31, %v5637_v0  ;;  %v3833_v26 = vrot.slane %v3832_v50, 1  ;;  %7285 = vrcp.f32 %v4446_v19  ;;  %v4460_v30 = vadd.f32 %v4459_v10, %v4458_v55  ;;  %v11892_v31 = vld [vmem:[#allocation87_spill] sm:$0xff] }
 0x925   : > { %v3799_v42 = vmax.f32 %v3797_v44, %v3798_v47  ;;  %v3825_v18 = vmax.f32 %v3823_v6, %v3824_v58  ;;  %v3844_v16 = vmax.f32 %v3842_v8, %v3843_v62  ;;  %v6123_v44 = vsel %vm6122_vm7, %v5634_v41, %v6121_v33  ;;  %v11893_v47 = vld [vmem:[#allocation21_spill] sm:$0xff]  ;;  %v11896_v10 = vld [vmem:[#allocation91_spill] sm:$0xff] }
 0x926   : > { %3223 = vadd.xlane.f32.xlu1 %v9636_v38  ;;  %5383 = vrot.lane.b32.xlu0 %v11891_v4, %s7700_s21  ;;  %v5640_v23 = vrot.slane %v5639_v40, 1  ;;  %v3834_v24 = vmax.f32 %v3832_v50, %v3833_v26  ;;  %v3005_v17 = vmul.f32 0.0625, %v11892_v31  ;;  %v4453_v28 = vadd.f32 %v4452_v11, %v4451_v3  ;;  %v11901_v26 = vld [vmem:[#allocation23_spill] sm:$0xff]  ;;  %v11904_v4 = vld [vmem:[#allocation93_spill] sm:$0xff] }
 0x927   : > { %v4193_v9 = vsub.f32 %v9935_v53, %v3799_v42  ;;  %v3826_v35 = vrot.slane %v3825_v18, 1  ;;  %v3845_v0 = vrot.slane %v3844_v16, 2  ;;  %v5648_v53 = vadd.f32 %v5647_v2, %v9926_v15  ;;  %v7662_v41 = vld [vmem:[%s7952_s26 + $0x148] sm:$0xff] }
 0x928   : > { %v5641_v57 = vadd.f32 %v5640_v23, %v5639_v40  ;;  %v4198_v38 = vsub.f32 %v9949_v52, %v3834_v24  ;;  %v11894_v52 = vld [vmem:[#allocation24_spill] sm:$0xff]  ;;  %v3008_v3 = vmul.f32 0.0625, %v11896_v10  ;;  %v11905_v23 = vld [vmem:[#allocation73_spill] sm:$0xff]  ;;  %v7665_v31 = vld [vmem:[%s7952_s26 + $0x168] sm:$0xff] }
 0x929   : > { %v4265_v7 = vmul.f32 1.442695, %v4193_v9  ;;  %v3827_v6 = vmax.f32 %v3825_v18, %v3826_v35  ;;  %v3846_v8 = vmax.f32 %v3844_v16, %v3845_v0  ;;  %v9991_v19 = vsub.f32 %v11894_v52, %v9906_v27  ;;  %v11902_v16 = vld [vmem:[#allocation34_spill] sm:$0xff]  ;;  %v7663_v9 = vld [vmem:[%s7952_s26 + $0x158] sm:$0xff]  ;;  %v11907_v35 = vld [vmem:[#allocation36_spill] sm:$0xff] }
 0x92a   : > { %3226 = vadd.xlane.f32.xlu1 %v11893_v47  ;;  %5407 = vrot.lane.b32.xlu0 %v9780_v12, %s7700_s21  ;;  %v6125_v55 = vsel %vm6124_vm8, %v5641_v57, %v6123_v44  ;;  %v4275_v50 = vmul.f32 1.442695, %v4198_v38  ;;  %v11897_v12 = vld [vmem:[#allocation27_spill] sm:$0xff]  ;;  %v3124_v18 = vmul.f32 %v9897_v21, %v9897_v21  ;;  %v10014_v11 = vsub.f32 %v11902_v16, %v3005_v17  ;;  %v7664_v57 = vld [vmem:[%s7952_s26 + $0x150] sm:$0xff]  ;;  %v11909_v44 = vld [vmem:[#allocation77_spill] sm:$0xff] }
 0x92b   : > { %7287 = vpow2.f32 %v4265_v7  ;;  %v4197_v58 = vsub.f32 %v9957_v54, %v3827_v6  ;;  %v3847_v62 = vrot.slane %v3846_v8, 1  ;;  %11895 = vst [vmem:[#allocation22_spill] sm:$0xff] %v9991_v19  ;;  %v6127_v40 = vsel %vm6126_vm9, %v5648_v53, %v6125_v55  ;;  %v11899_v54 = vld [vmem:[#allocation32_spill] sm:$0xff]  ;;  %v11910_v17 = vld [vmem:[#allocation74_spill] sm:$0xff]  ;;  %v11913_v10 = vld [vmem:[#allocation37_spill] sm:$0xff] }
 0x92c   : > { %7289 = vrcp.f32 %v4460_v30  ;;  %v9997_v15 = vsub.f32 %v11897_v12, %v9912_v59  ;;  %7150 = vmatprep.mubr.msk.f32.mxu0 %vm1264_vm2, %v6127_v40  ;;  %v10002_v27 = vsub.f32 %v11899_v54, %v9915_v48  ;;  %v10009_v59 = vsel %vm1264_vm2, %v9885_v61, 0.0  ;;  %11903 = vst [vmem:[#allocation38_spill] sm:$0xff] %v10014_v11  ;;  %v11906_v61 = vld [vmem:[#allocation71_spill] sm:$0xff]  ;;  %v7666_v47 = vld [vmem:[%s7952_s26 + $0x160] sm:$0xff]  ;;  %v11911_v53 = vld [vmem:[#allocation76_spill] sm:$0xff] }
 0x92d   : > { %7291 = vpow2.f32 %v4275_v50  ;;  %v4273_v33 = vmul.f32 1.442695, %v4197_v58  ;;  %v3848_v42 = vmax.f32 %v3846_v8, %v3847_v62  ;;  %v3007_v48 = vmul.f32 0.0625, %v11904_v4  ;;  %v7667_v58 = vld [vmem:[%s7952_s26 + $0x170] sm:$0xff]  ;;  %v11912_v62 = vld [vmem:[#allocation79_spill] sm:$0xff]  ;;  %v7668_v40 = vld [vmem:[%s7952_s26 + $0x178] sm:$0xff] }
 0x92e   : > { %11898 = vst [vmem:[#allocation61_spill] sm:$0xff] %v9997_v15  ;;  %11900 = vst [vmem:[#allocation35_spill] sm:$0xff] %v10002_v27  ;;  %7293 = vrcp.f32 %v4453_v28  ;;  %3238 = vadd.xlane.f32.xlu1 %v9740_v1  ;;  %5399 = vrot.lane.b32.xlu0 %v11901_v26, %s7700_s21  ;;  %v10020_v2 = vadd.f32 %v7662_v41, %v11905_v23  ;;  %v5252_v24 = vadd.f32 %v7663_v9, %v11906_v61  ;;  %v7286_v8 = vpop.eup %7285  ;;  %v11915_v12 = vld [vmem:[#allocation80_spill] sm:$0xff]  ;;  %v11916_v54 = vld [vmem:[#allocation82_spill] sm:$0xff] }
 0x92f   : > { %7295 = vpow2.f32 %v4273_v33  ;;  %v4200_v1 = vsub.f32 %v9966_v20, %v3848_v42  ;;  %v10025_v0 = vsub.f32 %v11907_v35, %v3008_v3  ;;  %v3125_v30 = vmul.f32 %v9991_v19, %v9991_v19  ;;  %v7669_v42 = vld [vmem:[%s7952_s26 + $0x180] sm:$0xff]  ;;  %v7671_v23 = vld [vmem:[%s7952_s26 + $0x190] sm:$0xff]  ;;  %v11918_v9 = vld [vmem:[#allocation85_spill] sm:$0xff]  ;;  %v10083_v35 = vpop.permute.xlu1 %5389 }
 0x930   : > { %v10031_v7 = vadd.f32 %v7664_v57, %v11909_v44  ;;  %v10035_v20 = vsel %vm1264_vm2, %v9901_v29, 0.0  ;;  %v3129_v6 = vmul.f32 %v9997_v15, %v9997_v15  ;;  %v10041_v28 = vadd.f32 %v7665_v31, %v11910_v17  ;;  %11919 = vst [vmem:[#allocation42_spill] sm:$0xff] %v10083_v35  ;;  %v7672_v44 = vld [vmem:[%s7952_s26 + $0x198] sm:$0xff]  ;;  %v7673_v17 = vld [vmem:[%s7952_s26 + $0x1a8] sm:$0xff] }
 0x931   : > { %11908 = vst [vmem:[#allocation67_spill] sm:$0xff] %v10025_v0  ;;  %v4279_v38 = vmul.f32 1.442695, %v4200_v1  ;;  %v5253_v55 = vadd.f32 %v7666_v47, %v11911_v53  ;;  %v10048_v29 = vsel %vm1264_vm2, %v3124_v18, 0.0  ;;  %v3131_v50 = vmul.f32 %v10002_v27, %v10002_v27  ;;  %v11917_v1 = vld [vmem:[#allocation83_spill] sm:$0xff]  ;;  %v11921_v47 = vld [vmem:[#allocation88_spill] sm:$0xff] }
 0x932   : > { %3244 = vadd.xlane.f32.xlu1 %v9761_v63  ;;  %5423 = vrot.lane.b32.xlu0 %v5252_v24, %s7700_s21  ;;  %v10054_v52 = vadd.f32 %v7667_v58, %v11912_v62  ;;  %v10057_v3 = vsub.f32 %v11913_v10, %v3007_v48  ;;  %v3133_v63 = vmul.f32 %v10014_v11, %v10014_v11  ;;  %v10070_v18 = vsel %vm1264_vm2, %v3125_v30, 0.0  ;;  %v7670_v48 = vld [vmem:[%s7952_s26 + $0x188] sm:$0xff]  ;;  %v11923_v62 = vld [vmem:[#allocation90_spill] sm:$0xff] }
 0x933   : > { %7297 = vpow2.f32 %v4279_v38  ;;  %v10063_v33 = vadd.f32 %v7668_v40, %v11915_v12  ;;  %v10067_v26 = vadd.f32 %v7669_v42, %v11916_v54  ;;  %v3136_v16 = vmul.f32 %v10025_v0, %v10025_v0  ;;  %v11920_v38 = vld [vmem:[#allocation86_spill] sm:$0xff] }
 0x934   : > { %11914 = vst [vmem:[#allocation62_spill] sm:$0xff] %v10057_v3  ;;  %v5258_v41 = vadd.f32 %v7670_v48, %v11917_v1  ;;  %v10080_v61 = vadd.f32 %v7671_v23, %v11918_v9  ;;  %v4898_v24 = vmul.f32 %v7286_v8, %v9876_v34  ;;  %v10086_v30 = vsel %vm1264_vm2, %v3129_v6, 0.0  ;;  %v7674_v8 = vld [vmem:[%s7952_s26 + $0x1a0] sm:$0xff]  ;;  %v11924_v48 = vld [vmem:[#allocation89_spill] sm:$0xff] }
 0x935   : > { %v10074_v4 = vpop.eup %7287  ;;  %v10090_v31 = vadd.f32 %v7672_v44, %v11920_v38  ;;  %v10094_v53 = vadd.f32 %v7673_v17, %v11921_v47  ;;  %v10101_v34 = vsel %vm1264_vm2, %v3131_v50, 0.0  ;;  %v10107_v10 = vadd.f32 %v7674_v8, %v11923_v62  ;;  %v7675_v54 = vld [vmem:[%s7952_s26 + $0x1c0] sm:$0xff]  ;;  %v11925_v1 = vld [vmem:[#allocation97_spill] sm:$0xff]  ;;  %v11928_v47 = vld [vmem:[#allocation108_spill] sm:$0xff] }
 0x936   : > { %v7290_v57 = vpop.eup %7289  ;;  %v4433_v58 = vsel %vm1264_vm2, %v10074_v4, 0.0  ;;  %3250 = vadd.xlane.f32.xlu1 %v9801_v22  ;;  %5425 = vrot.lane.b32.xlu0 %v5253_v55, %s7700_s21  ;;  %v10110_v12 = vsel %vm1264_vm2, %v3133_v63, 0.0  ;;  %v3135_v42 = vmul.f32 %v10057_v3, %v10057_v3  ;;  %v5265_v55 = vadd.f32 %v7675_v54, %v11924_v48  ;;  %v7676_v38 = vld [vmem:[%s7952_s26 + $0x1b8] sm:$0xff]  ;;  %v11926_v63 = vld [vmem:[#allocation94_spill] sm:$0xff]  ;;  %v11929_v48 = vld [vmem:[#allocation99_spill] sm:$0xff] }
 0x937   : > { %11922 = vst [vmem:[#allocation64_spill] sm:$0xff] %v10094_v53  ;;  %v10103_v6 = vpop.eup %7291  ;;  %v4434_v40 = vrot.slane %v4433_v58, 4  ;;  %v3010_v50 = vmul.f32 0.0625, %v11925_v1  ;;  %v10120_v9 = vsel %vm1264_vm2, %v3136_v16, 0.0  ;;  %v10126_v17 = vadd.f32 %v7676_v38, %v11926_v63 }
 0x938   : > { %v7294_v22 = vpop.eup %7293  ;;  %v4468_v23 = vsel %vm1264_vm2, %v10103_v6, 0.0  ;;  %v5538_v8 = vmul.f32 %v11928_v47, %v4898_v24  ;;  %v3009_v1 = vmul.f32 0.0625, %v11929_v48  ;;  %v4900_v3 = vmul.f32 %v7290_v57, %v9887_v51  ;;  %v11932_v48 = vld [vmem:[#allocation39_spill] sm:$0xff] }
 0x939   : > { %v10122_v44 = vpop.eup %7295  ;;  %11927 = vst [vmem:[#allocation16_spill] sm:$0xff] %v10126_v17  ;;  %v4435_v62 = vadd.f32 %v4434_v40, %v4433_v58  ;;  %v4469_v35 = vrot.slane %v4468_v23, 4  ;;  %v3191_v54 = vpop.xlane.xlu1 %3190  ;;  %v10136_v24 = vsel %vm1264_vm2, %v3135_v42, 0.0  ;;  %v7677_v58 = vld [vmem:[%s7952_s26 + $0x1b0] sm:$0xff]  ;;  %v11930_v40 = vld [vmem:[#allocation95_spill] sm:$0xff]  ;;  %v10143_v51 = vsub.f32 %v11932_v48, %v3010_v50 }
 0x93a   : > { %v4461_v16 = vsel %vm1264_vm2, %v10122_v44, 0.0  ;;  %v3353_v0 = vmul.f32 0.0625, %v3191_v54  ;;  %3259 = vadd.xlane.f32.xlu1 %v9852_v43  ;;  %5435 = vrot.lane.b32.xlu0 %v5258_v41, %s7700_s21  ;;  %v10140_v47 = vadd.f32 %v7677_v58, %v11930_v40  ;;  %v4899_v57 = vmul.f32 %v7294_v22, %v9890_v46  ;;  %v11937_v46 = vld [vmem:[#allocation110_spill] sm:$0xff] }
 0x93b   : > { %v4436_v11 = vrot.slane %v4435_v62, 2  ;;  %v4470_v38 = vadd.f32 %v4469_v35, %v4468_v23  ;;  %v4462_v63 = vrot.slane %v4461_v16, 4  ;;  %11933 = vst [vmem:[#allocation44_spill] sm:$0xff] %v10143_v51  ;;  %v10148_v35 = vpop.permute.xlu0 %5403  ;;  %v5656_v42 = vsel %vm1264_vm2, %v5538_v8, 0.0  ;;  %v11935_v23 = vld [vmem:[#allocation40_spill] sm:$0xff] }
 0x93c   : > { %11931 = vst [vmem:[#allocation69_spill] sm:$0xff] %v10140_v47  ;;  %v3417_v54 = vadd.f32 1e-05, %v3353_v0  ;;  %11934 = vst [vmem:[#allocation102_spill] sm:$0xff] %v10148_v35  ;;  %v10152_v19 = vsub.f32 %v11935_v23, %v3009_v1  ;;  %v3138_v1 = vmul.f32 %v10143_v51, %v10143_v51  ;;  %v5657_v48 = vrot.slane %v5656_v42, 4 }
 0x93d   : > { %v10146_v27 = vpop.eup %7297  ;;  %v4437_v43 = vadd.f32 %v4436_v11, %v4435_v62  ;;  %v4471_v41 = vrot.slane %v4470_v38, 2  ;;  %v4463_v15 = vadd.f32 %v4462_v63, %v4461_v16  ;;  %v5540_v11 = vmul.f32 %v11937_v46, %v4900_v3  ;;  %v11938_v16 = vld [vmem:[#allocation101_spill] sm:$0xff]  ;;  %v11939_v63 = vld [vmem:[#allocation111_spill] sm:$0xff] }
 0x93e   : > { %11936 = vst [vmem:[#allocation105_spill] sm:$0xff] %v10152_v19  ;;  %v4482_v58 = vsel %vm1264_vm2, %v10146_v27, 0.0  ;;  %7299 = vrsqrt.f32 %v3417_v54  ;;  %3256 = vadd.xlane.f32.xlu1 %v10009_v59  ;;  %5427 = vrot.lane.b32.xlu0 %v10041_v28, %s7700_s21  ;;  %v3012_v8 = vmul.f32 0.0625, %v11938_v16  ;;  %v5539_v40 = vmul.f32 %v11939_v63, %v4899_v57  ;;  %v11940_v28 = vld [vmem:[#allocation106_spill] sm:$0xff]  ;;  %v7678_v63 = vld [vmem:[%s7952_s26 + $0x1d8] sm:$0xff] }
 0x93f   : > { %v4438_v0 = vrot.slane %v4437_v43, 1  ;;  %v4472_v22 = vadd.f32 %v4471_v41, %v4470_v38  ;;  %v4464_v50 = vrot.slane %v4463_v15, 2  ;;  %v4483_v62 = vrot.slane %v4482_v58, 4 }
 0x940   : > { %v3013_v17 = vmul.f32 0.0625, %v11940_v28  ;;  %v3137_v38 = vmul.f32 %v10152_v19, %v10152_v19  ;;  %v5670_v41 = vsel %vm1264_vm2, %v5540_v11, 0.0  ;;  %v11943_v28 = vld [vmem:[#allocation92_spill] sm:$0xff] }
 0x941   : > { %v4439_v54 = vadd.f32 %v4438_v0, %v4437_v43  ;;  %v4473_v23 = vrot.slane %v4472_v22, 1  ;;  %v4465_v59 = vadd.f32 %v4464_v50, %v4463_v15  ;;  %v4484_v35 = vadd.f32 %v4483_v62, %v4482_v58  ;;  %v3200_v21 = vpop.xlane.xlu0 %3199  ;;  %v11941_v15 = vld [vmem:[#allocation43_spill] sm:$0xff] }
 0x942   : > { %v3356_v3 = vmul.f32 0.0625, %v3200_v21  ;;  %3262 = vadd.xlane.f32.xlu1 %v10035_v20  ;;  %5449 = vrot.lane.b32.xlu0 %v5265_v55, %s7700_s21  ;;  %v10171_v58 = vsub.f32 %v11941_v15, %v3012_v8  ;;  %v5658_v50 = vadd.f32 %v5657_v48, %v5656_v42  ;;  %v5663_v21 = vsel %vm1264_vm2, %v5539_v40, 0.0  ;;  %v11946_v42 = vld [vmem:[#allocation113_spill] sm:$0xff] }
 0x943   : > { %7301 = vrcp.f32 %v4439_v54  ;;  %v4474_v57 = vadd.f32 %v4473_v23, %v4472_v22  ;;  %v4466_v43 = vrot.slane %v4465_v59, 1  ;;  %v4485_v46 = vrot.slane %v4484_v35, 2  ;;  %v11944_v22 = vld [vmem:[#allocation46_spill] sm:$0xff] }
 0x944   : > { %11942 = vst [vmem:[#allocation66_spill] sm:$0xff] %v10171_v58  ;;  %v3420_v0 = vadd.f32 1e-05, %v3356_v3  ;;  %v5671_v16 = vrot.slane %v5670_v41, 4  ;;  %v10176_v11 = vadd.f32 %v7678_v63, %v11943_v28  ;;  %v10179_v54 = vsub.f32 %v11944_v22, %v3013_v17  ;;  %v11947_v3 = vld [vmem:[#allocation100_spill] sm:$0xff]  ;;  %v7680_v22 = vld [vmem:[%s7952_s26 + $0x1e8] sm:$0xff] }
 0x945   : > { %7303 = vrcp.f32 %v4474_v57  ;;  %v4467_v20 = vadd.f32 %v4466_v43, %v4465_v59  ;;  %v4486_v55 = vadd.f32 %v4485_v46, %v4484_v35  ;;  %v3206_v62 = vpop.xlane.xlu0 %3205  ;;  %v3018_v40 = vmul.f32 0.0625, %v11946_v42  ;;  %v7679_v59 = vld [vmem:[%s7952_s26 + $0x1c8] sm:$0xff]  ;;  %v11948_v46 = vld [vmem:[#allocation129_spill] sm:$0xff] }
 0x946   : > { %11945 = vst [vmem:[#allocation65_spill] sm:$0xff] %v10179_v54  ;;  %7305 = vrsqrt.f32 %v3420_v0  ;;  %v3358_v8 = vmul.f32 0.0625, %v3206_v62  ;;  %3271 = vadd.xlane.f32.xlu1 %v10048_v29  ;;  %5415 = vrot.lane.b32.xlu0 %v9827_v60, %s7700_s21  ;;  %v5664_v48 = vrot.slane %v5663_v21, 4  ;;  %v10187_v57 = vadd.f32 %v7679_v59, %v11947_v3  ;;  %v7681_v59 = vld [vmem:[%s7952_s26 + $0x1e0] sm:$0xff] }
 0x947   : > { %7307 = vrcp.f32 %v4467_v20  ;;  %v4487_v35 = vrot.slane %v4486_v55, 1  ;;  %v10190_v43 = vsel %vm1264_vm2, %v3138_v1, 0.0  ;;  %v3140_v29 = vmul.f32 %v10171_v58, %v10171_v58 }
 0x948   : > { %v7300_v23 = vpop.eup %7299  ;;  %v3422_v17 = vadd.f32 1e-05, %v3358_v8  ;;  %v10196_v0 = vsel %vm1264_vm2, %v3137_v38, 0.0  ;;  %v5659_v20 = vrot.slane %v5658_v50, 2  ;;  %v5672_v62 = vadd.f32 %v5671_v16, %v5670_v41  ;;  %v11949_v8 = vld [vmem:[#allocation96_spill] sm:$0xff]  ;;  %v11950_v38 = vld [vmem:[#allocation41_spill] sm:$0xff] }
 0x949   : > { %v3545_v60 = vmul.f32 %v7300_v23, %v11948_v46  ;;  %v3218_v15 = vpop.xlane.xlu0 %3217  ;;  %v3141_v1 = vmul.f32 %v10179_v54, %v10179_v54  ;;  %v4488_v28 = vadd.f32 %v4487_v35, %v4486_v55  ;;  %v10205_v42 = vadd.f32 %v7680_v22, %v11949_v8  ;;  %v11953_v46 = vld [vmem:[#allocation103_spill] sm:$0xff]  ;;  %v7683_v22 = vld [vmem:[%s7952_s26 + $0x1f0] sm:$0xff] }
 0x94a   : > { %7309 = vrsqrt.f32 %v3422_v17  ;;  %v3362_v63 = vmul.f32 0.0625, %v3218_v15  ;;  %3274 = vadd.xlane.f32.xlu1 %v10070_v18  ;;  %5439 = vrot.lane.b32.xlu0 %v10090_v31, %s7700_s21  ;;  %v10208_v23 = vsub.f32 %v11950_v38, %v3018_v40  ;;  %v5665_v16 = vadd.f32 %v5664_v48, %v5663_v21  ;;  %v11952_v18 = vld [vmem:[#allocation98_spill] sm:$0xff]  ;;  %v7682_v17 = vld [vmem:[%s7952_s26 + $0x1d0] sm:$0xff] }
 0x94b   : > { %v3616_v41 = vmul.f32 %v9920_v14, %v3545_v60  ;;  %v5269_v3 = vadd.f32 %v7681_v59, %v11952_v18  ;;  %v10215_v31 = vadd.f32 %v7682_v17, %v11953_v46  ;;  %v10218_v55 = vsel %vm1264_vm2, %v3140_v29, 0.0  ;;  %v11954_v8 = vld [vmem:[#allocation104_spill] sm:$0xff]  ;;  %v7684_v17 = vld [vmem:[%s7952_s26 + $0x1f8] sm:$0xff] }
 0x94c   : > { %11951 = vst [vmem:[#allocation17_spill] sm:$0xff] %v10208_v23  ;;  %v3426_v15 = vadd.f32 1e-05, %v3362_v63  ;;  %v10222_v40 = vadd.f32 %v7683_v22, %v11954_v8  ;;  %v5660_v48 = vadd.f32 %v5659_v20, %v5658_v50  ;;  %v5673_v38 = vrot.slane %v5672_v62, 2  ;;  %v11955_v46 = vld [vmem:[#allocation109_spill] sm:$0xff] }
 0x94d   : > { %v7302_v35 = vpop.eup %7301  ;;  %v10225_v60 = vadd.f32 %v9932_v36, %v3616_v41  ;;  %v3221_v21 = vpop.xlane.xlu0 %3220  ;;  %v10232_v29 = vsel %vm1264_vm2, %v3141_v1, 0.0  ;;  %7311 = vrcp.f32 %v4488_v28  ;;  %v10236_v41 = vadd.f32 %v7684_v17, %v11955_v46  ;;  %v11958_v28 = vld [vmem:[#allocation130_spill] sm:$0xff] }
 0x94e   : > { %v4897_v59 = vmul.f32 %v7302_v35, %v10074_v4  ;;  %v3363_v18 = vmul.f32 0.0625, %v3221_v21  ;;  %3286 = vadd.xlane.f32.xlu1 %v10086_v30  ;;  %5431 = vrot.lane.b32.xlu0 %v10063_v33, %s7700_s21  ;;  %v3146_v4 = vmul.f32 %v10208_v23, %v10208_v23  ;;  %v5666_v20 = vrot.slane %v5665_v16, 2  ;;  %v11957_v35 = vld [vmem:[#allocation117_spill] sm:$0xff] }
 0x94f   : > { %v7304_v63 = vpop.eup %7303  ;;  %11956 = vst [vmem:[#allocation45_spill] sm:$0xff] %v10236_v41  ;;  %v3835_v50 = vsel %vm1264_vm2, %v10225_v60, -inf  ;;  %7313 = vrsqrt.f32 %v3426_v15  ;;  %v5661_v46 = vrot.slane %v5660_v48, 1  ;;  %v5674_v58 = vadd.f32 %v5673_v38, %v5672_v62 }
 0x950   : > { %v7306_v30 = vpop.eup %7305  ;;  %v5537_v22 = vmul.f32 %v11957_v35, %v4897_v59  ;;  %v3836_v33 = vrot.slane %v3835_v50, 4  ;;  %v3427_v1 = vadd.f32 1e-05, %v3363_v18  ;;  %v4902_v17 = vmul.f32 %v7304_v63, %v10103_v6 }
 0x951   : > { %v7308_v8 = vpop.eup %7307  ;;  %v3548_v21 = vmul.f32 %v7306_v30, %v11958_v28  ;;  %v3230_v54 = vpop.xlane.xlu0 %3229  ;;  %v10251_v18 = vsel %vm1264_vm2, %v3146_v4, 0.0  ;;  %v5667_v6 = vadd.f32 %v5666_v20, %v5665_v16  ;;  %v10260_v28 = vadd.f32 %v5661_v46, %v5660_v48 }
 0x952   : > { %v3837_v19 = vmax.f32 %v3835_v50, %v3836_v33  ;;  %7315 = vrsqrt.f32 %v3427_v1  ;;  %v3366_v51 = vmul.f32 0.0625, %v3230_v54  ;;  %3292 = vadd.xlane.f32.xlu1 %v10101_v34  ;;  %5455 = vrot.lane.b32.xlu0 %v10176_v11, %s7700_s21  ;;  %v4901_v59 = vmul.f32 %v7308_v8, %v10122_v44  ;;  %v11959_v50 = vld [vmem:[#allocation114_spill] sm:$0xff]  ;;  %v11960_v11 = vld [vmem:[#allocation131_spill] sm:$0xff]  ;;  %v11961_v1 = vld [vmem:[#allocation112_spill] sm:$0xff] }
 0x953   : > { %v3619_v15 = vmul.f32 %v9920_v14, %v3548_v21  ;;  %v5649_v30 = vsel %vm1264_vm2, %v5537_v22, 0.0  ;;  %v5542_v8 = vmul.f32 %v11961_v1, %v4902_v17 }
 0x954   : > { %v7310_v63 = vpop.eup %7309  ;;  %v3838_v62 = vrot.slane %v3837_v19, 2  ;;  %v3430_v38 = vadd.f32 1e-05, %v3366_v51  ;;  %v5541_v54 = vmul.f32 %v11959_v50, %v4901_v59  ;;  %v5650_v35 = vrot.slane %v5649_v30, 4 }
 0x955   : > { %v10256_v34 = vadd.f32 %v9932_v36, %v3619_v15  ;;  %v3550_v33 = vmul.f32 %v7310_v63, %v11960_v11  ;;  %v3236_v44 = vpop.xlane.xlu0 %3235  ;;  %v5675_v51 = vrot.slane %v5674_v58, 1 }
 0x956   : > { %v3839_v4 = vmax.f32 %v3837_v19, %v3838_v62  ;;  %7317 = vrsqrt.f32 %v3430_v38  ;;  %v3368_v22 = vmul.f32 0.0625, %v3236_v44  ;;  %3298 = vadd.xlane.f32.xlu1 %v10110_v12  ;;  %5457 = vrot.lane.b32.xlu0 %v5269_v3, %s7700_s21  ;;  %v5651_v21 = vadd.f32 %v5650_v35, %v5649_v30 }
 0x957   : > { %v3856_v16 = vsel %vm1264_vm2, %v10256_v34, -inf  ;;  %v3621_v20 = vmul.f32 %v9920_v14, %v3550_v33  ;;  %v5677_v59 = vsel %vm1264_vm2, %v5541_v54, 0.0  ;;  %v7312_v15 = vpop.eup %7311  ;;  %v5668_v19 = vrot.slane %v5667_v6, 1 }
 0x958   : > { %v3840_v17 = vrot.slane %v3839_v4, 1  ;;  %v3857_v48 = vrot.slane %v3856_v16, 4  ;;  %v3432_v46 = vadd.f32 1e-05, %v3368_v22  ;;  %v5652_v62 = vrot.slane %v5651_v21, 2 }
 0x959   : > { %v10269_v63 = vadd.f32 %v9932_v36, %v3621_v20  ;;  %v3233_v12 = vpop.xlane.xlu0 %3232  ;;  %v5678_v3 = vrot.slane %v5677_v59, 4  ;;  %v5684_v38 = vsel %vm1264_vm2, %v5542_v8, 0.0  ;;  %v7314_v50 = vpop.eup %7313  ;;  %v4904_v35 = vmul.f32 %v7312_v15, %v10146_v27 }
 0x95a   : > { %v3841_v11 = vmax.f32 %v3839_v4, %v3840_v17  ;;  %v3858_v44 = vmax.f32 %v3856_v16, %v3857_v48  ;;  %7319 = vrsqrt.f32 %v3432_v46  ;;  %v3367_v30 = vmul.f32 0.0625, %v3233_v12  ;;  %3307 = vadd.xlane.f32.xlu1 %v10120_v9  ;;  %5459 = vrot.lane.b32.xlu0 %v10205_v42, %s7700_s21  ;;  %v11962_v17 = vld [vmem:[#allocation5_spill] sm:$0xff] }
 0x95b   : > { %v3870_v54 = vsel %vm1264_vm2, %v10269_v63, -inf  ;;  %v5653_v33 = vadd.f32 %v5652_v62, %v5651_v21  ;;  %v5679_v1 = vadd.f32 %v5678_v3, %v5677_v59  ;;  %v3554_v48 = vmul.f32 %v7314_v50, %v11962_v17  ;;  %v11963_v46 = vld [vmem:[#allocation13_spill] sm:$0xff]  ;;  %v11964_v62 = vld [vmem:[#allocation116_spill] sm:$0xff] }
 0x95c   : > { %v7316_v22 = vpop.eup %7315  ;;  %v4199_v8 = vsub.f32 %v10225_v60, %v3841_v11  ;;  %v3859_v20 = vrot.slane %v3858_v44, 2  ;;  %v3871_v4 = vrot.slane %v3870_v54, 4  ;;  %v3431_v16 = vadd.f32 1e-05, %v3367_v30 }
 0x95d   : > { %v3555_v9 = vmul.f32 %v7316_v22, %v11963_v46  ;;  %v3242_v12 = vpop.xlane.xlu0 %3241  ;;  %v10281_v23 = vadd.f32 %v5675_v51, %v5674_v58  ;;  %v5685_v42 = vrot.slane %v5684_v38, 4  ;;  %v5654_v60 = vrot.slane %v5653_v33, 1 }
 0x95e   : > { %v4277_v41 = vmul.f32 1.442695, %v4199_v8  ;;  %v3860_v47 = vmax.f32 %v3858_v44, %v3859_v20  ;;  %v3872_v53 = vmax.f32 %v3870_v54, %v3871_v4  ;;  %7321 = vrsqrt.f32 %v3431_v16  ;;  %3304 = vadd.xlane.f32.xlu1 %v10136_v24  ;;  %5461 = vrot.lane.b32.xlu0 %v10222_v40, %s7700_s21  ;;  %v11965_v24 = vld [vmem:[#allocation15_spill] sm:$0xff] }
 0x95f   : > { %v3626_v27 = vmul.f32 %v9920_v14, %v3555_v9  ;;  %v10287_v21 = vadd.f32 %v5668_v19, %v5667_v6  ;;  %v5680_v59 = vrot.slane %v5679_v1, 2  ;;  %v10290_v3 = vmul.f32 %v11964_v62, %v4904_v35 }
 0x960   : > { %v7318_v15 = vpop.eup %7317  ;;  %7323 = vpow2.f32 %v4277_v41  ;;  %v3861_v58 = vrot.slane %v3860_v47, 1  ;;  %v3873_v51 = vrot.slane %v3872_v53, 2  ;;  %v3370_v44 = vmul.f32 0.0625, %v3242_v12 }
 0x961   : > { %v10293_v50 = vadd.f32 %v9932_v36, %v3626_v27  ;;  %v3558_v11 = vmul.f32 %v7318_v15, %v11965_v24  ;;  %v3248_v40 = vpop.xlane.xlu0 %3247  ;;  %v5686_v30 = vadd.f32 %v5685_v42, %v5684_v38  ;;  %v10297_v6 = vmul.f32 %v9920_v14, %v3554_v48  ;;  %v11966_v48 = vld [vmem:[#allocation7_spill] sm:$0xff] }
 0x962   : > { %v3862_v54 = vmax.f32 %v3860_v47, %v3861_v58  ;;  %v3874_v22 = vmax.f32 %v3872_v53, %v3873_v51  ;;  %v3372_v19 = vmul.f32 0.0625, %v3248_v40  ;;  %3313 = vadd.xlane.f32.xlu1 %v10190_v43  ;;  %v10303_v8 = vadd.f32 %v5654_v60, %v5653_v33 }
 0x963   : > { %v3905_v41 = vsel %vm1264_vm2, %v10293_v50, -inf  ;;  %v3629_v35 = vmul.f32 %v9920_v14, %v3558_v11  ;;  %v10305_v20 = vadd.f32 %v5680_v59, %v5679_v1  ;;  %v3434_v46 = vadd.f32 1e-05, %v3370_v44  ;;  %v11967_v11 = vld [vmem:[#allocation54_spill] sm:$0xff] }
 0x964   : > { %v7320_v4 = vpop.eup %7319  ;;  %v4202_v38 = vsub.f32 %v10256_v34, %v3862_v54  ;;  %v3875_v47 = vrot.slane %v3874_v22, 1  ;;  %v3906_v53 = vrot.slane %v3905_v41, 4  ;;  %v3436_v16 = vadd.f32 1e-05, %v3372_v19 }
 0x965   : > { %v10309_v17 = vadd.f32 %v9932_v36, %v3629_v35  ;;  %v3560_v43 = vmul.f32 %v7320_v4, %v11966_v48  ;;  %v3254_v9 = vpop.xlane.xlu0 %3253  ;;  %v5687_v12 = vrot.slane %v5686_v30, 2  ;;  %v5682_v59 = vrot.slane %v10305_v20, 1 }
 0x966   : > { %v4283_v42 = vmul.f32 1.442695, %v4202_v38  ;;  %v3876_v27 = vmax.f32 %v3874_v22, %v3875_v47  ;;  %v3907_v33 = vmax.f32 %v3905_v41, %v3906_v53  ;;  %7325 = vrsqrt.f32 %v3436_v16  ;;  %3310 = vadd.xlane.f32.xlu1 %v10196_v0 }
 0x967   : > { %v3926_v34 = vsel %vm1264_vm2, %v10309_v17, -inf  ;;  %v3631_v1 = vmul.f32 %v9920_v14, %v3560_v43  ;;  %v3374_v60 = vmul.f32 0.0625, %v3254_v9  ;;  %v5688_v54 = vadd.f32 %v5687_v12, %v5686_v30 }
 0x968   : > { %v7322_v15 = vpop.eup %7321  ;;  %7327 = vpow2.f32 %v4283_v42  ;;  %v4204_v58 = vsub.f32 %v10269_v63, %v3876_v27  ;;  %v3908_v51 = vrot.slane %v3907_v33, 2  ;;  %v3927_v62 = vrot.slane %v3926_v34, 4  ;;  %v10333_v42 = vpop.permute.xlu1 %5401 }
 0x969   : > { %v10319_v24 = vadd.f32 %v9932_v36, %v3631_v1  ;;  %v3559_v44 = vmul.f32 %v7322_v15, %v11967_v11  ;;  %v3438_v0 = vadd.f32 1e-05, %v3374_v60  ;;  %v3266_v40 = vpop.xlane.xlu0 %3265  ;;  %7329 = vrsqrt.f32 %v3434_v46  ;;  %11968 = vst [vmem:[#allocation47_spill] sm:$0xff] %v10333_v42  ;;  %v11973_v42 = vld [vmem:[#allocation48_spill] sm:$0xff] }
 0x96a   : > { %v10322_v22 = vpop.eup %7323  ;;  %v4287_v19 = vmul.f32 1.442695, %v4204_v58  ;;  %v3909_v41 = vmax.f32 %v3907_v33, %v3908_v51  ;;  %v3928_v35 = vmax.f32 %v3926_v34, %v3927_v62  ;;  %v3378_v4 = vmul.f32 0.0625, %v3266_v40  ;;  %3319 = vadd.xlane.f32.xlu1 %v10218_v55  ;;  %v11969_v40 = vld [vmem:[#allocation6_spill] sm:$0xff] }
 0x96b   : > { %v4475_v63 = vsel %vm1264_vm2, %v10322_v22, 0.0  ;;  %v3940_v38 = vsel %vm1264_vm2, %v10319_v24, -inf  ;;  %v3630_v47 = vmul.f32 %v9920_v14, %v3559_v44  ;;  %v5689_v34 = vrot.slane %v5688_v54, 1 }
 0x96c   : > { %v4476_v53 = vrot.slane %v4475_v63, 4  ;;  %7331 = vpow2.f32 %v4287_v19  ;;  %v3910_v30 = vrot.slane %v3909_v41, 1  ;;  %v3929_v16 = vrot.slane %v3928_v35, 2 }
 0x96d   : > { %v3941_v48 = vrot.slane %v3940_v38, 4  ;;  %v10331_v43 = vadd.f32 %v9932_v36, %v3630_v47  ;;  %7333 = vrsqrt.f32 %v3438_v0  ;;  %v3442_v9 = vadd.f32 1e-05, %v3378_v4  ;;  %v3269_v55 = vpop.xlane.xlu0 %3268 }
 0x96e   : > { %v4477_v12 = vadd.f32 %v4476_v53, %v4475_v63  ;;  %v3911_v27 = vmax.f32 %v3909_v41, %v3910_v30  ;;  %v3930_v33 = vmax.f32 %v3928_v35, %v3929_v16  ;;  %3322 = vadd.xlane.f32.xlu1 %v10232_v29  ;;  %v3379_v60 = vmul.f32 0.0625, %v3269_v55  ;;  %v3197_v47 = vpop.xlane.xlu1 %3196 }
 0x96f   : > { %v3942_v46 = vmax.f32 %v3940_v38, %v3941_v48  ;;  %v3933_v1 = vsel %vm1264_vm2, %v10331_v43, -inf  ;;  %7335 = vrsqrt.f32 %v3442_v9  ;;  %v10340_v11 = vadd.f32 %v5682_v59, %v10305_v20 }
 0x970   : > { %v7326_v15 = vpop.eup %7325  ;;  %v4209_v58 = vsub.f32 %v10293_v50, %v3911_v27  ;;  %v3931_v51 = vrot.slane %v3930_v33, 1  ;;  %v3934_v62 = vrot.slane %v3933_v1, 4  ;;  %v4478_v44 = vrot.slane %v4477_v12, 2 }
 0x971   : > { %v3943_v0 = vrot.slane %v3942_v46, 2  ;;  %v3564_v19 = vmul.f32 %v7326_v15, %v11969_v40  ;;  %v3278_v29 = vpop.xlane.xlu0 %3277  ;;  %v10345_v41 = vsel %vm1264_vm2, %v10290_v3, 0.0  ;;  %v3443_v50 = vadd.f32 1e-05, %v3379_v60 }
 0x972   : > { %v10347_v35 = vpop.eup %7327  ;;  %v4297_v4 = vmul.f32 1.442695, %v4209_v58  ;;  %v3932_v63 = vmax.f32 %v3930_v33, %v3931_v51  ;;  %v3935_v38 = vmax.f32 %v3933_v1, %v3934_v62  ;;  %3337 = vadd.xlane.f32.xlu1 %v10251_v18  ;;  %v10353_v30 = vadd.f32 %v5689_v34, %v5688_v54 }
 0x973   : > { %v4496_v20 = vsel %vm1264_vm2, %v10347_v35, 0.0  ;;  %v3944_v59 = vmax.f32 %v3942_v46, %v3943_v0  ;;  %v3635_v53 = vmul.f32 %v9920_v14, %v3564_v19  ;;  %v7330_v9 = vpop.eup %7329  ;;  %v3355_v18 = vmul.f32 0.0625, %v3197_v47 }
 0x974   : > { %v4497_v16 = vrot.slane %v4496_v20, 4  ;;  %7337 = vpow2.f32 %v4297_v4  ;;  %v4212_v3 = vsub.f32 %v10309_v17, %v3932_v63  ;;  %v3936_v27 = vrot.slane %v3935_v38, 2 }
 0x975   : > { %v3945_v55 = vrot.slane %v3944_v59, 1  ;;  %v10358_v33 = vadd.f32 %v9932_v36, %v3635_v53  ;;  %v3284_v1 = vpop.xlane.xlu0 %3283  ;;  %v4479_v46 = vadd.f32 %v4478_v44, %v4477_v12  ;;  %7339 = vrsqrt.f32 %v3443_v50  ;;  %v11971_v44 = vld [vmem:[#allocation10_spill] sm:$0xff] }
 0x976   : > { %v10360_v60 = vpop.eup %7331  ;;  %v4498_v14 = vadd.f32 %v4497_v16, %v4496_v20  ;;  %v4303_v54 = vmul.f32 1.442695, %v4212_v3  ;;  %v3937_v58 = vmax.f32 %v3935_v38, %v3936_v27  ;;  %v3562_v4 = vmul.f32 %v7330_v9, %v11971_v44 }
 0x977   : > { %11970 = vst [vmem:[#allocation70_spill] sm:$0xff] %v10360_v60  ;;  %v7334_v34 = vpop.eup %7333  ;;  %v4510_v17 = vsel %vm1264_vm2, %v10360_v60, 0.0  ;;  %v3946_v15 = vmax.f32 %v3944_v59, %v3945_v55  ;;  %v3968_v51 = vsel %vm1264_vm2, %v10358_v33, -inf  ;;  %v3419_v63 = vadd.f32 1e-05, %v3355_v18  ;;  %v11972_v59 = vld [vmem:[#allocation53_spill] sm:$0xff] }
 0x978   : > { %v4499_v62 = vrot.slane %v4498_v14, 2  ;;  %v4511_v36 = vrot.slane %v4510_v17, 4  ;;  %7341 = vpow2.f32 %v4303_v54  ;;  %v3969_v0 = vrot.slane %v3968_v51, 4 }
 0x979   : > { %v7336_v40 = vpop.eup %7335  ;;  %v4214_v19 = vsub.f32 %v10319_v24, %v3946_v15  ;;  %v3938_v12 = vrot.slane %v3937_v58, 1  ;;  %v3281_v50 = vpop.xlane.xlu0 %3280  ;;  %v4480_v47 = vrot.slane %v4479_v46, 1  ;;  %v3566_v38 = vmul.f32 %v7334_v34, %v11972_v59 }
 0x97a   : > { %v4512_v20 = vadd.f32 %v4511_v36, %v4510_v17  ;;  %v3970_v53 = vmax.f32 %v3968_v51, %v3969_v0  ;;  %7343 = vrsqrt.f32 %v3419_v63  ;;  %v3382_v55 = vmul.f32 0.0625, %v3278_v29  ;;  %v10378_v29 = vld [vmem:[%s11537_s7] ss:$0 sm:$0xff] }
 0x97b   : > { %v4307_v16 = vmul.f32 1.442695, %v4214_v19  ;;  %v3939_v3 = vmax.f32 %v3937_v58, %v3938_v12  ;;  %v4500_v27 = vadd.f32 %v4499_v62, %v4498_v14  ;;  %v3570_v60 = vmul.f32 %v7336_v40, %v11973_v42 }
 0x97c   : > { %v4513_v54 = vrot.slane %v4512_v20, 2  ;;  %v3971_v48 = vrot.slane %v3970_v53, 2  ;;  %v3446_v9 = vadd.f32 1e-05, %v3382_v55  ;;  %v3384_v18 = vmul.f32 0.0625, %v3284_v1 }
 0x97d   : > { %7345 = vpow2.f32 %v4307_v16  ;;  %v4213_v24 = vsub.f32 %v10331_v43, %v3939_v3  ;;  %v3290_v15 = vpop.xlane.xlu0 %3289  ;;  %v10373_v17 = vadd.f32 %v4480_v47, %v4479_v46  ;;  %v10381_v14 = vmul.f32 %v10378_v29, %v3562_v4 }
 0x97e   : > { %v10371_v44 = vpop.eup %7337  ;;  %v4514_v34 = vadd.f32 %v4513_v54, %v4512_v20  ;;  %v3972_v42 = vmax.f32 %v3970_v53, %v3971_v48  ;;  %7347 = vrsqrt.f32 %v3446_v9  ;;  %v3448_v1 = vadd.f32 1e-05, %v3384_v18 }
 0x97f   : > { %11974 = vst [vmem:[#allocation72_spill] sm:$0xff] %v10371_v44  ;;  %v4545_v43 = vsel %vm1264_vm2, %v10371_v44, 0.0  ;;  %v4305_v58 = vmul.f32 1.442695, %v4213_v24  ;;  %v7340_v51 = vpop.eup %7339  ;;  %v4501_v62 = vrot.slane %v4500_v27, 1  ;;  %v10386_v0 = vmul.f32 %v10378_v29, %v3566_v38  ;;  %v11976_v24 = vld [vmem:[#allocation8_spill] sm:$0xff] }
 0x980   : > { %v4546_v46 = vrot.slane %v4545_v43, 4  ;;  %v3973_v36 = vrot.slane %v3972_v42, 1  ;;  %v10389_v40 = vmul.f32 %v10378_v29, %v3570_v60  ;;  %v3383_v19 = vmul.f32 0.0625, %v3281_v50 }
 0x981   : > { %7349 = vpow2.f32 %v4305_v58  ;;  %v3386_v12 = vmul.f32 0.0625, %v3290_v15  ;;  %v3296_v48 = vpop.xlane.xlu0 %3295  ;;  %v4515_v63 = vrot.slane %v4514_v34, 1  ;;  %v4502_v60 = vadd.f32 %v4501_v62, %v4500_v27 }
 0x982   : > { %v10391_v4 = vpop.eup %7341  ;;  %v4547_v47 = vadd.f32 %v4546_v46, %v4545_v43  ;;  %v3974_v20 = vmax.f32 %v3972_v42, %v3973_v36  ;;  %7351 = vrsqrt.f32 %v3448_v1  ;;  %v3447_v59 = vadd.f32 1e-05, %v3383_v19  ;;  %v11978_v36 = vld [vmem:[#allocation59_spill] sm:$0xff]  ;;  %v11980_v19 = vld [vmem:[#allocation12_spill] sm:$0xff] }
 0x983   : > { %11975 = vst [vmem:[#allocation107_spill] sm:$0xff] %v10391_v4  ;;  %v4566_v53 = vsel %vm1264_vm2, %v10391_v4, 0.0  ;;  %v3450_v16 = vadd.f32 1e-05, %v3386_v12  ;;  %v3388_v38 = vmul.f32 0.0625, %v3296_v48  ;;  %5419 = vrot.lane.b32.xlu1 %v10020_v2, %s7700_s21  ;;  %v3571_v9 = vmul.f32 %v7340_v51, %v11976_v24 }
 0x984   : > { %v4548_v3 = vrot.slane %v4547_v47, 2  ;;  %v4567_v50 = vrot.slane %v4566_v53, 4  ;;  %v4218_v55 = vsub.f32 %v10358_v33, %v3974_v20  ;;  %v7344_v54 = vpop.eup %7343  ;;  %7353 = vrsqrt.f32 %v3447_v59 }
 0x985   : > { %v3452_v18 = vadd.f32 1e-05, %v3388_v38  ;;  %v3302_v15 = vpop.xlane.xlu0 %3301  ;;  %v11977_v42 = vrot.slane %v10345_v41, 4  ;;  %v3547_v2 = vmul.f32 %v7344_v54, %v11978_v36  ;;  %v4516_v62 = vadd.f32 %v4515_v63, %v4514_v34 }
 0x986   : > { %v4549_v58 = vadd.f32 %v4548_v3, %v4547_v47  ;;  %v4568_v1 = vadd.f32 %v4567_v50, %v4566_v53  ;;  %v4315_v46 = vmul.f32 1.442695, %v4218_v55  ;;  %7355 = vrsqrt.f32 %v3450_v16  ;;  %v10415_v55 = vld [vmem:[%s11538_s8] ss:$0 sm:$0xff] }
 0x987   : > { %v5700_v43 = vadd.f32 %v11977_v42, %v10345_v41  ;;  %v10403_v27 = vpop.eup %7345  ;;  %v3390_v33 = vmul.f32 0.0625, %v3302_v15  ;;  %5397 = vrot.lane.b32.xlu1 %v11980_v19, %s7700_s21  ;;  %v3618_v53 = vmul.f32 %v10378_v29, %v3547_v2  ;;  %v11982_v42 = vld [vmem:[#allocation57_spill] sm:$0xff] }
 0x988   : > { %11979 = vst [vmem:[#allocation20_spill] sm:$0xff] %v10403_v27  ;;  %v4550_v12 = vrot.slane %v4549_v58, 1  ;;  %v4569_v48 = vrot.slane %v4568_v1, 2  ;;  %v4580_v20 = vsel %vm1264_vm2, %v10403_v27, 0.0  ;;  %7357 = vpow2.f32 %v4315_v46  ;;  %v7348_v41 = vpop.eup %7347 }
 0x989   : > { %v5701_v51 = vrot.slane %v5700_v43, 2  ;;  %v4581_v47 = vrot.slane %v4580_v20, 4  ;;  %7359 = vrsqrt.f32 %v3452_v18  ;;  %v3454_v59 = vadd.f32 1e-05, %v3390_v33  ;;  %v3317_v38 = vpop.xlane.xlu0 %3316 }
 0x98a   : > { %7361 = vrcp.f32 %v4502_v60  ;;  %v4551_v34 = vadd.f32 %v4550_v12, %v4549_v58  ;;  %v4570_v63 = vadd.f32 %v4569_v48, %v4568_v1  ;;  %v3395_v16 = vmul.f32 0.0625, %v3317_v38 }
 0x98b   : > { %v10410_v3 = vpop.eup %7349  ;;  %7363 = vrcp.f32 %v4516_v62  ;;  %v4582_v50 = vadd.f32 %v4581_v47, %v4580_v20  ;;  %v10418_v54 = vadd.f32 %v10415_v55, %v3618_v53  ;;  %5421 = vrot.lane.b32.xlu1 %v10031_v7, %s7700_s21  ;;  %v6128_v60 = vsel %vm6114_vm3, %v10260_v28, %v10303_v8 }
 0x98c   : > { %11981 = vst [vmem:[#allocation75_spill] sm:$0xff] %v10410_v3  ;;  %v7352_v24 = vpop.eup %7351  ;;  %v4571_v18 = vrot.slane %v4570_v63, 1  ;;  %v4573_v15 = vsel %vm1264_vm2, %v10410_v3, 0.0  ;;  %v3574_v58 = vmul.f32 %v7348_v41, %v11982_v42  ;;  %7365 = vrsqrt.f32 %v3454_v59 }
 0x98d   : > { %7367 = vrcp.f32 %v4551_v34  ;;  %v4574_v1 = vrot.slane %v4573_v15, 4  ;;  %v3849_v46 = vsel %vm1264_vm2, %v10418_v54, -inf  ;;  %v3326_v36 = vpop.xlane.xlu0 %3325  ;;  %v5702_v2 = vadd.f32 %v5701_v51, %v5700_v43 }
 0x98e   : > { %v4583_v7 = vrot.slane %v4582_v50, 2  ;;  %v3850_v62 = vrot.slane %v3849_v46, 4  ;;  %v3459_v33 = vadd.f32 1e-05, %v3395_v16  ;;  %v3398_v19 = vmul.f32 0.0625, %v3326_v36  ;;  %v7354_v28 = vpop.eup %7353 }
 0x98f   : > { %v4575_v8 = vadd.f32 %v4574_v1, %v4573_v15  ;;  %v3642_v12 = vmul.f32 %v10378_v29, %v3571_v9  ;;  %5409 = vrot.lane.b32.xlu1 %v9819_v45, %s7700_s21  ;;  %7369 = vrcp.f32 %v10373_v17  ;;  %v6129_v48 = vsel %vm6116_vm4, %v10287_v21, %v6128_v60 }
 0x990   : > { %v4572_v20 = vadd.f32 %v4571_v18, %v4570_v63  ;;  %v3851_v41 = vmax.f32 %v3849_v46, %v3850_v62  ;;  %v3576_v43 = vmul.f32 %v7352_v24, %v9690_v37  ;;  %v3462_v51 = vadd.f32 1e-05, %v3398_v19  ;;  %v7356_v47 = vpop.eup %7355 }
 0x991   : > { %v4576_v53 = vrot.slane %v4575_v8, 2  ;;  %v10438_v59 = vmul.f32 %v10378_v29, %v3574_v58  ;;  %v3575_v9 = vmul.f32 %v7354_v28, %v9707_v13  ;;  %7371 = vrsqrt.f32 %v3459_v33  ;;  %v3332_v38 = vpop.xlane.xlu0 %3331 }
 0x992   : > { %v10441_v45 = vpop.eup %7357  ;;  %v10443_v17 = vadd.f32 %v4583_v7, %v4582_v50  ;;  %v3852_v34 = vrot.slane %v3851_v41, 2  ;;  %7373 = vrsqrt.f32 %v3462_v51  ;;  %v5703_v21 = vrot.slane %v5702_v2, 1 }
 0x993   : > { %11983 = vst [vmem:[#allocation68_spill] sm:$0xff] %v10441_v45  ;;  %v7360_v63 = vpop.eup %7359  ;;  %v10445_v16 = vadd.f32 %v4576_v53, %v4575_v8  ;;  %v4608_v37 = vsel %vm1264_vm2, %v10441_v45, 0.0  ;;  %v3578_v60 = vmul.f32 %v7356_v47, %v9729_v5  ;;  %v3400_v24 = vmul.f32 0.0625, %v3332_v38  ;;  %5411 = vrot.lane.b32.xlu1 %v9791_v49, %s7700_s21 }
 0x994   : > { %11984 = vst [vmem:[#allocation30_spill] sm:$0xff] %v10443_v17  ;;  %v10452_v13 = vpop.eup %7361  ;;  %7375 = vrcp.f32 %v4572_v20  ;;  %v4609_v50 = vrot.slane %v4608_v37, 4  ;;  %v3853_v18 = vmax.f32 %v3851_v41, %v3852_v34  ;;  %v10455_v15 = vmul.f32 %v10378_v29, %v3576_v43 }
 0x995   : > { %11985 = vst [vmem:[#allocation78_spill] sm:$0xff] %v10445_v16  ;;  %v10457_v42 = vpop.eup %7363  ;;  %v10460_v58 = vmul.f32 %v10378_v29, %v3575_v9  ;;  %v3580_v1 = vmul.f32 %v7360_v63, %v9736_v32  ;;  %v3329_v5 = vpop.xlane.xlu0 %3328  ;;  %v6130_v46 = vsel %vm6118_vm5, %v10281_v23, %v6129_v48  ;;  %v10466_v49 = vadd.f32 %v10415_v55, %v3642_v12 }
 0x996   : > { %v7366_v36 = vpop.eup %7365  ;;  %v4610_v7 = vadd.f32 %v4609_v50, %v4608_v37  ;;  %v3854_v62 = vrot.slane %v3853_v18, 1  ;;  %v3464_v33 = vadd.f32 1e-05, %v3400_v24  ;;  %v10468_v19 = vadd.f32 %v5703_v21, %v5702_v2  ;;  %v11987_v24 = vld [vmem:[#allocation119_spill] sm:$0xff] }
 0x997   : > { %v10470_v28 = vpop.eup %7367  ;;  %v10474_v20 = vmul.f32 %v10378_v29, %v3578_v60  ;;  %v3399_v32 = vmul.f32 0.0625, %v3329_v5  ;;  %5433 = vrot.lane.b32.xlu1 %v10067_v26, %s7700_s21  ;;  %v4017_v23 = vsel %vm1264_vm2, %v10466_v49, -inf  ;;  %v6131_v2 = vsel %vm6120_vm6, %v10340_v11, %v6130_v46 }
 0x998   : > { %11986 = vst [vmem:[#allocation120_spill] sm:$0xff] %v10470_v28  ;;  %v4611_v12 = vrot.slane %v4610_v7, 2  ;;  %v3855_v48 = vmax.f32 %v3853_v18, %v3854_v62  ;;  %v4018_v41 = vrot.slane %v4017_v23, 4  ;;  %v10483_v51 = vmul.f32 %v10378_v29, %v3580_v1  ;;  %v10518_v62 = vpop.permute.xlu1 %5405 }
 0x999   : > { %v7370_v43 = vpop.eup %7369  ;;  %v3582_v47 = vmul.f32 %v7366_v36, %v9757_v25  ;;  %v3335_v53 = vpop.xlane.xlu0 %3334  ;;  %v10488_v9 = vadd.f32 %v10415_v55, %v10297_v6  ;;  %v10492_v26 = vadd.f32 %v10415_v55, %v10386_v0  ;;  %7377 = vrsqrt.f32 %v3464_v33  ;;  %11989 = vst [vmem:[#allocation84_spill] sm:$0xff] %v10518_v62 }
 0x99a   : > { %v4612_v38 = vadd.f32 %v4611_v12, %v4610_v7  ;;  %v4201_v34 = vsub.f32 %v10418_v54, %v3855_v48  ;;  %v4903_v11 = vmul.f32 %v7370_v43, %v10322_v22  ;;  %v3463_v63 = vadd.f32 1e-05, %v3399_v32 }
 0x99b   : > { %v7372_v21 = vpop.eup %7371  ;;  %v10498_v25 = vsel %vm6122_vm7, %v10353_v30, %v6131_v2  ;;  %5413 = vrot.lane.b32.xlu1 %v9856_v39, %s7700_s21  ;;  %v4019_v6 = vmax.f32 %v4017_v23, %v4018_v41  ;;  %v3898_v0 = vsel %vm1264_vm2, %v10488_v9, -inf  ;;  %v3401_v50 = vmul.f32 0.0625, %v3335_v53 }
 0x99c   : > { %v7374_v37 = vpop.eup %7373  ;;  %v4281_v60 = vmul.f32 1.442695, %v4201_v34  ;;  %v5543_v54 = vmul.f32 %v11987_v24, %v4903_v11  ;;  %v10507_v22 = vadd.f32 %v10415_v55, %v10381_v14  ;;  %v10510_v18 = vmul.f32 %v10378_v29, %v3582_v47  ;;  %v11990_v14 = vld [vmem:[#allocation11_spill] sm:$0xff] }
 0x99d   : > { %v4020_v30 = vrot.slane %v4019_v6, 2  ;;  %v3899_v1 = vrot.slane %v3898_v0, 4  ;;  %v3982_v39 = vsel %vm1264_vm2, %v10492_v26, -inf  ;;  %v4613_v46 = vrot.slane %v4612_v38, 1 }
 0x99e   : > { %v10514_v5 = vpop.eup %7375  ;;  %7379 = vpow2.f32 %v4281_v60  ;;  %v3587_v36 = vmul.f32 %v7372_v21, %v9766_v56  ;;  %v5691_v7 = vsel %vm1264_vm2, %v5543_v54, 0.0  ;;  %v3590_v33 = vmul.f32 %v7374_v37, %v11990_v14 }
 0x99f   : > { %11988 = vst [vmem:[#allocation81_spill] sm:$0xff] %v10514_v5  ;;  %7381 = vrsqrt.f32 %v3463_v63  ;;  %v5692_v32 = vrot.slane %v5691_v7, 4  ;;  %v4021_v23 = vmax.f32 %v4019_v6, %v4020_v30  ;;  %5437 = vrot.lane.b32.xlu1 %v10080_v61, %s7700_s21  ;;  %v3465_v12 = vadd.f32 1e-05, %v3401_v50 }
 0x9a0   : > { %v3900_v48 = vmax.f32 %v3898_v0, %v3899_v1  ;;  %v3983_v2 = vrot.slane %v3982_v39, 4  ;;  %v3954_v41 = vsel %vm1264_vm2, %v10507_v22, -inf  ;;  %v10527_v53 = vadd.f32 %v10415_v55, %v10438_v59 }
 0x9a1   : > { %v5693_v43 = vadd.f32 %v5692_v32, %v5691_v7  ;;  %v4022_v56 = vrot.slane %v4021_v23, 1  ;;  %v3955_v47 = vrot.slane %v3954_v41, 4  ;;  %v4614_v34 = vadd.f32 %v4613_v46, %v4612_v38 }
 0x9a2   : > { %v10530_v11 = vmul.f32 %v10378_v29, %v3587_v36  ;;  %v3901_v21 = vrot.slane %v3900_v48, 2  ;;  %v3984_v63 = vmax.f32 %v3982_v39, %v3983_v2  ;;  %v4038_v60 = vsel %vm1264_vm2, %v10527_v53, -inf }
 0x9a3   : > { %v5694_v61 = vrot.slane %v5693_v43, 2  ;;  %v4023_v6 = vmax.f32 %v4021_v23, %v4022_v56  ;;  %5451 = vrot.lane.b32.xlu1 %v10187_v57, %s7700_s21  ;;  %v3203_v0 = vpop.xlane.xlu1 %3202  ;;  %v3956_v37 = vmax.f32 %v3954_v41, %v3955_v47  ;;  %v7378_v24 = vpop.eup %7377  ;;  %7383 = vrsqrt.f32 %v3465_v12 }
 0x9a4   : > { %v3902_v59 = vmax.f32 %v3900_v48, %v3901_v21  ;;  %v3357_v54 = vmul.f32 0.0625, %v3203_v0  ;;  %v3985_v38 = vrot.slane %v3984_v63, 2  ;;  %v4039_v39 = vrot.slane %v4038_v60, 4 }
 0x9a5   : > { %v5695_v50 = vadd.f32 %v5694_v61, %v5693_v43  ;;  %v4225_v30 = vsub.f32 %v10466_v49, %v4023_v6  ;;  %v3957_v1 = vrot.slane %v3956_v37, 2  ;;  %7385 = vrcp.f32 %v4614_v34 }
 0x9a6   : > { %v3903_v46 = vrot.slane %v3902_v59, 1  ;;  %v3421_v36 = vadd.f32 1e-05, %v3357_v54  ;;  %v3986_v7 = vmax.f32 %v3984_v63, %v3985_v38  ;;  %v4040_v12 = vmax.f32 %v4038_v60, %v4039_v39  ;;  %v11991_v54 = vld [vmem:[#allocation56_spill] sm:$0xff] }
 0x9a7   : > { %v5696_v57 = vrot.slane %v5695_v50, 1  ;;  %v4329_v14 = vmul.f32 1.442695, %v4225_v30  ;;  %5429 = vrot.lane.b32.xlu1 %v10054_v52, %s7700_s21  ;;  %v3212_v32 = vpop.xlane.xlu1 %3211  ;;  %v3958_v23 = vmax.f32 %v3956_v37, %v3957_v1  ;;  %v10542_v2 = vmul.f32 %v10378_v29, %v3590_v33 }
 0x9a8   : > { %v10539_v48 = vpop.eup %7379  ;;  %v3904_v49 = vmax.f32 %v3902_v59, %v3903_v46  ;;  %7387 = vrsqrt.f32 %v3421_v36  ;;  %v3987_v41 = vrot.slane %v3986_v7, 1  ;;  %v3360_v34 = vmul.f32 0.0625, %v3212_v32 }
 0x9a9   : > { %v10544_v43 = vpop.eup %7381  ;;  %v4489_v56 = vsel %vm1264_vm2, %v10539_v48, 0.0  ;;  %v5697_v47 = vadd.f32 %v5696_v57, %v5695_v50  ;;  %7389 = vpow2.f32 %v4329_v14  ;;  %v10551_v61 = vadd.f32 %v10415_v55, %v10460_v58 }
 0x9aa   : > { %v4490_v52 = vrot.slane %v4489_v56, 4  ;;  %v4208_v21 = vsub.f32 %v10488_v9, %v3904_v49  ;;  %v3988_v63 = vmax.f32 %v3986_v7, %v3987_v41  ;;  %v3424_v6 = vadd.f32 1e-05, %v3360_v34 }
 0x9ab   : > { %v6133_v33 = vsel %vm6124_vm8, %v5697_v47, %v10498_v25  ;;  %v3959_v0 = vrot.slane %v3958_v23, 1  ;;  %5453 = vrot.lane.b32.xlu1 %v10215_v31, %s7700_s21  ;;  %v3209_v37 = vpop.xlane.xlu1 %3208  ;;  %v4041_v60 = vrot.slane %v4040_v12, 2  ;;  %v3592_v38 = vmul.f32 %v7378_v24, %v11991_v54 }
 0x9ac   : > { %v4491_v59 = vadd.f32 %v4490_v52, %v4489_v56  ;;  %v6134_v9 = vsel %vm6126_vm9, %v10468_v19, %v6133_v33  ;;  %v4295_v50 = vmul.f32 1.442695, %v4208_v21  ;;  %v4220_v58 = vsub.f32 %v10492_v26, %v3988_v63  ;;  %v11993_v21 = vld [vmem:[#allocation4_spill] sm:$0xff] }
 0x9ad   : > { %7151 = vmatmul.mubr.msk.f32.vlgmr.msra.gmra.mrb[64].mxu0 %vm1264_vm2, %v6134_v9  ;;  %7391 = vrsqrt.f32 %v3424_v6  ;;  %v3960_v25 = vmax.f32 %v3958_v23, %v3959_v0  ;;  %v3359_v30 = vmul.f32 0.0625, %v3209_v37  ;;  %v7384_v1 = vpop.eup %7383  ;;  %v4042_v31 = vmax.f32 %v4040_v12, %v4041_v60 }
 0x9ae   : > { %v4492_v39 = vrot.slane %v4491_v59, 2  ;;  %7393 = vpow2.f32 %v4295_v50  ;;  %v4045_v46 = vsel %vm1264_vm2, %v10551_v61, -inf  ;;  %v4319_v36 = vmul.f32 1.442695, %v4220_v58  ;;  %v11995_v58 = vld [vmem:[#allocation25_spill] sm:$0xff] }
 0x9af   : > { %v4216_v24 = vsub.f32 %v10507_v22, %v3960_v25  ;;  %v3423_v7 = vadd.f32 1e-05, %v3359_v30  ;;  %5441 = vrot.lane.b32.xlu1 %v10107_v10, %s7700_s21  ;;  %v3215_v19 = vpop.xlane.xlu1 %3214  ;;  %v4046_v57 = vrot.slane %v4045_v46, 4  ;;  %v10567_v26 = vpop.eup %7385  ;;  %v4043_v32 = vrot.slane %v4042_v31, 1 }
 0x9b0   : > { %11992 = vst [vmem:[#allocation121_spill] sm:$0xff] %v10567_v26  ;;  %v4493_v14 = vadd.f32 %v4492_v39, %v4491_v59  ;;  %v3361_v23 = vmul.f32 0.0625, %v3215_v19  ;;  %v10571_v12 = vadd.f32 %v10415_v55, %v10483_v51  ;;  %v10574_v49 = vmul.f32 %v10378_v29, %v3592_v38  ;;  %v11994_v51 = vld [vmem:[#allocation64_spill] sm:$0xff] }
 0x9b1   : > { %7395 = vpow2.f32 %v4319_v36  ;;  %v4311_v22 = vmul.f32 1.442695, %v4216_v24  ;;  %v4047_v41 = vmax.f32 %v4045_v46, %v4046_v57  ;;  %v4044_v10 = vmax.f32 %v4042_v31, %v4043_v32 }
 0x9b2   : > { %v7388_v56 = vpop.eup %7387  ;;  %v4494_v47 = vrot.slane %v4493_v14, 1  ;;  %7397 = vrsqrt.f32 %v3423_v7  ;;  %v3425_v34 = vadd.f32 1e-05, %v3361_v23  ;;  %v4080_v0 = vsel %vm1264_vm2, %v10571_v12, -inf  ;;  %v11996_v7 = vld [vmem:[#allocation69_spill] sm:$0xff] }
 0x9b3   : > { %v10576_v52 = vpop.eup %7389  ;;  %v3549_v63 = vmul.f32 %v7388_v56, %v11993_v21  ;;  %7399 = vpow2.f32 %v4311_v22  ;;  %v4048_v33 = vrot.slane %v4047_v41, 2  ;;  %5443 = vrot.lane.b32.xlu1 %v11994_v51, %s7700_s21  ;;  %v3224_v6 = vpop.xlane.xlu1 %3223  ;;  %v4228_v59 = vsub.f32 %v10527_v53, %v4044_v10 }
 0x9b4   : > { %v4495_v37 = vadd.f32 %v4494_v47, %v4493_v14  ;;  %v4657_v60 = vsel %vm1264_vm2, %v10576_v52, 0.0  ;;  %7401 = vrsqrt.f32 %v3425_v34  ;;  %v3364_v50 = vmul.f32 0.0625, %v3224_v6  ;;  %v11997_v14 = vld [vmem:[#allocation26_spill] sm:$0xff] }
 0x9b5   : > { %v4658_v54 = vrot.slane %v4657_v60, 4  ;;  %v3620_v38 = vmul.f32 %v10378_v29, %v3549_v63  ;;  %v4049_v9 = vmax.f32 %v4047_v41, %v4048_v33  ;;  %v10589_v25 = vmul.f32 %v10544_v43, %v11995_v58  ;;  %v11998_v43 = vld [vmem:[#allocation49_spill] sm:$0xff] }
 0x9b6   : > { %7403 = vrcp.f32 %v4495_v37  ;;  %v4335_v30 = vmul.f32 1.442695, %v4228_v59  ;;  %v4081_v39 = vrot.slane %v4080_v0, 4  ;;  %v3428_v53 = vadd.f32 1e-05, %v3364_v50  ;;  %v11999_v37 = vld [vmem:[#allocation16_spill] sm:$0xff] }
 0x9b7   : > { %v7392_v31 = vpop.eup %7391  ;;  %v4659_v46 = vadd.f32 %v4658_v54, %v4657_v60  ;;  %v10592_v36 = vadd.f32 %v10415_v55, %v3620_v38  ;;  %v4050_v24 = vrot.slane %v4049_v9, 1  ;;  %5445 = vrot.lane.b32.xlu1 %v11996_v7, %s7700_s21  ;;  %v3227_v19 = vpop.xlane.xlu1 %3226  ;;  %v10599_v32 = vmul.f32 %v7384_v1, %v11997_v14 }
 0x9b8   : > { %v10596_v57 = vpop.eup %7393  ;;  %v3552_v23 = vmul.f32 %v7392_v31, %v11998_v43  ;;  %7405 = vpow2.f32 %v4335_v30  ;;  %v10602_v22 = vmax.f32 %v4080_v0, %v4081_v39  ;;  %v10609_v33 = vmul.f32 0.0625, %v3227_v19 }
 0x9b9   : > { %v4660_v41 = vrot.slane %v4659_v46, 2  ;;  %v4538_v56 = vsel %vm1264_vm2, %v10596_v57, 0.0  ;;  %v3863_v47 = vsel %vm1264_vm2, %v10592_v36, -inf  ;;  %v4051_v10 = vmax.f32 %v4049_v9, %v4050_v24 }
 0x9ba   : > { %v4539_v34 = vrot.slane %v4538_v56, 4  ;;  %v3864_v21 = vrot.slane %v3863_v47, 4  ;;  %v3623_v63 = vmul.f32 %v10378_v29, %v3552_v23  ;;  %7407 = vrsqrt.f32 %v3428_v53 }
 0x9bb   : > { %v10611_v1 = vpop.eup %7395  ;;  %v4661_v51 = vadd.f32 %v4660_v41, %v4659_v46  ;;  %v4229_v6 = vsub.f32 %v10551_v61, %v4051_v10  ;;  %5447 = vrot.lane.b32.xlu1 %v11999_v37, %s7700_s21  ;;  %v12000_v61 = vld [vmem:[#allocation50_spill] sm:$0xff] }
 0x9bc   : > { %v7398_v60 = vpop.eup %7397  ;;  %v4540_v59 = vadd.f32 %v4539_v34, %v4538_v56  ;;  %v3865_v54 = vmax.f32 %v3863_v47, %v3864_v21  ;;  %v4622_v38 = vsel %vm1264_vm2, %v10611_v1, 0.0  ;;  %v10620_v9 = vadd.f32 %v10415_v55, %v3623_v63  ;;  %v12001_v56 = vld [vmem:[#allocation45_spill] sm:$0xff]  ;;  %v12002_v63 = vld [vmem:[#allocation51_spill] sm:$0xff] }
 0x9bd   : > { %v10622_v50 = vpop.eup %7399  ;;  %v4662_v58 = vrot.slane %v4661_v51, 1  ;;  %v4623_v30 = vrot.slane %v4622_v38, 4  ;;  %v3551_v39 = vmul.f32 %v7398_v60, %v12000_v61  ;;  %v4337_v31 = vmul.f32 1.442695, %v4229_v6 }
 0x9be   : > { %v7402_v46 = vpop.eup %7401  ;;  %v4541_v24 = vrot.slane %v4540_v59, 2  ;;  %v3866_v53 = vrot.slane %v3865_v54, 2  ;;  %v3884_v7 = vsel %vm1264_vm2, %v10620_v9, -inf  ;;  %v4594_v19 = vsel %vm1264_vm2, %v10622_v50, 0.0 }
 0x9bf   : > { %v4663_v14 = vadd.f32 %v4662_v58, %v4661_v51  ;;  %v4624_v43 = vadd.f32 %v4623_v30, %v4622_v38  ;;  %v3885_v23 = vrot.slane %v3884_v7, 4  ;;  %v4595_v41 = vrot.slane %v4594_v19, 4  ;;  %5463 = vrot.lane.b32.xlu1 %v12001_v56, %s7700_s21  ;;  %v5418_v56 = vpop.permute.xlu0 %5417 }
 0x9c0   : > { %v10631_v47 = vpop.eup %7403  ;;  %v4542_v10 = vadd.f32 %v4541_v24, %v4540_v59  ;;  %v3867_v34 = vmax.f32 %v3865_v54, %v3866_v53  ;;  %v3622_v21 = vmul.f32 %v10378_v29, %v3551_v39  ;;  %v3553_v6 = vmul.f32 %v7402_v46, %v12002_v63 }
 0x9c1   : > { %7409 = vrcp.f32 %v4663_v14  ;;  %v4625_v37 = vrot.slane %v4624_v43, 2  ;;  %v3886_v60 = vmax.f32 %v3884_v7, %v3885_v23  ;;  %v4596_v61 = vadd.f32 %v4595_v41, %v4594_v19 }
 0x9c2   : > { %v10635_v8 = vpop.eup %7405  ;;  %v4543_v51 = vrot.slane %v4542_v10, 1  ;;  %v3868_v38 = vrot.slane %v3867_v34, 1  ;;  %v10638_v58 = vadd.f32 %v10415_v55, %v3622_v21  ;;  %v3624_v30 = vmul.f32 %v10378_v29, %v3553_v6 }
 0x9c3   : > { %v4626_v59 = vadd.f32 %v4625_v37, %v4624_v43  ;;  %v3887_v54 = vrot.slane %v3886_v60, 2  ;;  %v4597_v24 = vrot.slane %v4596_v61, 2  ;;  %v4678_v39 = vsel %vm1264_vm2, %v10635_v8, 0.0 }
 0x9c4   : > { %v4544_v46 = vadd.f32 %v4543_v51, %v4542_v10  ;;  %v3869_v53 = vmax.f32 %v3867_v34, %v3868_v38  ;;  %v3877_v7 = vsel %vm1264_vm2, %v10638_v58, -inf  ;;  %v4679_v19 = vrot.slane %v4678_v39, 4  ;;  %v7408_v14 = vpop.eup %7407 }
 0x9c5   : > { %v4627_v23 = vrot.slane %v4626_v59, 1  ;;  %v3888_v41 = vmax.f32 %v3886_v60, %v3887_v54  ;;  %v4598_v21 = vadd.f32 %v4597_v24, %v4596_v61  ;;  %v3878_v63 = vrot.slane %v3877_v7, 4  ;;  %v5384_v60 = vpop.permute.xlu0 %5383 }
 0x9c6   : > { %7411 = vrcp.f32 %v4544_v46  ;;  %v4203_v6 = vsub.f32 %v10592_v36, %v3869_v53  ;;  %v4680_v43 = vadd.f32 %v4679_v19, %v4678_v39  ;;  %v10647_v37 = vadd.f32 %v10415_v55, %v3624_v30  ;;  %v12003_v30 = vld [vmem:[#allocation58_spill] sm:$0xff] }
 0x9c7   : > { %v4628_v0 = vadd.f32 %v4627_v23, %v4626_v59  ;;  %v3889_v62 = vrot.slane %v3888_v41, 1  ;;  %v4599_v10 = vrot.slane %v4598_v21, 1  ;;  %v3879_v34 = vmax.f32 %v3877_v7, %v3878_v63 }
 0x9c8   : > { %v4285_v51 = vmul.f32 1.442695, %v4203_v6  ;;  %v4681_v38 = vrot.slane %v4680_v43, 2  ;;  %v3891_v26 = vsel %vm1264_vm2, %v10647_v37, -inf  ;;  %7413 = vpow2.f32 %v4337_v31 }
 0x9c9   : > { %7415 = vrcp.f32 %v4628_v0  ;;  %v3890_v61 = vmax.f32 %v3888_v41, %v3889_v62  ;;  %v4600_v54 = vadd.f32 %v4599_v10, %v4598_v21  ;;  %v3880_v24 = vrot.slane %v3879_v34, 2 }
 0x9ca   : > { %7417 = vpow2.f32 %v4285_v51  ;;  %v4682_v36 = vadd.f32 %v4681_v38, %v4680_v43  ;;  %v3892_v39 = vrot.slane %v3891_v26, 4  ;;  %v3556_v46 = vmul.f32 %v7408_v14, %v12003_v30 }
 0x9cb   : > { %v7410_v59 = vpop.eup %7409  ;;  %v4206_v53 = vsub.f32 %v10620_v9, %v3890_v61  ;;  %7419 = vrcp.f32 %v4600_v54  ;;  %v3881_v7 = vmax.f32 %v3879_v34, %v3880_v24  ;;  %v10655_v19 = vadd.f32 %v10415_v55, %v10455_v15  ;;  %v5408_v34 = vpop.permute.xlu0 %5407 }
 0x9cc   : > { %v4929_v31 = vmul.f32 %v7410_v59, %v10576_v52  ;;  %v4683_v0 = vrot.slane %v4682_v36, 1  ;;  %v3893_v62 = vmax.f32 %v3891_v26, %v3892_v39  ;;  %v3627_v23 = vmul.f32 %v10378_v29, %v3556_v46 }
 0x9cd   : > { %v4291_v41 = vmul.f32 1.442695, %v4206_v53  ;;  %v3882_v21 = vrot.slane %v3881_v7, 1  ;;  %v12004_v63 = vrot.slane %v10602_v22, 2  ;;  %v3429_v9 = vadd.f32 1e-05, %v10609_v33 }
 0x9ce   : > { %v5569_v6 = vmul.f32 %v5418_v56, %v4929_v31  ;;  %v4684_v43 = vadd.f32 %v4683_v0, %v4682_v36  ;;  %v3894_v10 = vrot.slane %v3893_v62, 2  ;;  %v10664_v15 = vadd.f32 %v10415_v55, %v3627_v23 }
 0x9cf   : > { %v4084_v14 = vmax.f32 %v10602_v22, %v12004_v63  ;;  %v10668_v52 = vmul.f32 %v10378_v29, %v10589_v25  ;;  %v10672_v26 = vmul.f32 %v10378_v29, %v10599_v32  ;;  %7421 = vpow2.f32 %v4291_v41 }
 0x9d0   : > { %v3883_v51 = vmax.f32 %v3881_v7, %v3882_v21  ;;  %v7412_v22 = vpop.eup %7411  ;;  %v5873_v33 = vsel %vm1264_vm2, %v5569_v6, 0.0  ;;  %7423 = vrcp.f32 %v4684_v43  ;;  %v3895_v56 = vmax.f32 %v3893_v62, %v3894_v10  ;;  %v5400_v6 = vpop.permute.xlu0 %5399 }
 0x9d1   : > { %v3912_v38 = vsel %vm1264_vm2, %v10664_v15, -inf  ;;  %v5874_v61 = vrot.slane %v5873_v33, 4  ;;  %v4912_v54 = vmul.f32 %v7412_v22, %v10596_v57  ;;  %v4085_v39 = vrot.slane %v4084_v14, 1  ;;  %v3239_v22 = vpop.xlane.xlu1 %3238 }
 0x9d2   : > { %v4205_v25 = vsub.f32 %v10638_v58, %v3883_v51  ;;  %v3913_v24 = vrot.slane %v3912_v38, 4  ;;  %v10679_v36 = vpop.eup %7413  ;;  %v3896_v32 = vrot.slane %v3895_v56, 1  ;;  %7425 = vrsqrt.f32 %v3429_v9 }
 0x9d3   : > { %v10683_v30 = vsel %vm1264_vm2, %v10655_v19, -inf  ;;  %v7416_v46 = vpop.eup %7415  ;;  %v5875_v59 = vadd.f32 %v5874_v61, %v5873_v33  ;;  %v5552_v53 = vmul.f32 %v5384_v60, %v4912_v54  ;;  %v4685_v31 = vsel %vm1264_vm2, %v10679_v36, 0.0 }
 0x9d4   : > { %v4289_v7 = vmul.f32 1.442695, %v4205_v25  ;;  %v10687_v57 = vpop.eup %7417  ;;  %v4924_v58 = vmul.f32 %v7416_v46, %v10611_v1  ;;  %v3897_v0 = vmax.f32 %v3895_v56, %v3896_v32  ;;  %v4686_v62 = vrot.slane %v4685_v31, 4 }
 0x9d5   : > { %v3914_v23 = vmax.f32 %v3912_v38, %v3913_v24  ;;  %v7420_v41 = vpop.eup %7419  ;;  %v5876_v21 = vrot.slane %v5875_v59, 2  ;;  %v5754_v63 = vsel %vm1264_vm2, %v5552_v53, 0.0  ;;  %v4503_v9 = vsel %vm1264_vm2, %v10687_v57, 0.0 }
 0x9d6   : > { %7427 = vpow2.f32 %v4289_v7  ;;  %v5755_v60 = vrot.slane %v5754_v63, 4  ;;  %v4504_v43 = vrot.slane %v4503_v9, 4  ;;  %v5564_v10 = vmul.f32 %v5408_v34, %v4924_v58 }
 0x9d7   : > { %v4920_v51 = vmul.f32 %v7420_v41, %v10622_v50  ;;  %v5877_v33 = vadd.f32 %v5876_v21, %v5875_v59  ;;  %v4207_v1 = vsub.f32 %v10647_v37, %v3897_v0  ;;  %v4687_v56 = vadd.f32 %v4686_v62, %v4685_v31 }
 0x9d8   : > { %v4086_v38 = vmax.f32 %v4084_v14, %v4085_v39  ;;  %v5756_v61 = vadd.f32 %v5755_v60, %v5754_v63  ;;  %v4505_v54 = vadd.f32 %v4504_v43, %v4503_v9  ;;  %v5838_v25 = vsel %vm1264_vm2, %v5564_v10, 0.0  ;;  %v10703_v9 = vpop.xlane.xlu1 %3244  ;;  %v5424_v10 = vpop.permute.xlu0 %5423 }
 0x9d9   : > { %v5560_v24 = vmul.f32 %v5400_v6, %v4920_v51  ;;  %v10696_v32 = vpop.eup %7421  ;;  %v5839_v46 = vrot.slane %v5838_v25, 4  ;;  %v4293_v53 = vmul.f32 1.442695, %v4207_v1  ;;  %v4688_v7 = vrot.slane %v4687_v56, 2 }
 0x9da   : > { %v3915_v45 = vrot.slane %v3914_v23, 2  ;;  %v7424_v34 = vpop.eup %7423  ;;  %v5757_v58 = vrot.slane %v5756_v61, 2  ;;  %v4506_v50 = vrot.slane %v4505_v54, 2  ;;  %v4524_v59 = vsel %vm1264_vm2, %v10696_v32, 0.0 }
 0x9db   : > { %v5810_v37 = vsel %vm1264_vm2, %v5560_v24, 0.0  ;;  %v5840_v14 = vadd.f32 %v5839_v46, %v5838_v25  ;;  %v4525_v39 = vrot.slane %v4524_v59, 4  ;;  %v4053_v0 = vrot.slane %v10683_v30, 4 }
 0x9dc   : > { %v5811_v31 = vrot.slane %v5810_v37, 4  ;;  %v7426_v62 = vpop.eup %7425  ;;  %v5878_v41 = vrot.slane %v5877_v33, 1  ;;  %v4507_v21 = vadd.f32 %v4506_v50, %v4505_v54  ;;  %v4932_v63 = vmul.f32 %v7424_v34, %v10635_v8 }
 0x9dd   : > { %7429 = vpow2.f32 %v4293_v53  ;;  %v5758_v6 = vadd.f32 %v5757_v58, %v5756_v61  ;;  %v5841_v60 = vrot.slane %v5840_v14, 2  ;;  %v4689_v51 = vadd.f32 %v4688_v7, %v4687_v56 }
 0x9de   : > { %v5812_v43 = vadd.f32 %v5811_v31, %v5810_v37  ;;  %v4526_v1 = vadd.f32 %v4525_v39, %v4524_v59  ;;  %v5572_v24 = vmul.f32 %v5424_v10, %v4932_v63  ;;  %v3916_v25 = vmax.f32 %v3914_v23, %v3915_v45  ;;  %v3251_v37 = vpop.xlane.xlu1 %3250 }
 0x9df   : > { %v4234_v46 = vsub.f32 %v10571_v12, %v4086_v38  ;;  %v4508_v3 = vrot.slane %v4507_v21, 1  ;;  %v5842_v5 = vadd.f32 %v5841_v60, %v5840_v14  ;;  %v4690_v50 = vrot.slane %v4689_v51, 1 }
 0x9e0   : > { %v10706_v27 = vpop.eup %7427  ;;  %v5813_v54 = vrot.slane %v5812_v43, 2  ;;  %v5894_v61 = vsel %vm1264_vm2, %v5572_v24, 0.0  ;;  %v4054_v53 = vmax.f32 %v10683_v30, %v4053_v0  ;;  %v3369_v34 = vmul.f32 0.0625, %v3239_v22  ;;  %v12006_v24 = vld [vmem:[#allocation3_spill] sm:$0xff] }
 0x9e1   : > { %v4517_v8 = vsel %vm1264_vm2, %v10706_v27, 0.0  ;;  %v10712_v56 = vadd.f32 %v5878_v41, %v5877_v33  ;;  %v5759_v7 = vrot.slane %v5758_v6, 1  ;;  %v4527_v12 = vrot.slane %v4526_v1, 2 }
 0x9e2   : > { %v5814_v45 = vadd.f32 %v5813_v54, %v5812_v43  ;;  %v4518_v23 = vrot.slane %v4517_v8, 4  ;;  %v5895_v38 = vrot.slane %v5894_v61, 4  ;;  %v4691_v58 = vadd.f32 %v4690_v50, %v4689_v51 }
 0x9e3   : > { %12005 = vst [vmem:[#allocation123_spill] sm:$0xff] %v10712_v56  ;;  %v3917_v59 = vrot.slane %v3916_v25, 1  ;;  %v4509_v14 = vadd.f32 %v4508_v3, %v4507_v21  ;;  %v5843_v39 = vrot.slane %v5842_v5, 1  ;;  %v4347_v63 = vmul.f32 1.442695, %v4234_v46 }
 0x9e4   : > { %v4519_v31 = vadd.f32 %v4518_v23, %v4517_v8  ;;  %v5896_v60 = vadd.f32 %v5895_v38, %v5894_v61  ;;  %7431 = vrcp.f32 %v4691_v58  ;;  %v3557_v30 = vmul.f32 %v7426_v62, %v12006_v24  ;;  %v3260_v61 = vpop.xlane.xlu1 %3259 }
 0x9e5   : > { %v3918_v10 = vmax.f32 %v3916_v25, %v3917_v59  ;;  %v5815_v22 = vrot.slane %v5814_v45, 1  ;;  %7433 = vpow2.f32 %v4347_v63  ;;  %v4055_v0 = vrot.slane %v4054_v53, 2 }
 0x9e6   : > { %v4520_v33 = vrot.slane %v4519_v31, 2  ;;  %v10717_v43 = vadd.f32 %v5759_v7, %v5758_v6  ;;  %v5897_v51 = vrot.slane %v5896_v60, 2  ;;  %v3628_v3 = vmul.f32 %v10378_v29, %v3557_v30 }
 0x9e7   : > { %v10715_v41 = vpop.eup %7429  ;;  %v4210_v54 = vsub.f32 %v10664_v15, %v3918_v10  ;;  %7435 = vrcp.f32 %v4509_v14  ;;  %v10721_v21 = vadd.f32 %v4527_v12, %v4526_v1  ;;  %v4056_v46 = vmax.f32 %v4054_v53, %v4055_v0 }
 0x9e8   : > { %12007 = vst [vmem:[#allocation115_spill] sm:$0xff] %v10717_v43  ;;  %v10725_v62 = vadd.f32 %v10415_v55, %v10530_v11  ;;  %v10727_v25 = vadd.f32 %v5843_v39, %v5842_v5  ;;  %v10729_v50 = vadd.f32 %v4520_v33, %v4519_v31  ;;  %v10732_v6 = vadd.f32 %v10415_v55, %v3628_v3 }
 0x9e9   : > { %v4299_v8 = vmul.f32 1.442695, %v4210_v54  ;;  %v10734_v15 = vadd.f32 %v5815_v22, %v5814_v45  ;;  %v4531_v29 = vsel %vm1264_vm2, %v10715_v41, 0.0  ;;  %v4057_v1 = vrot.slane %v4056_v46, 1  ;;  %v10757_v22 = vpop.xlane.xlu1 %3256 }
 0x9ea   : > { %12008 = vst [vmem:[#allocation125_spill] sm:$0xff] %v10727_v25  ;;  %v4129_v53 = vsel %vm1264_vm2, %v10725_v62, -inf  ;;  %v10740_v11 = vadd.f32 %v5897_v51, %v5896_v60  ;;  %v3919_v5 = vsel %vm1264_vm2, %v10732_v6, -inf  ;;  %v3433_v7 = vadd.f32 1e-05, %v3369_v34  ;;  %v5426_v51 = vpop.permute.xlu0 %5425 }
 0x9eb   : > { %12009 = vst [vmem:[#allocation2_spill] sm:$0xff] %v10734_v15  ;;  %7437 = vpow2.f32 %v4299_v8  ;;  %v3920_v23 = vrot.slane %v3919_v5, 4  ;;  %v4058_v12 = vmax.f32 %v4056_v46, %v4057_v1  ;;  %v4130_v38 = vrot.slane %v4129_v53, 4 }
 0x9ec   : > { %v3371_v45 = vmul.f32 0.0625, %v10703_v9  ;;  %v4532_v59 = vrot.slane %v4531_v29, 4  ;;  %v10748_v14 = vadd.f32 %v10415_v55, %v10389_v40  ;;  %v3373_v39 = vmul.f32 0.0625, %v3251_v37 }
 0x9ed   : > { %v3921_v31 = vmax.f32 %v3919_v5, %v3920_v23  ;;  %v4230_v63 = vsub.f32 %v10655_v19, %v4058_v12  ;;  %v4131_v60 = vmax.f32 %v4129_v53, %v4130_v38  ;;  %7439 = vrsqrt.f32 %v3433_v7 }
 0x9ee   : > { %v3435_v10 = vadd.f32 1e-05, %v3371_v45  ;;  %v7432_v24 = vpop.eup %7431  ;;  %v4010_v34 = vsel %vm1264_vm2, %v10748_v14, -inf  ;;  %v3437_v30 = vadd.f32 1e-05, %v3373_v39  ;;  %v10755_v9 = vadd.f32 %v10415_v55, %v10510_v18 }
 0x9ef   : > { %v10759_v40 = vpop.eup %7433  ;;  %v4933_v37 = vmul.f32 %v7432_v24, %v10679_v36  ;;  %v3922_v33 = vrot.slane %v3921_v31, 2  ;;  %v4339_v19 = vmul.f32 1.442695, %v4230_v63  ;;  %v4132_v0 = vrot.slane %v4131_v60, 2 }
 0x9f0   : > { %v4720_v54 = vsel %vm1264_vm2, %v10759_v40, 0.0  ;;  %7441 = vrsqrt.f32 %v3435_v10  ;;  %v4011_v3 = vrot.slane %v4010_v34, 4  ;;  %v4094_v46 = vsel %vm1264_vm2, %v10755_v9, -inf }
 0x9f1   : > { %v10766_v55 = vpop.eup %7435  ;;  %v5573_v18 = vmul.f32 %v5426_v51, %v4933_v37  ;;  %v4721_v8 = vrot.slane %v4720_v54, 4  ;;  %v3923_v1 = vmax.f32 %v3921_v31, %v3922_v33  ;;  %7443 = vpow2.f32 %v4339_v19  ;;  %v10772_v37 = vpop.xlane.xlu1 %3262 }
 0x9f2   : > { %v4133_v53 = vmax.f32 %v4131_v60, %v4132_v0  ;;  %v4012_v36 = vmax.f32 %v4010_v34, %v4011_v3  ;;  %7445 = vrsqrt.f32 %v3437_v30  ;;  %v4095_v5 = vrot.slane %v4094_v46, 4 }
 0x9f3   : > { %v5899_v7 = vrot.slane %v10740_v11, 1  ;;  %v5901_v23 = vsel %vm1264_vm2, %v5573_v18, 0.0  ;;  %v4722_v12 = vadd.f32 %v4721_v8, %v4720_v54  ;;  %v3924_v38 = vrot.slane %v3923_v1, 1 }
 0x9f4   : > { %v5902_v39 = vrot.slane %v5901_v23, 4  ;;  %v4134_v63 = vrot.slane %v4133_v53, 1  ;;  %v4013_v10 = vrot.slane %v4012_v36, 2  ;;  %v3376_v24 = vmul.f32 0.0625, %v3260_v61 }
 0x9f5   : > { %v10770_v45 = vpop.eup %7437  ;;  %v4723_v60 = vrot.slane %v4722_v12, 2  ;;  %v3925_v34 = vmax.f32 %v3923_v1, %v3924_v38  ;;  %v4096_v30 = vmax.f32 %v4094_v46, %v4095_v5  ;;  %v10776_v33 = vadd.f32 %v4532_v59, %v4531_v29  ;;  %v12012_v38 = vld [vmem:[#allocation19_spill] sm:$0xff] }
 0x9f6   : > { %12010 = vst [vmem:[#allocation87_spill] sm:$0xff] %v10770_v45  ;;  %v4552_v31 = vsel %vm1264_vm2, %v10770_v45, 0.0  ;;  %v5903_v19 = vadd.f32 %v5902_v39, %v5901_v23  ;;  %v4135_v51 = vmax.f32 %v4133_v53, %v4134_v63  ;;  %v4014_v18 = vmax.f32 %v4012_v36, %v4013_v10  ;;  %v10792_v36 = vpop.xlane.xlu1 %3271 }
 0x9f7   : > { %v4553_v0 = vrot.slane %v4552_v31, 4  ;;  %v4724_v54 = vadd.f32 %v4723_v60, %v4722_v12  ;;  %v4211_v3 = vsub.f32 %v10732_v6, %v3925_v34  ;;  %v4097_v8 = vrot.slane %v4096_v30, 2  ;;  %v7440_v58 = vpop.eup %7439  ;;  %v10786_v6 = vld [vmem:[%s11538_s8] ss:$0 sm:$0xff] }
 0x9f8   : > { %v10780_v61 = vadd.f32 %v5899_v7, %v10740_v11  ;;  %v4241_v15 = vsub.f32 %v10725_v62, %v4135_v51  ;;  %v3440_v56 = vadd.f32 1e-05, %v3376_v24  ;;  %v5904_v1 = vrot.slane %v5903_v19, 2  ;;  %v10803_v34 = vld [vmem:[%s11537_s7] ss:$0 sm:$0xff] }
 0x9f9   : > { %v4554_v25 = vadd.f32 %v4553_v0, %v4552_v31  ;;  %v4725_v46 = vrot.slane %v4724_v54, 1  ;;  %v4301_v29 = vmul.f32 1.442695, %v4211_v3  ;;  %v4015_v59 = vrot.slane %v4014_v18, 1  ;;  %v12013_v31 = vld [vmem:[#allocation14_spill] sm:$0xff] }
 0x9fa   : > { %12011 = vst [vmem:[#allocation21_spill] sm:$0xff] %v10780_v61  ;;  %v7442_v5 = vpop.eup %7441  ;;  %v4361_v53 = vmul.f32 1.442695, %v4241_v15  ;;  %v4098_v12 = vmax.f32 %v4096_v30, %v4097_v8  ;;  %v10790_v11 = vadd.f32 %v10786_v6, %v10474_v20  ;;  %v3561_v60 = vmul.f32 %v7440_v58, %v12013_v31 }
 0x9fb   : > { %v4555_v23 = vrot.slane %v4554_v25, 2  ;;  %v10794_v62 = vpop.eup %7443  ;;  %v4726_v7 = vadd.f32 %v4725_v46, %v4724_v54  ;;  %7447 = vpow2.f32 %v4301_v29  ;;  %v3563_v39 = vmul.f32 %v7442_v5, %v12012_v38  ;;  %v12014_v54 = vld [vmem:[#allocation55_spill] sm:$0xff] }
 0x9fc   : > { %v4016_v63 = vmax.f32 %v4014_v18, %v4015_v59  ;;  %v7446_v15 = vpop.eup %7445  ;;  %v4692_v24 = vsel %vm1264_vm2, %v10794_v62, 0.0  ;;  %7449 = vpow2.f32 %v4361_v53  ;;  %v10807_v51 = vadd.f32 %v5904_v1, %v5903_v19  ;;  %v10817_v19 = vpop.xlane.xlu1 %3274 }
 0x9fd   : > { %v4556_v10 = vadd.f32 %v4555_v23, %v4554_v25  ;;  %7451 = vrcp.f32 %v4726_v7  ;;  %v4693_v20 = vrot.slane %v4692_v24, 4  ;;  %v3634_v30 = vmul.f32 %v10803_v34, %v3563_v39  ;;  %v5436_v59 = vpop.permute.xlu0 %5435 }
 0x9fe   : > { %v4224_v0 = vsub.f32 %v10748_v14, %v4016_v63  ;;  %v3565_v3 = vmul.f32 %v7446_v15, %v12014_v54  ;;  %v4099_v18 = vrot.slane %v4098_v12, 1  ;;  %v4066_v29 = vsel %vm1264_vm2, %v10790_v11, -inf }
 0x9ff   : > { %v4557_v25 = vrot.slane %v4556_v10, 1  ;;  %v4694_v8 = vadd.f32 %v4693_v20, %v4692_v24  ;;  %v10811_v58 = vadd.f32 %v10786_v6, %v3634_v30  ;;  %v4067_v14 = vrot.slane %v4066_v29, 4 }
 0xa00   : > { %v4327_v46 = vmul.f32 1.442695, %v4224_v0  ;;  %v3636_v5 = vmul.f32 %v10803_v34, %v3565_v3  ;;  %v4100_v23 = vmax.f32 %v4098_v12, %v4099_v18  ;;  %v10820_v53 = vmul.f32 %v10803_v34, %v3561_v60 }
 0xa01   : > { %v4695_v1 = vrot.slane %v4694_v8, 2  ;;  %v3961_v7 = vsel %vm1264_vm2, %v10811_v58, -inf  ;;  %v4558_v15 = vadd.f32 %v4557_v25, %v4556_v10  ;;  %v4068_v31 = vmax.f32 %v4066_v29, %v4067_v14  ;;  %v10844_v29 = vpop.xlane.xlu1 %3286 }
 0xa02   : > { %7453 = vpow2.f32 %v4327_v46  ;;  %v3962_v38 = vrot.slane %v3961_v7, 4  ;;  %v10825_v39 = vadd.f32 %v10786_v6, %v3636_v5  ;;  %v4236_v63 = vsub.f32 %v10755_v9, %v4100_v23 }
 0xa03   : > { %7455 = vrsqrt.f32 %v3440_v56  ;;  %v4696_v24 = vadd.f32 %v4695_v1, %v4694_v8  ;;  %v10833_v0 = vadd.f32 %v10786_v6, %v10542_v2  ;;  %v4069_v9 = vrot.slane %v4068_v31, 2 }
 0xa04   : > { %v3963_v20 = vmax.f32 %v3961_v7, %v3962_v38  ;;  %v3975_v60 = vsel %vm1264_vm2, %v10825_v39, -inf  ;;  %v4351_v30 = vmul.f32 1.442695, %v4236_v63  ;;  %v3375_v56 = vmul.f32 0.0625, %v10757_v22 }
 0xa05   : > { %v10835_v54 = vpop.eup %7447  ;;  %v4697_v3 = vrot.slane %v4696_v24, 1  ;;  %v3976_v18 = vrot.slane %v3975_v60, 4  ;;  %v4150_v8 = vsel %vm1264_vm2, %v10833_v0, -inf  ;;  %v4070_v63 = vmax.f32 %v4068_v31, %v4069_v9 }
 0xa06   : > { %12015 = vst [vmem:[#allocation24_spill] sm:$0xff] %v10835_v54  ;;  %v10838_v46 = vpop.eup %7449  ;;  %v4559_v10 = vsel %vm1264_vm2, %v10835_v54, 0.0  ;;  %v3964_v25 = vrot.slane %v3963_v20, 2  ;;  %7457 = vpow2.f32 %v4351_v30  ;;  %v4151_v61 = vrot.slane %v4150_v8, 4 }
 0xa07   : > { %v7452_v2 = vpop.eup %7451  ;;  %v4560_v5 = vrot.slane %v4559_v10, 4  ;;  %v4698_v23 = vadd.f32 %v4697_v3, %v4696_v24  ;;  %v4769_v14 = vsel %vm1264_vm2, %v10838_v46, 0.0  ;;  %v3977_v1 = vmax.f32 %v3975_v60, %v3976_v18 }
 0xa08   : > { %v4938_v22 = vmul.f32 %v7452_v2, %v10759_v40  ;;  %v4770_v7 = vrot.slane %v4769_v14, 4  ;;  %v3965_v38 = vmax.f32 %v3963_v20, %v3964_v25  ;;  %v4071_v45 = vrot.slane %v4070_v63, 1 }
 0xa09   : > { %v4561_v12 = vadd.f32 %v4560_v5, %v4559_v10  ;;  %7459 = vrcp.f32 %v4698_v23  ;;  %v3978_v30 = vrot.slane %v3977_v1, 2  ;;  %v4152_v60 = vmax.f32 %v4150_v8, %v4151_v61  ;;  %v10854_v10 = vpop.xlane.xlu1 %3292 }
 0xa0a   : > { %v5578_v4 = vmul.f32 %v5436_v59, %v4938_v22  ;;  %v4771_v54 = vadd.f32 %v4770_v7, %v4769_v14  ;;  %v3966_v43 = vrot.slane %v3965_v38, 1  ;;  %7461 = vrcp.f32 %v4558_v15 }
 0xa0b   : > { %v4562_v24 = vrot.slane %v4561_v12, 2  ;;  %v3979_v3 = vmax.f32 %v3977_v1, %v3978_v30  ;;  %v3439_v5 = vadd.f32 1e-05, %v3375_v56  ;;  %v4072_v14 = vmax.f32 %v4070_v63, %v4071_v45  ;;  %v12016_v56 = vld [vmem:[#allocation29_spill] sm:$0xff] }
 0xa0c   : > { %v10849_v28 = vpop.eup %7453  ;;  %v5936_v40 = vsel %vm1264_vm2, %v5578_v4, 0.0  ;;  %v4772_v20 = vrot.slane %v4771_v54, 2  ;;  %v3967_v31 = vmax.f32 %v3965_v38, %v3966_v43  ;;  %v4153_v1 = vrot.slane %v4152_v60, 2 }
 0xa0d   : > { %v7456_v18 = vpop.eup %7455  ;;  %v4650_v9 = vsel %vm1264_vm2, %v10849_v28, 0.0  ;;  %v5937_v59 = vrot.slane %v5936_v40, 4  ;;  %v3980_v2 = vrot.slane %v3979_v3, 1  ;;  %v4563_v8 = vadd.f32 %v4562_v24, %v4561_v12  ;;  %v10864_v63 = vpop.xlane.xlu1 %3298 }
 0xa0e   : > { %v4651_v25 = vrot.slane %v4650_v9, 4  ;;  %v4773_v23 = vadd.f32 %v4772_v20, %v4771_v54  ;;  %v4217_v15 = vsub.f32 %v10811_v58, %v3967_v31  ;;  %v4232_v30 = vsub.f32 %v10790_v11, %v4072_v14 }
 0xa0f   : > { %v5938_v61 = vadd.f32 %v5937_v59, %v5936_v40  ;;  %v3981_v4 = vmax.f32 %v3979_v3, %v3980_v2  ;;  %v4154_v44 = vmax.f32 %v4152_v60, %v4153_v1  ;;  %v3568_v54 = vmul.f32 %v7456_v18, %v12016_v56 }
 0xa10   : > { %v4652_v22 = vadd.f32 %v4651_v25, %v4650_v9  ;;  %v10857_v7 = vpop.eup %7457  ;;  %v4774_v43 = vrot.slane %v4773_v23, 1  ;;  %v4313_v38 = vmul.f32 1.442695, %v4217_v15  ;;  %7463 = vrsqrt.f32 %v3439_v5  ;;  %v5428_v25 = vpop.permute.xlu0 %5427 }
 0xa11   : > { %v4219_v16 = vsub.f32 %v10825_v39, %v3981_v4  ;;  %v4734_v45 = vsel %vm1264_vm2, %v10857_v7, 0.0  ;;  %v4343_v12 = vmul.f32 1.442695, %v4232_v30  ;;  %v5939_v3 = vrot.slane %v5938_v61, 2 }
 0xa12   : > { %v4653_v17 = vrot.slane %v4652_v22, 2  ;;  %v4775_v58 = vadd.f32 %v4774_v43, %v4773_v23  ;;  %7465 = vpow2.f32 %v4313_v38  ;;  %v4564_v40 = vrot.slane %v4563_v8, 1  ;;  %v10883_v38 = vpop.xlane.xlu1 %3307 }
 0xa13   : > { %v7460_v24 = vpop.eup %7459  ;;  %v4317_v11 = vmul.f32 1.442695, %v4219_v16  ;;  %v4735_v39 = vrot.slane %v4734_v45, 4  ;;  %v4155_v31 = vrot.slane %v4154_v44, 1  ;;  %v12017_v9 = vrot.slane %v10807_v51, 1 }
 0xa14   : > { %v4654_v20 = vadd.f32 %v4653_v17, %v4652_v22  ;;  %v4934_v60 = vmul.f32 %v7460_v24, %v10794_v62  ;;  %7467 = vrcp.f32 %v4775_v58  ;;  %v10867_v18 = vpop.eup %7461  ;;  %v3377_v5 = vmul.f32 0.0625, %v10772_v37 }
 0xa15   : > { %v10872_v59 = vadd.f32 %v12017_v9, %v10807_v51  ;;  %7469 = vpow2.f32 %v4317_v11  ;;  %v4736_v17 = vadd.f32 %v4735_v39, %v4734_v45  ;;  %v10876_v16 = vmul.f32 %v10803_v34, %v3568_v54 }
 0xa16   : > { %v4655_v2 = vrot.slane %v4654_v20, 1  ;;  %v5574_v23 = vmul.f32 %v5428_v25, %v4934_v60  ;;  %7471 = vpow2.f32 %v4343_v12  ;;  %v4565_v62 = vadd.f32 %v4564_v40, %v4563_v8 }
 0xa17   : > { %12018 = vst [vmem:[#allocation91_spill] sm:$0xff] %v10872_v59  ;;  %v4156_v14 = vmax.f32 %v4154_v44, %v4155_v31  ;;  %v3441_v1 = vadd.f32 1e-05, %v3377_v5  ;;  %v5940_v22 = vadd.f32 %v5939_v3, %v5938_v61  ;;  %v4737_v51 = vrot.slane %v4736_v17, 2 }
 0xa18   : > { %v4656_v15 = vadd.f32 %v4655_v2, %v4654_v20  ;;  %v5908_v4 = vsel %vm1264_vm2, %v5574_v23, 0.0  ;;  %v10881_v43 = vadd.f32 %v10786_v6, %v10668_v52  ;;  %v3380_v56 = vmul.f32 0.0625, %v10792_v36  ;;  %v5450_v20 = vpop.permute.xlu0 %5449  ;;  %v10900_v2 = vpop.xlane.xlu1 %3304 }
 0xa19   : > { %v5909_v37 = vrot.slane %v5908_v4, 4  ;;  %v4244_v30 = vsub.f32 %v10833_v0, %v4156_v14  ;;  %v4738_v8 = vadd.f32 %v4737_v51, %v4736_v17  ;;  %v10891_v61 = vadd.f32 %v10786_v6, %v10574_v49 }
 0xa1a   : > { %7473 = vrcp.f32 %v4656_v15  ;;  %v4157_v44 = vsel %vm1264_vm2, %v10881_v43, -inf  ;;  %v7464_v54 = vpop.eup %7463  ;;  %v3444_v12 = vadd.f32 1e-05, %v3380_v56  ;;  %v3381_v3 = vmul.f32 0.0625, %v10817_v19 }
 0xa1b   : > { %7475 = vrsqrt.f32 %v3441_v1  ;;  %v5910_v52 = vadd.f32 %v5909_v37, %v5908_v4  ;;  %v4367_v58 = vmul.f32 1.442695, %v4244_v30  ;;  %v4158_v45 = vrot.slane %v4157_v44, 4 }
 0xa1c   : > { %v10893_v24 = vpop.eup %7465  ;;  %7477 = vrcp.f32 %v4565_v62  ;;  %v4739_v0 = vrot.slane %v4738_v8, 1  ;;  %v4164_v36 = vsel %vm1264_vm2, %v10891_v61, -inf  ;;  %v5941_v39 = vrot.slane %v5940_v22, 1 }
 0xa1d   : > { %12019 = vst [vmem:[#allocation27_spill] sm:$0xff] %v10893_v24  ;;  %v5911_v40 = vrot.slane %v5910_v52, 2  ;;  %v4601_v49 = vsel %vm1264_vm2, %v10893_v24, 0.0  ;;  %7479 = vpow2.f32 %v4367_v58  ;;  %v4159_v11 = vmax.f32 %v4157_v44, %v4158_v45 }
 0xa1e   : > { %v7468_v60 = vpop.eup %7467  ;;  %v4602_v31 = vrot.slane %v4601_v49, 4  ;;  %v4740_v9 = vadd.f32 %v4739_v0, %v4738_v8  ;;  %v4165_v25 = vrot.slane %v4164_v36, 4  ;;  %7481 = vrsqrt.f32 %v3444_v12  ;;  %v5416_v12 = vpop.permute.xlu0 %5415 }
 0xa1f   : > { %v10902_v5 = vpop.eup %7469  ;;  %v5912_v23 = vadd.f32 %v5911_v40, %v5910_v52  ;;  %v4945_v17 = vmul.f32 %v7468_v60, %v10838_v46  ;;  %v4160_v19 = vrot.slane %v4159_v11, 2  ;;  %v3445_v30 = vadd.f32 1e-05, %v3381_v3  ;;  %v12022_v40 = vld [vmem:[#allocation60_spill] sm:$0xff]  ;;  %v10916_v3 = vpop.xlane.xlu1 %3313 }
 0xa20   : > { %12020 = vst [vmem:[#allocation32_spill] sm:$0xff] %v10902_v5  ;;  %v10905_v62 = vpop.eup %7471  ;;  %v4603_v15 = vadd.f32 %v4602_v31, %v4601_v49  ;;  %v4615_v14 = vsel %vm1264_vm2, %v10902_v5, 0.0  ;;  %7483 = vrcp.f32 %v4740_v9  ;;  %v4166_v1 = vmax.f32 %v4164_v36, %v4165_v25 }
 0xa21   : > { %v5585_v4 = vmul.f32 %v5450_v20, %v4945_v17  ;;  %v4616_v51 = vrot.slane %v4615_v14, 4  ;;  %v4706_v37 = vsel %vm1264_vm2, %v10905_v62, 0.0  ;;  %v4161_v44 = vmax.f32 %v4159_v11, %v4160_v19 }
 0xa22   : > { %v4604_v56 = vrot.slane %v4603_v15, 2  ;;  %v4707_v8 = vrot.slane %v4706_v37, 4  ;;  %v4167_v46 = vrot.slane %v4166_v1, 2  ;;  %v10911_v58 = vadd.f32 %v5941_v39, %v5940_v22 }
 0xa23   : > { %v5985_v45 = vsel %vm1264_vm2, %v5585_v4, 0.0  ;;  %v4617_v0 = vadd.f32 %v4616_v51, %v4615_v14  ;;  %v3567_v49 = vmul.f32 %v7464_v54, %v12022_v40  ;;  %v5913_v25 = vrot.slane %v5912_v23, 1 }
 0xa24   : > { %v7474_v52 = vpop.eup %7473  ;;  %12021 = vst [vmem:[#allocation23_spill] sm:$0xff] %v10911_v58  ;;  %v5986_v20 = vrot.slane %v5985_v45, 4  ;;  %v4605_v60 = vadd.f32 %v4604_v56, %v4603_v15  ;;  %v4708_v9 = vadd.f32 %v4707_v8, %v4706_v37  ;;  %v4162_v17 = vrot.slane %v4161_v44, 1  ;;  %v12023_v15 = vld [vmem:[#allocation63_spill] sm:$0xff] }
 0xa25   : > { %v7476_v36 = vpop.eup %7475  ;;  %v4928_v31 = vmul.f32 %v7474_v52, %v10849_v28  ;;  %v4618_v11 = vrot.slane %v4617_v0, 2  ;;  %v4168_v19 = vmax.f32 %v4166_v1, %v4167_v46  ;;  %7485 = vrsqrt.f32 %v3445_v30 }
 0xa26   : > { %v10918_v22 = vpop.eup %7477  ;;  %v5987_v39 = vadd.f32 %v5986_v20, %v5985_v45  ;;  %v4709_v59 = vrot.slane %v4708_v9, 2  ;;  %v4606_v54 = vrot.slane %v4605_v60, 1  ;;  %v3569_v56 = vmul.f32 %v7476_v36, %v12023_v15  ;;  %v3311_v36 = vpop.xlane.xlu1 %3310 }
 0xa27   : > { %v5568_v4 = vmul.f32 %v5416_v12, %v4928_v31  ;;  %v10920_v14 = vpop.eup %7479  ;;  %v4619_v51 = vadd.f32 %v4618_v11, %v4617_v0  ;;  %v4163_v28 = vmax.f32 %v4161_v44, %v4162_v17  ;;  %v4169_v40 = vrot.slane %v4168_v19, 1 }
 0xa28   : > { %v5988_v37 = vrot.slane %v5987_v39, 2  ;;  %v4710_v52 = vadd.f32 %v4709_v59, %v4708_v9  ;;  %v7482_v58 = vpop.eup %7481  ;;  %v4790_v45 = vsel %vm1264_vm2, %v10920_v14, 0.0  ;;  %v10928_v0 = vmul.f32 %v10803_v34, %v3567_v49 }
 0xa29   : > { %v5866_v8 = vsel %vm1264_vm2, %v5568_v4, 0.0  ;;  %v4620_v46 = vrot.slane %v4619_v51, 1  ;;  %v4245_v30 = vsub.f32 %v10881_v43, %v4163_v28  ;;  %v4791_v44 = vrot.slane %v4790_v45, 4  ;;  %v5440_v43 = vpop.permute.xlu0 %5439 }
 0xa2a   : > { %v5867_v1 = vrot.slane %v5866_v8, 4  ;;  %v7484_v12 = vpop.eup %7483  ;;  %v5989_v20 = vadd.f32 %v5988_v37, %v5987_v39  ;;  %v4711_v31 = vrot.slane %v4710_v52, 1  ;;  %v10933_v17 = vadd.f32 %v10786_v6, %v10672_v26 }
 0xa2b   : > { %v4940_v59 = vmul.f32 %v7484_v12, %v10857_v7  ;;  %v4369_v9 = vmul.f32 1.442695, %v4245_v30  ;;  %v10935_v4 = vadd.f32 %v5913_v25, %v5912_v23  ;;  %v4607_v15 = vadd.f32 %v4606_v54, %v4605_v60 }
 0xa2c   : > { %v5868_v11 = vadd.f32 %v5867_v1, %v5866_v8  ;;  %v4712_v28 = vadd.f32 %v4711_v31, %v4710_v52  ;;  %v4792_v39 = vadd.f32 %v4791_v44, %v4790_v45  ;;  %v4621_v37 = vadd.f32 %v4620_v46, %v4619_v51  ;;  %v12024_v1 = vld [vmem:[#allocation33_spill] sm:$0xff] }
 0xa2d   : > { %v5580_v5 = vmul.f32 %v5440_v43, %v4940_v59  ;;  %v10938_v49 = vmul.f32 %v10803_v34, %v3569_v56  ;;  %v4170_v24 = vmax.f32 %v4168_v19, %v4169_v40  ;;  %v5990_v8 = vrot.slane %v5989_v20, 1  ;;  %v3320_v56 = vpop.xlane.xlu1 %3319 }
 0xa2e   : > { %7487 = vrcp.f32 %v4712_v28  ;;  %v4793_v7 = vrot.slane %v4792_v39, 2  ;;  %v3572_v30 = vmul.f32 %v7482_v58, %v12024_v1  ;;  %v5869_v12 = vrot.slane %v5868_v11, 2  ;;  %v12026_v28 = vld [vmem:[#allocation22_spill] sm:$0xff] }
 0xa2f   : > { %v5950_v26 = vsel %vm1264_vm2, %v5580_v5, 0.0  ;;  %7489 = vpow2.f32 %v4369_v9  ;;  %v4246_v23 = vsub.f32 %v10891_v61, %v4170_v24  ;;  %v7486_v60 = vpop.eup %7485  ;;  %v4171_v51 = vsel %vm1264_vm2, %v10933_v17, -inf }
 0xa30   : > { %7491 = vrcp.f32 %v4607_v15  ;;  %v5951_v25 = vrot.slane %v5950_v26, 4  ;;  %v4794_v54 = vadd.f32 %v4793_v7, %v4792_v39  ;;  %v4172_v52 = vrot.slane %v4171_v51, 4 }
 0xa31   : > { %7493 = vrcp.f32 %v4621_v37  ;;  %v4371_v19 = vmul.f32 1.442695, %v4246_v23  ;;  %v3385_v40 = vmul.f32 0.0625, %v10844_v29  ;;  %v10946_v58 = vadd.f32 %v5990_v8, %v5989_v20 }
 0xa32   : > { %v4795_v46 = vrot.slane %v4794_v54, 1  ;;  %v3643_v5 = vmul.f32 %v10803_v34, %v3572_v30  ;;  %v3387_v61 = vmul.f32 0.0625, %v10854_v10  ;;  %v5870_v24 = vadd.f32 %v5869_v12, %v5868_v11  ;;  %v3323_v11 = vpop.xlane.xlu1 %3322 }
 0xa33   : > { %12025 = vst [vmem:[#allocation34_spill] sm:$0xff] %v10946_v58  ;;  %7495 = vpow2.f32 %v4371_v19  ;;  %v4173_v45 = vmax.f32 %v4171_v51, %v4172_v52  ;;  %v3449_v31 = vadd.f32 1e-05, %v3385_v40  ;;  %v5952_v44 = vadd.f32 %v5951_v25, %v5950_v26 }
 0xa34   : > { %v4796_v59 = vadd.f32 %v4795_v46, %v4794_v54  ;;  %v3451_v9 = vadd.f32 1e-05, %v3387_v61  ;;  %v3389_v15 = vmul.f32 0.0625, %v10864_v63  ;;  %v3392_v29 = vmul.f32 0.0625, %v10883_v38  ;;  %v5432_v63 = vpop.permute.xlu0 %5431 }
 0xa35   : > { %v4174_v43 = vrot.slane %v4173_v45, 2  ;;  %7497 = vrsqrt.f32 %v3449_v31  ;;  %v3391_v20 = vmul.f32 0.0625, %v10900_v2  ;;  %v3573_v39 = vmul.f32 %v7486_v60, %v12026_v28 }
 0xa36   : > { %7499 = vrcp.f32 %v4796_v59  ;;  %v3453_v37 = vadd.f32 1e-05, %v3389_v15  ;;  %v3394_v10 = vmul.f32 0.0625, %v10916_v3  ;;  %v3456_v7 = vadd.f32 1e-05, %v3392_v29  ;;  %v3338_v31 = vpop.xlane.xlu1 %3337 }
 0xa37   : > { %v4175_v8 = vmax.f32 %v4173_v45, %v4174_v43  ;;  %7501 = vrsqrt.f32 %v3451_v9  ;;  %v3455_v1 = vadd.f32 1e-05, %v3391_v20  ;;  %v5953_v12 = vrot.slane %v5952_v44, 2 }
 0xa38   : > { %v7488_v30 = vpop.eup %7487  ;;  %7503 = vrsqrt.f32 %v3453_v37  ;;  %v3458_v26 = vadd.f32 1e-05, %v3394_v10  ;;  %v3393_v23 = vmul.f32 0.0625, %v3311_v36  ;;  %v3396_v60 = vmul.f32 0.0625, %v3320_v56 }
 0xa39   : > { %v10955_v38 = vpop.eup %7489  ;;  %v4936_v2 = vmul.f32 %v7488_v30, %v10905_v62  ;;  %v4176_v25 = vrot.slane %v4175_v8, 1  ;;  %7505 = vrsqrt.f32 %v3456_v7  ;;  %v5871_v3 = vrot.slane %v5870_v24, 1 }
 0xa3a   : > { %v10958_v54 = vpop.eup %7491  ;;  %v4797_v51 = vsel %vm1264_vm2, %v10955_v38, 0.0  ;;  %7507 = vrsqrt.f32 %v3455_v1  ;;  %v3457_v19 = vadd.f32 1e-05, %v3393_v23  ;;  %v5954_v61 = vadd.f32 %v5953_v12, %v5952_v44 }
 0xa3b   : > { %v10962_v52 = vpop.eup %7493  ;;  %v5576_v40 = vmul.f32 %v5432_v63, %v4936_v2  ;;  %v4798_v46 = vrot.slane %v4797_v51, 4  ;;  %v4177_v36 = vmax.f32 %v4175_v8, %v4176_v25  ;;  %7509 = vrsqrt.f32 %v3458_v26 }
 0xa3c   : > { %7511 = vrsqrt.f32 %v3457_v19  ;;  %v3460_v62 = vadd.f32 1e-05, %v3396_v60  ;;  %v3397_v45 = vmul.f32 0.0625, %v3323_v11  ;;  %v10969_v43 = vadd.f32 %v10786_v6, %v3643_v5  ;;  %v12027_v19 = vld [vmem:[#allocation61_spill] sm:$0xff] }
 0xa3d   : > { %v10964_v56 = vpop.eup %7495  ;;  %v5922_v59 = vsel %vm1264_vm2, %v5576_v40, 0.0  ;;  %v4799_v9 = vadd.f32 %v4798_v46, %v4797_v51  ;;  %v4247_v15 = vsub.f32 %v10933_v17, %v4177_v36  ;;  %v3402_v8 = vmul.f32 0.0625, %v3338_v31  ;;  %v5456_v51 = vpop.permute.xlu0 %5455  ;;  %v12028_v31 = vld [vmem:[#allocation35_spill] sm:$0xff] }
 0xa3e   : > { %v5923_v29 = vrot.slane %v5922_v59, 4  ;;  %v4804_v20 = vsel %vm1264_vm2, %v10964_v56, 0.0  ;;  %7513 = vrsqrt.f32 %v3460_v62  ;;  %v3461_v44 = vadd.f32 1e-05, %v3397_v45 }
 0xa3f   : > { %v7498_v28 = vpop.eup %7497  ;;  %v4800_v37 = vrot.slane %v4799_v9, 2  ;;  %v4805_v10 = vrot.slane %v4804_v20, 4  ;;  %v4373_v11 = vmul.f32 1.442695, %v4247_v15  ;;  %v10973_v1 = vadd.f32 %v5871_v3, %v5870_v24 }
 0xa40   : > { %v7500_v7 = vpop.eup %7499  ;;  %v5924_v30 = vadd.f32 %v5923_v29, %v5922_v59  ;;  %v3644_v17 = vmul.f32 %v10803_v34, %v3573_v39  ;;  %v4024_v5 = vsel %vm1264_vm2, %v10969_v43, -inf  ;;  %v5955_v25 = vrot.slane %v5954_v61, 1 }
 0xa41   : > { %v7502_v12 = vpop.eup %7501  ;;  %v4948_v63 = vmul.f32 %v7500_v7, %v10920_v14  ;;  %v4801_v26 = vadd.f32 %v4800_v37, %v4799_v9  ;;  %v4806_v23 = vadd.f32 %v4805_v10, %v4804_v20  ;;  %7515 = vpow2.f32 %v4373_v11  ;;  %v12029_v14 = vld [vmem:[#allocation38_spill] sm:$0xff]  ;;  %v12030_v11 = vld [vmem:[#allocation67_spill] sm:$0xff] }
 0xa42   : > { %v7504_v2 = vpop.eup %7503  ;;  %v5925_v60 = vrot.slane %v5924_v30, 2  ;;  %v3577_v40 = vmul.f32 %v7498_v28, %v12027_v19  ;;  %7517 = vrsqrt.f32 %v3461_v44  ;;  %v3466_v36 = vadd.f32 1e-05, %v3402_v8 }
 0xa43   : > { %v7506_v24 = vpop.eup %7505  ;;  %v5588_v3 = vmul.f32 %v5456_v51, %v4948_v63  ;;  %v4802_v46 = vrot.slane %v4801_v26, 1  ;;  %v4807_v39 = vrot.slane %v4806_v23, 2  ;;  %v3579_v59 = vmul.f32 %v7502_v12, %v12028_v31  ;;  %v12031_v12 = vld [vmem:[#allocation62_spill] sm:$0xff] }
 0xa44   : > { %v7508_v62 = vpop.eup %7507  ;;  %v5926_v45 = vadd.f32 %v5925_v60, %v5924_v30  ;;  %v3581_v9 = vmul.f32 %v7504_v2, %v12029_v14  ;;  %v4025_v15 = vrot.slane %v4024_v5, 4  ;;  %v3584_v28 = vmul.f32 %v7506_v24, %v12030_v11  ;;  %v12032_v60 = vld [vmem:[#allocation44_spill] sm:$0xff]  ;;  %v12033_v24 = vld [vmem:[#allocation105_spill] sm:$0xff] }
 0xa45   : > { %v7510_v29 = vpop.eup %7509  ;;  %v6006_v20 = vsel %vm1264_vm2, %v5588_v3, 0.0  ;;  %v4803_v37 = vadd.f32 %v4802_v46, %v4801_v26  ;;  %v4808_v10 = vadd.f32 %v4807_v39, %v4806_v23  ;;  %v10984_v7 = vadd.f32 %v5955_v25, %v5954_v61  ;;  %v12034_v39 = vld [vmem:[#allocation66_spill] sm:$0xff] }
 0xa46   : > { %v7512_v44 = vpop.eup %7511  ;;  %v5927_v63 = vrot.slane %v5926_v45, 1  ;;  %v6007_v51 = vrot.slane %v6006_v20, 4  ;;  %v10987_v8 = vmul.f32 %v10803_v34, %v3577_v40  ;;  %v3583_v2 = vmul.f32 %v7508_v62, %v12031_v12 }
 0xa47   : > { %7519 = vrcp.f32 %v4803_v37  ;;  %v4809_v30 = vrot.slane %v4808_v10, 1  ;;  %v3586_v19 = vmul.f32 %v7510_v29, %v12032_v60  ;;  %v10992_v26 = vmul.f32 %v10803_v34, %v3579_v59  ;;  %v12037_v60 = vld [vmem:[#allocation65_spill] sm:$0xff] }
 0xa48   : > { %v7514_v31 = vpop.eup %7513  ;;  %v6008_v3 = vadd.f32 %v6007_v51, %v6006_v20  ;;  %7521 = vrsqrt.f32 %v3466_v36  ;;  %v4026_v23 = vmax.f32 %v4024_v5, %v4025_v15  ;;  %v10995_v25 = vmul.f32 %v10803_v34, %v3581_v9 }
 0xa49   : > { %v4810_v61 = vadd.f32 %v4809_v30, %v4808_v10  ;;  %v10998_v40 = vmul.f32 %v10803_v34, %v3584_v28  ;;  %v3585_v46 = vmul.f32 %v7512_v44, %v12033_v24  ;;  %v3588_v62 = vmul.f32 %v7514_v31, %v12034_v39 }
 0xa4a   : > { %v4027_v14 = vrot.slane %v4026_v23, 2  ;;  %v11004_v29 = vadd.f32 %v10786_v6, %v10820_v53  ;;  %v11007_v59 = vadd.f32 %v10786_v6, %v3644_v17  ;;  %v11011_v36 = vadd.f32 %v5927_v63, %v5926_v45 }
 0xa4b   : > { %v11009_v5 = vpop.eup %7515  ;;  %7523 = vrcp.f32 %v4810_v61  ;;  %v11014_v9 = vmul.f32 %v10803_v34, %v3583_v2  ;;  %v11017_v15 = vmul.f32 %v10803_v34, %v3586_v19  ;;  %v6009_v37 = vrot.slane %v6008_v3, 2 }
 0xa4c   : > { %12035 = vst [vmem:[#allocation93_spill] sm:$0xff] %v11011_v36  ;;  %v7518_v20 = vpop.eup %7517  ;;  %v4811_v53 = vsel %vm1264_vm2, %v11009_v5, 0.0  ;;  %v4028_v10 = vmax.f32 %v4026_v23, %v4027_v14  ;;  %v3947_v6 = vsel %vm1264_vm2, %v11004_v29, -inf  ;;  %v11024_v45 = vmul.f32 %v10803_v34, %v3585_v46  ;;  %v5458_v14 = vpop.permute.xlu0 %5457 }
 0xa4d   : > { %v4812_v17 = vrot.slane %v4811_v53, 4  ;;  %v3948_v11 = vrot.slane %v3947_v6, 4  ;;  %v12036_v28 = vrot.slane %v10729_v50, 1  ;;  %v11030_v63 = vmul.f32 %v10803_v34, %v3588_v62 }
 0xa4e   : > { %v4029_v51 = vrot.slane %v4028_v10, 1  ;;  %v4031_v30 = vsel %vm1264_vm2, %v11007_v59, -inf  ;;  %v4529_v12 = vrot.slane %v10721_v21, 1  ;;  %v11036_v19 = vmul.f32 %v7518_v20, %v12037_v60 }
 0xa4f   : > { %v4523_v44 = vadd.f32 %v12036_v28, %v10729_v50  ;;  %v4813_v2 = vadd.f32 %v4812_v17, %v4811_v53  ;;  %v3949_v31 = vmax.f32 %v3947_v6, %v3948_v11  ;;  %v4032_v23 = vrot.slane %v4031_v30, 4 }
 0xa50   : > { %v11038_v61 = vadd.f32 %v6009_v37, %v6008_v3  ;;  %v4030_v24 = vmax.f32 %v4028_v10, %v4029_v51  ;;  %v4530_v50 = vadd.f32 %v4529_v12, %v10721_v21  ;;  %v12038_v46 = vrot.slane %v10776_v33, 2 }
 0xa51   : > { %v7520_v62 = vpop.eup %7519  ;;  %v4814_v28 = vrot.slane %v4813_v2, 2  ;;  %v3950_v58 = vrot.slane %v3949_v31, 2  ;;  %v4033_v36 = vmax.f32 %v4031_v30, %v4032_v23  ;;  %7525 = vrcp.f32 %v4523_v44  ;;  %v5460_v23 = vpop.permute.xlu0 %5459 }
 0xa52   : > { %v4535_v39 = vadd.f32 %v12038_v46, %v10776_v33  ;;  %v7522_v53 = vpop.eup %7521  ;;  %v4949_v20 = vmul.f32 %v7520_v62, %v10955_v38  ;;  %v4226_v6 = vsub.f32 %v10969_v43, %v4030_v24  ;;  %7527 = vrcp.f32 %v4530_v50  ;;  %v12040_v46 = vld [vmem:[#allocation122_spill] sm:$0xff] }
 0xa53   : > { %v4815_v37 = vadd.f32 %v4814_v28, %v4813_v2  ;;  %v3951_v10 = vmax.f32 %v3949_v31, %v3950_v58  ;;  %v4034_v21 = vrot.slane %v4033_v36, 2  ;;  %v4905_v17 = vmul.f32 %v10631_v47, %v10539_v48  ;;  %v12039_v31 = vld [vmem:[#allocation70_spill] sm:$0xff]  ;;  %v12042_v28 = vld [vmem:[#allocation17_spill] sm:$0xff] }
 0xa54   : > { %v4536_v3 = vrot.slane %v4535_v39, 1  ;;  %v5589_v33 = vmul.f32 %v5458_v14, %v4949_v20  ;;  %v4331_v11 = vmul.f32 1.442695, %v4226_v6  ;;  %v4906_v30 = vmul.f32 %v10452_v13, %v10347_v35  ;;  %v12043_v20 = vld [vmem:[#allocation126_spill] sm:$0xff] }
 0xa55   : > { %v7524_v44 = vpop.eup %7523  ;;  %v4816_v12 = vrot.slane %v4815_v37, 1  ;;  %v3952_v60 = vrot.slane %v3951_v10, 1  ;;  %v4035_v38 = vmax.f32 %v4033_v36, %v4034_v21  ;;  %v4907_v43 = vmul.f32 %v10766_v55, %v10687_v57 }
 0xa56   : > { %v4537_v51 = vadd.f32 %v4536_v3, %v4535_v39  ;;  %v6013_v2 = vsel %vm1264_vm2, %v5589_v33, 0.0  ;;  %v4950_v58 = vmul.f32 %v7524_v44, %v10964_v56  ;;  %7529 = vpow2.f32 %v4331_v11  ;;  %v12041_v39 = vld [vmem:[#allocation118_spill] sm:$0xff]  ;;  %v12044_v33 = vld [vmem:[#allocation124_spill] sm:$0xff] }
 0xa57   : > { %v4908_v48 = vmul.f32 %v10457_v42, %v12039_v31  ;;  %v6014_v47 = vrot.slane %v6013_v2, 4  ;;  %v4817_v24 = vadd.f32 %v4816_v12, %v4815_v37  ;;  %v3953_v50 = vmax.f32 %v3951_v10, %v3952_v60 }
 0xa58   : > { %v4036_v35 = vrot.slane %v4035_v38, 1  ;;  %v5590_v13 = vmul.f32 %v5460_v23, %v4950_v58  ;;  %7531 = vrcp.f32 %v4537_v51  ;;  %v5545_v36 = vmul.f32 %v12040_v46, %v4905_v17  ;;  %v12045_v23 = vld [vmem:[#allocation128_spill] sm:$0xff] }
 0xa59   : > { %v5546_v62 = vmul.f32 %v12041_v39, %v4906_v30  ;;  %v6015_v57 = vadd.f32 %v6014_v47, %v6013_v2  ;;  %7533 = vrcp.f32 %v4817_v24  ;;  %v4215_v55 = vsub.f32 %v11004_v29, %v3953_v50 }
 0xa5a   : > { %v4037_v56 = vmax.f32 %v4035_v38, %v4036_v35  ;;  %v6020_v14 = vsel %vm1264_vm2, %v5590_v13, 0.0  ;;  %v3594_v42 = vmul.f32 %v7522_v53, %v12042_v28  ;;  %v5547_v6 = vmul.f32 %v12043_v20, %v4907_v43  ;;  %v12046_v20 = vld [vmem:[#allocation127_spill] sm:$0xff] }
 0xa5b   : > { %v5705_v3 = vsel %vm1264_vm2, %v5545_v36, 0.0  ;;  %v7526_v37 = vpop.eup %7525  ;;  %v6016_v10 = vrot.slane %v6015_v57, 2  ;;  %v4309_v21 = vmul.f32 1.442695, %v4215_v55  ;;  %v5548_v11 = vmul.f32 %v12044_v33, %v4908_v48  ;;  %v5462_v33 = vpop.permute.xlu0 %5461 }
 0xa5c   : > { %v4227_v17 = vsub.f32 %v11007_v59, %v4037_v56  ;;  %v7528_v51 = vpop.eup %7527  ;;  %v4909_v30 = vmul.f32 %v7526_v37, %v10706_v27  ;;  %v5706_v29 = vrot.slane %v5705_v3, 4  ;;  %v5712_v44 = vsel %vm1264_vm2, %v5546_v62, 0.0 }
 0xa5d   : > { %v5719_v12 = vsel %vm1264_vm2, %v5547_v6, 0.0  ;;  %v6017_v53 = vadd.f32 %v6016_v10, %v6015_v57  ;;  %v6021_v60 = vrot.slane %v6020_v14, 4  ;;  %7535 = vpow2.f32 %v4309_v21 }
 0xa5e   : > { %v4333_v38 = vmul.f32 1.442695, %v4227_v17  ;;  %v6011_v43 = vrot.slane %v11038_v61, 1  ;;  %v11071_v2 = vmul.f32 %v10803_v34, %v11036_v19  ;;  %v5707_v59 = vadd.f32 %v5706_v29, %v5705_v3 }
 0xa5f   : > { %v5713_v58 = vrot.slane %v5712_v44, 4  ;;  %v11074_v31 = vmul.f32 %v10803_v34, %v3594_v42  ;;  %v4910_v27 = vmul.f32 %v7528_v51, %v10696_v32  ;;  %v5720_v48 = vrot.slane %v5719_v12, 4 }
 0xa60   : > { %7537 = vpow2.f32 %v4333_v38  ;;  %v11077_v47 = vpop.eup %7529  ;;  %v5549_v24 = vmul.f32 %v12045_v23, %v4909_v30  ;;  %v5708_v50 = vrot.slane %v5707_v59, 2  ;;  %v5726_v13 = vsel %vm1264_vm2, %v5548_v11, 0.0 }
 0xa61   : > { %v5714_v35 = vadd.f32 %v5713_v58, %v5712_v44  ;;  %v6018_v46 = vrot.slane %v6017_v53, 1  ;;  %v6022_v19 = vadd.f32 %v6021_v60, %v6020_v14  ;;  %v4664_v36 = vsel %vm1264_vm2, %v11077_v47, 0.0 }
 0xa62   : > { %v5721_v39 = vadd.f32 %v5720_v48, %v5719_v12  ;;  %v7532_v34 = vpop.eup %7531  ;;  %v4665_v62 = vrot.slane %v4664_v36, 4  ;;  %v5709_v57 = vadd.f32 %v5708_v50, %v5707_v59  ;;  %v5727_v32 = vrot.slane %v5726_v13, 4  ;;  %v12047_v48 = vld [vmem:[#allocation52_spill] sm:$0xff] }
 0xa63   : > { %v5715_v55 = vrot.slane %v5714_v35, 2  ;;  %v7534_v56 = vpop.eup %7533  ;;  %v11084_v28 = vadd.f32 %v6011_v43, %v11038_v61  ;;  %v4911_v42 = vmul.f32 %v7532_v34, %v10715_v41  ;;  %v5550_v6 = vmul.f32 %v12046_v20, %v4910_v27 }
 0xa64   : > { %v5722_v3 = vrot.slane %v5721_v39, 2  ;;  %v4951_v14 = vmul.f32 %v7534_v56, %v11009_v5  ;;  %v4666_v37 = vadd.f32 %v4665_v62, %v4664_v36  ;;  %v5733_v21 = vsel %vm1264_vm2, %v5549_v24, 0.0 }
 0xa65   : > { %v5716_v10 = vadd.f32 %v5715_v55, %v5714_v35  ;;  %v6023_v17 = vrot.slane %v6022_v19, 2  ;;  %v5710_v11 = vrot.slane %v5709_v57, 1  ;;  %v5728_v30 = vadd.f32 %v5727_v32, %v5726_v13 }
 0xa66   : > { %v5723_v51 = vadd.f32 %v5722_v3, %v5721_v39  ;;  %v11090_v29 = vadd.f32 %v6018_v46, %v6017_v53  ;;  %v5591_v61 = vmul.f32 %v5462_v33, %v4951_v14  ;;  %v4667_v44 = vrot.slane %v4666_v37, 2 }
 0xa67   : > { %v5717_v12 = vrot.slane %v5716_v10, 1  ;;  %v11092_v41 = vpop.eup %7535  ;;  %v5729_v38 = vrot.slane %v5728_v30, 2  ;;  %v5734_v43 = vrot.slane %v5733_v21, 4  ;;  %v5740_v5 = vsel %vm1264_vm2, %v5550_v6, 0.0 }
 0xa68   : > { %v5724_v60 = vrot.slane %v5723_v51, 1  ;;  %v6027_v59 = vsel %vm1264_vm2, %v5591_v61, 0.0  ;;  %v4668_v58 = vadd.f32 %v4667_v44, %v4666_v37  ;;  %v4587_v27 = vsel %vm1264_vm2, %v11092_v41, 0.0 }
 0xa69   : > { %v5551_v23 = vmul.f32 %v12047_v48, %v4911_v42  ;;  %v6028_v24 = vrot.slane %v6027_v59, 4  ;;  %v4588_v50 = vrot.slane %v4587_v27, 4  ;;  %v5711_v35 = vadd.f32 %v5710_v11, %v5709_v57 }
 0xa6a   : > { %v11099_v53 = vpop.eup %7537  ;;  %v5730_v13 = vadd.f32 %v5729_v38, %v5728_v30  ;;  %v4669_v46 = vrot.slane %v4668_v58, 1  ;;  %v5735_v39 = vadd.f32 %v5734_v43, %v5733_v21  ;;  %v5741_v34 = vrot.slane %v5740_v5, 4 }
 0xa6b   : > { %v4671_v36 = vsel %vm1264_vm2, %v11099_v53, 0.0  ;;  %v4589_v62 = vadd.f32 %v4588_v50, %v4587_v27  ;;  %v5718_v32 = vadd.f32 %v5717_v12, %v5716_v10  ;;  %v5725_v56 = vadd.f32 %v5724_v60, %v5723_v51 }
 0xa6c   : > { %v4672_v55 = vrot.slane %v4671_v36, 4  ;;  %v4670_v20 = vadd.f32 %v4669_v46, %v4668_v58  ;;  %v5736_v6 = vrot.slane %v5735_v39, 2  ;;  %v5742_v3 = vadd.f32 %v5741_v34, %v5740_v5 }
 0xa6d   : > { %v5747_v42 = vsel %vm1264_vm2, %v5551_v23, 0.0  ;;  %v11104_v14 = vadd.f32 %v6028_v24, %v6027_v59  ;;  %v4590_v37 = vrot.slane %v4589_v62, 2  ;;  %v5731_v33 = vrot.slane %v5730_v13, 1 }
 0xa6e   : > { %v4673_v57 = vadd.f32 %v4672_v55, %v4671_v36  ;;  %7539 = vrcp.f32 %v4670_v20  ;;  %v5737_v11 = vadd.f32 %v5736_v6, %v5735_v39  ;;  %v5743_v30 = vrot.slane %v5742_v3, 2 }
 0xa6f   : > { %v5748_v61 = vrot.slane %v5747_v42, 4  ;;  %v11106_v21 = vadd.f32 %v6023_v17, %v6022_v19  ;;  %v4591_v44 = vadd.f32 %v4590_v37, %v4589_v62  ;;  %v6135_v10 = vsel %vm6114_vm3, %v5718_v32, %v5711_v35  ;;  %v11114_v19 = vld [vmem:[%s11538_s8] ss:$0 sm:$0xff] }
 0xa70   : > { %v4674_v38 = vrot.slane %v4673_v57, 2  ;;  %v5738_v51 = vrot.slane %v5737_v11, 1  ;;  %v5744_v12 = vadd.f32 %v5743_v30, %v5742_v3  ;;  %v6136_v43 = vsel %vm6116_vm4, %v5725_v56, %v6135_v10  ;;  %v5420_v3 = vpop.permute.xlu1 %5419  ;;  %v12048_v37 = vld [vmem:[#allocation78_spill] sm:$0xff] }
 0xa71   : > { %v5749_v60 = vadd.f32 %v5748_v61, %v5747_v42  ;;  %v6030_v5 = vrot.slane %v11104_v14, 2  ;;  %v4592_v59 = vrot.slane %v4591_v44, 1  ;;  %v5732_v27 = vadd.f32 %v5731_v33, %v5730_v13 }
 0xa72   : > { %v4675_v58 = vadd.f32 %v4674_v38, %v4673_v57  ;;  %v5739_v48 = vadd.f32 %v5738_v51, %v5737_v11  ;;  %v5745_v23 = vrot.slane %v5744_v12, 1  ;;  %v11118_v17 = vadd.f32 %v11114_v19, %v10928_v0  ;;  %v12050_v11 = vld [vmem:[#allocation30_spill] sm:$0xff]  ;;  %v12051_v51 = vld [vmem:[#allocation72_spill] sm:$0xff] }
 0xa73   : > { %v5750_v24 = vrot.slane %v5749_v60, 2  ;;  %v4593_v50 = vadd.f32 %v4592_v59, %v4591_v44  ;;  %v6137_v46 = vsel %vm6118_vm5, %v5732_v27, %v6136_v43  ;;  %v11123_v36 = vadd.f32 %v11114_v19, %v10876_v16 }
 0xa74   : > { %v4676_v35 = vrot.slane %v4675_v58, 1  ;;  %v5746_v13 = vadd.f32 %v5745_v23, %v5744_v12  ;;  %v6138_v34 = vsel %vm6120_vm6, %v5739_v48, %v6137_v46  ;;  %v3989_v62 = vsel %vm1264_vm2, %v11118_v17, -inf  ;;  %v12052_v12 = vld [vmem:[#allocation120_spill] sm:$0xff]  ;;  %v12053_v23 = vld [vmem:[#allocation87_spill] sm:$0xff] }
 0xa75   : > { %v5751_v39 = vadd.f32 %v5750_v24, %v5749_v60  ;;  %7541 = vrcp.f32 %v4593_v50  ;;  %v3990_v32 = vrot.slane %v3989_v62, 4  ;;  %v3996_v0 = vsel %vm1264_vm2, %v11123_v36, -inf }
 0xa76   : > { %v4677_v55 = vadd.f32 %v4676_v35, %v4675_v58  ;;  %v6139_v20 = vsel %vm6122_vm7, %v5746_v13, %v6138_v34  ;;  %v3997_v6 = vrot.slane %v3996_v0, 4  ;;  %v11133_v16 = vadd.f32 %v11114_v19, %v10992_v26  ;;  %v12054_v35 = vld [vmem:[#allocation115_spill] sm:$0xff]  ;;  %v12055_v34 = vld [vmem:[#allocation24_spill] sm:$0xff] }
 0xa77   : > { %v5752_v56 = vrot.slane %v5751_v39, 1  ;;  %v3991_v42 = vmax.f32 %v3989_v62, %v3990_v32  ;;  %v12049_v57 = vrot.slane %v12048_v37, 1  ;;  %v4585_v30 = vrot.slane %v12050_v11, 1  ;;  %v12057_v32 = vld [vmem:[#allocation81_spill] sm:$0xff] }
 0xa78   : > { %7543 = vrcp.f32 %v4677_v55  ;;  %v7540_v61 = vpop.eup %7539  ;;  %v3998_v38 = vmax.f32 %v3996_v0, %v3997_v6  ;;  %v4073_v10 = vsel %vm1264_vm2, %v11133_v16, -inf  ;;  %v4913_v60 = vmul.f32 %v12052_v12, %v12051_v51  ;;  %v12056_v55 = vld [vmem:[#allocation107_spill] sm:$0xff] }
 0xa79   : > { %v4579_v33 = vadd.f32 %v12049_v57, %v12048_v37  ;;  %v5753_v44 = vadd.f32 %v5752_v56, %v5751_v39  ;;  %v4930_v26 = vmul.f32 %v7540_v61, %v11077_v47  ;;  %v3992_v43 = vrot.slane %v3991_v42, 2 }
 0xa7a   : > { %v4074_v59 = vrot.slane %v4073_v10, 4  ;;  %v4586_v58 = vadd.f32 %v4585_v30, %v12050_v11  ;;  %v3999_v48 = vrot.slane %v3998_v38, 2  ;;  %v4914_v24 = vmul.f32 %v10867_v18, %v12053_v23  ;;  %v12060_v30 = vld [vmem:[#allocation42_spill] sm:$0xff] }
 0xa7b   : > { %v6140_v27 = vsel %vm6124_vm8, %v5753_v44, %v6139_v20  ;;  %7545 = vrcp.f32 %v4579_v33  ;;  %v5570_v50 = vmul.f32 %v5420_v3, %v4930_v26  ;;  %v3993_v13 = vmax.f32 %v3991_v42, %v3992_v43  ;;  %v5398_v20 = vpop.permute.xlu1 %5397  ;;  %v12058_v3 = vld [vmem:[#allocation132_spill] sm:$0xff] }
 0xa7c   : > { %v6141_v46 = vsel %vm6126_vm9, %v12054_v35, %v6140_v27  ;;  %v4075_v39 = vmax.f32 %v4073_v10, %v4074_v59  ;;  %v4000_v47 = vmax.f32 %v3998_v38, %v3999_v48  ;;  %7547 = vrcp.f32 %v4586_v58  ;;  %v12059_v33 = vld [vmem:[#allocation28_spill] sm:$0xff] }
 0xa7d   : > { %7153 = vmatprep.mubr.msk.f32.mxu0 %vm1264_vm2, %v6141_v46  ;;  %v4915_v62 = vmul.f32 %v10918_v22, %v12055_v34  ;;  %v4916_v0 = vmul.f32 %v12057_v32, %v12056_v55  ;;  %v5880_v56 = vsel %vm1264_vm2, %v5570_v50, 0.0  ;;  %v3994_v18 = vrot.slane %v3993_v13, 1  ;;  %v12061_v22 = vld [vmem:[#allocation9_spill] sm:$0xff] }
 0xa7e   : > { %v4076_v6 = vrot.slane %v4075_v39, 2  ;;  %v5553_v37 = vmul.f32 %v12058_v3, %v4913_v60  ;;  %v5881_v57 = vrot.slane %v5880_v56, 4  ;;  %v4001_v42 = vrot.slane %v4000_v47, 1 }
 0xa7f   : > { %v5554_v11 = vmul.f32 %v12059_v33, %v4914_v24  ;;  %v5555_v61 = vmul.f32 %v12060_v30, %v4915_v62  ;;  %v7542_v44 = vpop.eup %7541  ;;  %v3995_v38 = vmax.f32 %v3993_v13, %v3994_v18  ;;  %v5556_v51 = vmul.f32 %v12061_v22, %v4916_v0  ;;  %v12063_v30 = vld [vmem:[#allocation20_spill] sm:$0xff] }
 0xa80   : > { %v4077_v10 = vmax.f32 %v4075_v39, %v4076_v6  ;;  %v5761_v12 = vsel %vm1264_vm2, %v5553_v37, 0.0  ;;  %v5882_v26 = vadd.f32 %v5881_v57, %v5880_v56  ;;  %v4919_v43 = vmul.f32 %v7542_v44, %v11092_v41  ;;  %v5422_v39 = vpop.permute.xlu1 %5421 }
 0xa81   : > { %v4002_v59 = vmax.f32 %v4000_v47, %v4001_v42  ;;  %v5762_v58 = vrot.slane %v5761_v12, 4  ;;  %v4221_v60 = vsub.f32 %v11118_v17, %v3995_v38  ;;  %v5768_v23 = vsel %vm1264_vm2, %v5554_v11, 0.0  ;;  %v12064_v38 = vld [vmem:[#allocation18_spill] sm:$0xff] }
 0xa82   : > { %v7544_v27 = vpop.eup %7543  ;;  %v4078_v48 = vrot.slane %v4077_v10, 1  ;;  %v5775_v24 = vsel %vm1264_vm2, %v5555_v61, 0.0  ;;  %v5883_v50 = vrot.slane %v5882_v26, 2  ;;  %v5559_v35 = vmul.f32 %v5398_v20, %v4919_v43  ;;  %v12062_v20 = vld [vmem:[#allocation75_spill] sm:$0xff] }
 0xa83   : > { %v4931_v46 = vmul.f32 %v7544_v27, %v11099_v53  ;;  %v4222_v13 = vsub.f32 %v11123_v36, %v4002_v59  ;;  %v4321_v34 = vmul.f32 1.442695, %v4221_v60  ;;  %v5763_v41 = vadd.f32 %v5762_v58, %v5761_v12  ;;  %v12065_v43 = vld [vmem:[#allocation31_spill] sm:$0xff] }
 0xa84   : > { %v4079_v62 = vmax.f32 %v4077_v10, %v4078_v48  ;;  %v5769_v47 = vrot.slane %v5768_v23, 4  ;;  %v5884_v32 = vadd.f32 %v5883_v50, %v5882_v26  ;;  %v5803_v17 = vsel %vm1264_vm2, %v5559_v35, 0.0  ;;  %v12066_v58 = vld [vmem:[#allocation123_spill] sm:$0xff] }
 0xa85   : > { %v7546_v55 = vpop.eup %7545  ;;  %v5571_v0 = vmul.f32 %v5422_v39, %v4931_v46  ;;  %v4323_v56 = vmul.f32 1.442695, %v4222_v13  ;;  %v5804_v18 = vrot.slane %v5803_v17, 4  ;;  %7549 = vpow2.f32 %v4321_v34 }
 0xa86   : > { %v4233_v6 = vsub.f32 %v11133_v16, %v4079_v62  ;;  %v4917_v3 = vmul.f32 %v7546_v55, %v12062_v20  ;;  %v7548_v53 = vpop.eup %7547  ;;  %v5885_v37 = vrot.slane %v5884_v32, 1  ;;  %v5764_v57 = vrot.slane %v5763_v41, 2 }
 0xa87   : > { %v5887_v36 = vsel %vm1264_vm2, %v5571_v0, 0.0  ;;  %7551 = vpow2.f32 %v4323_v56  ;;  %v5805_v42 = vadd.f32 %v5804_v18, %v5803_v17  ;;  %v4918_v61 = vmul.f32 %v7548_v53, %v12063_v30 }
 0xa88   : > { %v5888_v33 = vrot.slane %v5887_v36, 4  ;;  %v4345_v11 = vmul.f32 1.442695, %v4233_v6  ;;  %v5886_v44 = vadd.f32 %v5885_v37, %v5884_v32  ;;  %v5557_v10 = vmul.f32 %v12064_v38, %v4917_v3 }
 0xa89   : > { %v5765_v22 = vadd.f32 %v5764_v57, %v5763_v41  ;;  %v5770_v12 = vadd.f32 %v5769_v47, %v5768_v23  ;;  %v5806_v26 = vrot.slane %v5805_v42, 2  ;;  %v5558_v59 = vmul.f32 %v12065_v43, %v4918_v61 }
 0xa8a   : > { %v5889_v16 = vadd.f32 %v5888_v33, %v5887_v36  ;;  %7553 = vpow2.f32 %v4345_v11  ;;  %v6156_v27 = vsel %vm6114_vm3, %v5886_v44, %v12066_v58  ;;  %v5776_v50 = vrot.slane %v5775_v24, 4 }
 0xa8b   : > { %v5766_v60 = vrot.slane %v5765_v22, 1  ;;  %v5771_v48 = vrot.slane %v5770_v12, 2  ;;  %v5807_v35 = vadd.f32 %v5806_v26, %v5805_v42  ;;  %v5782_v13 = vsel %vm1264_vm2, %v5556_v51, 0.0 }
 0xa8c   : > { %v5890_v46 = vrot.slane %v5889_v16, 2  ;;  %v5789_v39 = vsel %vm1264_vm2, %v5557_v10, 0.0  ;;  %v5777_v23 = vadd.f32 %v5776_v50, %v5775_v24  ;;  %v5783_v41 = vrot.slane %v5782_v13, 4 }
 0xa8d   : > { %v5767_v34 = vadd.f32 %v5766_v60, %v5765_v22  ;;  %v5772_v62 = vadd.f32 %v5771_v48, %v5770_v12  ;;  %v5808_v47 = vrot.slane %v5807_v35, 1  ;;  %v5790_v32 = vrot.slane %v5789_v39, 4 }
 0xa8e   : > { %v5891_v55 = vadd.f32 %v5890_v46, %v5889_v16  ;;  %v5796_v17 = vsel %vm1264_vm2, %v5558_v59, 0.0  ;;  %v5778_v56 = vrot.slane %v5777_v23, 2  ;;  %v5784_v18 = vadd.f32 %v5783_v41, %v5782_v13 }
 0xa8f   : > { %v5773_v0 = vrot.slane %v5772_v62, 1  ;;  %v5797_v6 = vrot.slane %v5796_v17, 4  ;;  %v11179_v20 = vpop.eup %7549  ;;  %v11181_v3 = vadd.f32 %v5808_v47, %v5807_v35  ;;  %v5791_v53 = vadd.f32 %v5790_v32, %v5789_v39 }
 0xa90   : > { %v5892_v51 = vrot.slane %v5891_v55, 1  ;;  %v11185_v37 = vadd.f32 %v11114_v19, %v10938_v49  ;;  %v4629_v36 = vsel %vm1264_vm2, %v11179_v20, 0.0  ;;  %v5779_v42 = vadd.f32 %v5778_v56, %v5777_v23 }
 0xa91   : > { %v11187_v24 = vpop.eup %7551  ;;  %v5774_v57 = vadd.f32 %v5773_v0, %v5772_v62  ;;  %v5785_v33 = vrot.slane %v5784_v18, 2  ;;  %v4630_v30 = vrot.slane %v4629_v36, 4  ;;  %v5792_v44 = vrot.slane %v5791_v53, 2  ;;  %v11201_v62 = vpop.f32.mrb[64].mxu0 }
 0xa92   : > { %v5893_v11 = vadd.f32 %v5892_v51, %v5891_v55  ;;  %v4636_v61 = vsel %vm1264_vm2, %v11187_v24, 0.0  ;;  %v5780_v10 = vrot.slane %v5779_v42, 1  ;;  %v5798_v12 = vadd.f32 %v5797_v6, %v5796_v17 }
 0xa93   : > { %v4637_v38 = vrot.slane %v4636_v61, 4  ;;  %v5786_v22 = vadd.f32 %v5785_v33, %v5784_v18  ;;  %v4631_v16 = vadd.f32 %v4630_v30, %v4629_v36  ;;  %v5793_v43 = vadd.f32 %v5792_v44, %v5791_v53 }
 0xa94   : > { %v11193_v49 = vpop.eup %7553  ;;  %v11196_v26 = vsel %vm6116_vm4, %v5893_v11, %v6156_v27  ;;  %v6142_v59 = vsel %vm6114_vm3, %v5774_v57, %v5767_v34  ;;  %v5781_v48 = vadd.f32 %v5780_v10, %v5779_v42  ;;  %v5799_v39 = vrot.slane %v5798_v12, 2  ;;  %v11206_v34 = vpop.f32.mrb[65].mxu0 }
 0xa95   : > { %v4638_v58 = vadd.f32 %v4637_v38, %v4636_v61  ;;  %v4713_v60 = vsel %vm1264_vm2, %v11193_v49, 0.0  ;;  %v5787_v50 = vrot.slane %v5786_v22, 1  ;;  %v4632_v35 = vrot.slane %v4631_v16, 2 }
 0xa96   : > { %v4714_v46 = vrot.slane %v4713_v60, 4  ;;  %v5794_v13 = vrot.slane %v5793_v43, 1  ;;  %v6143_v27 = vsel %vm6116_vm4, %v5781_v48, %v6142_v59  ;;  %v4003_v47 = vsel %vm1264_vm2, %v11185_v37, -inf }
 0xa97   : > { %v4639_v23 = vrot.slane %v4638_v58, 2  ;;  %v5788_v41 = vadd.f32 %v5787_v50, %v5786_v22  ;;  %v4633_v55 = vadd.f32 %v4632_v35, %v4631_v16  ;;  %v5800_v0 = vadd.f32 %v5799_v39, %v5798_v12 }
 0xa98   : > { %v4715_v32 = vadd.f32 %v4714_v46, %v4713_v60  ;;  %v5795_v17 = vadd.f32 %v5794_v13, %v5793_v43  ;;  %v4004_v6 = vrot.slane %v4003_v47, 4  ;;  %v11211_v51 = vadd.f32 %v11114_v19, %v10995_v25  ;;  %v12067_v46 = vld [vmem:[#allocation2_spill] sm:$0xff] }
 0xa99   : > { %v4640_v56 = vadd.f32 %v4639_v23, %v4638_v58  ;;  %v6144_v18 = vsel %vm6118_vm5, %v5788_v41, %v6143_v27  ;;  %v4634_v53 = vrot.slane %v4633_v55, 1  ;;  %v5801_v57 = vrot.slane %v5800_v0, 1 }
 0xa9a   : > { %v4716_v36 = vrot.slane %v4715_v32, 2  ;;  %v6145_v42 = vsel %vm6120_vm6, %v5795_v17, %v6144_v18  ;;  %v4005_v11 = vmax.f32 %v4003_v47, %v4004_v6  ;;  %v4087_v30 = vsel %vm1264_vm2, %v11211_v51, -inf }
 0xa9b   : > { %v4641_v33 = vrot.slane %v4640_v56, 1  ;;  %v11218_v61 = vadd.f32 %v11114_v19, %v11030_v63  ;;  %v4635_v44 = vadd.f32 %v4634_v53, %v4633_v55  ;;  %v5802_v10 = vadd.f32 %v5801_v57, %v5800_v0  ;;  %v12069_v0 = vld [vmem:[#allocation68_spill] sm:$0xff] }
 0xa9c   : > { %v4717_v38 = vadd.f32 %v4716_v36, %v4715_v32  ;;  %v4088_v22 = vrot.slane %v4087_v30, 4  ;;  %v4006_v12 = vrot.slane %v4005_v11, 2  ;;  %v11224_v43 = vadd.f32 %v11114_v19, %v10987_v8  ;;  %v12068_v32 = vld [vmem:[#allocation27_spill] sm:$0xff] }
 0xa9d   : > { %v4642_v25 = vadd.f32 %v4641_v33, %v4640_v56  ;;  %v4136_v16 = vsel %vm1264_vm2, %v11218_v61, -inf  ;;  %7555 = vrcp.f32 %v4635_v44  ;;  %v6146_v58 = vsel %vm6122_vm7, %v5802_v10, %v6145_v42  ;;  %v12070_v56 = vld [vmem:[#allocation121_spill] sm:$0xff] }
 0xa9e   : > { %v4718_v59 = vrot.slane %v4717_v38, 1  ;;  %v4089_v60 = vmax.f32 %v4087_v30, %v4088_v22  ;;  %v6147_v63 = vsel %vm6124_vm8, %v11181_v3, %v6146_v58  ;;  %v4007_v48 = vmax.f32 %v4005_v11, %v4006_v12  ;;  %v5410_v3 = vpop.permute.xlu1 %5409  ;;  %v12071_v11 = vld [vmem:[#allocation32_spill] sm:$0xff]  ;;  %v12072_v30 = vld [vmem:[#allocation47_spill] sm:$0xff]  ;;  %v12073_v22 = vld [vmem:[#allocation102_spill] sm:$0xff] }
 0xa9f   : > { %7557 = vrcp.f32 %v4642_v25  ;;  %v4137_v50 = vrot.slane %v4136_v16, 4  ;;  %v6148_v13 = vsel %vm6126_vm9, %v12067_v46, %v6147_v63  ;;  %v4059_v8 = vsel %vm1264_vm2, %v11224_v43, -inf }
 0xaa0   : > { %v4719_v35 = vadd.f32 %v4718_v59, %v4717_v38  ;;  %v4090_v39 = vrot.slane %v4089_v60, 2  ;;  %7154 = vmatmul.mubr.msk.f32.gmra.mrb[66].mxu0 %vm1264_vm2, %v6148_v13  ;;  %v4008_v23 = vrot.slane %v4007_v48, 1  ;;  %v4060_v27 = vrot.slane %v4059_v8, 4  ;;  %v12074_v59 = vld [vmem:[#allocation84_spill] sm:$0xff] }
 0xaa1   : > { %v4138_v41 = vmax.f32 %v4136_v16, %v4137_v50  ;;  %v11236_v47 = vadd.f32 %v11114_v19, %v11071_v2  ;;  %v4921_v17 = vmul.f32 %v10958_v54, %v12068_v32  ;;  %v4922_v18 = vmul.f32 %v12070_v56, %v12069_v0 }
 0xaa2   : > { %7559 = vrcp.f32 %v4719_v35  ;;  %v4091_v55 = vmax.f32 %v4089_v60, %v4090_v39  ;;  %v4009_v6 = vmax.f32 %v4007_v48, %v4008_v23  ;;  %v4061_v36 = vmax.f32 %v4059_v8, %v4060_v27 }
 0xaa3   : > { %v4139_v53 = vrot.slane %v4138_v41, 2  ;;  %v4143_v57 = vsel %vm1264_vm2, %v11236_v47, -inf  ;;  %v4923_v2 = vmul.f32 %v10962_v52, %v12071_v11  ;;  %v5561_v44 = vmul.f32 %v12072_v30, %v4921_v17  ;;  %v5412_v52 = vpop.permute.xlu1 %5411 }
 0xaa4   : > { %v4092_v42 = vrot.slane %v4091_v55, 1  ;;  %v4144_v33 = vrot.slane %v4143_v57, 4  ;;  %v4223_v38 = vsub.f32 %v11185_v37, %v4009_v6  ;;  %v4062_v54 = vrot.slane %v4061_v36, 2 }
 0xaa5   : > { %v4140_v10 = vmax.f32 %v4138_v41, %v4139_v53  ;;  %v5562_v25 = vmul.f32 %v12073_v22, %v4922_v18  ;;  %v5563_v58 = vmul.f32 %v12074_v59, %v4923_v2  ;;  %v5817_v60 = vsel %vm1264_vm2, %v5561_v44, 0.0 }
 0xaa6   : > { %v4093_v12 = vmax.f32 %v4091_v55, %v4092_v42  ;;  %v4145_v16 = vmax.f32 %v4143_v57, %v4144_v33  ;;  %v4325_v63 = vmul.f32 1.442695, %v4223_v38  ;;  %v4063_v50 = vmax.f32 %v4061_v36, %v4062_v54 }
 0xaa7   : > { %v4141_v48 = vrot.slane %v4140_v10, 1  ;;  %v5818_v35 = vrot.slane %v5817_v60, 4  ;;  %v7556_v46 = vpop.eup %7555  ;;  %v5824_v37 = vsel %vm1264_vm2, %v5562_v25, 0.0  ;;  %v5831_v8 = vsel %vm1264_vm2, %v5563_v58, 0.0 }
 0xaa8   : > { %v4235_v13 = vsub.f32 %v11211_v51, %v4093_v12  ;;  %v4146_v39 = vrot.slane %v4145_v16, 2  ;;  %v4925_v41 = vmul.f32 %v7556_v46, %v11179_v20  ;;  %7561 = vpow2.f32 %v4325_v63 }
 0xaa9   : > { %v7558_v23 = vpop.eup %7557  ;;  %v4142_v27 = vmax.f32 %v4140_v10, %v4141_v48  ;;  %v4064_v55 = vrot.slane %v4063_v50, 1  ;;  %v5819_v56 = vadd.f32 %v5818_v35, %v5817_v60  ;;  %v5825_v53 = vrot.slane %v5824_v37, 4 }
 0xaaa   : > { %v4926_v32 = vmul.f32 %v7558_v23, %v11187_v24  ;;  %v4349_v17 = vmul.f32 1.442695, %v4235_v13  ;;  %v4147_v0 = vmax.f32 %v4145_v16, %v4146_v39  ;;  %v5565_v18 = vmul.f32 %v5410_v3, %v4925_v41  ;;  %v5434_v3 = vpop.permute.xlu1 %5433 }
 0xaab   : > { %v4242_v6 = vsub.f32 %v11218_v61, %v4142_v27  ;;  %v4065_v51 = vmax.f32 %v4063_v50, %v4064_v55  ;;  %v5820_v33 = vrot.slane %v5819_v56, 2  ;;  %v5826_v59 = vadd.f32 %v5825_v53, %v5824_v37 }
 0xaac   : > { %v7560_v36 = vpop.eup %7559  ;;  %v5566_v57 = vmul.f32 %v5412_v52, %v4926_v32  ;;  %7563 = vpow2.f32 %v4349_v17  ;;  %v4148_v42 = vrot.slane %v4147_v0, 1  ;;  %v5845_v20 = vsel %vm1264_vm2, %v5565_v18, 0.0 }
 0xaad   : > { %v4937_v11 = vmul.f32 %v7560_v36, %v11193_v49  ;;  %v4363_v2 = vmul.f32 1.442695, %v4242_v6  ;;  %v4231_v24 = vsub.f32 %v11224_v43, %v4065_v51  ;;  %v5846_v30 = vrot.slane %v5845_v20, 4 }
 0xaae   : > { %v5852_v44 = vsel %vm1264_vm2, %v5566_v57, 0.0  ;;  %v4149_v38 = vmax.f32 %v4147_v0, %v4148_v42  ;;  %v5821_v61 = vadd.f32 %v5820_v33, %v5819_v56  ;;  %v5832_v43 = vrot.slane %v5831_v8, 4 }
 0xaaf   : > { %v5853_v10 = vrot.slane %v5852_v44, 4  ;;  %v5577_v54 = vmul.f32 %v5434_v3, %v4937_v11  ;;  %7565 = vpow2.f32 %v4363_v2  ;;  %v4341_v22 = vmul.f32 1.442695, %v4231_v24 }
 0xab0   : > { %v5847_v25 = vadd.f32 %v5846_v30, %v5845_v20  ;;  %v4243_v12 = vsub.f32 %v11236_v47, %v4149_v38  ;;  %v5822_v16 = vrot.slane %v5821_v61, 1  ;;  %v5827_v52 = vrot.slane %v5826_v59, 2 }
 0xab1   : > { %v5854_v58 = vadd.f32 %v5853_v10, %v5852_v44  ;;  %v5929_v49 = vsel %vm1264_vm2, %v5577_v54, 0.0  ;;  %7567 = vpow2.f32 %v4341_v22  ;;  %v5833_v13 = vadd.f32 %v5832_v43, %v5831_v8 }
 0xab2   : > { %v5848_v60 = vrot.slane %v5847_v25, 2  ;;  %v5930_v63 = vrot.slane %v5929_v49, 4  ;;  %v4365_v48 = vmul.f32 1.442695, %v4243_v12  ;;  %v5823_v50 = vadd.f32 %v5822_v16, %v5821_v61  ;;  %v11263_v35 = vpop.eup %7561 }
 0xab3   : > { %v5855_v46 = vrot.slane %v5854_v58, 2  ;;  %v11267_v39 = vadd.f32 %v11114_v19, %v11014_v9  ;;  %v4643_v23 = vsel %vm1264_vm2, %v11263_v35, 0.0  ;;  %v5828_v55 = vadd.f32 %v5827_v52, %v5826_v59 }
 0xab4   : > { %v5849_v47 = vadd.f32 %v5848_v60, %v5847_v25  ;;  %v5931_v37 = vadd.f32 %v5930_v63, %v5929_v49  ;;  %7569 = vpow2.f32 %v4365_v48  ;;  %v4644_v27 = vrot.slane %v4643_v23, 4 }
 0xab5   : > { %v5856_v41 = vadd.f32 %v5855_v46, %v5854_v58  ;;  %v5834_v32 = vrot.slane %v5833_v13, 2  ;;  %v4101_v8 = vsel %vm1264_vm2, %v11267_v39, -inf  ;;  %v11277_v9 = vadd.f32 %v11114_v19, %v10998_v40  ;;  %v12075_v46 = vld [vmem:[#allocation23_spill] sm:$0xff] }
 0xab6   : > { %v11271_v17 = vpop.eup %7563  ;;  %v5850_v0 = vrot.slane %v5849_v47, 1  ;;  %v5932_v56 = vrot.slane %v5931_v37, 2  ;;  %v4645_v6 = vadd.f32 %v4644_v27, %v4643_v23  ;;  %v5829_v53 = vrot.slane %v5828_v55, 1 }
 0xab7   : > { %v5857_v18 = vrot.slane %v5856_v41, 1  ;;  %v4727_v51 = vsel %vm1264_vm2, %v11271_v17, 0.0  ;;  %v5835_v33 = vadd.f32 %v5834_v32, %v5833_v13  ;;  %v4102_v30 = vrot.slane %v4101_v8, 4 }
 0xab8   : > { %v5851_v36 = vadd.f32 %v5850_v0, %v5849_v47  ;;  %v5933_v57 = vadd.f32 %v5932_v56, %v5931_v37  ;;  %v4728_v42 = vrot.slane %v4727_v51, 4  ;;  %v4646_v2 = vrot.slane %v4645_v6, 2  ;;  %v12076_v56 = vld [vmem:[#allocation125_spill] sm:$0xff] }
 0xab9   : > { %v11281_v20 = vpop.eup %7565  ;;  %v5858_v11 = vadd.f32 %v5857_v18, %v5856_v41  ;;  %v5830_v24 = vadd.f32 %v5829_v53, %v5828_v55  ;;  %v5836_v38 = vrot.slane %v5835_v33, 1  ;;  %v4103_v25 = vmax.f32 %v4101_v8, %v4102_v30  ;;  %v11301_v55 = vpop.permute.xlu1 %5413 }
 0xaba   : > { %v5934_v44 = vrot.slane %v5933_v57, 1  ;;  %v4729_v3 = vadd.f32 %v4728_v42, %v4727_v51  ;;  %v4776_v40 = vsel %vm1264_vm2, %v11281_v20, 0.0  ;;  %v4647_v10 = vadd.f32 %v4646_v2, %v4645_v6 }
 0xabb   : > { %v11285_v61 = vpop.eup %7567  ;;  %v4777_v54 = vrot.slane %v4776_v40, 4  ;;  %v6149_v22 = vsel %vm6114_vm3, %v5830_v24, %v5823_v50  ;;  %v5837_v58 = vadd.f32 %v5836_v38, %v5835_v33  ;;  %v4104_v63 = vrot.slane %v4103_v25, 2 }
 0xabc   : > { %v5935_v12 = vadd.f32 %v5934_v44, %v5933_v57  ;;  %v4730_v16 = vrot.slane %v4729_v3, 2  ;;  %v4699_v59 = vsel %vm1264_vm2, %v11285_v61, 0.0  ;;  %v4648_v49 = vrot.slane %v4647_v10, 1 }
 0xabd   : > { %v4778_v43 = vadd.f32 %v4777_v54, %v4776_v40  ;;  %v4700_v60 = vrot.slane %v4699_v59, 4  ;;  %v6150_v50 = vsel %vm6116_vm4, %v5837_v58, %v6149_v22  ;;  %v4108_v47 = vsel %vm1264_vm2, %v11277_v9, -inf }
 0xabe   : > { %v11290_v48 = vpop.eup %7569  ;;  %v11294_v52 = vsel %vm6114_vm3, %v12075_v46, %v5935_v12  ;;  %v4731_v13 = vadd.f32 %v4730_v16, %v4729_v3  ;;  %v4649_v37 = vadd.f32 %v4648_v49, %v4647_v10  ;;  %v6151_v8 = vsel %vm6118_vm5, %v12076_v56, %v6150_v50  ;;  %v12077_v10 = vld [vmem:[#allocation21_spill] sm:$0xff]  ;;  %v5438_v12 = vpop.permute.xlu1 %5437 }
 0xabf   : > { %v4779_v23 = vrot.slane %v4778_v43, 2  ;;  %v4701_v41 = vadd.f32 %v4700_v60, %v4699_v59  ;;  %v4783_v27 = vsel %vm1264_vm2, %v11290_v48, 0.0  ;;  %v4105_v18 = vmax.f32 %v4103_v25, %v4104_v63 }
 0xac0   : > { %v4732_v32 = vrot.slane %v4731_v13, 1  ;;  %v4784_v0 = vrot.slane %v4783_v27, 4  ;;  %7571 = vrcp.f32 %v4649_v37  ;;  %v6152_v53 = vsel %vm6120_vm6, %v5851_v36, %v6151_v8 }
 0xac1   : > { %v4780_v6 = vadd.f32 %v4779_v23, %v4778_v43  ;;  %v4702_v51 = vrot.slane %v4701_v41, 2  ;;  %v11307_v33 = vsel %vm6122_vm7, %v5858_v11, %v6152_v53  ;;  %v4106_v2 = vrot.slane %v4105_v18, 1  ;;  %v11324_v43 = vld [vmem:[%s11540_s10] ss:$0 sm:$0xff] }
 0xac2   : > { %v4733_v57 = vadd.f32 %v4732_v32, %v4731_v13  ;;  %v4785_v42 = vadd.f32 %v4784_v0, %v4783_v27  ;;  %v4109_v44 = vrot.slane %v4108_v47, 4  ;;  %v11311_v3 = vadd.f32 %v11114_v19, %v11024_v45  ;;  %v12078_v45 = vld [vmem:[#allocation91_spill] sm:$0xff] }
 0xac3   : > { %v4781_v24 = vrot.slane %v4780_v6, 1  ;;  %v4703_v30 = vadd.f32 %v4702_v51, %v4701_v41  ;;  %v4107_v38 = vmax.f32 %v4105_v18, %v4106_v2  ;;  %v6158_v36 = vsel %vm6118_vm5, %v12077_v10, %v11196_v26  ;;  %v5452_v18 = vpop.permute.xlu1 %5451 }
 0xac4   : > { %7573 = vrcp.f32 %v4733_v57  ;;  %v4786_v40 = vrot.slane %v4785_v42, 2  ;;  %v4110_v25 = vmax.f32 %v4108_v47, %v4109_v44  ;;  %v4115_v11 = vsel %vm1264_vm2, %v11311_v3, -inf }
 0xac5   : > { %v4782_v54 = vadd.f32 %v4781_v24, %v4780_v6  ;;  %v4704_v22 = vrot.slane %v4703_v30, 1  ;;  %v4237_v59 = vsub.f32 %v11267_v39, %v4107_v38  ;;  %v4116_v58 = vrot.slane %v4115_v11, 4 }
 0xac6   : > { %v4787_v16 = vadd.f32 %v4786_v40, %v4785_v42  ;;  %v6159_v49 = vsel %vm6120_vm6, %v12078_v45, %v6158_v36  ;;  %v4111_v60 = vrot.slane %v4110_v25, 2  ;;  %v11332_v39 = vadd.f32 %v11114_v19, %v11017_v15 }
 0xac7   : > { %7575 = vrcp.f32 %v4782_v54  ;;  %v4705_v26 = vadd.f32 %v4704_v22, %v4703_v30  ;;  %v11328_v63 = vsel %vm6122_vm7, %v10935_v4, %v6159_v49  ;;  %v4353_v13 = vmul.f32 1.442695, %v4237_v59 }
 0xac8   : > { %v4788_v46 = vrot.slane %v4787_v16, 1  ;;  %v4117_v50 = vmax.f32 %v4115_v11, %v4116_v58  ;;  %v4112_v47 = vmax.f32 %v4110_v25, %v4111_v60  ;;  %v11336_v37 = vadd.f32 %v11114_v19, %v11074_v31  ;;  %v6370_v19 = vld [vmem:[%s11541_s11] sm:$0xff] }
 0xac9   : > { %7577 = vrcp.f32 %v4705_v26  ;;  %v11340_v23 = vadd.f32 %v11201_v62, %v11324_v43  ;;  %v4122_v27 = vsel %vm1264_vm2, %v11332_v39, -inf  ;;  %v6371_v62 = vld [vmem:[%s11541_s11 + $0x8] sm:$0xff]  ;;  %v11358_v2 = vadd.f32 %v11324_v43, %v11206_v34 }
 0xaca   : > { %v4789_v41 = vadd.f32 %v4788_v46, %v4787_v16  ;;  %7579 = vpow2.f32 %v4353_v13  ;;  %v4118_v4 = vrot.slane %v4117_v50, 2  ;;  %v7572_v32 = vpop.eup %7571  ;;  %v4113_v0 = vrot.slane %v4112_v47, 1 }
 0xacb   : > { %v4123_v15 = vrot.slane %v4122_v27, 4  ;;  %v4178_v56 = vsel %vm1264_vm2, %v11336_v37, -inf  ;;  %v6299_v31 = vmul.f32 %v11340_v23, %v11340_v23  ;;  %v4927_v8 = vmul.f32 %v7572_v32, %v11263_v35 }
 0xacc   : > { %7581 = vrcp.f32 %v4789_v41  ;;  %v4119_v6 = vmax.f32 %v4117_v50, %v4118_v4  ;;  %v4179_v51 = vrot.slane %v4178_v56, 4  ;;  %v4114_v53 = vmax.f32 %v4112_v47, %v4113_v0 }
 0xacd   : > { %v4124_v57 = vmax.f32 %v4122_v27, %v4123_v15  ;;  %v6307_v42 = vmul.f32 %v6299_v31, %v11340_v23  ;;  %v5567_v30 = vmul.f32 %v11301_v55, %v4927_v8  ;;  %v7190_v38 = vpack.c.bf16 %v6371_v62, %v6370_v19 }
 0xace   : > { %v7574_v24 = vpop.eup %7573  ;;  %v4120_v44 = vrot.slane %v4119_v6, 1  ;;  %v4180_v40 = vmax.f32 %v4178_v56, %v4179_v51  ;;  %v4238_v10 = vsub.f32 %v11277_v9, %v4114_v53  ;;  %v11366_v34 = vmul.f32 %v11358_v2, %v11358_v2  ;;  %v5430_v9 = vpop.permute.xlu1 %5429 }
 0xacf   : > { %v4939_v35 = vmul.f32 %v7574_v24, %v11271_v17  ;;  %v4125_v36 = vrot.slane %v4124_v57, 2  ;;  %v6315_v54 = vmul.f32 0.044715, %v6307_v42  ;;  %v5859_v22 = vsel %vm1264_vm2, %v5567_v30, 0.0  ;;  %7191 = vmatprep.subr.bf16.mxu1 %v7190_v38 }
 0xad0   : > { %v4121_v25 = vmax.f32 %v4119_v6, %v4120_v44  ;;  %v4181_v11 = vrot.slane %v4180_v40, 2  ;;  %v5860_v55 = vrot.slane %v5859_v22, 4  ;;  %v4355_v58 = vmul.f32 1.442695, %v4238_v10  ;;  %7193 = vmatpush3.bf16.msra.mxu1 %v7190_v38 }
 0xad1   : > { %v7576_v16 = vpop.eup %7575  ;;  %v5579_v59 = vmul.f32 %v5438_v12, %v4939_v35  ;;  %v4126_v45 = vmax.f32 %v4124_v57, %v4125_v36  ;;  %v11371_v60 = vadd.f32 %v6315_v54, %v11340_v23 }
 0xad2   : > { %v4946_v17 = vmul.f32 %v7576_v16, %v11281_v20  ;;  %v4239_v49 = vsub.f32 %v11311_v3, %v4121_v25  ;;  %v4182_v26 = vmax.f32 %v4180_v40, %v4181_v11  ;;  %v5861_v13 = vadd.f32 %v5860_v55, %v5859_v22  ;;  %v5454_v57 = vpop.permute.xlu1 %5453 }
 0xad3   : > { %v7578_v46 = vpop.eup %7577  ;;  %v5943_v50 = vsel %vm1264_vm2, %v5579_v59, 0.0  ;;  %7583 = vpow2.f32 %v4355_v58  ;;  %v4127_v47 = vrot.slane %v4126_v45, 1 }
 0xad4   : > { %v11374_v41 = vpop.eup %7579  ;;  %v5944_v12 = vrot.slane %v5943_v50, 4  ;;  %v5586_v4 = vmul.f32 %v5452_v18, %v4946_v17  ;;  %v4935_v27 = vmul.f32 %v7578_v46, %v11285_v61  ;;  %v4357_v20 = vmul.f32 1.442695, %v4239_v49 }
 0xad5   : > { %v5862_v32 = vrot.slane %v5861_v13, 2  ;;  %v4741_v3 = vsel %vm1264_vm2, %v11374_v41, 0.0  ;;  %v4128_v0 = vmax.f32 %v4126_v45, %v4127_v47  ;;  %v4183_v15 = vrot.slane %v4182_v26, 1 }
 0xad6   : > { %v7582_v56 = vpop.eup %7581  ;;  %v5945_v31 = vadd.f32 %v5944_v12, %v5943_v50  ;;  %v5992_v19 = vsel %vm1264_vm2, %v5586_v4, 0.0  ;;  %v5575_v62 = vmul.f32 %v5430_v9, %v4935_v27  ;;  %v4742_v8 = vrot.slane %v4741_v3, 4 }
 0xad7   : > { %v5863_v6 = vadd.f32 %v5862_v32, %v5861_v13  ;;  %v5993_v51 = vrot.slane %v5992_v19, 4  ;;  %v4947_v53 = vmul.f32 %v7582_v56, %v11290_v48  ;;  %7585 = vpow2.f32 %v4357_v20 }
 0xad8   : > { %v5946_v18 = vrot.slane %v5945_v31, 2  ;;  %v5915_v61 = vsel %vm1264_vm2, %v5575_v62, 0.0  ;;  %v4743_v42 = vadd.f32 %v4742_v8, %v4741_v3  ;;  %v4240_v24 = vsub.f32 %v11332_v39, %v4128_v0 }
 0xad9   : > { %v5864_v30 = vrot.slane %v5863_v6, 1  ;;  %v5994_v44 = vadd.f32 %v5993_v51, %v5992_v19  ;;  %v5916_v40 = vrot.slane %v5915_v61, 4  ;;  %v5587_v38 = vmul.f32 %v5454_v57, %v4947_v53 }
 0xada   : > { %v5947_v35 = vadd.f32 %v5946_v18, %v5945_v31  ;;  %v4744_v10 = vrot.slane %v4743_v42, 2  ;;  %v4359_v36 = vmul.f32 1.442695, %v4240_v24  ;;  %v4184_v54 = vmax.f32 %v4182_v26, %v4183_v15  ;;  %v6372_v15 = vld [vmem:[%s11541_s11 + $0x10] sm:$0xff] }
 0xadb   : > { %v5865_v22 = vadd.f32 %v5864_v30, %v5863_v6  ;;  %v5995_v25 = vrot.slane %v5994_v44, 2  ;;  %v5917_v11 = vadd.f32 %v5916_v40, %v5915_v61  ;;  %v5999_v48 = vsel %vm1264_vm2, %v5587_v38, 0.0  ;;  %v12079_v40 = vld [vmem:[#allocation93_spill] sm:$0xff] }
 0xadc   : > { %v5948_v16 = vrot.slane %v5947_v35, 1  ;;  %v6000_v55 = vrot.slane %v5999_v48, 4  ;;  %v4745_v59 = vadd.f32 %v4744_v10, %v4743_v42  ;;  %7587 = vpow2.f32 %v4359_v36 }
 0xadd   : > { %v11384_v58 = vpop.eup %7583  ;;  %v5996_v39 = vadd.f32 %v5995_v25, %v5994_v44  ;;  %v5918_v45 = vrot.slane %v5917_v11, 2  ;;  %v6154_v17 = vsel %vm6124_vm8, %v5865_v22, %v11307_v33  ;;  %v4248_v9 = vsub.f32 %v11336_v37, %v4184_v54 }
 0xade   : > { %v5949_v49 = vadd.f32 %v5948_v16, %v5947_v35  ;;  %v6001_v26 = vadd.f32 %v6000_v55, %v5999_v48  ;;  %v6155_v46 = vsel %vm6126_vm9, %v10973_v1, %v6154_v17  ;;  %v4746_v13 = vrot.slane %v4745_v59, 1  ;;  %v12080_v35 = vld [vmem:[#allocation34_spill] sm:$0xff] }
 0xadf   : > { %v5997_v50 = vrot.slane %v5996_v39, 1  ;;  %v5919_v47 = vadd.f32 %v5918_v45, %v5917_v11  ;;  %7156 = vmatprep.mubr.msk.f32.mxu0 %vm1264_vm2, %v6155_v46  ;;  %v4748_v12 = vsel %vm1264_vm2, %v11384_v58, 0.0  ;;  %v4375_v4 = vmul.f32 1.442695, %v4248_v9 }
 0xae0   : > { %v6164_v27 = vsel %vm6116_vm4, %v5949_v49, %v11294_v52  ;;  %v6002_v33 = vrot.slane %v6001_v26, 2  ;;  %v4747_v20 = vadd.f32 %v4746_v13, %v4745_v59  ;;  %v4749_v37 = vrot.slane %v4748_v12, 4  ;;  %v6373_v52 = vld [vmem:[%s11541_s11 + $0x18] sm:$0xff]  ;;  %v5442_v13 = vpop.permute.xlu1 %5441 }
 0xae1   : > { %v11396_v32 = vpop.eup %7585  ;;  %v6031_v1 = vadd.f32 %v6030_v5, %v11104_v14  ;;  %v5920_v3 = vrot.slane %v5919_v47, 1  ;;  %7589 = vpow2.f32 %v4375_v4  ;;  %v11403_v0 = vsel %vm6118_vm5, %v10984_v7, %v6164_v27 }
 0xae2   : > { %v6003_v56 = vadd.f32 %v6002_v33, %v6001_v26  ;;  %7591 = vrcp.f32 %v4747_v20  ;;  %v4750_v31 = vadd.f32 %v4749_v37, %v4748_v12  ;;  %v4755_v14 = vsel %vm1264_vm2, %v11396_v32, 0.0 }
 0xae3   : > { %v5998_v5 = vadd.f32 %v5997_v50, %v5996_v39  ;;  %v5921_v19 = vadd.f32 %v5920_v3, %v5919_v47  ;;  %v4756_v62 = vrot.slane %v4755_v14, 4  ;;  %v6331_v7 = vmul.f32 0.7978846, %v11371_v60 }
 0xae4   : > { %v6004_v8 = vrot.slane %v6003_v56, 1  ;;  %v4751_v6 = vrot.slane %v4750_v31, 2  ;;  %v6306_v51 = vmul.f32 %v11366_v34, %v11358_v2  ;;  %v7194_v53 = vpack.c.bf16 %v6373_v52, %v6372_v15  ;;  %v5444_v52 = vpop.permute.xlu1 %5443 }
 0xae5   : > { %v6025_v18 = vrot.slane %v11106_v21, 1  ;;  %v6032_v61 = vrot.slane %v6031_v1, 1  ;;  %v4757_v57 = vadd.f32 %v4756_v62, %v4755_v14  ;;  %v6161_v42 = vsel %vm6124_vm8, %v5921_v19, %v11328_v63 }
 0xae6   : > { %v11419_v24 = vpop.eup %7587  ;;  %v6005_v30 = vadd.f32 %v6004_v8, %v6003_v56  ;;  %v4752_v44 = vadd.f32 %v4751_v6, %v4750_v31  ;;  %v6162_v60 = vsel %vm6126_vm9, %v12079_v40, %v6161_v42  ;;  %v6314_v38 = vmul.f32 0.044715, %v6306_v51  ;;  %7195 = vmatprep.subr.bf16.mxu1 %v7194_v53 }
 0xae7   : > { %v6170_v34 = vsel %vm6114_vm3, %v5998_v5, %v12080_v35  ;;  %v4758_v10 = vrot.slane %v4757_v57, 2  ;;  %7157 = vmatmul.mubr.msk.f32.gmra.mrb[68].mxu0 %vm1264_vm2, %v6162_v60  ;;  %v4762_v36 = vsel %vm1264_vm2, %v11419_v24, 0.0  ;;  %7593 = vtanh.f32 %v6331_v7  ;;  %7197 = vmatpush3.bf16.msra.mxu1 %v7194_v53 }
 0xae8   : > { %v6171_v63 = vsel %vm6116_vm4, %v6005_v30, %v6170_v34  ;;  %v4753_v54 = vrot.slane %v4752_v44, 1  ;;  %v4763_v22 = vrot.slane %v4762_v36, 4  ;;  %v6322_v25 = vadd.f32 %v6314_v38, %v11358_v2  ;;  %v5446_v6 = vpop.permute.xlu1 %5445 }
 0xae9   : > { %v6026_v11 = vadd.f32 %v6025_v18, %v11106_v21  ;;  %v6033_v48 = vadd.f32 %v6032_v61, %v6031_v1  ;;  %v4759_v16 = vadd.f32 %v4758_v10, %v4757_v57  ;;  %v6172_v55 = vsel %vm6118_vm5, %v11084_v28, %v6171_v63 }
 0xaea   : > { %v4754_v59 = vadd.f32 %v4753_v54, %v4752_v44  ;;  %v4764_v39 = vadd.f32 %v4763_v22, %v4762_v36  ;;  %v6173_v45 = vsel %vm6120_vm6, %v11090_v29, %v6172_v55  ;;  %v6330_v17 = vmul.f32 0.7978846, %v6322_v25 }
 0xaeb   : > { %v11435_v9 = vpop.eup %7589  ;;  %v4760_v49 = vrot.slane %v4759_v16, 1  ;;  %v6174_v26 = vsel %vm6122_vm7, %v6026_v11, %v6173_v45 }
 0xaec   : > { %v7592_v46 = vpop.eup %7591  ;;  %7595 = vrcp.f32 %v4754_v59  ;;  %v4765_v21 = vrot.slane %v4764_v39, 2  ;;  %v4818_v50 = vsel %vm1264_vm2, %v11435_v9, 0.0  ;;  %v11441_v28 = vsel %vm6124_vm8, %v6033_v48, %v6174_v26  ;;  %v5448_v63 = vpop.permute.xlu1 %5447 }
 0xaed   : > { %v4941_v47 = vmul.f32 %v7592_v46, %v11374_v41  ;;  %v4761_v12 = vadd.f32 %v4760_v49, %v4759_v16  ;;  %v4819_v29 = vrot.slane %v4818_v50, 4  ;;  %7597 = vtanh.f32 %v6330_v17 }
 0xaee   : > { %v4766_v4 = vadd.f32 %v4765_v21, %v4764_v39 }
 0xaef   : > { %v5581_v27 = vmul.f32 %v5442_v13, %v4941_v47  ;;  %7599 = vrcp.f32 %v4761_v12  ;;  %v4820_v33 = vadd.f32 %v4819_v29, %v4818_v50 }
 0xaf0   : > { %v4767_v20 = vrot.slane %v4766_v4, 1  ;;  %v5464_v49 = vpop.permute.xlu1 %5463 }
 0xaf1   : > { %v7594_v37 = vpop.eup %7593  ;;  %v5957_v1 = vsel %vm1264_vm2, %v5581_v27, 0.0  ;;  %v4821_v3 = vrot.slane %v4820_v33, 2 }
 0xaf2   : > { %v5958_v15 = vrot.slane %v5957_v1, 4  ;;  %v4768_v56 = vadd.f32 %v4767_v20, %v4766_v4  ;;  %v6347_v41 = vadd.f32 1.0, %v7594_v37 }
 0xaf3   : > { %v4822_v31 = vadd.f32 %v4821_v3, %v4820_v33 }
 0xaf4   : > { %7601 = vrcp.f32 %v4768_v56  ;;  %v5959_v14 = vadd.f32 %v5958_v15, %v5957_v1  ;;  %v6355_v57 = vmul.f32 0.5, %v6347_v41 }
 0xaf5   : > { %v4823_v5 = vrot.slane %v4822_v31, 1 }
 0xaf6   : > { %v7596_v19 = vpop.eup %7595  ;;  %v5960_v18 = vrot.slane %v5959_v14, 2 }
 0xaf7   : > { %v7598_v62 = vpop.eup %7597  ;;  %v4942_v7 = vmul.f32 %v7596_v19, %v11384_v58  ;;  %v4824_v8 = vadd.f32 %v4823_v5, %v4822_v31  ;;  %v6363_v58 = vmul.f32 %v6355_v57, %v11340_v23 }
 0xaf8   : > { %v6346_v51 = vadd.f32 1.0, %v7598_v62  ;;  %v5961_v35 = vadd.f32 %v5960_v18, %v5959_v14 }
 0xaf9   : > { %v7600_v53 = vpop.eup %7599  ;;  %v5582_v61 = vmul.f32 %v5444_v52, %v4942_v7  ;;  %7603 = vrcp.f32 %v4824_v8 }
 0xafa   : > { %v4943_v42 = vmul.f32 %v7600_v53, %v11396_v32  ;;  %v6354_v30 = vmul.f32 0.5, %v6346_v51  ;;  %v5962_v25 = vrot.slane %v5961_v35, 1 }
 0xafb   : > { %v5964_v44 = vsel %vm1264_vm2, %v5582_v61, 0.0 }
 0xafc   : > { %v5965_v40 = vrot.slane %v5964_v44, 4  ;;  %v5583_v60 = vmul.f32 %v5446_v6, %v4943_v42  ;;  %v6362_v38 = vmul.f32 %v6354_v30, %v11358_v2  ;;  %v5963_v45 = vadd.f32 %v5962_v25, %v5961_v35 }
 0xafe   : > { %v7602_v34 = vpop.eup %7601  ;;  %v5966_v10 = vadd.f32 %v5965_v40, %v5964_v44  ;;  %v5971_v36 = vsel %vm1264_vm2, %v5583_v60, 0.0  ;;  %7170 = vmatprep.mubr.msk.f32.mxu1 %vm6381_vm10, %v6362_v38  ;;  %v6166_v29 = vsel %vm6120_vm6, %v5963_v45, %v11403_v0 }
 0xaff   : > { %v5972_v54 = vrot.slane %v5971_v36, 4  ;;  %v4944_v32 = vmul.f32 %v7602_v34, %v11419_v24  ;;  %7171 = vmatmul.mubr.msk.f32.vlgmr.msra.gmra.mrb[64].mxu1 %vm6381_vm10, %v6363_v58 }
 0xb00   : > { %v5967_v22 = vrot.slane %v5966_v10, 2 }
 0xb01   : > { %v5973_v11 = vadd.f32 %v5972_v54, %v5971_v36  ;;  %v5584_v48 = vmul.f32 %v5448_v63, %v4944_v32 }
 0xb02   : > { %v5968_v2 = vadd.f32 %v5967_v22, %v5966_v10 }
 0xb03   : > { %v7604_v16 = vpop.eup %7603  ;;  %v5974_v55 = vrot.slane %v5973_v11, 2  ;;  %v5978_v23 = vsel %vm1264_vm2, %v5584_v48, 0.0 }
 0xb04   : > { %v5979_v59 = vrot.slane %v5978_v23, 4  ;;  %v4952_v39 = vmul.f32 %v7604_v16, %v11435_v9  ;;  %v5969_v26 = vrot.slane %v5968_v2, 1 }
 0xb05   : > { %v5975_v17 = vadd.f32 %v5974_v55, %v5973_v11 }
 0xb06   : > { %v5980_v46 = vadd.f32 %v5979_v59, %v5978_v23  ;;  %v5592_v24 = vmul.f32 %v5464_v49, %v4952_v39  ;;  %v5970_v4 = vadd.f32 %v5969_v26, %v5968_v2  ;;  %v11481_v59 = vld [vmem:[%s11542_s12] ss:$0 sm:$0xff]  ;;  %v6512_v26 = vld [vmem:[%s11476_s24 + $0x8] sm:$0xff] }
 0xb07   : > { %v5976_v13 = vrot.slane %v5975_v17, 1 }
 0xb08   : > { %v5981_v21 = vrot.slane %v5980_v46, 2  ;;  %v6034_v50 = vsel %vm1264_vm2, %v5592_v24, 0.0  ;;  %v6167_v9 = vsel %vm6122_vm7, %v5970_v4, %v6166_v29 }
 0xb09   : > { %v5977_v47 = vadd.f32 %v5976_v13, %v5975_v17  ;;  %v6035_v12 = vrot.slane %v6034_v50, 4 }
 0xb0a   : > { %v5982_v27 = vadd.f32 %v5981_v21, %v5980_v46  ;;  %v6511_v21 = vld [vmem:[%s11476_s24] sm:$0xff] }
 0xb0b   : > { %v6036_v33 = vadd.f32 %v6035_v12, %v6034_v50  ;;  %v6168_v1 = vsel %vm6124_vm8, %v5977_v47, %v6167_v9 }
 0xb0c   : > { %v5983_v20 = vrot.slane %v5982_v27, 1 }
 0xb0d   : > { %v6037_v37 = vrot.slane %v6036_v33, 2 }
 0xb0e   : > { %v5984_v3 = vadd.f32 %v5983_v20, %v5982_v27 }
 0xb0f   : > { %v6038_v15 = vadd.f32 %v6037_v37, %v6036_v33 }
 0xb10   : > { %v6169_v52 = vsel %vm6126_vm9, %v5984_v3, %v6168_v1 }
 0xb11   : > { %v6039_v56 = vrot.slane %v6038_v15, 1  ;;  %7159 = vmatprep.mubr.msk.f32.mxu0 %vm1264_vm2, %v6169_v52 }
 0xb13   : > { %v6040_v31 = vadd.f32 %v6039_v56, %v6038_v15 }
 0xb15   : > { %v6176_v0 = vsel %vm6126_vm9, %v6040_v31, %v11441_v28 }
 0xb16   : > { %7160 = vmatmul.mubr.msk.f32.gmra.mrb[70].mxu0 %vm1264_vm2, %v6176_v0 }
 0xb73   : > { %v7155_v14 = vpop.f32.mrb[66].mxu0 }
 0xb74   : > { %v6275_v5 = vadd.f32 %v7155_v14, %v11324_v43  ;;  %v6269_v41 = vpop.f32.mrb[67].mxu0 }
 0xb75   : > { %v6270_v19 = vadd.f32 %v11324_v43, %v6269_v41 }
 0xb76   : > { %v6301_v62 = vmul.f32 %v6275_v5, %v6275_v5 }
 0xb77   : > { %v6300_v7 = vmul.f32 %v6270_v19, %v6270_v19 }
 0xb78   : > { %v6309_v8 = vmul.f32 %v6301_v62, %v6275_v5 }
 0xb79   : > { %v6308_v6 = vmul.f32 %v6300_v7, %v6270_v19 }
 0xb7a   : > { %v6317_v51 = vmul.f32 0.044715, %v6309_v8 }
 0xb7b   : > { %v6316_v53 = vmul.f32 0.044715, %v6308_v6 }
 0xb7c   : > { %v6325_v18 = vadd.f32 %v6317_v51, %v6275_v5 }
 0xb7d   : > { %v6324_v61 = vadd.f32 %v6316_v53, %v6270_v19 }
 0xb7e   : > { %v6333_v57 = vmul.f32 0.7978846, %v6325_v18 }
 0xb7f   : > { %v6332_v42 = vmul.f32 0.7978846, %v6324_v61 }
 0xb80   : > { %7605 = vtanh.f32 %v6333_v57  ;;  %v6514_v57 = vld [vmem:[%s11476_s24 + $0x18] sm:$0xff] }
 0xb81   : > { %7607 = vtanh.f32 %v6332_v42 }
 0xb8a   : > { %v7606_v28 = vpop.eup %7605 }
 0xb8b   : > { %v7608_v30 = vpop.eup %7607  ;;  %v6349_v44 = vadd.f32 1.0, %v7606_v28 }
 0xb8c   : > { %v6348_v40 = vadd.f32 1.0, %v7608_v30  ;;  %v6513_v30 = vld [vmem:[%s11476_s24 + $0x10] sm:$0xff] }
 0xb8d   : > { %v6357_v60 = vmul.f32 0.5, %v6349_v44 }
 0xb8e   : > { %v6356_v38 = vmul.f32 0.5, %v6348_v40 }
 0xb8f   : > { %v6365_v58 = vmul.f32 %v6357_v60, %v6275_v5 }
 0xb90   : > { %v6364_v35 = vmul.f32 %v6356_v38, %v6270_v19 }
 0xb92   : > { %7173 = vmatprep.mubr.msk.f32.mxu1 %vm6381_vm10, %v6364_v35  ;;  %v6516_v35 = vld [vmem:[%s11476_s24 + $0x28] sm:$0xff] }
 0xb93   : > { %7174 = vmatmul.mubr.msk.f32.gmra.mrb[66].mxu1 %vm6381_vm10, %v6365_v58 }
 0xbba   : > { %v7158_v34 = vpop.f32.mrb[68].mxu0 }
 0xbbb   : > { %v6285_v10 = vadd.f32 %v7158_v34, %v11324_v43  ;;  %v6279_v36 = vpop.f32.mrb[69].mxu0 }
 0xbbc   : > { %v6280_v63 = vadd.f32 %v11324_v43, %v6279_v36 }
 0xbbd   : > { %v6303_v54 = vmul.f32 %v6285_v10, %v6285_v10 }
 0xbbe   : > { %v6302_v32 = vmul.f32 %v6280_v63, %v6280_v63 }
 0xbbf   : > { %v6311_v22 = vmul.f32 %v6303_v54, %v6285_v10 }
 0xbc0   : > { %v6310_v25 = vmul.f32 %v6302_v32, %v6280_v63 }
 0xbc1   : > { %v6319_v11 = vmul.f32 0.044715, %v6311_v22  ;;  %v6518_v22 = vld [vmem:[%s11476_s24 + $0x38] sm:$0xff] }
 0xbc2   : > { %v6318_v48 = vmul.f32 0.044715, %v6310_v25 }
 0xbc3   : > { %v6327_v2 = vadd.f32 %v6319_v11, %v6285_v10 }
 0xbc4   : > { %v6326_v16 = vadd.f32 %v6318_v48, %v6280_v63  ;;  %v6517_v48 = vld [vmem:[%s11476_s24 + $0x30] sm:$0xff] }
 0xbc5   : > { %v6335_v55 = vmul.f32 0.7978846, %v6327_v2 }
 0xbc6   : > { %v6334_v23 = vmul.f32 0.7978846, %v6326_v16 }
 0xbc7   : > { %7609 = vtanh.f32 %v6335_v55 }
 0xbc8   : > { %7611 = vtanh.f32 %v6334_v23 }
 0xbd1   : > { %v7610_v39 = vpop.eup %7609 }
 0xbd2   : > { %v7612_v45 = vpop.eup %7611  ;;  %v6351_v17 = vadd.f32 1.0, %v7610_v39  ;;  %v7172_v49 = vpop.f32.mrb[64].mxu1 }
 0xbd3   : > { %v6350_v46 = vadd.f32 1.0, %v7612_v45  ;;  %v6478_v24 = vadd.f32 %v7172_v49, %v11481_v59  ;;  %v6472_v13 = vpop.f32.mrb[65].mxu1 }
 0xbd4   : > { %v6359_v50 = vmul.f32 0.5, %v6351_v17  ;;  %v6473_v47 = vadd.f32 %v11481_v59, %v6472_v13 }
 0xbd5   : > { %v6358_v12 = vmul.f32 0.5, %v6350_v46  ;;  %v6520_v29 = vadd.f32 %v6512_v26, %v6478_v24 }
 0xbd6   : > { %v6519_v4 = vadd.f32 %v6511_v21, %v6473_v47  ;;  %v6367_v33 = vmul.f32 %v6359_v50, %v6285_v10  ;;  %v6515_v10 = vld [vmem:[%s11476_s24 + $0x20] sm:$0xff] }
 0xbd7   : > { %v6366_v27 = vmul.f32 %v6358_v12, %v6280_v63  ;;  %6528 = vst.msk [vmem:[%s11490_s28 + $0x8] sm:$0xff] %vm6381_vm10, %v6520_v29 }
 0xbd8   : > { %6527 = vst.msk [vmem:[%s11490_s28] sm:$0xff] %vm6381_vm10, %v6519_v4 }
 0xbd9   : > { %7176 = vmatprep.mubr.msk.f32.mxu1 %vm6381_vm10, %v6366_v27 }
 0xbda   : > { %7177 = vmatmul.mubr.msk.f32.gmra.mrb[68].mxu1 %vm6381_vm10, %v6367_v33 }
 0xbe9   : > { %v7161_v20 = vpop.f32.mrb[70].mxu0 }
 0xbea   : > { %v6295_v9 = vadd.f32 %v7161_v20, %v11324_v43  ;;  %v6289_v37 = vpop.f32.mrb[71].mxu0 }
 0xbeb   : > { %v6290_v1 = vadd.f32 %v11324_v43, %v6289_v37 }
 0xbec   : > { %v6305_v3 = vmul.f32 %v6295_v9, %v6295_v9 }
 0xbed   : > { %v6304_v15 = vmul.f32 %v6290_v1, %v6290_v1 }
 0xbee   : > { %v6313_v52 = vmul.f32 %v6305_v3, %v6295_v9 }
 0xbef   : > { %v6312_v56 = vmul.f32 %v6304_v15, %v6290_v1 }
 0xbf0   : > { %v6321_v31 = vmul.f32 0.044715, %v6313_v52 }
 0xbf1   : > { %v6320_v0 = vmul.f32 0.044715, %v6312_v56 }
 0xbf2   : > { %v6329_v14 = vadd.f32 %v6321_v31, %v6295_v9 }
 0xbf3   : > { %v6328_v5 = vadd.f32 %v6320_v0, %v6290_v1 }
 0xbf4   : > { %v6337_v41 = vmul.f32 0.7978846, %v6329_v14 }
 0xbf5   : > { %v6336_v19 = vmul.f32 0.7978846, %v6328_v5 }
 0xbf6   : > { %7613 = vtanh.f32 %v6337_v41 }
 0xbf7   : > { %7615 = vtanh.f32 %v6336_v19 }
 0xc00   : > { %v7614_v62 = vpop.eup %7613 }
 0xc01   : > { %v7616_v7 = vpop.eup %7615  ;;  %v6353_v8 = vadd.f32 1.0, %v7614_v62 }
 0xc02   : > { %v6352_v6 = vadd.f32 1.0, %v7616_v7 }
 0xc03   : > { %v6361_v43 = vmul.f32 0.5, %v6353_v8 }
 0xc04   : > { %v6360_v51 = vmul.f32 0.5, %v6352_v6 }
 0xc05   : > { %v6369_v18 = vmul.f32 %v6361_v43, %v6295_v9 }
 0xc06   : > { %v6368_v53 = vmul.f32 %v6360_v51, %v6290_v1 }
 0xc08   : > { %7179 = vmatprep.mubr.msk.f32.mxu1 %vm6381_vm10, %v6368_v53 }
 0xc09   : > { %7180 = vmatmul.mubr.msk.f32.gmra.mrb[70].mxu1 %vm6381_vm10, %v6369_v18 }
 0xc66   : > { %v7175_v61 = vpop.f32.mrb[66].mxu1 }
 0xc67   : > { %v6488_v42 = vadd.f32 %v7175_v61, %v11481_v59  ;;  %v6482_v28 = vpop.f32.mrb[67].mxu1 }
 0xc68   : > { %v6483_v44 = vadd.f32 %v11481_v59, %v6482_v28 }
 0xc69   : > { %v6522_v40 = vadd.f32 %v6514_v57, %v6488_v42 }
 0xc6a   : > { %v6521_v60 = vadd.f32 %v6513_v30, %v6483_v44 }
 0xc6b   : > { %6530 = vst.msk [vmem:[%s11490_s28 + $0x18] sm:$0xff] %vm6381_vm10, %v6522_v40 }
 0xc6c   : > { %6529 = vst.msk [vmem:[%s11490_s28 + $0x10] sm:$0xff] %vm6381_vm10, %v6521_v60 }
 0xcad   : > { %v7178_v38 = vpop.f32.mrb[68].mxu1 }
 0xcae   : > { %v6498_v58 = vadd.f32 %v7178_v38, %v11481_v59  ;;  %v6492_v34 = vpop.f32.mrb[69].mxu1 }
 0xcaf   : > { %v6493_v36 = vadd.f32 %v11481_v59, %v6492_v34 }
 0xcb0   : > { %v6524_v63 = vadd.f32 %v6516_v35, %v6498_v58 }
 0xcb1   : > { %v6523_v54 = vadd.f32 %v6515_v10, %v6493_v36 }
 0xcb2   : > { %6532 = vst.msk [vmem:[%s11490_s28 + $0x28] sm:$0xff] %vm6381_vm10, %v6524_v63 }
 0xcb3   : > { %6531 = vst.msk [vmem:[%s11490_s28 + $0x20] sm:$0xff] %vm6381_vm10, %v6523_v54 }
 0xcdc   : > { %v7181_v32 = vpop.f32.mrb[70].mxu1 }
 0xcdd   : > { %v6508_v25 = vadd.f32 %v7181_v32, %v11481_v59  ;;  %v6502_v11 = vpop.f32.mrb[71].mxu1 }
 0xcde   : > { %v6503_v2 = vadd.f32 %v11481_v59, %v6502_v11 }
 0xcdf   : > { %v6526_v16 = vadd.f32 %v6518_v22, %v6508_v25 }
 0xce0   : > { %v6525_v55 = vadd.f32 %v6517_v48, %v6503_v2 }
 0xce1   : > { %6534 = vst.msk [vmem:[%s11490_s28 + $0x38] sm:$0xff] %vm6381_vm10, %v6526_v16 }
 0xce2   : > { %6533 = vst.msk [vmem:[%s11490_s28 + $0x30] sm:$0xff] %vm6381_vm10, %v6525_v55 }
 0xce3 PF: > { %s24_s29 = sadd.s32 1, %s7696_s29  }
 0xce4   : > { %p21_p5 = scmp.ge.s32.totalorder %s24_s29, 4  }
 0xce6   :  { %23 = sbr.rel (!%p21_p5) target bundleno = 1 (0x1), region = 115 }

</bundles_post_ra>
